<compile_context>
chip_gen: v5e
topology: v5e:2x2
jax: 0.10.0
libtpu: 0.0.40
codegen_flags: <defaults>
</compile_context>

<pallas_src>
import functools

import jax
import jax.numpy as jnp
from jax.experimental import pallas as pl
from jax.experimental.pallas import tpu as pltpu

_NEG_SLOPE = 0.01  # nn.LeakyReLU default


# ------------------------------- fused kernel --------------------------------
def _fused_block_kernel(*refs, stride, has_proj, Ho, Wo, negative_slope):
    """conv1 + LeakyReLU + conv2 + identity/conv3 + LeakyReLU, fully in VMEM.

    Ref order: [x_pad | (patches, xid)], w1, b1, w2, b2, [w3, b3], out, scratch.
    """
    if stride == 1:
        x_ref, w1_ref, b1_ref, w2_ref, b2_ref, *rest = refs
    else:
        x1_ref, xid_ref, w1_ref, b1_ref, w2_ref, b2_ref, *rest = refs
    if has_proj:
        w3_ref, b3_ref, o_ref, h_scr = rest
    else:
        o_ref, h_scr = rest

    def leaky(v):                       # 1 mul + 1 max (VPU-slot friendly)
        return jnp.maximum(v, negative_slope * v)

    Cm = h_scr.shape[-1]

    # --- conv1 patches (+ identity source) -----------------------------------
    if stride == 1:
        xin = x_ref[...]                                   # (Ho+2, Wo+2, Cin) f32
        Cin = xin.shape[-1]
        taps = [xin[dy:dy + Ho, dx:dx + Wo, :].reshape(Ho * Wo, Cin)
                for dy in range(3) for dx in range(3)]
        p1 = jnp.concatenate(taps, axis=-1).astype(jnp.bfloat16)  # VMEM-only im2col
        xid = xin[1:1 + Ho, 1:1 + Wo, :].reshape(Ho * Wo, Cin)    # f32 residual src
    else:
        p1 = x1_ref[...].reshape(Ho * Wo, x1_ref.shape[-1])       # bf16 patches
        xid = xid_ref[...].reshape(Ho * Wo, xid_ref.shape[-1])    # f32 residual src

    # --- conv1 + bias + LeakyReLU (bf16 MXU operands, f32 accumulation) ------
    a1 = jnp.dot(p1, w1_ref[...], preferred_element_type=jnp.float32) + b1_ref[...]
    h = leaky(a1)

    # --- stage the spatially padded intermediate in VMEM (never touches HBM) -
    h_scr[...] = jnp.zeros_like(h_scr)
    h_scr[1:1 + Ho, 1:1 + Wo, :] = h.reshape(Ho, Wo, Cm).astype(h_scr.dtype)

    # --- conv2 + bias ---------------------------------------------------------
    taps2 = [h_scr[dy:dy + Ho, dx:dx + Wo, :].reshape(Ho * Wo, Cm)
             for dy in range(3) for dx in range(3)]
    p2 = jnp.concatenate(taps2, axis=-1)                           # bf16
    a2 = jnp.dot(p2, w2_ref[...], preferred_element_type=jnp.float32) + b2_ref[...]

    # --- identity branch ------------------------------------------------------
    if has_proj:
        ident = jnp.dot(xid.astype(jnp.bfloat16), w3_ref[...],
                        preferred_element_type=jnp.float32) + b3_ref[...]
    else:
        ident = xid                                                # exact f32 residual

    out = leaky(a2 + ident)
    o_ref[...] = out.reshape(Ho, Wo, Cm).astype(o_ref.dtype)


# ------------------------------ helpers / glue -------------------------------
def _w_to_mat(w_oihw):
    """PyTorch (Cout, Cin, KH, KW) -> (KH*KW*Cin, Cout); rows ordered (tap-major,
    channel-minor) to match the in-kernel tap concatenation order."""
    cout, cin, kh, kw = w_oihw.shape
    return jnp.transpose(w_oihw, (2, 3, 1, 0)).reshape(kh * kw * cin, cout)


def _vmem_limit_bytes():
    """Generation-aware VMEM cap (v7x: 64 MiB/TC, v5e/v6e: 128 MiB)."""
    cap = 64 << 20  # conservative fallback = v7x physical VMEM per TensorCore
    try:
        cap = int(getattr(pltpu.get_tpu_info(), "vmem_capacity_bytes", cap))
    except Exception:
        pass
    return (cap * 3) // 4  # headroom for Mosaic internal scratch


def _fused_step_vmem_bytes(stride, H, W, Ho, Wo, Cin, Cm):
    """Rough per-grid-step VMEM footprint of the fused kernel."""
    f32, bf16 = 4, 2
    if stride == 1:
        xin = (H + 2) * (W + 2) * Cin * f32
    else:
        xin = Ho * Wo * 9 * Cin * bf16 + Ho * Wo * Cin * f32
    out = Ho * Wo * Cm * f32
    scr = (Ho + 2) * (Wo + 2) * Cm * bf16
    patches = Ho * Wo * 9 * (Cin + Cm) * bf16      # in-kernel im2col values
    acc = 3 * Ho * Wo * Cm * f32                   # f32 accumulators / epilogue
    return 2 * (xin + out) + scr + patches + acc   # in/out are double-buffered


# ------------------------------ module forward --------------------------------
def mask_basic_block(x_nchw, params, input_filters, num_filters,
                     down_sampling=False, out_dtype=jnp.float32):
    """maskBasicBlock forward. x_nchw: (B, Cin, H, W) -> (B, Cout, Ho, Wo)."""
    x = jnp.transpose(x_nchw, (0, 2, 3, 1)).astype(jnp.float32)   # NHWC
    B, H, W, Cin = x.shape
    assert Cin == input_filters
    Cm = num_filters
    stride = 2 if down_sampling else 1
    has_proj = (num_filters != input_filters) or down_sampling
    Ho = (H + 2 - 3) // stride + 1
    Wo = (W + 2 - 3) // stride + 1

    vmem_limit = _vmem_limit_bytes()
    if _fused_step_vmem_bytes(stride, H, W, Ho, Wo, Cin, Cm) > vmem_limit:
        # TODO(synk): halo-tiled variant (row bands, manual DMA) for big maps.
        raise NotImplementedError(
            "feature map too large for the single-step fused kernel")

    # MXU operands in bf16 (f32 accumulation in-kernel); biases stay f32.
    w1 = _w_to_mat(params["w1"]).astype(jnp.bfloat16)      # (9*Cin, Cm)
    w2 = _w_to_mat(params["w2"]).astype(jnp.bfloat16)      # (9*Cm,  Cm)
    b1 = params["b1"].astype(jnp.float32).reshape(1, Cm)
    b2 = params["b2"].astype(jnp.float32).reshape(1, Cm)

    in_arrays, in_specs = [], []
    xp = jnp.pad(x, ((0, 0), (1, 1), (1, 1), (0, 0)))      # 1-px spatial halo
    if stride == 1:
        # Whole padded image per grid step; 3x3 taps extracted in-kernel.
        in_arrays.append(xp)
        in_specs.append(pl.BlockSpec((None, H + 2, W + 2, Cin),
                                     lambda b: (b, 0, 0, 0)))
    else:
        # Down-sampling: conv1's strided taps extracted here (~2.25x input
        # bytes, vs. the old 9x im2col + out1 round-trip); residual src is f32.
        taps = [xp[:, dy:dy + stride * (Ho - 1) + 1:stride,
                     dx:dx + stride * (Wo - 1) + 1:stride, :]
                for dy in range(3) for dx in range(3)]
        x1 = jnp.concatenate(taps, axis=-1).astype(jnp.bfloat16)  # (B,Ho,Wo,9Cin)
        xid = x[:, ::stride, ::stride, :]                          # (B,Ho,Wo,Cin)
        in_arrays += [x1, xid]
        in_specs += [pl.BlockSpec((None, Ho, Wo, 9 * Cin), lambda b: (b, 0, 0, 0)),
                     pl.BlockSpec((None, Ho, Wo, Cin), lambda b: (b, 0, 0, 0))]

    in_arrays += [w1, b1, w2, b2]
    in_specs += [pl.BlockSpec(w1.shape, lambda b: (0, 0)),
                 pl.BlockSpec(b1.shape, lambda b: (0, 0)),
                 pl.BlockSpec(w2.shape, lambda b: (0, 0)),
                 pl.BlockSpec(b2.shape, lambda b: (0, 0))]
    if has_proj:
        w3 = _w_to_mat(params["w3"]).astype(jnp.bfloat16)  # (Cin, Cm)
        b3 = params["b3"].astype(jnp.float32).reshape(1, Cm)
        in_arrays += [w3, b3]
        in_specs += [pl.BlockSpec(w3.shape, lambda b: (0, 0)),
                     pl.BlockSpec(b3.shape, lambda b: (0, 0))]

    kernel = functools.partial(_fused_block_kernel, stride=stride,
                               has_proj=has_proj, Ho=Ho, Wo=Wo,
                               negative_slope=_NEG_SLOPE)

    flops = 2 * B * Ho * Wo * (9 * Cin * Cm + 9 * Cm * Cm
                               + (Cin * Cm if has_proj else 0))
    bytes_accessed = (sum(int(a.size) * a.dtype.itemsize for a in in_arrays)
                      + B * Ho * Wo * Cm * jnp.dtype(out_dtype).itemsize)

    out = pl.pallas_call(
        kernel,
        out_shape=jax.ShapeDtypeStruct((B, Ho, Wo, Cm), out_dtype),
        grid_spec=pltpu.PrefetchScalarGridSpec(
            num_scalar_prefetch=0,
            grid=(B,),
            in_specs=in_specs,
            out_specs=pl.BlockSpec((None, Ho, Wo, Cm), lambda b: (b, 0, 0, 0)),
            scratch_shapes=[pltpu.VMEM((Ho + 2, Wo + 2, Cm), jnp.bfloat16)],
        ),
        compiler_params=pltpu.CompilerParams(
            dimension_semantics=("parallel",),
            vmem_limit_bytes=int(vmem_limit),
        ),
        cost_estimate=pl.CostEstimate(flops=int(flops), transcendentals=0,
                                      bytes_accessed=int(bytes_accessed)),
    )(*in_arrays)

    # TODO(synk): callers consuming NHWC could skip this transpose entirely.
    return jnp.transpose(out, (0, 3, 1, 2))


# ------------------------------ pure-JAX reference -----------------------------
def _reference_forward(x, params, input_filters, num_filters, down_sampling):
    stride = 2 if down_sampling else 1

    def conv(v, w, b, s, pad):
        y = jax.lax.conv_general_dilated(
            v, w, (s, s), [(pad, pad), (pad, pad)],
            dimension_numbers=("NCHW", "OIHW", "NCHW"))
        return y + b[None, :, None, None]

    leaky = lambda v: jnp.where(v > 0, v, _NEG_SLOPE * v)
    out = leaky(conv(x, params["w1"], params["b1"], stride, 1))
    out = conv(out, params["w2"], params["b2"], 1, 1)
    if num_filters != input_filters or down_sampling:
        identity = conv(x, params["w3"], params["b3"], stride, 0)
    else:
        identity = x
    return leaky(out + identity)


# ------------------------------------ main -------------------------------------
if __name__ == "__main__":
    B, H, W = 2, 16, 16
    key = jax.random.PRNGKey(0)

    def init_conv(kw, kb, cout, cin, k):
        bound = 1.0 / (cin * k * k) ** 0.5
        w = jax.random.uniform(kw, (cout, cin, k, k), jnp.float32, -bound, bound)
        b = jax.random.uniform(kb, (cout,), jnp.float32, -bound, bound)
        return w, b

    configs = [
        dict(cin=4, cout=8, down=False),   # projection identity (1x1 conv3)
        dict(cin=4, cout=4, down=False),   # pass-through identity
        dict(cin=4, cout=8, down=True),    # down-sampling (stride 2) + conv3
    ]
    for idx, cfg in enumerate(configs):
        cin, cout, down = cfg["cin"], cfg["cout"], cfg["down"]
        ks = jax.random.split(jax.random.fold_in(key, idx), 7)
        x = jax.random.normal(ks[0], (B, cin, H, W), jnp.float32)
        w1, b1 = init_conv(ks[1], ks[2], cout, cin, 3)
        w2, b2 = init_conv(ks[3], ks[4], cout, cout, 3)
        w3, b3 = init_conv(ks[5], ks[6], cout, cin, 1)
        params = dict(w1=w1, b1=b1, w2=w2, b2=b2, w3=w3, b3=b3)

        out = jax.block_until_ready(mask_basic_block(x, params, cin, cout, down))
        ref = jax.block_until_ready(
            _reference_forward(x, params, cin, cout, down))
        assert out.shape == ref.shape, (cfg, out.shape, ref.shape)
        err = float(jnp.max(jnp.abs(out - ref)))
        # bf16 MXU operands / f32 accumulation & f32 residual vs pure-f32 ref
        assert bool(jnp.allclose(out, ref, atol=2e-2, rtol=2e-2)), (cfg, err)

    print("KERNEL_OK")
</pallas_src>

<mosaic_0001>
module attributes {stable_mosaic.version = 11 : i64} {
  func.func @_fused_block_kernel(%arg0: i32, %arg1: memref<1x18x18x4xf32, #tpu.memory_space<vmem>>, %arg2: memref<36x8xbf16, #tpu.memory_space<vmem>>, %arg3: memref<1x8xf32, #tpu.memory_space<vmem>>, %arg4: memref<72x8xbf16, #tpu.memory_space<vmem>>, %arg5: memref<1x8xf32, #tpu.memory_space<vmem>>, %arg6: memref<4x8xbf16, #tpu.memory_space<vmem>>, %arg7: memref<1x8xf32, #tpu.memory_space<vmem>>, %arg8: memref<1x16x16x8xf32, #tpu.memory_space<vmem>>, %arg9: memref<18x18x8xbf16, #tpu.memory_space<vmem>>) attributes {dimension_semantics = [#tpu.dimension_semantics<parallel>], iteration_bounds = array<i64: 2>, scalar_prefetch = 0 : i64, scratch_operands = 1 : i64, tpu.core_type = #tpu.core_type<tc>, window_params = [{transform_indices = @transform_0, window_bounds = array<i64: 1, 18, 18, 4>}, {pipeline_mode = #tpu.pipeline_mode<synchronous>, transform_indices = @transform_1, window_bounds = array<i64: 36, 8>}, {pipeline_mode = #tpu.pipeline_mode<synchronous>, transform_indices = @transform_2, window_bounds = array<i64: 1, 8>}, {pipeline_mode = #tpu.pipeline_mode<synchronous>, transform_indices = @transform_3, window_bounds = array<i64: 72, 8>}, {pipeline_mode = #tpu.pipeline_mode<synchronous>, transform_indices = @transform_4, window_bounds = array<i64: 1, 8>}, {pipeline_mode = #tpu.pipeline_mode<synchronous>, transform_indices = @transform_5, window_bounds = array<i64: 4, 8>}, {pipeline_mode = #tpu.pipeline_mode<synchronous>, transform_indices = @transform_6, window_bounds = array<i64: 1, 8>}, {transform_indices = @transform_7, window_bounds = array<i64: 1, 16, 16, 8>}]} {
    %c0 = arith.constant 0 : index
    %c0_0 = arith.constant 0 : index
    %c0_1 = arith.constant 0 : index
    %c0_2 = arith.constant 0 : index
    %0 = vector.load %arg1[%c0, %c0_0, %c0_1, %c0_2] : memref<1x18x18x4xf32, #tpu.memory_space<vmem>>, vector<1x18x18x4xf32>
    %1 = vector.shape_cast %0 : vector<1x18x18x4xf32> to vector<18x18x4xf32>
    %2 = vector.extract_strided_slice %1 {offsets = [0, 0, 0], sizes = [16, 16, 4], strides = [1, 1, 1]} : vector<18x18x4xf32> to vector<16x16x4xf32>
    %3 = vector.shape_cast %2 : vector<16x16x4xf32> to vector<256x4xf32>
    %4 = vector.extract_strided_slice %1 {offsets = [0, 1, 0], sizes = [16, 16, 4], strides = [1, 1, 1]} : vector<18x18x4xf32> to vector<16x16x4xf32>
    %5 = vector.shape_cast %4 : vector<16x16x4xf32> to vector<256x4xf32>
    %6 = vector.extract_strided_slice %1 {offsets = [0, 2, 0], sizes = [16, 16, 4], strides = [1, 1, 1]} : vector<18x18x4xf32> to vector<16x16x4xf32>
    %7 = vector.shape_cast %6 : vector<16x16x4xf32> to vector<256x4xf32>
    %8 = vector.extract_strided_slice %1 {offsets = [1, 0, 0], sizes = [16, 16, 4], strides = [1, 1, 1]} : vector<18x18x4xf32> to vector<16x16x4xf32>
    %9 = vector.shape_cast %8 : vector<16x16x4xf32> to vector<256x4xf32>
    %10 = vector.extract_strided_slice %1 {offsets = [1, 1, 0], sizes = [16, 16, 4], strides = [1, 1, 1]} : vector<18x18x4xf32> to vector<16x16x4xf32>
    %11 = vector.shape_cast %10 : vector<16x16x4xf32> to vector<256x4xf32>
    %12 = vector.extract_strided_slice %1 {offsets = [1, 2, 0], sizes = [16, 16, 4], strides = [1, 1, 1]} : vector<18x18x4xf32> to vector<16x16x4xf32>
    %13 = vector.shape_cast %12 : vector<16x16x4xf32> to vector<256x4xf32>
    %14 = vector.extract_strided_slice %1 {offsets = [2, 0, 0], sizes = [16, 16, 4], strides = [1, 1, 1]} : vector<18x18x4xf32> to vector<16x16x4xf32>
    %15 = vector.shape_cast %14 : vector<16x16x4xf32> to vector<256x4xf32>
    %16 = vector.extract_strided_slice %1 {offsets = [2, 1, 0], sizes = [16, 16, 4], strides = [1, 1, 1]} : vector<18x18x4xf32> to vector<16x16x4xf32>
    %17 = vector.shape_cast %16 : vector<16x16x4xf32> to vector<256x4xf32>
    %18 = vector.extract_strided_slice %1 {offsets = [2, 2, 0], sizes = [16, 16, 4], strides = [1, 1, 1]} : vector<18x18x4xf32> to vector<16x16x4xf32>
    %19 = vector.shape_cast %18 : vector<16x16x4xf32> to vector<256x4xf32>
    %20 = tpu.concatenate %3, %5, %7, %9, %11, %13, %15, %17, %19 in 1 : vector<256x4xf32>, vector<256x4xf32>, vector<256x4xf32>, vector<256x4xf32>, vector<256x4xf32>, vector<256x4xf32>, vector<256x4xf32>, vector<256x4xf32>, vector<256x4xf32> -> vector<256x36xf32>
    %21 = arith.truncf %20 : vector<256x36xf32> to vector<256x36xbf16>
    %22 = vector.extract_strided_slice %1 {offsets = [1, 1, 0], sizes = [16, 16, 4], strides = [1, 1, 1]} : vector<18x18x4xf32> to vector<16x16x4xf32>
    %23 = vector.shape_cast %22 : vector<16x16x4xf32> to vector<256x4xf32>
    %c0_3 = arith.constant 0 : index
    %c0_4 = arith.constant 0 : index
    %24 = vector.load %arg2[%c0_3, %c0_4] : memref<36x8xbf16, #tpu.memory_space<vmem>>, vector<36x8xbf16>
    %cst = arith.constant dense<0.000000e+00> : vector<256x8xf32>
    %25 = tpu.matmul %21, %24, %cst {dimension_numbers = #tpu.dot_dimension_numbers<[1], [0], [0], [1], [0, 0, 1, 1], [], []>} : vector<256x36xbf16>, vector<36x8xbf16>, vector<256x8xf32> -> vector<256x8xf32>
    %c0_5 = arith.constant 0 : index
    %c0_6 = arith.constant 0 : index
    %26 = vector.load %arg3[%c0_5, %c0_6] : memref<1x8xf32, #tpu.memory_space<vmem>>, vector<1x8xf32>
    %27 = vector.broadcast %26 : vector<1x8xf32> to vector<256x8xf32>
    %28 = arith.addf %25, %27 : vector<256x8xf32>
    %cst_7 = arith.constant 0.00999999977 : f32
    %29 = vector.broadcast %cst_7 : f32 to vector<256x8xf32>
    %30 = arith.mulf %29, %28 : vector<256x8xf32>
    %31 = arith.maximumf %28, %30 : vector<256x8xf32>
    %cst_8 = arith.constant 0.000000e+00 : bf16
    %32 = vector.broadcast %cst_8 : bf16 to vector<18x18x8xbf16>
    %c0_9 = arith.constant 0 : index
    %c0_10 = arith.constant 0 : index
    %c0_11 = arith.constant 0 : index
    %33 = vector.load %arg9[%c0_9, %c0_10, %c0_11] : memref<18x18x8xbf16, #tpu.memory_space<vmem>>, vector<18x18x8xbf16>
    tpu.vector_store %arg9[%c0_9, %c0_10, %c0_11], %32 {strides = array<i32>} : memref<18x18x8xbf16, #tpu.memory_space<vmem>>, vector<18x18x8xbf16>,
    %34 = vector.shape_cast %31 : vector<256x8xf32> to vector<16x16x8xf32>
    %35 = arith.truncf %34 : vector<16x16x8xf32> to vector<16x16x8xbf16>
    %c1 = arith.constant 1 : index
    %c1_12 = arith.constant 1 : index
    %c0_13 = arith.constant 0 : index
    %36 = vector.load %arg9[%c1, %c1_12, %c0_13] : memref<18x18x8xbf16, #tpu.memory_space<vmem>>, vector<16x16x8xbf16>
    tpu.vector_store %arg9[%c1, %c1_12, %c0_13], %35 {strides = array<i32>} : memref<18x18x8xbf16, #tpu.memory_space<vmem>>, vector<16x16x8xbf16>,
    %c0_14 = arith.constant 0 : index
    %c0_15 = arith.constant 0 : index
    %c0_16 = arith.constant 0 : index
    %37 = vector.load %arg9[%c0_14, %c0_15, %c0_16] : memref<18x18x8xbf16, #tpu.memory_space<vmem>>, vector<16x16x8xbf16>
    %38 = vector.shape_cast %37 : vector<16x16x8xbf16> to vector<256x8xbf16>
    %c0_17 = arith.constant 0 : index
    %c1_18 = arith.constant 1 : index
    %c0_19 = arith.constant 0 : index
    %39 = vector.load %arg9[%c0_17, %c1_18, %c0_19] : memref<18x18x8xbf16, #tpu.memory_space<vmem>>, vector<16x16x8xbf16>
    %40 = vector.shape_cast %39 : vector<16x16x8xbf16> to vector<256x8xbf16>
    %c0_20 = arith.constant 0 : index
    %c2 = arith.constant 2 : index
    %c0_21 = arith.constant 0 : index
    %41 = vector.load %arg9[%c0_20, %c2, %c0_21] : memref<18x18x8xbf16, #tpu.memory_space<vmem>>, vector<16x16x8xbf16>
    %42 = vector.shape_cast %41 : vector<16x16x8xbf16> to vector<256x8xbf16>
    %c1_22 = arith.constant 1 : index
    %c0_23 = arith.constant 0 : index
    %c0_24 = arith.constant 0 : index
    %43 = vector.load %arg9[%c1_22, %c0_23, %c0_24] : memref<18x18x8xbf16, #tpu.memory_space<vmem>>, vector<16x16x8xbf16>
    %44 = vector.shape_cast %43 : vector<16x16x8xbf16> to vector<256x8xbf16>
    %c1_25 = arith.constant 1 : index
    %c1_26 = arith.constant 1 : index
    %c0_27 = arith.constant 0 : index
    %45 = vector.load %arg9[%c1_25, %c1_26, %c0_27] : memref<18x18x8xbf16, #tpu.memory_space<vmem>>, vector<16x16x8xbf16>
    %46 = vector.shape_cast %45 : vector<16x16x8xbf16> to vector<256x8xbf16>
    %c1_28 = arith.constant 1 : index
    %c2_29 = arith.constant 2 : index
    %c0_30 = arith.constant 0 : index
    %47 = vector.load %arg9[%c1_28, %c2_29, %c0_30] : memref<18x18x8xbf16, #tpu.memory_space<vmem>>, vector<16x16x8xbf16>
    %48 = vector.shape_cast %47 : vector<16x16x8xbf16> to vector<256x8xbf16>
    %c2_31 = arith.constant 2 : index
    %c0_32 = arith.constant 0 : index
    %c0_33 = arith.constant 0 : index
    %49 = vector.load %arg9[%c2_31, %c0_32, %c0_33] : memref<18x18x8xbf16, #tpu.memory_space<vmem>>, vector<16x16x8xbf16>
    %50 = vector.shape_cast %49 : vector<16x16x8xbf16> to vector<256x8xbf16>
    %c2_34 = arith.constant 2 : index
    %c1_35 = arith.constant 1 : index
    %c0_36 = arith.constant 0 : index
    %51 = vector.load %arg9[%c2_34, %c1_35, %c0_36] : memref<18x18x8xbf16, #tpu.memory_space<vmem>>, vector<16x16x8xbf16>
    %52 = vector.shape_cast %51 : vector<16x16x8xbf16> to vector<256x8xbf16>
    %c2_37 = arith.constant 2 : index
    %c2_38 = arith.constant 2 : index
    %c0_39 = arith.constant 0 : index
    %53 = vector.load %arg9[%c2_37, %c2_38, %c0_39] : memref<18x18x8xbf16, #tpu.memory_space<vmem>>, vector<16x16x8xbf16>
    %54 = vector.shape_cast %53 : vector<16x16x8xbf16> to vector<256x8xbf16>
    %55 = tpu.concatenate %38, %40, %42, %44, %46, %48, %50, %52, %54 in 1 : vector<256x8xbf16>, vector<256x8xbf16>, vector<256x8xbf16>, vector<256x8xbf16>, vector<256x8xbf16>, vector<256x8xbf16>, vector<256x8xbf16>, vector<256x8xbf16>, vector<256x8xbf16> -> vector<256x72xbf16>
    %c0_40 = arith.constant 0 : index
    %c0_41 = arith.constant 0 : index
    %56 = vector.load %arg4[%c0_40, %c0_41] : memref<72x8xbf16, #tpu.memory_space<vmem>>, vector<72x8xbf16>
    %cst_42 = arith.constant dense<0.000000e+00> : vector<256x8xf32>
    %57 = tpu.matmul %55, %56, %cst_42 {dimension_numbers = #tpu.dot_dimension_numbers<[1], [0], [0], [1], [0, 0, 1, 1], [], []>} : vector<256x72xbf16>, vector<72x8xbf16>, vector<256x8xf32> -> vector<256x8xf32>
    %c0_43 = arith.constant 0 : index
    %c0_44 = arith.constant 0 : index
    %58 = vector.load %arg5[%c0_43, %c0_44] : memref<1x8xf32, #tpu.memory_space<vmem>>, vector<1x8xf32>
    %59 = vector.broadcast %58 : vector<1x8xf32> to vector<256x8xf32>
    %60 = arith.addf %57, %59 : vector<256x8xf32>
    %61 = arith.truncf %23 : vector<256x4xf32> to vector<256x4xbf16>
    %c0_45 = arith.constant 0 : index
    %c0_46 = arith.constant 0 : index
    %62 = vector.load %arg6[%c0_45, %c0_46] : memref<4x8xbf16, #tpu.memory_space<vmem>>, vector<4x8xbf16>
    %cst_47 = arith.constant dense<0.000000e+00> : vector<256x8xf32>
    %63 = tpu.matmul %61, %62, %cst_47 {dimension_numbers = #tpu.dot_dimension_numbers<[1], [0], [0], [1], [0, 0, 1, 1], [], []>} : vector<256x4xbf16>, vector<4x8xbf16>, vector<256x8xf32> -> vector<256x8xf32>
    %c0_48 = arith.constant 0 : index
    %c0_49 = arith.constant 0 : index
    %64 = vector.load %arg7[%c0_48, %c0_49] : memref<1x8xf32, #tpu.memory_space<vmem>>, vector<1x8xf32>
    %65 = vector.broadcast %64 : vector<1x8xf32> to vector<256x8xf32>
    %66 = arith.addf %63, %65 : vector<256x8xf32>
    %67 = arith.addf %60, %66 : vector<256x8xf32>
    %cst_50 = arith.constant 0.00999999977 : f32
    %68 = vector.broadcast %cst_50 : f32 to vector<256x8xf32>
    %69 = arith.mulf %68, %67 : vector<256x8xf32>
    %70 = arith.maximumf %67, %69 : vector<256x8xf32>
    %71 = vector.shape_cast %70 : vector<256x8xf32> to vector<16x16x8xf32>
    %c0_51 = arith.constant 0 : index
    %c0_52 = arith.constant 0 : index
    %c0_53 = arith.constant 0 : index
    %c0_54 = arith.constant 0 : index
    %72 = vector.load %arg8[%c0_51, %c0_52, %c0_53, %c0_54] : memref<1x16x16x8xf32, #tpu.memory_space<vmem>>, vector<1x16x16x8xf32>
    %73 = vector.shape_cast %72 : vector<1x16x16x8xf32> to vector<16x16x8xf32>
    %74 = vector.shape_cast %71 : vector<16x16x8xf32> to vector<1x16x16x8xf32>
    tpu.vector_store %arg8[%c0_51, %c0_52, %c0_53, %c0_54], %74 {strides = array<i32>} : memref<1x16x16x8xf32, #tpu.memory_space<vmem>>, vector<1x16x16x8xf32>,
    return
  }
  func.func @transform_0(%arg0: i32) -> (i32, i32, i32, i32) {
    %c0_i32 = arith.constant 0 : i32
    %c0_i32_0 = arith.constant 0 : i32
    %c0_i32_1 = arith.constant 0 : i32
    %c0_i32_2 = arith.constant 0 : i32
    return %arg0, %c0_i32, %c0_i32_0, %c0_i32_1 : i32, i32, i32, i32
  }
  func.func @transform_1(%arg0: i32) -> (i32, i32) {
    %c0_i32 = arith.constant 0 : i32
    %c0_i32_0 = arith.constant 0 : i32
    %c0_i32_1 = arith.constant 0 : i32
    return %c0_i32, %c0_i32_0 : i32, i32
  }
  func.func @transform_2(%arg0: i32) -> (i32, i32) {
    %c0_i32 = arith.constant 0 : i32
    %c0_i32_0 = arith.constant 0 : i32
    %c0_i32_1 = arith.constant 0 : i32
    return %c0_i32, %c0_i32_0 : i32, i32
  }
  func.func @transform_3(%arg0: i32) -> (i32, i32) {
    %c0_i32 = arith.constant 0 : i32
    %c0_i32_0 = arith.constant 0 : i32
    %c0_i32_1 = arith.constant 0 : i32
    return %c0_i32, %c0_i32_0 : i32, i32
  }
  func.func @transform_4(%arg0: i32) -> (i32, i32) {
    %c0_i32 = arith.constant 0 : i32
    %c0_i32_0 = arith.constant 0 : i32
    %c0_i32_1 = arith.constant 0 : i32
    return %c0_i32, %c0_i32_0 : i32, i32
  }
  func.func @transform_5(%arg0: i32) -> (i32, i32) {
    %c0_i32 = arith.constant 0 : i32
    %c0_i32_0 = arith.constant 0 : i32
    %c0_i32_1 = arith.constant 0 : i32
    return %c0_i32, %c0_i32_0 : i32, i32
  }
  func.func @transform_6(%arg0: i32) -> (i32, i32) {
    %c0_i32 = arith.constant 0 : i32
    %c0_i32_0 = arith.constant 0 : i32
    %c0_i32_1 = arith.constant 0 : i32
    return %c0_i32, %c0_i32_0 : i32, i32
  }
  func.func @transform_7(%arg0: i32) -> (i32, i32, i32, i32) {
    %c0_i32 = arith.constant 0 : i32
    %c0_i32_0 = arith.constant 0 : i32
    %c0_i32_1 = arith.constant 0 : i32
    %c0_i32_2 = arith.constant 0 : i32
    return %arg0, %c0_i32, %c0_i32_0, %c0_i32_1 : i32, i32, i32, i32
  }
}

</mosaic_0001>

<bundles_post_ra>
// kernel: tpu_custom_call.1
= control target key start
LH: loop header
LB: loop body
LE: loop exit
PB: predicated region body
PF: predicated region fallthrough
CT: control target
= control target key end

     0   :  { %s6917_s24 = smov 0   ;;  %s10407_s0 = inlined_call_operand.vmem [shape: f32[2,18,18,4], index: 0, kind: input, shape index: {}]   ;;  %s10408_s1 = inlined_call_operand.vmem [shape: bf16[36,8], index: 1, kind: input, shape index: {}]   ;;  %s10409_s2 = inlined_call_operand.vmem [shape: f32[1,8], index: 2, kind: input, shape index: {}]   ;;  %s10410_s3 = inlined_call_operand.vmem [shape: bf16[72,8], index: 3, kind: input, shape index: {}]   ;;  %s10411_s4 = inlined_call_operand.vmem [shape: f32[1,8], index: 4, kind: input, shape index: {}]   ;;  %s10412_s5 = inlined_call_operand.vmem [shape: bf16[4,8], index: 5, kind: input, shape index: {}]   ;;  %s10413_s6 = inlined_call_operand.vmem [shape: f32[1,8], index: 6, kind: input, shape index: {}]   ;;  %s10414_s7 = inlined_call_operand.vmem [shape: f32[2,16,16,8], index: 7, kind: output, shape index: {}]  }
   0x1 LB: > { %s5762_s25 = sadd.s32 4294967295, %s6862_s24   ;;  %p5766_p0 = scmp.ge.s32.totalorder %s6862_s24, 1  ;;  %s6862_s24 = sphi %s6917_s24, %s17_s24  }
   0x2   : > { %p237_p1 = scmp.lt.s32.totalorder %s6862_s24, 3 }
   0x4   : > { %p238_p2 = pnand %p5766_p0, %p237_p1 }
   0x6   : > { %241 = sbr.rel (%p238_p2) target bundleno = 1236 (0x4d4), region = 48 }
   0xb   : > { %p269_p3 = scmp.lt.s32.totalorder %s5762_s25, 1  ;;  %vm382_vm0 = vcmask 1046528   ;;  %s6864_s30 = smov 4   ;;  %vm463_vm1 = vcmask 1045504   ;;  %vm1723_vm2 = vcmask 1041408   ;;  %vm1370_vm3 = vcmask 31744  }
   0xc   : > { %s6865_s8 = smov 8   ;;  %s6866_s9 = smov 12   ;;  %vm1436_vm4 = vcmask 97280   ;;  %vm1403_vm5 = vcmask 64512   ;;  %vm1469_vm6 = vcmask 130048   ;;  %vm1502_vm7 = vcmask 162816  }
   0xd   : > { %s10712_s25 = smov (!%p269_p3, %s5762_s25), 1  ;;  %s6867_s10 = smov 16   ;;  %vm1535_vm8 = vcmask 195584   ;;  %vm1568_vm9 = vcmask 228352   ;;  %vm1601_vm10 = vcmask 261120   ;;  %vm1674_vm11 = vcmask 293888  }
   0xe   : > { %s6148_s26 = smul.u32 432, %s10712_s25  ;;  %s6868_s11 = smov 20   ;;  %vm1880_vm12 = vcmask 60416   ;;  %vm1883_vm13 = vcmask 57344   ;;  %vm2293_vm14 = vsmask.f32 7938 }
   0xf   : > { %s6869_s12 = smov 28   ;;  %s6870_s13 = smov 24   ;;  %vm8650_vm15 = vmand %vm1880_vm12, %vm2293_vm14  ;;  %vm2458_vm14 = vsmask.f32 7440 }
  0x10   : > { %s6931_s29 = scalar_lea.vmem %s10407_s0, %s6148_s26  ;;  %s6871_s14 = smov 32  }
  0x11   : > { %v6934_v0 = vld [vmem:[%s6931_s29 + $0x60] sm:$0xff]  ;;  %v6937_v1 = vld [vmem:[%s6931_s29 + $0x68] sm:$0xff]  ;;  %v6940_v2 = vld [vmem:[%s6931_s29 + $0x70] sm:$0x3]  ;;  %s6873_s23 = smov 48   ;;  %s6874_s26 = smov 56  }
  0x12   : > { %v403_v3 = vrot.slane %v6934_v0, 1  ;;  %v404_v4 = vrot.slane %v6937_v1, 1  ;;  %v406_v5 = vrot.slane %v6940_v2, 1  ;;  %v6946_v6 = vld [vmem:[%s6931_s29 + $0x30] sm:$0xff]  ;;  %v6949_v7 = vld [vmem:[%s6931_s29 + $0x38] sm:$0xff]  ;;  %v6952_v8 = vld [vmem:[%s6931_s29] sm:$0xff] }
  0x13   : > { %v6955_v9 = vld [vmem:[%s6931_s29 + $0x40] sm:$0x3]  ;;  %v393_v10 = vrot.slane %v6946_v6, 1  ;;  %v394_v11 = vrot.slane %v6949_v7, 1  ;;  %v6960_v12 = vld [vmem:[%s6931_s29 + $0x8] sm:$0xff]  ;;  %v383_v13 = vrot.slane %v6952_v8, 1 }
  0x14   : > { %v6964_v14 = vsel %vm382_vm0, %v403_v3, %v404_v4  ;;  %v6967_v15 = vsel %vm382_vm0, %v404_v4, %v406_v5  ;;  %v396_v16 = vrot.slane %v6955_v9, 1  ;;  %v6971_v17 = vld [vmem:[%s6931_s29 + $0x10] sm:$0x3]  ;;  %v384_v18 = vrot.slane %v6960_v12, 1  ;;  %v6975_v19 = vld [vmem:[%s6931_s29 + $0x78] sm:$0xff]  ;;  %v6978_v20 = vld [vmem:[%s6931_s29 + $0x80] sm:$0xff] }
  0x15   : > { %10513 = vst [vmem:[#allocation3_spill] sm:$0xff] %v6964_v14  ;;  %v6982_v21 = vpack.i.bf16 %v6967_v15, %v6964_v14  ;;  %v6985_v22 = vsel %vm382_vm0, %v393_v10, %v394_v11  ;;  %v386_v23 = vrot.slane %v6971_v17, 1  ;;  %v6989_v24 = vld [vmem:[%s6931_s29 + $0x88] sm:$0x3]  ;;  %v6995_v26 = vld [vmem:[%s6931_s29 + $0x50] sm:$0xff]  ;;  %v408_v29 = vrot.slane %v6975_v19, 1 }
  0x16   : > { %10514 = vst [vmem:[#allocation4_spill] sm:$0xff] %v6967_v15  ;;  %v6992_v25 = vld [vmem:[%s6931_s29 + $0x48] sm:$0xff]  ;;  %v6998_v27 = vsel %vm382_vm0, %v394_v11, %v396_v16  ;;  %v385_v28 = vsel %vm382_vm0, %v383_v13, %v384_v18  ;;  %v409_v30 = vrot.slane %v6978_v20, 1  ;;  %v7004_v31 = vld [vmem:[%s6931_s29 + $0x58] sm:$0x3]  ;;  %v7010_v33 = vld [vmem:[%s6931_s29 + $0x20] sm:$0xff] }
  0x17   : > { %10515 = vst [vmem:[#allocation5_spill] sm:$0xff] %v6982_v21  ;;  %v7007_v32 = vld [vmem:[%s6931_s29 + $0x18] sm:$0xff]  ;;  %6191 = vrot.lane.b32.xlu2 %v6982_v21, %s6864_s30  ;;  %v7016_v34 = vpack.i.bf16 %v6998_v27, %v6985_v22  ;;  %v387_v35 = vsel %vm382_vm0, %v384_v18, %v386_v23  ;;  %v411_v36 = vrot.slane %v6989_v24, 1  ;;  %v398_v37 = vrot.slane %v6992_v25, 1  ;;  %v7022_v38 = vld [vmem:[%s6931_s29 + $0x28] sm:$0x3] }
  0x18   : > { %10516 = vst [vmem:[#allocation6_spill] sm:$0xff] %v6985_v22  ;;  %v6170_v39 = vpack.i.bf16 %v387_v35, %v385_v28  ;;  %v7025_v40 = vsel %vm382_vm0, %v408_v29, %v409_v30  ;;  %v399_v41 = vrot.slane %v6995_v26, 1  ;;  %v401_v42 = vrot.slane %v7004_v31, 1  ;;  %v7030_v43 = vld [vmem:[%s6931_s29 + $0xc0] sm:$0xff]  ;;  %v7041_v48 = vld [vmem:[%s6931_s29 + $0xc8] sm:$0xff]  ;;  %v7067_v56 = vld [vmem:[%s6931_s29 + $0xb0] sm:$0xff] }
  0x19   : > { %10517 = vst [vmem:[#allocation7_spill] sm:$0xff] %v6998_v27  ;;  %6181 = vrot.lane.b32.xlu1 %v7016_v34, %s6864_s30  ;;  %v7035_v44 = vsel %vm382_vm0, %v409_v30, %v411_v36  ;;  %v388_v45 = vrot.slane %v7007_v32, 1  ;;  %v389_v46 = vrot.slane %v7010_v33, 1  ;;  %v391_v47 = vrot.slane %v7022_v38, 1  ;;  %v7044_v49 = vld [vmem:[%s6931_s29 + $0xd0] sm:$0x3] }
  0x1a   : > { %10518 = vst [vmem:[#allocation8_spill] sm:$0xff] %v7025_v40  ;;  %6171 = vrot.lane.b32.xlu0 %v6170_v39, %s6864_s30  ;;  %v7048_v50 = vsel %vm382_vm0, %v398_v37, %v399_v41  ;;  %v7051_v51 = vsel %vm382_vm0, %v399_v41, %v401_v42  ;;  %v7054_v52 = vld [vmem:[%s6931_s29 + $0xa8] sm:$0xff]  ;;  %v7058_v53 = vpack.i.bf16 %v7035_v44, %v7025_v40  ;;  %v7070_v57 = vld [vmem:[%s6931_s29 + $0xb8] sm:$0x3]  ;;  %v7073_v58 = vld [vmem:[%s6931_s29 + $0x90] sm:$0xff]  ;;  %v423_v59 = vrot.slane %v7030_v43, 1 }
  0x1b   : > { %10519 = vst [vmem:[#allocation9_spill] sm:$0xff] %v7035_v44  ;;  %v7061_v54 = vsel %vm382_vm0, %v388_v45, %v389_v46  ;;  %v7064_v55 = vsel %vm382_vm0, %v389_v46, %v391_v47  ;;  %v424_v60 = vrot.slane %v7041_v48, 1  ;;  %v426_v61 = vrot.slane %v7044_v49, 1  ;;  %v7079_v62 = vld [vmem:[%s6931_s29 + $0x98] sm:$0xff]  ;;  %v7082_v63 = vld [vmem:[%s6931_s29 + $0xa0] sm:$0x3] }
  0x1c   : > { %10520 = vst [vmem:[#allocation10_spill] sm:$0xff] %v7048_v50  ;;  %v7086_v3 = vpack.i.bf16 %v7051_v51, %v7048_v50  ;;  %v7090_v4 = vpack.i.bf16 %v7064_v55, %v7061_v54  ;;  %v418_v5 = vrot.slane %v7054_v52, 1  ;;  %v419_v10 = vrot.slane %v7067_v56, 1  ;;  %v7109_v29 = vld [vmem:[%s6931_s29 + $0x108] sm:$0xff]  ;;  %v7112_v30 = vld [vmem:[%s6931_s29 + $0x110] sm:$0xff]  ;;  %v7139_v46 = vld [vmem:[%s6931_s29 + $0xf8] sm:$0xff] }
  0x1d   : > { %10521 = vst [vmem:[#allocation11_spill] sm:$0xff] %v7051_v51  ;;  %v421_v11 = vrot.slane %v7070_v57, 1  ;;  %v413_v13 = vrot.slane %v7073_v58, 1  ;;  %v414_v16 = vrot.slane %v7079_v62, 1  ;;  %v416_v18 = vrot.slane %v7082_v63, 1  ;;  %v7126_v39 = vld [vmem:[%s6931_s29 + $0xf0] sm:$0xff] }
  0x1e   : > { %10522 = vst [vmem:[#allocation12_spill] sm:$0xff] %v7058_v53  ;;  %v7101_v23 = vsel %vm382_vm0, %v423_v59, %v424_v60  ;;  %v7104_v28 = vsel %vm382_vm0, %v424_v60, %v426_v61  ;;  %v7115_v35 = vld [vmem:[%s6931_s29 + $0x118] sm:$0x3]  ;;  %v7120_v36 = vsel %vm382_vm0, %v418_v5, %v419_v10  ;;  %v7142_v47 = vld [vmem:[%s6931_s29 + $0x100] sm:$0x3]  ;;  %v438_v60 = vrot.slane %v7109_v29, 1 }
  0x1f   : > { %10523 = vst [vmem:[#allocation13_spill] sm:$0xff] %v7061_v54  ;;  %6196 = vrot.lane.b32.xlu2 %v7058_v53, %s6864_s30  ;;  %v7123_v37 = vsel %vm382_vm0, %v419_v10, %v421_v11  ;;  %v7130_v41 = vpack.i.bf16 %v7104_v28, %v7101_v23  ;;  %v7133_v42 = vsel %vm382_vm0, %v413_v13, %v414_v16  ;;  %v7145_v59 = vld [vmem:[%s6931_s29 + $0xd8] sm:$0xff]  ;;  %v439_v61 = vrot.slane %v7112_v30, 1  ;;  %v7151_v10 = vld [vmem:[%s6931_s29 + $0xe0] sm:$0xff]  ;;  %v7154_v11 = vld [vmem:[%s6931_s29 + $0xe8] sm:$0x3] }
  0x20   : > { %10524 = vst [vmem:[#allocation14_spill] sm:$0xff] %v7064_v55  ;;  %v7136_v45 = vsel %vm382_vm0, %v414_v16, %v416_v18  ;;  %v441_v5 = vrot.slane %v7115_v35, 1  ;;  %v7158_v13 = vpack.i.bf16 %v7123_v37, %v7120_v36  ;;  %v433_v18 = vrot.slane %v7126_v39, 1  ;;  %v7181_v40 = vld [vmem:[%s6931_s29 + $0x150] sm:$0xff]  ;;  %v7184_v15 = vld [vmem:[%s6931_s29 + $0x158] sm:$0xff]  ;;  %v7211_v22 = vld [vmem:[%s6931_s29 + $0x140] sm:$0xff] }
  0x21   : > { %10525 = vst [vmem:[#allocation15_spill] sm:$0xff] %v7090_v4  ;;  %6186 = vrot.lane.b32.xlu1 %v7086_v3, %s6864_s30  ;;  %v7162_v16 = vpack.i.bf16 %v7136_v45, %v7133_v42  ;;  %v428_v44 = vrot.slane %v7145_v59, 1  ;;  %v7187_v14 = vld [vmem:[%s6931_s29 + $0x160] sm:$0x3]  ;;  %v7214_v55 = vld [vmem:[%s6931_s29 + $0x148] sm:$0x3] }
  0x22   : > { %10526 = vst [vmem:[#allocation16_spill] sm:$0xff] %v7101_v23  ;;  %6176 = vrot.lane.b32.xlu0 %v7090_v4, %s6864_s30  ;;  %v436_v23 = vrot.slane %v7142_v47, 1  ;;  %v456_v54 = vrot.slane %v7187_v14, 1  ;;  %s6084_s17 = sshll.u32 %s10712_s25, 8 }
  0x23   : > { %10527 = vst [vmem:[#allocation17_spill] sm:$0xff] %v7104_v28  ;;  %v434_v28 = vrot.slane %v7139_v46, 1  ;;  %s9952_s19 = scalar_lea.vmem %s10414_s7, %s6084_s17 }
  0x24   : > { %10528 = vst [vmem:[#allocation18_spill] sm:$0xff] %v7120_v36  ;;  %v431_v36 = vrot.slane %v7154_v11, 1 }
  0x25   : > { %10529 = vst [vmem:[#allocation19_spill] sm:$0xff] %v7123_v37  ;;  %v429_v37 = vrot.slane %v7151_v10, 1 }
  0x26   : > { %10530 = vst [vmem:[#allocation20_spill] sm:$0xff] %v7130_v41 }
  0x27   : > { %10531 = vst [vmem:[#allocation21_spill] sm:$0xff] %v7133_v42  ;;  %6211 = vrot.lane.b32.xlu2 %v7130_v41, %s6864_s30  ;;  %v7176_v42 = vsel %vm382_vm0, %v439_v61, %v441_v5  ;;  %v7198_v5 = vld [vmem:[%s6931_s29 + $0x138] sm:$0xff]  ;;  %v7205_v50 = vsel %vm382_vm0, %v428_v44, %v429_v37  ;;  %v7208_v27 = vsel %vm382_vm0, %v429_v37, %v431_v36  ;;  %v451_v41 = vrot.slane %v7214_v55, 1 }
  0x28   : > { %10532 = vst [vmem:[#allocation22_spill] sm:$0xff] %v7136_v45  ;;  %v7173_v45 = vsel %vm382_vm0, %v438_v60, %v439_v61  ;;  %v7192_v60 = vsel %vm382_vm0, %v433_v18, %v434_v28  ;;  %v7195_v61 = vsel %vm382_vm0, %v434_v28, %v436_v23  ;;  %v7217_v18 = vld [vmem:[%s6931_s29 + $0x120] sm:$0xff]  ;;  %v453_v23 = vrot.slane %v7181_v40, 1 }
  0x29   : > { %10533 = vst [vmem:[#allocation23_spill] sm:$0xff] %v7158_v13  ;;  %6206 = vrot.lane.b32.xlu1 %v7158_v13, %s6864_s30  ;;  %v7202_v51 = vpack.i.bf16 %v7176_v42, %v7173_v45  ;;  %v454_v28 = vrot.slane %v7184_v15, 1  ;;  %v7230_v44 = vpack.i.bf16 %v7195_v61, %v7192_v60  ;;  %v7234_v36 = vpack.i.bf16 %v7208_v27, %v7205_v50 }
  0x2a   : > { %10534 = vst [vmem:[#allocation24_spill] sm:$0xff] %v7162_v16  ;;  %6201 = vrot.lane.b32.xlu0 %v7162_v16, %s6864_s30  ;;  %v448_v37 = vrot.slane %v7198_v5, 1  ;;  %v449_v13 = vrot.slane %v7211_v22, 1  ;;  %v443_v21 = vrot.slane %v7217_v18, 1 }
  0x2b   : > { %10535 = vst [vmem:[#allocation25_spill] sm:$0xff] %v7173_v45  ;;  %v7226_v45 = vld [vmem:[%s6931_s29 + $0x130] sm:$0x3] }
  0x2c   : > { %10536 = vst [vmem:[#allocation26_spill] sm:$0xff] %v7176_v42  ;;  %v7223_v42 = vld [vmem:[%s6931_s29 + $0x128] sm:$0xff]  ;;  %v7258_v53 = vsel %vm382_vm0, %v449_v13, %v451_v41  ;;  %v7277_v41 = vld [vmem:[%s6931_s29 + $0x170] sm:$0xff] }
  0x2d   : > { %10537 = vst [vmem:[#allocation27_spill] sm:$0xff] %v7192_v60  ;;  %v446_v60 = vrot.slane %v7226_v45, 1  ;;  %v459_v4 = vrot.slane %v7277_v41, 1 }
  0x2e   : > { %10538 = vst [vmem:[#allocation28_spill] sm:$0xff] %v7195_v61  ;;  %v444_v61 = vrot.slane %v7223_v42, 1 }
  0x2f   : > { %10539 = vst [vmem:[#allocation29_spill] sm:$0xff] %v7202_v51  ;;  %6226 = vrot.lane.b32.xlu2 %v7202_v51, %s6864_s30  ;;  %v7255_v51 = vsel %vm382_vm0, %v448_v37, %v449_v13  ;;  %v470_v37 = vrot.slane %v7010_v33, 2  ;;  %v7280_v13 = vld [vmem:[%s6931_s29 + $0x178] sm:$0x3] }
  0x30   : > { %10540 = vst [vmem:[#allocation30_spill] sm:$0xff] %v7205_v50  ;;  %v7248_v50 = vsel %vm382_vm0, %v454_v28, %v456_v54  ;;  %v7268_v54 = vsel %vm382_vm0, %v444_v61, %v446_v60 }
  0x31   : > { %10541 = vst [vmem:[#allocation31_spill] sm:$0xff] %v7208_v27  ;;  %v7245_v27 = vsel %vm382_vm0, %v453_v23, %v454_v28  ;;  %6221 = vrot.lane.b32.xlu1 %v7230_v44, %s6864_s30  ;;  %v7265_v23 = vsel %vm382_vm0, %v443_v21, %v444_v61  ;;  %v7271_v28 = vld [vmem:[%s6931_s29 + $0x168] sm:$0xff]  ;;  %v467_v21 = vrot.slane %v6971_v17, 2  ;;  %v464_v61 = vrot.slane %v6952_v8, 2 }
  0x32   : > { %10542 = vst [vmem:[#allocation32_spill] sm:$0xff] %v7230_v44  ;;  %6216 = vrot.lane.b32.xlu0 %v7234_v36, %s6864_s30  ;;  %v7262_v16 = vpack.i.bf16 %v7248_v50, %v7245_v27  ;;  %v469_v44 = vrot.slane %v7007_v32, 2  ;;  %v7289_v60 = vpack.i.bf16 %v7268_v54, %v7265_v23 }
  0x33   : > { %10543 = vst [vmem:[#allocation33_spill] sm:$0xff] %v7234_v36  ;;  %v472_v36 = vrot.slane %v7022_v38, 2  ;;  %v458_v38 = vrot.slane %v7271_v28, 1 }
  0x34   : > { %10544 = vst [vmem:[#allocation34_spill] sm:$0xff] %v7245_v27  ;;  %v465_v27 = vrot.slane %v6960_v12, 2 }
  0x35   : > { %10545 = vst [vmem:[#allocation35_spill] sm:$0xff] %v7248_v50  ;;  %v7284_v50 = vpack.i.bf16 %v7258_v53, %v7255_v51  ;;  %v473_v17 = vsel %vm463_vm1, %v470_v37, %v472_v36  ;;  %v485_v36 = vrot.slane %v6937_v1, 2 }
  0x36   : > { %10546 = vst [vmem:[#allocation36_spill] sm:$0xff] %v7255_v51  ;;  %v471_v51 = vsel %vm463_vm1, %v469_v44, %v470_v37  ;;  %v466_v8 = vsel %vm463_vm1, %v464_v61, %v465_v27  ;;  %v468_v12 = vsel %vm463_vm1, %v465_v27, %v467_v21  ;;  %v484_v44 = vrot.slane %v6934_v0, 2 }
  0x37   : > { %10547 = vst [vmem:[#allocation37_spill] sm:$0xff] %v7258_v53  ;;  %6241 = vrot.lane.b32.xlu2 %v7262_v16, %s6864_s30  ;;  %v461_v53 = vrot.slane %v7280_v13, 1  ;;  %v487_v37 = vrot.slane %v6940_v2, 2  ;;  %v479_v27 = vrot.slane %v6992_v25, 2  ;;  %v482_v21 = vrot.slane %v7004_v31, 2 }
  0x38   : > { %10548 = vst [vmem:[#allocation38_spill] sm:$0xff] %v7262_v16  ;;  %v477_v2 = vrot.slane %v6955_v9, 2  ;;  %v499_v9 = vrot.slane %v7054_v52, 2 }
  0x39   : > { %10549 = vst [vmem:[#allocation39_spill] sm:$0xff] %v7265_v23  ;;  %6236 = vrot.lane.b32.xlu1 %v7284_v50, %s6864_s30  ;;  %v7309_v23 = vsel %vm382_vm0, %v458_v38, %v459_v4  ;;  %v7312_v16 = vsel %vm382_vm0, %v459_v4, %v461_v53  ;;  %v474_v53 = vrot.slane %v6946_v6, 2  ;;  %v475_v4 = vrot.slane %v6949_v7, 2 }
  0x3a   : > { %10550 = vst [vmem:[#allocation40_spill] sm:$0xff] %v7268_v54  ;;  %6231 = vrot.lane.b32.xlu0 %v7289_v60, %s6864_s30  ;;  %v7306_v54 = vpack.i.bf16 %v473_v17, %v471_v51  ;;  %v7319_v61 = vpack.i.bf16 %v7312_v16, %v7309_v23  ;;  %v480_v51 = vrot.slane %v6995_v26, 2  ;;  %v486_v38 = vsel %vm463_vm1, %v484_v44, %v485_v36 }
  0x3b   : > { %10551 = vst [vmem:[#allocation41_spill] sm:$0xff] %v7284_v50  ;;  %v6250_v50 = vpack.i.bf16 %v468_v12, %v466_v8  ;;  %v488_v17 = vsel %vm463_vm1, %v485_v36, %v487_v37  ;;  %v500_v44 = vrot.slane %v7067_v56, 2  ;;  %v502_v36 = vrot.slane %v7070_v57, 2 }
  0x3c   : > { %10552 = vst [vmem:[#allocation42_spill] sm:$0xff] %v7309_v23  ;;  %v481_v31 = vsel %vm463_vm1, %v479_v27, %v480_v51  ;;  %v483_v8 = vsel %vm463_vm1, %v480_v51, %v482_v21  ;;  %v7336_v12 = vpack.i.bf16 %v488_v17, %v486_v38  ;;  %v478_v23 = vsel %vm463_vm1, %v475_v4, %v477_v2 }
  0x3d   : > { %10553 = vst [vmem:[#allocation43_spill] sm:$0xff] %v7312_v16  ;;  %v476_v16 = vsel %vm463_vm1, %v474_v53, %v475_v4  ;;  %v494_v27 = vrot.slane %v7073_v58, 2  ;;  %v495_v51 = vrot.slane %v7079_v62, 2  ;;  %v497_v21 = vrot.slane %v7082_v63, 2 }
  0x3e   : > { %v7345_v37 = vpack.i.bf16 %v478_v23, %v476_v16  ;;  %v489_v53 = vrot.slane %v6975_v19, 2  ;;  %v490_v4 = vrot.slane %v6978_v20, 2  ;;  %v492_v2 = vrot.slane %v6989_v24, 2 }
  0x3f   : > { %6256 = vrot.lane.b32.xlu2 %v7306_v54, %s6865_s8  ;;  %v501_v57 = vsel %vm463_vm1, %v499_v9, %v500_v44  ;;  %v503_v16 = vsel %vm463_vm1, %v500_v44, %v502_v36  ;;  %v496_v63 = vsel %vm463_vm1, %v494_v27, %v495_v51  ;;  %v498_v23 = vsel %vm463_vm1, %v495_v51, %v497_v21 }
  0x40   : > { %v7363_v38 = vpack.i.bf16 %v503_v16, %v501_v57  ;;  %v491_v17 = vsel %vm463_vm1, %v489_v53, %v490_v4  ;;  %v493_v24 = vsel %vm463_vm1, %v490_v4, %v492_v2  ;;  %v517_v9 = vrot.slane %v7142_v47, 2 }
  0x41   : > { %6251 = vrot.lane.b32.xlu1 %v6250_v50, %s6865_s8  ;;  %v7343_v50 = vpack.i.bf16 %v483_v8, %v481_v31  ;;  %v514_v31 = vrot.slane %v7126_v39, 2  ;;  %v515_v8 = vrot.slane %v7139_v46, 2  ;;  %v7370_v44 = vpack.i.bf16 %v498_v23, %v496_v63 }
  0x42   : > { %6246 = vrot.lane.b32.xlu0 %v7319_v61, %s6864_s30  ;;  %v7372_v36 = vpack.i.bf16 %v493_v24, %v491_v17  ;;  %v509_v27 = vrot.slane %v7145_v59, 2  ;;  %v510_v51 = vrot.slane %v7151_v10, 2  ;;  %v512_v21 = vrot.slane %v7154_v11, 2  ;;  %s6876_s30 = smov 64  }
  0x43   : > { %v504_v53 = vrot.slane %v7030_v43, 2  ;;  %v505_v4 = vrot.slane %v7041_v48, 2  ;;  %v507_v2 = vrot.slane %v7044_v49, 2  ;;  %v516_v47 = vsel %vm463_vm1, %v514_v31, %v515_v8 }
  0x44   : > { %v518_v57 = vsel %vm463_vm1, %v515_v8, %v517_v9  ;;  %v511_v11 = vsel %vm463_vm1, %v509_v27, %v510_v51  ;;  %v513_v16 = vsel %vm463_vm1, %v510_v51, %v512_v21  ;;  %v529_v17 = vrot.slane %v7198_v5, 2 }
  0x45   : > { %v7390_v63 = vpack.i.bf16 %v518_v57, %v516_v47  ;;  %v506_v23 = vsel %vm463_vm1, %v504_v53, %v505_v4  ;;  %v508_v49 = vsel %vm463_vm1, %v505_v4, %v507_v2  ;;  %v530_v24 = vrot.slane %v7211_v22, 2 }
  0x46   : > { %v532_v31 = vrot.slane %v7214_v55, 2  ;;  %v7397_v8 = vpack.i.bf16 %v513_v16, %v511_v11  ;;  %v7399_v9 = vpack.i.bf16 %v508_v49, %v506_v23  ;;  %v524_v27 = vrot.slane %v7217_v18, 2 }
  0x47   : > { %6271 = vrot.lane.b32.xlu2 %v7336_v12, %s6865_s8  ;;  %v525_v51 = vrot.slane %v7223_v42, 2  ;;  %v527_v21 = vrot.slane %v7226_v45, 2  ;;  %v519_v53 = vrot.slane %v7109_v29, 2  ;;  %v520_v4 = vrot.slane %v7112_v30, 2 }
  0x48   : > { %v522_v2 = vrot.slane %v7115_v35, 2  ;;  %v531_v55 = vsel %vm463_vm1, %v529_v17, %v530_v24  ;;  %v533_v47 = vsel %vm463_vm1, %v530_v24, %v532_v31  ;;  %v539_v17 = vrot.slane %v7271_v28, 2 }
  0x49   : > { %6266 = vrot.lane.b32.xlu1 %v7343_v50, %s6865_s8  ;;  %v526_v45 = vsel %vm463_vm1, %v524_v27, %v525_v51  ;;  %v528_v57 = vsel %vm463_vm1, %v525_v51, %v527_v21  ;;  %v7417_v11 = vpack.i.bf16 %v533_v47, %v531_v55  ;;  %v521_v16 = vsel %vm463_vm1, %v519_v53, %v520_v4 }
  0x4a   : > { %6261 = vrot.lane.b32.xlu0 %v7345_v37, %s6865_s8  ;;  %v523_v35 = vsel %vm463_vm1, %v520_v4, %v522_v2  ;;  %v7421_v23 = vpack.i.bf16 %v528_v57, %v526_v45  ;;  %v540_v24 = vrot.slane %v7277_v41, 2  ;;  %v542_v31 = vrot.slane %v7280_v13, 2 }
  0x4b   : > { %v7423_v49 = vpack.i.bf16 %v523_v35, %v521_v16  ;;  %v534_v27 = vrot.slane %v7181_v40, 2  ;;  %v535_v51 = vrot.slane %v7184_v15, 2  ;;  %v537_v21 = vrot.slane %v7187_v14, 2  ;;  %v10563_v35 = vld [vmem:[#allocation5_spill] sm:$0xff] }
  0x4c   : > { %v541_v53 = vsel %vm463_vm1, %v539_v17, %v540_v24  ;;  %v543_v4 = vsel %vm463_vm1, %v540_v24, %v542_v31  ;;  %v6330_v13 = vpack.i.bf16 %v7010_v33, %v7007_v32  ;;  %v7454_v32 = vpack.i.bf16 %v6937_v1, %v6934_v0  ;;  %v10566_v31 = vld [vmem:[#allocation33_spill] sm:$0xff] }
  0x4d   : > { %v536_v2 = vsel %vm463_vm1, %v534_v27, %v535_v51  ;;  %v538_v55 = vsel %vm463_vm1, %v535_v51, %v537_v21  ;;  %v7443_v47 = vpack.i.bf16 %v543_v4, %v541_v53  ;;  %v7458_v33 = vpack.i.bf16 %v6995_v26, %v6992_v25  ;;  %v10567_v27 = vld [vmem:[#allocation20_spill] sm:$0xff]  ;;  %v10569_v21 = vld [vmem:[#allocation23_spill] sm:$0xff] }
  0x4e   : > { %v7445_v14 = vpack.i.bf16 %v538_v55, %v536_v2  ;;  %v7462_v45 = vpack.i.bf16 %v6949_v7, %v6946_v6  ;;  %v7474_v0 = vpack.i.bf16 %v7067_v56, %v7054_v52  ;;  %v7478_v1 = vpack.i.bf16 %v7079_v62, %v7073_v58  ;;  %v7530_v58 = vld [vmem:[%s6931_s29 + $0x188] sm:$0xff]  ;;  %v10574_v55 = vld [vmem:[#allocation32_spill] sm:$0xff] }
  0x4f   : > { %6286 = vrot.lane.b32.xlu2 %v7363_v38, %s6865_s8  ;;  %v7482_v6 = vpack.i.bf16 %v6978_v20, %v6975_v19  ;;  %v7494_v25 = vpack.i.bf16 %v7139_v46, %v7126_v39  ;;  %v7498_v19 = vpack.i.bf16 %v7151_v10, %v7145_v59  ;;  %v7502_v20 = vpack.i.bf16 %v7041_v48, %v7030_v43  ;;  %v7527_v48 = vld [vmem:[%s6931_s29 + $0x180] sm:$0xff] }
  0x50   : > { %v7514_v52 = vpack.i.bf16 %v7211_v22, %v7198_v5  ;;  %v7518_v56 = vpack.i.bf16 %v7223_v42, %v7217_v18  ;;  %v7522_v43 = vpack.i.bf16 %v7112_v30, %v7109_v29  ;;  %v7542_v29 = vpack.i.bf16 %v7530_v58, %v7527_v48 }
  0x51   : > { %6281 = vrot.lane.b32.xlu1 %v7370_v44, %s6865_s8  ;;  %v7548_v39 = vpack.i.bf16 %v7277_v41, %v7271_v28  ;;  %v7552_v42 = vpack.i.bf16 %v7184_v15, %v7181_v40  ;;  %v10557_v40 = vld [vmem:[#allocation15_spill] sm:$0xff]  ;;  %v10560_v28 = vld [vmem:[#allocation24_spill] sm:$0xff] }
  0x52   : > { %6276 = vrot.lane.b32.xlu0 %v7372_v36, %s6865_s8  ;;  %v10561_v41 = vld [vmem:[#allocation12_spill] sm:$0xff] }
  0x57   : > { %6301 = vrot.lane.b32.xlu2 %v7390_v63, %s6865_s8 }
  0x59   : > { %6296 = vrot.lane.b32.xlu1 %v7397_v8, %s6865_s8 }
  0x5a   : > { %6291 = vrot.lane.b32.xlu0 %v7399_v9, %s6865_s8 }
  0x5f   : > { %6316 = vrot.lane.b32.xlu2 %v7417_v11, %s6865_s8 }
  0x61   : > { %6311 = vrot.lane.b32.xlu1 %v7421_v23, %s6865_s8 }
  0x62   : > { %6306 = vrot.lane.b32.xlu0 %v7423_v49, %s6865_s8 }
  0x67   : > { %6331 = vrot.lane.b32.xlu2 %v6330_v13, %s6866_s9  ;;  %v10572_v13 = vld [vmem:[#allocation29_spill] sm:$0xff] }
  0x69   : > { %6326 = vrot.lane.b32.xlu1 %v7443_v47, %s6865_s8 }
  0x6a   : > { %6321 = vrot.lane.b32.xlu0 %v7445_v14, %s6865_s8 }
  0x6f   : > { %6346 = vrot.lane.b32.xlu2 %v7454_v32, %s6866_s9 }
  0x71   : > { %6341 = vrot.lane.b32.xlu1 %v7458_v33, %s6866_s9  ;;  %v7468_v57 = vpop.permute.xlu2 %6191 }
  0x72   : > { %6336 = vrot.lane.b32.xlu0 %v7462_v45, %s6866_s9 }
  0x77   : > { %6361 = vrot.lane.b32.xlu2 %v7474_v0, %s6866_s9 }
  0x79   : > { %6356 = vrot.lane.b32.xlu1 %v7478_v1, %s6866_s9  ;;  %v7488_v7 = vpop.permute.xlu2 %6196 }
  0x7a   : > { %6351 = vrot.lane.b32.xlu0 %v7482_v6, %s6866_s9 }
  0x7f   : > { %6376 = vrot.lane.b32.xlu2 %v7494_v25, %s6866_s9 }
  0x81   : > { %6371 = vrot.lane.b32.xlu1 %v7498_v19, %s6866_s9  ;;  %v7508_v26 = vpop.permute.xlu2 %6211 }
  0x82   : > { %6366 = vrot.lane.b32.xlu0 %v7502_v20, %s6866_s9 }
  0x87   : > { %6391 = vrot.lane.b32.xlu2 %v7514_v52, %s6866_s9 }
  0x89   : > { %6386 = vrot.lane.b32.xlu1 %v7518_v56, %s6866_s9  ;;  %v7534_v22 = vpop.permute.xlu2 %6226 }
  0x8a   : > { %10554 = vst [vmem:[#allocation44_spill] sm:$0xff] %v7534_v22  ;;  %6381 = vrot.lane.b32.xlu0 %v7522_v43, %s6866_s9 }
  0x8b   : > { %v7538_v62 = vpop.permute.xlu1 %6181 }
  0x8c   : > { %v7544_v30 = vpop.permute.xlu0 %6171 }
  0x8f   : > { %6406 = vrot.lane.b32.xlu2 %v7542_v29, %s6866_s9 }
  0x91   : > { %6401 = vrot.lane.b32.xlu1 %v7548_v39, %s6866_s9  ;;  %v7558_v46 = vpop.permute.xlu2 %6241 }
  0x92   : > { %10555 = vst [vmem:[#allocation45_spill] sm:$0xff] %v7558_v46  ;;  %6396 = vrot.lane.b32.xlu0 %v7552_v42, %s6866_s9 }
  0x93   : > { %v7562_v59 = vpop.permute.xlu1 %6186 }
  0x94   : > { %10556 = vst [vmem:[#allocation46_spill] sm:$0xff] %v7562_v59  ;;  %v7564_v10 = vpop.permute.xlu0 %6176 }
  0x97   : > { %6421 = vrot.lane.b32.xlu2 %v7086_v3, %s6867_s10 }
  0x99   : > { %6416 = vrot.lane.b32.xlu1 %v7016_v34, %s6867_s10  ;;  %v7570_v15 = vpop.permute.xlu2 %6256 }
  0x9a   : > { %6411 = vrot.lane.b32.xlu0 %v10557_v40, %s6867_s10 }
  0x9b   : > { %v7574_v5 = vpop.permute.xlu1 %6206 }
  0x9c   : > { %10558 = vst [vmem:[#allocation15_spill] sm:$0xff] %v7574_v5  ;;  %v7576_v18 = vpop.permute.xlu0 %6201 }
  0x9d   : > { %10559 = vst [vmem:[#allocation47_spill] sm:$0xff] %v7576_v18  ;;  %v10578_v18 = vld [vmem:[#allocation41_spill] sm:$0xff] }
  0x9f   : > { %6436 = vrot.lane.b32.xlu2 %v10560_v28, %s6867_s10 }
  0xa1   : > { %6431 = vrot.lane.b32.xlu1 %v10561_v41, %s6867_s10  ;;  %v7582_v16 = vpop.permute.xlu2 %6271 }
  0xa2   : > { %10562 = vst [vmem:[#allocation24_spill] sm:$0xff] %v7582_v16  ;;  %6426 = vrot.lane.b32.xlu0 %v10563_v35, %s6867_s10 }
  0xa3   : > { %v7586_v17 = vpop.permute.xlu1 %6221 }
  0xa4   : > { %10564 = vst [vmem:[#allocation12_spill] sm:$0xff] %v7586_v17  ;;  %v7588_v24 = vpop.permute.xlu0 %6216 }
  0xa5   : > { %10565 = vst [vmem:[#allocation5_spill] sm:$0xff] %v7588_v24 }
  0xa7   : > { %6451 = vrot.lane.b32.xlu2 %v10566_v31, %s6867_s10 }
  0xa9   : > { %6446 = vrot.lane.b32.xlu1 %v10567_v27, %s6867_s10  ;;  %v7594_v51 = vpop.permute.xlu2 %6286 }
  0xaa   : > { %10568 = vst [vmem:[#allocation33_spill] sm:$0xff] %v7594_v51  ;;  %6441 = vrot.lane.b32.xlu0 %v10569_v21, %s6867_s10  ;;  %v7615_v51 = vld [vmem:[%s6931_s29 + $0x190] sm:$0x3] }
  0xab   : > { %v7598_v53 = vpop.permute.xlu1 %6236  ;;  %v550_v17 = vrot.slane %v7615_v51, 1 }
  0xac   : > { %10570 = vst [vmem:[#allocation20_spill] sm:$0xff] %v7598_v53  ;;  %v7600_v4 = vpop.permute.xlu0 %6231  ;;  %v548_v53 = vrot.slane %v7530_v58, 1 }
  0xad   : > { %10571 = vst [vmem:[#allocation23_spill] sm:$0xff] %v7600_v4  ;;  %v547_v4 = vrot.slane %v7527_v48, 1 }
  0xae   : > { %v7634_v59 = vsel %vm382_vm0, %v548_v53, %v550_v17 }
  0xaf   : > { %6466 = vrot.lane.b32.xlu2 %v7289_v60, %s6867_s10  ;;  %v7631_v5 = vsel %vm382_vm0, %v547_v4, %v548_v53  ;;  %10580 = vst [vmem:[#allocation48_spill] sm:$0xff] %v7634_v59 }
  0xb0   : > { %10579 = vst [vmem:[#allocation41_spill] sm:$0xff] %v7631_v5  ;;  %v7640_v22 = vpack.i.bf16 %v7634_v59, %v7631_v5 }
  0xb1   : > { %6461 = vrot.lane.b32.xlu1 %v10572_v13, %s6867_s10  ;;  %v7606_v2 = vpop.permute.xlu2 %6301 }
  0xb2   : > { %10573 = vst [vmem:[#allocation29_spill] sm:$0xff] %v7606_v2  ;;  %6456 = vrot.lane.b32.xlu0 %v10574_v55, %s6867_s10  ;;  %v10576_v2 = vld [vmem:[#allocation38_spill] sm:$0xff] }
  0xb3   : > { %v7610_v40 = vpop.permute.xlu1 %6251 }
  0xb4   : > { %v7612_v24 = vpop.permute.xlu0 %6246 }
  0xb5   : > { %10575 = vst [vmem:[#allocation32_spill] sm:$0xff] %v7612_v24 }
  0xb7   : > { %6481 = vrot.lane.b32.xlu2 %v7319_v61, %s6867_s10 }
  0xb9   : > { %6476 = vrot.lane.b32.xlu1 %v10576_v2, %s6867_s10  ;;  %v7624_v16 = vpop.permute.xlu2 %6316 }
  0xba   : > { %10577 = vst [vmem:[#allocation38_spill] sm:$0xff] %v7624_v16  ;;  %6471 = vrot.lane.b32.xlu0 %v10578_v18, %s6867_s10 }
  0xbb   : > { %v7628_v24 = vpop.permute.xlu1 %6266 }
  0xbc   : > { %v7636_v46 = vpop.permute.xlu0 %6261 }
  0xbf   : > { %6496 = vrot.lane.b32.xlu2 %v7345_v37, %s6868_s11 }
  0xc1   : > { %6491 = vrot.lane.b32.xlu1 %v7306_v54, %s6868_s11  ;;  %v7646_v16 = vpop.permute.xlu2 %6331 }
  0xc2   : > { %6486 = vrot.lane.b32.xlu0 %v7640_v22, %s6867_s10 }
  0xc3   : > { %v7650_v17 = vpop.permute.xlu1 %6281 }
  0xc4   : > { %10581 = vst [vmem:[#allocation49_spill] sm:$0xff] %v7650_v17  ;;  %v7652_v53 = vpop.permute.xlu0 %6276 }
  0xc5   : > { %10582 = vst [vmem:[#allocation50_spill] sm:$0xff] %v7652_v53 }
  0xc7   : > { %6511 = vrot.lane.b32.xlu2 %v7372_v36, %s6868_s11 }
  0xc9   : > { %6506 = vrot.lane.b32.xlu1 %v7336_v12, %s6868_s11  ;;  %v7658_v4 = vpop.permute.xlu2 %6346 }
  0xca   : > { %6501 = vrot.lane.b32.xlu0 %v7343_v50, %s6868_s11 }
  0xcb   : > { %v7662_v54 = vpop.permute.xlu1 %6296 }
  0xcc   : > { %10583 = vst [vmem:[#allocation51_spill] sm:$0xff] %v7662_v54  ;;  %v7664_v59 = vpop.permute.xlu0 %6291 }
  0xcd   : > { %10584 = vst [vmem:[#allocation52_spill] sm:$0xff] %v7664_v59 }
  0xcf   : > { %6526 = vrot.lane.b32.xlu2 %v7399_v9, %s6868_s11 }
  0xd1   : > { %6521 = vrot.lane.b32.xlu1 %v7363_v38, %s6868_s11  ;;  %v7670_v5 = vpop.permute.xlu2 %6361 }
  0xd2   : > { %10585 = vst [vmem:[#allocation53_spill] sm:$0xff] %v7670_v5  ;;  %6516 = vrot.lane.b32.xlu0 %v7370_v44, %s6868_s11 }
  0xd3   : > { %v7674_v53 = vpop.permute.xlu1 %6311 }
  0xd4   : > { %10586 = vst [vmem:[#allocation54_spill] sm:$0xff] %v7674_v53  ;;  %v7676_v17 = vpop.permute.xlu0 %6306 }
  0xd5   : > { %10587 = vst [vmem:[#allocation55_spill] sm:$0xff] %v7676_v17 }
  0xd7   : > { %6541 = vrot.lane.b32.xlu2 %v7423_v49, %s6868_s11 }
  0xd9   : > { %6536 = vrot.lane.b32.xlu1 %v7390_v63, %s6868_s11  ;;  %v7682_v54 = vpop.permute.xlu2 %6376 }
  0xda   : > { %10588 = vst [vmem:[#allocation56_spill] sm:$0xff] %v7682_v54  ;;  %6531 = vrot.lane.b32.xlu0 %v7397_v8, %s6868_s11 }
  0xdb   : > { %v7686_v59 = vpop.permute.xlu1 %6326 }
  0xdc   : > { %10589 = vst [vmem:[#allocation57_spill] sm:$0xff] %v7686_v59  ;;  %v7688_v5 = vpop.permute.xlu0 %6321 }
  0xdd   : > { %10590 = vst [vmem:[#allocation58_spill] sm:$0xff] %v7688_v5 }
  0xdf   : > { %6556 = vrot.lane.b32.xlu2 %v7445_v14, %s6868_s11 }
  0xe1   : > { %6551 = vrot.lane.b32.xlu1 %v7417_v11, %s6868_s11  ;;  %v7694_v17 = vpop.permute.xlu2 %6391 }
  0xe2   : > { %10591 = vst [vmem:[#allocation59_spill] sm:$0xff] %v7694_v17  ;;  %6546 = vrot.lane.b32.xlu0 %v7421_v23, %s6868_s11 }
  0xe3   : > { %v7698_v53 = vpop.permute.xlu1 %6341 }
  0xe4   : > { %v7700_v54 = vpop.permute.xlu0 %6336 }
  0xe7   : > { %6571 = vrot.lane.b32.xlu2 %v7016_v34, %s6869_s12 }
  0xe9   : > { %6566 = vrot.lane.b32.xlu1 %v7462_v45, %s6870_s13  ;;  %v7706_v59 = vpop.permute.xlu2 %6406 }
  0xea   : > { %10592 = vst [vmem:[#allocation60_spill] sm:$0xff] %v7706_v59  ;;  %6561 = vrot.lane.b32.xlu0 %v7443_v47, %s6868_s11 }
  0xeb   : > { %v7710_v5 = vpop.permute.xlu1 %6356 }
  0xec   : > { %10593 = vst [vmem:[#allocation61_spill] sm:$0xff] %v7710_v5  ;;  %v7712_v17 = vpop.permute.xlu0 %6351 }
  0xef   : > { %6586 = vrot.lane.b32.xlu2 %v7086_v3, %s6869_s12 }
  0xf1   : > { %6581 = vrot.lane.b32.xlu1 %v7458_v33, %s6870_s13  ;;  %v7718_v34 = vpop.permute.xlu2 %6421 }
  0xf2   : > { %6576 = vrot.lane.b32.xlu0 %v7345_v37, %s6871_s14 }
  0xf3   : > { %v7722_v45 = vpop.permute.xlu1 %6371 }
  0xf4   : > { %10594 = vst [vmem:[#allocation62_spill] sm:$0xff] %v7722_v45  ;;  %v7724_v59 = vpop.permute.xlu0 %6366  ;;  %v331_v45 = vld [vmem:[%s6931_s29 + $0x198] sm:$0xff] }
  0xf7   : > { %6601 = vrot.lane.b32.xlu2 %v10563_v35, %s6869_s12 }
  0xf9   : > { %6596 = vrot.lane.b32.xlu1 %v7454_v32, %s6870_s13  ;;  %v7730_v3 = vpop.permute.xlu2 %6436 }
  0xfa   : > { %6591 = vrot.lane.b32.xlu0 %v7343_v50, %s6871_s14 }
  0xfb   : > { %v7734_v33 = vpop.permute.xlu1 %6386 }
  0xfc   : > { %v7736_v5 = vpop.permute.xlu0 %6381 }
  0xff   : > { %6616 = vrot.lane.b32.xlu2 %v10561_v41, %s6869_s12 }
 0x101   : > { %6611 = vrot.lane.b32.xlu1 %v7482_v6, %s6870_s13  ;;  %v7742_v37 = vpop.permute.xlu2 %6451 }
 0x102   : > { %10595 = vst [vmem:[#allocation63_spill] sm:$0xff] %v7742_v37  ;;  %6606 = vrot.lane.b32.xlu0 %v7336_v12, %s6871_s14  ;;  %v6813_v37 = vld [vmem:[%s6931_s29] sm:$0xff] }
 0x103   : > { %v7746_v32 = vpop.permute.xlu1 %6401 }
 0x104   : > { %10596 = vst [vmem:[#allocation64_spill] sm:$0xff] %v7746_v32  ;;  %v7748_v35 = vpop.permute.xlu0 %6396 }
 0x107   : > { %6631 = vrot.lane.b32.xlu2 %v10560_v28, %s6869_s12 }
 0x109   : > { %6626 = vrot.lane.b32.xlu1 %v7478_v1, %s6870_s13  ;;  %v7754_v50 = vpop.permute.xlu2 %6466 }
 0x10a   : > { %6621 = vrot.lane.b32.xlu0 %v7372_v36, %s6871_s14 }
 0x10b   : > { %v7758_v6 = vpop.permute.xlu1 %6416 }
 0x10c   : > { %v7760_v41 = vpop.permute.xlu0 %6411 }
 0x10f   : > { %6646 = vrot.lane.b32.xlu2 %v10569_v21, %s6869_s12 }
 0x111   : > { %6641 = vrot.lane.b32.xlu1 %v7474_v0, %s6870_s13  ;;  %v7766_v12 = vpop.permute.xlu2 %6481 }
 0x112   : > { %10597 = vst [vmem:[#allocation65_spill] sm:$0xff] %v7766_v12  ;;  %6636 = vrot.lane.b32.xlu0 %v7370_v44, %s6871_s14  ;;  %v332_v12 = vld [vmem:[%s6931_s29 + $0x1a0] sm:$0xff] }
 0x113   : > { %v7770_v1 = vpop.permute.xlu1 %6431 }
 0x114   : > { %v7772_v28 = vpop.permute.xlu0 %6426 }
 0x117   : > { %6661 = vrot.lane.b32.xlu2 %v10567_v27, %s6869_s12 }
 0x119   : > { %6656 = vrot.lane.b32.xlu1 %v7502_v20, %s6870_s13  ;;  %v7778_v36 = vpop.permute.xlu2 %6496 }
 0x11a   : > { %6651 = vrot.lane.b32.xlu0 %v7363_v38, %s6871_s14 }
 0x11b   : > { %v7782_v0 = vpop.permute.xlu1 %6446 }
 0x11c   : > { %10598 = vst [vmem:[#allocation66_spill] sm:$0xff] %v7782_v0  ;;  %v7784_v21 = vpop.permute.xlu0 %6441 }
 0x11f   : > { %6676 = vrot.lane.b32.xlu2 %v10566_v31, %s6869_s12 }
 0x121   : > { %6671 = vrot.lane.b32.xlu1 %v7498_v19, %s6870_s13  ;;  %v7790_v44 = vpop.permute.xlu2 %6511 }
 0x122   : > { %6666 = vrot.lane.b32.xlu0 %v7399_v9, %s6871_s14 }
 0x123   : > { %v7794_v20 = vpop.permute.xlu1 %6461 }
 0x124   : > { %v7796_v27 = vpop.permute.xlu0 %6456 }
 0x125   : > { %10599 = vst [vmem:[#allocation67_spill] sm:$0xff] %v7796_v27 }
 0x127   : > { %6691 = vrot.lane.b32.xlu2 %v10574_v55, %s6869_s12 }
 0x129   : > { %6686 = vrot.lane.b32.xlu1 %v7494_v25, %s6870_s13  ;;  %v7802_v38 = vpop.permute.xlu2 %6526 }
 0x12a   : > { %10600 = vst [vmem:[#allocation68_spill] sm:$0xff] %v7802_v38  ;;  %6681 = vrot.lane.b32.xlu0 %v7397_v8, %s6871_s14  ;;  %v6795_v38 = vpack.i.bf16 %v332_v12, %v331_v45 }
 0x12b   : > { %v7806_v19 = vpop.permute.xlu1 %6476 }
 0x12c   : > { %v7808_v31 = vpop.permute.xlu0 %6471 }
 0x12f   : > { %6706 = vrot.lane.b32.xlu2 %v10572_v13, %s6869_s12 }
 0x131   : > { %6701 = vrot.lane.b32.xlu1 %v7522_v43, %s6870_s13  ;;  %v7814_v9 = vpop.permute.xlu2 %6541  ;;  %v1654_v43 = vld [vmem:[%s10408_s1 + $0x10] sm:$0x3] }
 0x132   : > { %6696 = vrot.lane.b32.xlu0 %v7390_v63, %s6871_s14  ;;  %v1668_v63 = vunpack.c.l.b16 %v1654_v43 }
 0x133   : > { %v7818_v25 = vpop.permute.xlu1 %6491 }
 0x134   : > { %v7820_v55 = vpop.permute.xlu0 %6486 }
 0x135   : > { %10601 = vst [vmem:[#allocation69_spill] sm:$0xff] %v7820_v55  ;;  %v1671_v55 = vpack.c.b16 %v1668_v63, %v1668_v63 }
 0x137   : > { %6721 = vrot.lane.b32.xlu2 %v7552_v42, %s6870_s13 }
 0x139   : > { %6716 = vrot.lane.b32.xlu1 %v7518_v56, %s6870_s13  ;;  %v7826_v8 = vpop.permute.xlu2 %6556  ;;  %v1725_v56 = vsel %vm1723_vm2, %v1671_v55, 0 }
 0x13a   : > { %10602 = vst [vmem:[#allocation70_spill] sm:$0xff] %v7826_v8  ;;  %6711 = vrot.lane.b32.xlu0 %v7423_v49, %s6871_s14  ;;  %1732 = vmatpush.bf16.msra.mxu0 %v1725_v56  ;;  %v6086_v49 = vld [vmem:[%s10408_s1 + $0x8] sm:$0xff] }
 0x13b   : > { %v7833_v13 = vpop.permute.xlu1 %6506  ;;  %6139 = vmatpush.bf16.msra.mxu3 %v1725_v56  ;;  %v6173_v56 = vunpack.i.l.bf16 %v7544_v30 }
 0x13c   : > { %v7835_v27 = vpop.permute.xlu0 %6501 }
 0x13e   : > { %1733 = vmatpush.bf16.msra.mxu0 %v6086_v49 }
 0x13f   : > { %6736 = vrot.lane.b32.xlu2 %v7421_v23, %s6871_s14  ;;  %6140 = vmatpush.bf16.msra.mxu3 %v6086_v49  ;;  %v6085_v23 = vld [vmem:[%s10408_s1] sm:$0xff]  ;;  %v6253_v49 = vunpack.i.l.bf16 %v7610_v40 }
 0x141   : > { %6731 = vrot.lane.b32.xlu1 %v10576_v2, %s6869_s12  ;;  %v7842_v42 = vpop.permute.xlu2 %6571 }
 0x142   : > { %6726 = vrot.lane.b32.xlu0 %v7289_v60, %s6869_s12  ;;  %1734 = vmatpush.bf16.msra.mxu0 %v6085_v23 }
 0x143   : > { %v7849_v43 = vpop.permute.xlu1 %6521  ;;  %6141 = vmatpush.bf16.msra.mxu3 %v6085_v23  ;;  %v585_v23 = vrot.slane %v7530_v58, 2  ;;  %v6814_v58 = vld [vmem:[%s6931_s29 + $0x8] sm:$0xff] }
 0x144   : > { %v7851_v63 = vpop.permute.xlu0 %6516 }
 0x147   : > { %6751 = vrot.lane.b32.xlu2 %v7548_v39, %s6870_s13  ;;  %v6174_v39 = vunpack.i.h.bf16 %v7544_v30  ;;  %v6334_v30 = vunpack.i.h.bf16 %v7646_v16 }
 0x149   : > { %6746 = vrot.lane.b32.xlu1 %v7514_v52, %s6870_s13  ;;  %v7862_v60 = vpop.permute.xlu2 %6586 }
 0x14a   : > { %6741 = vrot.lane.b32.xlu0 %v7445_v14, %s6871_s14 }
 0x14b   : > { %v7864_v2 = vpop.permute.xlu1 %6536 }
 0x14c   : > { %10603 = vst [vmem:[#allocation71_spill] sm:$0xff] %v7864_v2  ;;  %v7866_v55 = vpop.permute.xlu0 %6531  ;;  %v6254_v2 = vunpack.i.h.bf16 %v7610_v40 }
 0x14d   : > { %10604 = vst [vmem:[#allocation72_spill] sm:$0xff] %v7866_v55  ;;  %v6333_v55 = vunpack.i.l.bf16 %v7646_v16 }
 0x14f   : > { %6766 = vrot.lane.b32.xlu2 %v7417_v11, %s6871_s14 }
 0x151   : > { %6761 = vrot.lane.b32.xlu1 %v7319_v61, %s6869_s12  ;;  %v7881_v11 = vpop.permute.xlu2 %6601  ;;  %v584_v61 = vrot.slane %v7527_v48, 2  ;;  %v1371_v48 = vsel %vm1370_vm3, %v6813_v37, %v6173_v56 }
 0x152   : > { %6756 = vrot.lane.b32.xlu0 %v10578_v18, %s6869_s12  ;;  %v587_v18 = vrot.slane %v7615_v51, 2  ;;  %v1372_v51 = vsel %vm1370_vm3, %v6814_v58, %v6174_v39  ;;  %v1404_v40 = vsel %vm1403_vm5, %v1371_v48, %v6253_v49  ;;  %v6414_v49 = vunpack.i.h.bf16 %v7760_v41 }
 0x153   : > { %v7874_v52 = vpop.permute.xlu1 %6551  ;;  %v1405_v37 = vsel %vm1403_vm5, %v1372_v51, %v6254_v2  ;;  %v1437_v56 = vsel %vm1436_vm4, %v1404_v40, %v6333_v55  ;;  %v592_v2 = vrot.slane %v331_v45, 1  ;;  %v597_v58 = vrot.slane %v331_v45, 2 }
 0x154   : > { %v7876_v14 = vpop.permute.xlu0 %6546  ;;  %v588_v16 = vsel %vm463_vm1, %v585_v23, %v587_v18  ;;  %v1438_v39 = vsel %vm1436_vm4, %v1405_v37, %v6334_v30  ;;  %v598_v55 = vrot.slane %v332_v12, 2  ;;  %v593_v37 = vrot.slane %v332_v12, 1 }
 0x156   : > { %v599_v12 = vsel %vm463_vm1, %v597_v58, %v598_v55 }
 0x157   : > { %6781 = vrot.lane.b32.xlu2 %v7640_v22, %s6869_s12  ;;  %v586_v22 = vsel %vm463_vm1, %v584_v61, %v585_v23  ;;  %v6494_v61 = vunpack.i.h.bf16 %v7818_v25  ;;  %v6493_v23 = vunpack.i.l.bf16 %v7818_v25 }
 0x158   : > { %v6790_v18 = vpack.i.bf16 %v588_v16, %v586_v22  ;;  %v6574_v22 = vunpack.i.h.bf16 %v7842_v42 }
 0x159   : > { %6776 = vrot.lane.b32.xlu1 %v7542_v29, %s6870_s13  ;;  %v333_v29 = vld [vmem:[%s6931_s29 + $0x1a8] sm:$0x3]  ;;  %v7914_v40 = vpop.permute.xlu2 %6616 }
 0x15a   : > { %6771 = vrot.lane.b32.xlu0 %v7443_v47, %s6871_s14  ;;  %v6413_v47 = vunpack.i.l.bf16 %v7760_v41  ;;  %v600_v51 = vrot.slane %v333_v29, 2  ;;  %v595_v8 = vrot.slane %v333_v29, 1 }
 0x15b   : > { %v6567_v32 = vpop.permute.xlu1 %6566 }
 0x15c   : > { %v7910_v48 = vpop.permute.xlu0 %6561  ;;  %v6569_v0 = vunpack.i.h.bf16 %v6567_v32  ;;  %v6568_v30 = vunpack.i.l.bf16 %v6567_v32  ;;  %v1470_v41 = vsel %vm1469_vm6, %v1437_v56, %v6413_v47  ;;  %v6573_v32 = vunpack.i.l.bf16 %v7842_v42 }
 0x15d   : > { %10605 = vst [vmem:[#allocation73_spill] sm:$0xff] %v7910_v48  ;;  %v1471_v48 = vsel %vm1469_vm6, %v1438_v39, %v6414_v49  ;;  %v1503_v25 = vsel %vm1502_vm7, %v1470_v41, %v6493_v23  ;;  %v594_v39 = vsel %vm382_vm0, %v592_v2, %v593_v37  ;;  %v596_v49 = vsel %vm382_vm0, %v593_v37, %v595_v8 }
 0x15e   : > { %v1504_v45 = vsel %vm1502_vm7, %v1471_v48, %v6494_v61  ;;  %v1536_v16 = vsel %vm1535_vm8, %v1503_v25, %v6568_v30  ;;  %v6800_v23 = vpack.i.bf16 %v596_v49, %v594_v39  ;;  %v6178_v8 = vunpack.i.l.bf16 %v7564_v10 }
 0x15f   : > { %6796 = vrot.lane.b32.xlu2 %v6795_v38, %s6870_s13  ;;  %v601_v38 = vsel %vm463_vm1, %v598_v55, %v600_v51  ;;  %v1537_v56 = vsel %vm1535_vm8, %v1504_v45, %v6569_v0  ;;  %v6179_v0 = vunpack.i.h.bf16 %v7564_v10  ;;  %v6259_v30 = vunpack.i.h.bf16 %v7570_v15 }
 0x160   : > { %v6805_v42 = vpack.i.bf16 %v601_v38, %v599_v12  ;;  %v1570_v58 = vsel %vm1568_vm9, %v1537_v56, %v6574_v22  ;;  %v6258_v37 = vunpack.i.l.bf16 %v7570_v15  ;;  %v6339_v25 = vunpack.i.h.bf16 %v7700_v54  ;;  %v6815_v12 = vld [vmem:[%s6931_s29 + $0x20] sm:$0xff]  ;;  %v6816_v38 = vld [vmem:[%s6931_s29 + $0x18] sm:$0xff] }
 0x161   : > { %6791 = vrot.lane.b32.xlu1 %v6790_v18, %s6868_s11  ;;  %v7939_v41 = vpop.permute.xlu2 %6631  ;;  %v6338_v45 = vunpack.i.l.bf16 %v7700_v54  ;;  %v6419_v22 = vunpack.i.h.bf16 %v7758_v6  ;;  %v6418_v10 = vunpack.i.l.bf16 %v7758_v6  ;;  %v1374_v15 = vsel %vm1370_vm3, %v6815_v12, %v6179_v0 }
 0x162   : > { %6786 = vrot.lane.b32.xlu0 %v6790_v18, %s6871_s14  ;;  %v1569_v18 = vsel %vm1568_vm9, %v1536_v16, %v6573_v32  ;;  %v1373_v16 = vsel %vm1370_vm3, %v6816_v38, %v6178_v8  ;;  %v6499_v56 = vunpack.i.h.bf16 %v7778_v36  ;;  %v6498_v54 = vunpack.i.l.bf16 %v7778_v36 }
 0x163   : > { %v6582_v29 = vpop.permute.xlu1 %6581  ;;  %v1406_v49 = vsel %vm1403_vm5, %v1373_v16, %v6258_v37  ;;  %v6589_v36 = vunpack.i.h.bf16 %v7862_v60  ;;  %v6184_v12 = vunpack.i.h.bf16 %v7538_v62  ;;  %v6264_v16 = vunpack.i.h.bf16 %v7636_v46 }
 0x164   : > { %v6577_v47 = vpop.permute.xlu0 %6576  ;;  %v1439_v6 = vsel %vm1436_vm4, %v1406_v49, %v6338_v45  ;;  %v6424_v49 = vunpack.i.h.bf16 %v7718_v34  ;;  %vm1968_vm0 = vsmask.f32 256  ;;  %vm1969_vm1 = vsmask.f32 4368 }
 0x165   : > { %v6579_v48 = vunpack.i.h.bf16 %v6577_v47  ;;  %v6578_v61 = vunpack.i.l.bf16 %v6577_v47  ;;  %v1407_v47 = vsel %vm1403_vm5, %v1374_v15, %v6259_v30  ;;  %v6183_v15 = vunpack.i.l.bf16 %v7538_v62 }
 0x167   : > { %v1602_v55 = vsel %vm1601_vm10, %v1569_v18, %v6578_v61  ;;  %v1603_v51 = vsel %vm1601_vm10, %v1570_v58, %v6579_v48  ;;  %v6584_v48 = vunpack.i.h.bf16 %v6582_v29  ;;  %v6583_v61 = vunpack.i.l.bf16 %v6582_v29 }
 0x168   : > { %v1634_v2 = vpack.c.bf16 %v1603_v51, %v1602_v55  ;;  %v6588_v51 = vunpack.i.l.bf16 %v7862_v60 }
 0x169   : > { %6806 = vrot.lane.b32.xlu1 %v6805_v42, %s6871_s14  ;;  %v1440_v42 = vsel %vm1436_vm4, %v1407_v47, %v6339_v25  ;;  %v7968_v30 = vpop.permute.xlu2 %6646  ;;  %v6423_v47 = vunpack.i.l.bf16 %v7718_v34 }
 0x16a   : > { %6801 = vrot.lane.b32.xlu0 %v6800_v23, %s6869_s12  ;;  %5778 = vmatmul.msk.bf16.vlgmr.msra.gmra.mxu0 %vm1674_vm11, %v1634_v2  ;;  %v1472_v23 = vsel %vm1469_vm6, %v1439_v6, %v6418_v10  ;;  %v1473_v18 = vsel %vm1469_vm6, %v1440_v42, %v6419_v22  ;;  %v6818_v6 = vld [vmem:[%s6931_s29 + $0x30] sm:$0xff] }
 0x16b   : > { %v7948_v32 = vpop.permute.xlu1 %6596  ;;  %v1505_v58 = vsel %vm1502_vm7, %v1472_v23, %v6498_v54  ;;  %v1506_v55 = vsel %vm1502_vm7, %v1473_v18, %v6499_v56  ;;  %v6263_v56 = vunpack.i.l.bf16 %v7636_v46  ;;  %v6344_v54 = vunpack.i.h.bf16 %v7698_v53 }
 0x16c   : > { %v6592_v39 = vpop.permute.xlu0 %6591  ;;  %v1538_v0 = vsel %vm1535_vm8, %v1505_v58, %v6583_v61  ;;  %v1539_v29 = vsel %vm1535_vm8, %v1506_v55, %v6584_v48  ;;  %v6817_v61 = vld [vmem:[%s6931_s29 + $0x38] sm:$0xff]  ;;  %v1375_v42 = vsel %vm1370_vm3, %v6818_v6, %v6183_v15  ;;  %v6504_v46 = vunpack.i.h.bf16 %v7835_v27 }
 0x16d   : > { %v6594_v8 = vunpack.i.h.bf16 %v6592_v39  ;;  %v6593_v2 = vunpack.i.l.bf16 %v6592_v39  ;;  %v1571_v45 = vsel %vm1568_vm9, %v1538_v0, %v6588_v51  ;;  %v1572_v22 = vsel %vm1568_vm9, %v1539_v29, %v6589_v36 }
 0x16e   : > { %v6343_v39 = vunpack.i.l.bf16 %v7698_v53  ;;  %v1376_v62 = vsel %vm1370_vm3, %v6817_v61, %v6184_v12  ;;  %v6503_v23 = vunpack.i.l.bf16 %v7835_v27  ;;  %v1408_v58 = vsel %vm1403_vm5, %v1375_v42, %v6263_v56  ;;  %v6819_v42 = vld [vmem:[%s6931_s29 + $0x68] sm:$0xff] }
 0x16f   : > { %v1604_v10 = vsel %vm1601_vm10, %v1571_v45, %v6593_v2  ;;  %v1605_v60 = vsel %vm1601_vm10, %v1572_v22, %v6594_v8  ;;  %v1409_v53 = vsel %vm1403_vm5, %v1376_v62, %v6264_v16  ;;  %v6599_v34 = vunpack.i.h.bf16 %v7948_v32  ;;  %v10606_v62 = vld [vmem:[#allocation44_spill] sm:$0xff] }
 0x170   : > { %v1635_v38 = vpack.c.bf16 %v1605_v60, %v1604_v10  ;;  %v6598_v55 = vunpack.i.l.bf16 %v7948_v32  ;;  %v1441_v51 = vsel %vm1436_vm4, %v1408_v58, %v6343_v39  ;;  %v1442_v0 = vsel %vm1436_vm4, %v1409_v53, %v6344_v54 }
 0x171   : > { %v7999_v36 = vpop.permute.xlu2 %6661  ;;  %v1474_v29 = vsel %vm1469_vm6, %v1441_v51, %v6423_v47  ;;  %v1475_v27 = vsel %vm1469_vm6, %v1442_v0, %v6424_v49  ;;  %v6604_v45 = vunpack.i.h.bf16 %v7881_v11  ;;  %v6603_v22 = vunpack.i.l.bf16 %v7881_v11  ;;  %v6822_v0 = vld [vmem:[%s6931_s29 + $0x78] sm:$0xff] }
 0x172   : > { %v1507_v8 = vsel %vm1502_vm7, %v1474_v29, %v6503_v23  ;;  %v1508_v2 = vsel %vm1502_vm7, %v1475_v27, %v6504_v46  ;;  %v6194_v15 = vunpack.i.h.bf16 %v7468_v57  ;;  %v6199_v16 = vunpack.i.h.bf16 %v7488_v7  ;;  %v6820_v23 = vld [vmem:[%s6931_s29 + $0x60] sm:$0xff]  ;;  %v10609_v27 = vld [vmem:[#allocation46_spill] sm:$0xff] }
 0x173   : > { %v7970_v37 = vpop.permute.xlu1 %6611  ;;  %v1540_v32 = vsel %vm1535_vm8, %v1507_v8, %v6598_v55  ;;  %v1541_v10 = vsel %vm1535_vm8, %v1508_v2, %v6599_v34  ;;  %v6198_v54 = vunpack.i.l.bf16 %v7488_v7  ;;  %v6213_v47 = vunpack.i.l.bf16 %v7508_v26  ;;  %v10607_v34 = vld [vmem:[#allocation45_spill] sm:$0xff] }
 0x174   : > { %v6607_v25 = vpop.permute.xlu0 %6606  ;;  %v1573_v39 = vsel %vm1568_vm9, %v1540_v32, %v6603_v22  ;;  %v1574_v49 = vsel %vm1568_vm9, %v1541_v10, %v6604_v45  ;;  %v6229_v6 = vunpack.i.h.bf16 %v10606_v62  ;;  %v6228_v7 = vunpack.i.l.bf16 %v10606_v62  ;;  %v6823_v22 = vld [vmem:[%s6931_s29 + $0xc8] sm:$0xff]  ;;  %v6824_v10 = vld [vmem:[%s6931_s29 + $0xc0] sm:$0xff] }
 0x175   : > { %v6609_v60 = vunpack.i.h.bf16 %v6607_v25  ;;  %v6608_v12 = vunpack.i.l.bf16 %v6607_v25  ;;  %v6214_v25 = vunpack.i.h.bf16 %v7508_v26  ;;  %v8029_v46 = vsel %vm1370_vm3, %v6819_v42, %v6194_v15  ;;  %v6821_v26 = vld [vmem:[%s6931_s29 + $0x80] sm:$0xff] }
 0x176   : > { %v8037_v58 = vsel %vm1370_vm3, %v6821_v26, %v6199_v16  ;;  %v6244_v55 = vunpack.i.h.bf16 %v10607_v34  ;;  %v8044_v29 = vsel %vm1370_vm3, %v6822_v0, %v6198_v54  ;;  %v6189_v8 = vunpack.i.h.bf16 %v10609_v27  ;;  %v6826_v54 = vld [vmem:[%s6931_s29 + $0x108] sm:$0xff] }
 0x177   : > { %v1607_v61 = vsel %vm1601_vm10, %v1574_v49, %v6609_v60  ;;  %v6188_v2 = vunpack.i.l.bf16 %v10609_v27  ;;  %v8050_v32 = vsel %vm1370_vm3, %v6823_v22, %v6214_v25  ;;  %v8054_v60 = vsel %vm1370_vm3, %v6824_v10, %v6213_v47  ;;  %v6827_v47 = vld [vmem:[%s6931_s29 + $0x158] sm:$0xff] }
 0x178   : > { %10610 = vst [vmem:[#allocation45_spill] sm:$0xff] %v8050_v32  ;;  %v6268_v15 = vunpack.i.l.bf16 %v7628_v24  ;;  %v6349_v49 = vunpack.i.h.bf16 %v7658_v4  ;;  %v6348_v25 = vunpack.i.l.bf16 %v7658_v4  ;;  %v6428_v62 = vunpack.i.l.bf16 %v7772_v28  ;;  %v10613_v22 = vld [vmem:[#allocation15_spill] sm:$0xff] }
 0x179   : > { %v8040_v51 = vpop.permute.xlu2 %6676  ;;  %10611 = vst [vmem:[#allocation46_spill] sm:$0xff] %v8054_v60  ;;  %v6509_v26 = vunpack.i.h.bf16 %v7833_v13  ;;  %v6209_v10 = vunpack.i.h.bf16 %v10613_v22  ;;  %v6833_v32 = vld [vmem:[%s6931_s29 + $0x98] sm:$0xff] }
 0x17a   : > { %5779 = vmatmul.msk.bf16.gmra.mxu0 %vm1674_vm11, %v1635_v38  ;;  %v6193_v38 = vunpack.i.l.bf16 %v7468_v57  ;;  %v1606_v57 = vsel %vm1601_vm10, %v1573_v39, %v6608_v12  ;;  %10608 = vst [vmem:[#allocation44_spill] sm:$0xff] %v8040_v51  ;;  %v6269_v12 = vunpack.i.h.bf16 %v7628_v24  ;;  %v8064_v39 = vsel %vm1370_vm3, %v6826_v54, %v6228_v7  ;;  %v6828_v7 = vld [vmem:[%s6931_s29 + $0x50] sm:$0xff]  ;;  %v6837_v51 = vld [vmem:[%s6931_s29 + $0x140] sm:$0xff] }
 0x17b   : > { %v7985_v48 = vpop.permute.xlu1 %6626  ;;  %v1636_v45 = vpack.c.bf16 %v1607_v61, %v1606_v57  ;;  %v8071_v57 = vsel %vm1370_vm3, %v6827_v47, %v6244_v55  ;;  %v6243_v24 = vunpack.i.l.bf16 %v10607_v34  ;;  %v6429_v61 = vunpack.i.h.bf16 %v7772_v28 }
 0x17c   : > { %v7993_v18 = vpop.permute.xlu0 %6621  ;;  %v8033_v53 = vsel %vm1370_vm3, %v6820_v23, %v6193_v38  ;;  %v6825_v38 = vld [vmem:[%s6931_s29 + $0x110] sm:$0xff]  ;;  %10612 = vst [vmem:[#allocation74_spill] sm:$0xff] %v8071_v57  ;;  %v1378_v42 = vsel %vm1370_vm3, %v6828_v7, %v6189_v8  ;;  %v6829_v23 = vld [vmem:[%s6931_s29 + $0x48] sm:$0xff]  ;;  %v6508_v55 = vunpack.i.l.bf16 %v7833_v13  ;;  %v6614_v28 = vunpack.i.h.bf16 %v7970_v37 }
 0x17d   : > { %v8060_v16 = vsel %vm1370_vm3, %v6825_v38, %v6229_v6  ;;  %v1377_v4 = vsel %vm1370_vm3, %v6829_v23, %v6188_v2  ;;  %v1411_v34 = vsel %vm1403_vm5, %v1378_v42, %v6269_v12  ;;  %v6208_v8 = vunpack.i.l.bf16 %v10613_v22  ;;  %v6830_v13 = vld [vmem:[%s6931_s29 + $0x150] sm:$0xff]  ;;  %v10615_v12 = vld [vmem:[#allocation47_spill] sm:$0xff] }
 0x17e   : > { %v1410_v27 = vsel %vm1403_vm5, %v1377_v4, %v6268_v15  ;;  %v1444_v38 = vsel %vm1436_vm4, %v1411_v34, %v6349_v49  ;;  %v8096_v54 = vsel %vm1370_vm3, %v6830_v13, %v6243_v24  ;;  %v6204_v15 = vunpack.i.h.bf16 %v10615_v12  ;;  %v10619_v13 = vld [vmem:[#allocation33_spill] sm:$0xff] }
 0x17f   : > { %v1443_v2 = vsel %vm1436_vm4, %v1410_v27, %v6348_v25  ;;  %10614 = vst [vmem:[#allocation15_spill] sm:$0xff] %v8096_v54  ;;  %v1477_v47 = vsel %vm1469_vm6, %v1444_v38, %v6429_v61  ;;  %v6619_v25 = vunpack.i.h.bf16 %v7914_v40  ;;  %v6618_v23 = vunpack.i.l.bf16 %v7914_v40  ;;  %v6831_v61 = vld [vmem:[%s6931_s29 + $0xb0] sm:$0xff] }
 0x180   : > { %v1510_v42 = vsel %vm1502_vm7, %v1477_v47, %v6509_v26  ;;  %v6624_v24 = vunpack.i.h.bf16 %v7993_v18  ;;  %v6623_v34 = vunpack.i.l.bf16 %v7993_v18  ;;  %v6203_v22 = vunpack.i.l.bf16 %v10615_v12  ;;  %v6834_v54 = vld [vmem:[%s6931_s29 + $0x90] sm:$0xff] }
 0x181   : > { %v1543_v4 = vsel %vm1535_vm8, %v1510_v42, %v6614_v28  ;;  %v8109_v27 = vpop.permute.xlu2 %6691  ;;  %v6289_v47 = vunpack.i.h.bf16 %v10619_v13 }
 0x182   : > { %10616 = vst [vmem:[#allocation47_spill] sm:$0xff] %v8109_v27 }
 0x183   : > { %v8014_v56 = vpop.permute.xlu1 %6641 }
 0x184   : > { %v8017_v11 = vpop.permute.xlu0 %6636 }
 0x18a   : > { %5780 = vmatmul.msk.bf16.gmra.mxu0 %vm1674_vm11, %v1636_v45  ;;  %v6613_v45 = vunpack.i.l.bf16 %v7970_v37  ;;  %v1476_v37 = vsel %vm1469_vm6, %v1443_v2, %v6428_v62  ;;  %v1386_v62 = vsel %vm1370_vm3, %v6831_v61, %v6209_v10  ;;  %v10617_v2 = vld [vmem:[#allocation24_spill] sm:$0xff]  ;;  %v1576_v61 = vsel %vm1568_vm9, %v1543_v4, %v6619_v25 }
 0x18b   : > { %v8076_v6 = vpop.permute.xlu1 %6656  ;;  %v1509_v7 = vsel %vm1502_vm7, %v1476_v37, %v6508_v55  ;;  %v6832_v55 = vld [vmem:[%s6931_s29 + $0xa8] sm:$0xff]  ;;  %v6274_v40 = vunpack.i.h.bf16 %v10617_v2  ;;  %v6273_v18 = vunpack.i.l.bf16 %v10617_v2  ;;  %v10621_v10 = vld [vmem:[#allocation20_spill] sm:$0xff]  ;;  %v1609_v60 = vsel %vm1601_vm10, %v1576_v61, %v6624_v24 }
 0x18c   : > { %v8084_v0 = vpop.permute.xlu0 %6651  ;;  %v1542_v49 = vsel %vm1535_vm8, %v1509_v7, %v6613_v45  ;;  %v1385_v26 = vsel %vm1370_vm3, %v6832_v55, %v6208_v8  ;;  %v10618_v45 = vld [vmem:[#allocation12_spill] sm:$0xff]  ;;  %v6239_v7 = vunpack.i.h.bf16 %v10621_v10  ;;  %v6288_v8 = vunpack.i.l.bf16 %v10619_v13 }
 0x18d   : > { %v6224_v38 = vunpack.i.h.bf16 %v10618_v45  ;;  %v6223_v28 = vunpack.i.l.bf16 %v10618_v45  ;;  %v1575_v12 = vsel %vm1568_vm9, %v1542_v49, %v6618_v23  ;;  %v6238_v55 = vunpack.i.l.bf16 %v10621_v10  ;;  %v10622_v45 = vld [vmem:[#allocation23_spill] sm:$0xff]  ;;  %v10623_v49 = vld [vmem:[#allocation29_spill] sm:$0xff] }
 0x18e   : > { %v6234_v2 = vunpack.i.h.bf16 %v10622_v45  ;;  %v1608_v27 = vsel %vm1601_vm10, %v1575_v12, %v6623_v34  ;;  %v8135_v13 = vsel %vm1370_vm3, %v6833_v32, %v6204_v15  ;;  %v1383_v23 = vsel %vm1370_vm3, %v6834_v54, %v6203_v22  ;;  %v6835_v15 = vld [vmem:[%s6931_s29 + $0xf8] sm:$0xff]  ;;  %v6836_v54 = vld [vmem:[%s6931_s29 + $0xf0] sm:$0xff]  ;;  %v10632_v34 = vld [vmem:[#allocation53_spill] sm:$0xff] }
 0x18f   : > { %v6233_v25 = vunpack.i.l.bf16 %v10622_v45  ;;  %v6304_v4 = vunpack.i.h.bf16 %v10623_v49  ;;  %v1413_v10 = vsel %vm1403_vm5, %v8029_v46, %v6274_v40  ;;  %v1412_v24 = vsel %vm1403_vm5, %v8033_v53, %v6273_v18  ;;  %v6838_v40 = vld [vmem:[%s6931_s29 + $0x138] sm:$0xff] }
 0x190   : > { %v6303_v32 = vunpack.i.l.bf16 %v10623_v49  ;;  %v1392_v61 = vsel %vm1370_vm3, %v6835_v15, %v6224_v38  ;;  %v1391_v22 = vsel %vm1370_vm3, %v6836_v54, %v6223_v28  ;;  %v8152_v45 = vsel %vm1403_vm5, %v1386_v62, %v6289_v47  ;;  %v6839_v49 = vld [vmem:[%s6931_s29 + $0x128] sm:$0xff]  ;;  %v6840_v38 = vld [vmem:[%s6931_s29 + $0x120] sm:$0xff] }
 0x191   : > { %v1637_v57 = vpack.c.bf16 %v1609_v60, %v1608_v27  ;;  %v1398_v46 = vsel %vm1370_vm3, %v6837_v51, %v6239_v7  ;;  %v1397_v53 = vsel %vm1370_vm3, %v6838_v40, %v6238_v55  ;;  %v8159_v18 = vsel %vm1403_vm5, %v1385_v26, %v6288_v8  ;;  %v8177_v8 = vpop.permute.xlu2 %6706 }
 0x192   : > { %v1396_v12 = vsel %vm1370_vm3, %v6839_v49, %v6234_v2  ;;  %v1395_v15 = vsel %vm1370_vm3, %v6840_v38, %v6233_v25  ;;  %v8166_v28 = vsel %vm1403_vm5, %v1392_v61, %v6304_v4  ;;  %v6354_v60 = vunpack.i.h.bf16 %v7712_v17  ;;  %10626 = vst [vmem:[#allocation12_spill] sm:$0xff] %v8177_v8  ;;  %v10628_v2 = vld [vmem:[#allocation38_spill] sm:$0xff]  ;;  %v10630_v61 = vld [vmem:[#allocation49_spill] sm:$0xff] }
 0x193   : > { %v8121_v37 = vpop.permute.xlu1 %6671  ;;  %v6353_v27 = vunpack.i.l.bf16 %v7712_v17  ;;  %v8172_v51 = vsel %vm1403_vm5, %v1391_v22, %v6303_v32  ;;  %v6434_v47 = vunpack.i.h.bf16 %v7770_v1  ;;  %v6433_v7 = vunpack.i.l.bf16 %v7770_v1  ;;  %v10631_v49 = vld [vmem:[#allocation50_spill] sm:$0xff] }
 0x194   : > { %10620 = vst [vmem:[#allocation24_spill] sm:$0xff] %v8121_v37  ;;  %v8125_v42 = vpop.permute.xlu0 %6666  ;;  %v6319_v25 = vunpack.i.h.bf16 %v10628_v2  ;;  %v6318_v4 = vunpack.i.l.bf16 %v10628_v2  ;;  %v6514_v17 = vunpack.i.h.bf16 %v7790_v44  ;;  %v6284_v54 = vunpack.i.h.bf16 %v10630_v61 }
 0x195   : > { %v6283_v22 = vunpack.i.l.bf16 %v10630_v61  ;;  %v6629_v1 = vunpack.i.h.bf16 %v7985_v48  ;;  %v6628_v40 = vunpack.i.l.bf16 %v7985_v48  ;;  %v6279_v38 = vunpack.i.h.bf16 %v10631_v49 }
 0x196   : > { %v6278_v26 = vunpack.i.l.bf16 %v10631_v49  ;;  %v1446_v2 = vsel %vm1436_vm4, %v1413_v10, %v6354_v60  ;;  %v1445_v8 = vsel %vm1436_vm4, %v1412_v24, %v6353_v27  ;;  %v6634_v37 = vunpack.i.h.bf16 %v7939_v41 }
 0x197   : > { %v1478_v62 = vsel %vm1469_vm6, %v1445_v8, %v6433_v7  ;;  %v1479_v61 = vsel %vm1469_vm6, %v1446_v2, %v6434_v47  ;;  %v6633_v49 = vunpack.i.l.bf16 %v7939_v41  ;;  %v6639_v60 = vunpack.i.h.bf16 %v8017_v11 }
 0x198   : > { %v1512_v48 = vsel %vm1502_vm7, %v1479_v61, %v6514_v17  ;;  %v8208_v27 = vsel %vm1403_vm5, %v1398_v46, %v6319_v25  ;;  %v8211_v47 = vsel %vm1403_vm5, %v1397_v53, %v6318_v4  ;;  %v1416_v41 = vsel %vm1403_vm5, %v1383_v23, %v6283_v22  ;;  %v10636_v61 = vld [vmem:[#allocation61_spill] sm:$0xff] }
 0x199   : > { %v1545_v24 = vsel %vm1535_vm8, %v1512_v48, %v6629_v1  ;;  %v1417_v17 = vsel %vm1403_vm5, %v8135_v13, %v6284_v54  ;;  %v1414_v46 = vsel %vm1403_vm5, %v8044_v29, %v6278_v26  ;;  %v8236_v54 = vpop.permute.xlu2 %6721  ;;  %v6358_v48 = vunpack.i.l.bf16 %v10636_v61 }
 0x19a   : > { %5781 = vmatmul.msk.bf16.gmra.mxu0 %vm1674_vm11, %v1637_v57  ;;  %v6513_v57 = vunpack.i.l.bf16 %v7790_v44  ;;  %v6364_v44 = vunpack.i.h.bf16 %v10632_v34  ;;  %v1578_v23 = vsel %vm1568_vm9, %v1545_v24, %v6634_v37 }
 0x19b   : > { %v8179_v55 = vpop.permute.xlu1 %6686  ;;  %v1611_v29 = vsel %vm1601_vm10, %v1578_v23, %v6639_v60  ;;  %v10637_v60 = vld [vmem:[#allocation58_spill] sm:$0xff]  ;;  %v6519_v23 = vunpack.i.h.bf16 %v7851_v63 }
 0x19c   : > { %10627 = vst [vmem:[#allocation33_spill] sm:$0xff] %v8179_v55  ;;  %v8185_v32 = vpop.permute.xlu0 %6681  ;;  %v6363_v55 = vunpack.i.l.bf16 %v10632_v34  ;;  %v6638_v34 = vunpack.i.l.bf16 %v8017_v11 }
 0x19d   : > { %10629 = vst [vmem:[#allocation20_spill] sm:$0xff] %v8185_v32  ;;  %v1511_v32 = vsel %vm1502_vm7, %v1478_v62, %v6513_v57  ;;  %v10633_v62 = vld [vmem:[#allocation54_spill] sm:$0xff]  ;;  %v1415_v57 = vsel %vm1403_vm5, %v8037_v58, %v6279_v38  ;;  %v8234_v58 = vsel %vm1436_vm4, %v1417_v17, %v6364_v44  ;;  %v10635_v38 = vld [vmem:[#allocation59_spill] sm:$0xff]  ;;  %v6359_v44 = vunpack.i.h.bf16 %v10636_v61 }
 0x19e   : > { %v1544_v10 = vsel %vm1535_vm8, %v1511_v32, %v6628_v40  ;;  %v6314_v7 = vunpack.i.h.bf16 %v10633_v62  ;;  %v6313_v8 = vunpack.i.l.bf16 %v10633_v62  ;;  %v10634_v32 = vld [vmem:[#allocation55_spill] sm:$0xff]  ;;  %v8231_v13 = vsel %vm1436_vm4, %v1416_v41, %v6363_v55 }
 0x19f   : > { %v6309_v11 = vunpack.i.h.bf16 %v10634_v32  ;;  %v6308_v53 = vunpack.i.l.bf16 %v10634_v32  ;;  %v1577_v4 = vsel %vm1568_vm9, %v1544_v10, %v6633_v49  ;;  %v6394_v2 = vunpack.i.h.bf16 %v10635_v38 }
 0x1a0   : > { %v1610_v22 = vsel %vm1601_vm10, %v1577_v4, %v6638_v34  ;;  %v1428_v26 = vsel %vm1403_vm5, %v1395_v15, %v6313_v8  ;;  %v1429_v40 = vsel %vm1403_vm5, %v1396_v12, %v6314_v7  ;;  %v6393_v37 = vunpack.i.l.bf16 %v10635_v38 }
 0x1a1   : > { %v1427_v55 = vsel %vm1403_vm5, %v8060_v16, %v6309_v11  ;;  %v6369_v49 = vunpack.i.h.bf16 %v7724_v59  ;;  %v1426_v10 = vsel %vm1403_vm5, %v8064_v39, %v6308_v53  ;;  %v6368_v15 = vunpack.i.l.bf16 %v7724_v59 }
 0x1a2   : > { %v6438_v12 = vunpack.i.l.bf16 %v7730_v3  ;;  %v1638_v24 = vpack.c.bf16 %v1611_v29, %v1610_v22  ;;  %v6324_v34 = vunpack.i.h.bf16 %v10637_v60  ;;  %v6323_v62 = vunpack.i.l.bf16 %v10637_v60 }
 0x1a3   : > { %v8221_v1 = vpop.permute.xlu1 %6701  ;;  %v6439_v16 = vunpack.i.h.bf16 %v7730_v3  ;;  %v6388_v7 = vunpack.i.l.bf16 %v7734_v33  ;;  %v8258_v8 = vsel %vm1436_vm4, %v1428_v26, %v6393_v37  ;;  %v8261_v41 = vsel %vm1436_vm4, %v1429_v40, %v6394_v2 }
 0x1a4   : > { %v8226_v25 = vpop.permute.xlu0 %6696  ;;  %v6389_v39 = vunpack.i.h.bf16 %v7734_v33  ;;  %v6384_v59 = vunpack.i.h.bf16 %v7736_v5  ;;  %v1447_v17 = vsel %vm1436_vm4, %v1414_v46, %v6358_v48  ;;  %v1448_v32 = vsel %vm1436_vm4, %v1415_v57, %v6359_v44 }
 0x1a5   : > { %v8270_v3 = vsel %vm1436_vm4, %v8152_v45, %v6369_v49  ;;  %v6383_v11 = vunpack.i.l.bf16 %v7736_v5  ;;  %v8275_v4 = vsel %vm1436_vm4, %v8159_v18, %v6368_v15  ;;  %v1480_v33 = vsel %vm1469_vm6, %v1447_v17, %v6438_v12 }
 0x1a6   : > { %v6518_v22 = vunpack.i.l.bf16 %v7851_v63  ;;  %v1481_v57 = vsel %vm1469_vm6, %v1448_v32, %v6439_v16  ;;  %v8284_v45 = vsel %vm1436_vm4, %v1426_v10, %v6388_v7  ;;  %v6644_v5 = vunpack.i.h.bf16 %v8014_v56 }
 0x1a7   : > { %v6643_v29 = vunpack.i.l.bf16 %v8014_v56  ;;  %v8289_v18 = vsel %vm1436_vm4, %v1427_v55, %v6389_v39  ;;  %v1458_v26 = vsel %vm1436_vm4, %v8166_v28, %v6384_v59  ;;  %v6464_v40 = vunpack.i.h.bf16 %v7794_v20  ;;  %v6737_v56 = vpop.permute.xlu2 %6736 }
 0x1a8   : > { %v6463_v63 = vunpack.i.l.bf16 %v7794_v20  ;;  %v1457_v38 = vsel %vm1436_vm4, %v8172_v51, %v6383_v11  ;;  %v6399_v2 = vunpack.i.h.bf16 %v7748_v35  ;;  %v6544_v37 = vunpack.i.h.bf16 %v7814_v9 }
 0x1a9   : > { %v6543_v61 = vunpack.i.l.bf16 %v7814_v9  ;;  %v1513_v55 = vsel %vm1502_vm7, %v1480_v33, %v6518_v22  ;;  %v1514_v44 = vsel %vm1502_vm7, %v1481_v57, %v6519_v23  ;;  %v6649_v28 = vunpack.i.h.bf16 %v7968_v30 }
 0x1aa   : > { %5782 = vmatmul.msk.bf16.gmra.mxu0 %vm1674_vm11, %v1638_v24  ;;  %v6648_v48 = vunpack.i.l.bf16 %v7968_v30  ;;  %v1546_v20 = vsel %vm1535_vm8, %v1513_v55, %v6643_v29  ;;  %v1547_v49 = vsel %vm1535_vm8, %v1514_v44, %v6644_v5  ;;  %v6654_v51 = vunpack.i.h.bf16 %v8084_v0 }
 0x1ab   : > { %v6717_v53 = vpop.permute.xlu1 %6716  ;;  %v6653_v10 = vunpack.i.l.bf16 %v8084_v0  ;;  %v1490_v15 = vsel %vm1469_vm6, %v1457_v38, %v6463_v63  ;;  %v1491_v9 = vsel %vm1469_vm6, %v1458_v26, %v6464_v40  ;;  %v6398_v16 = vunpack.i.l.bf16 %v7748_v35 }
 0x1ac   : > { %v8280_v46 = vpop.permute.xlu0 %6711  ;;  %v6719_v12 = vunpack.i.h.bf16 %v6717_v53  ;;  %v6718_v24 = vunpack.i.l.bf16 %v6717_v53  ;;  %v6469_v7 = vunpack.i.h.bf16 %v7754_v50  ;;  %v1523_v30 = vsel %vm1502_vm7, %v1490_v15, %v6543_v61 }
 0x1ad   : > { %v1524_v39 = vsel %vm1502_vm7, %v1491_v9, %v6544_v37  ;;  %v6739_v17 = vunpack.i.h.bf16 %v6737_v56  ;;  %v6738_v32 = vunpack.i.l.bf16 %v6737_v56  ;;  %v1579_v0 = vsel %vm1568_vm9, %v1546_v20, %v6648_v48 }
 0x1ae   : > { %v1580_v33 = vsel %vm1568_vm9, %v1547_v49, %v6649_v28  ;;  %v1612_v53 = vsel %vm1601_vm10, %v1579_v0, %v6653_v10  ;;  %v6443_v5 = vunpack.i.l.bf16 %v7784_v21  ;;  %v6474_v29 = vunpack.i.h.bf16 %v7808_v31 }
 0x1af   : > { %v1613_v57 = vsel %vm1601_vm10, %v1580_v33, %v6654_v51  ;;  %v1556_v26 = vsel %vm1535_vm8, %v1523_v30, %v6718_v24  ;;  %v1557_v40 = vsel %vm1535_vm8, %v1524_v39, %v6719_v12  ;;  %v6473_v63 = vunpack.i.l.bf16 %v7808_v31  ;;  %v8336_v49 = vpop.permute.xlu2 %6751 }
 0x1b0   : > { %v6554_v38 = vunpack.i.h.bf16 %v7874_v52  ;;  %v6553_v56 = vunpack.i.l.bf16 %v7874_v52  ;;  %v1639_v55 = vpack.c.bf16 %v1613_v57, %v1612_v53  ;;  %v6468_v48 = vunpack.i.l.bf16 %v7754_v50 }
 0x1b1   : > { %v6724_v20 = vunpack.i.h.bf16 %v8236_v54  ;;  %v6723_v31 = vunpack.i.l.bf16 %v8236_v54  ;;  %v6444_v52 = vunpack.i.h.bf16 %v7784_v21  ;;  %v6523_v10 = vunpack.i.l.bf16 %v7849_v43 }
 0x1b2   : > { %v1482_v12 = vsel %vm1469_vm6, %v8231_v13, %v6443_v5  ;;  %v1494_v24 = vsel %vm1469_vm6, %v8258_v8, %v6473_v63  ;;  %v1495_v54 = vsel %vm1469_vm6, %v8261_v41, %v6474_v29  ;;  %v6524_v30 = vunpack.i.h.bf16 %v7849_v43 }
 0x1b3   : > { %v6732_v59 = vpop.permute.xlu1 %6731  ;;  %v1527_v39 = vsel %vm1502_vm7, %v1494_v24, %v6553_v56  ;;  %v1528_v21 = vsel %vm1502_vm7, %v1495_v54, %v6554_v38  ;;  %v1483_v41 = vsel %vm1469_vm6, %v8234_v58, %v6444_v52  ;;  %v1515_v43 = vsel %vm1502_vm7, %v1482_v12, %v6523_v10  ;;  %v10638_v24 = vld [vmem:[#allocation70_spill] sm:$0xff] }
 0x1b4   : > { %v6727_v11 = vpop.permute.xlu0 %6726  ;;  %v6734_v15 = vunpack.i.h.bf16 %v6732_v59  ;;  %v6733_v9 = vunpack.i.l.bf16 %v6732_v59  ;;  %v6658_v59 = vunpack.i.l.bf16 %v8076_v6  ;;  %v1561_v13 = vsel %vm1535_vm8, %v1528_v21, %v6724_v20 }
 0x1b5   : > { %v6729_v23 = vunpack.i.h.bf16 %v6727_v11  ;;  %v6728_v22 = vunpack.i.l.bf16 %v6727_v11  ;;  %v1560_v11 = vsel %vm1535_vm8, %v1527_v39, %v6723_v31  ;;  %v6549_v53 = vunpack.i.h.bf16 %v7876_v14 }
 0x1b6   : > { %v1516_v29 = vsel %vm1502_vm7, %v1483_v41, %v6524_v30  ;;  %v6663_v58 = vunpack.i.l.bf16 %v7999_v36  ;;  %v1548_v63 = vsel %vm1535_vm8, %v1515_v43, %v6658_v59  ;;  %v1492_v56 = vsel %vm1469_vm6, %v8284_v45, %v6468_v48  ;;  %v10639_v59 = vld [vmem:[#allocation66_spill] sm:$0xff] }
 0x1b7   : > { %v1589_v37 = vsel %vm1568_vm9, %v1556_v26, %v6728_v22  ;;  %v1590_v61 = vsel %vm1568_vm9, %v1557_v40, %v6729_v23  ;;  %v1593_v23 = vsel %vm1568_vm9, %v1560_v11, %v6733_v9  ;;  %v1594_v22 = vsel %vm1568_vm9, %v1561_v13, %v6734_v15 }
 0x1b8   : > { %v8328_v44 = vsel %vm1601_vm10, %v1589_v37, %v6738_v32  ;;  %v8331_v28 = vsel %vm1601_vm10, %v1590_v61, %v6739_v17  ;;  %v6659_v17 = vunpack.i.h.bf16 %v8076_v6  ;;  %v6548_v6 = vunpack.i.l.bf16 %v7876_v14  ;;  %v6767_v14 = vpop.permute.xlu2 %6766 }
 0x1b9   : > { %v1644_v51 = vpack.c.bf16 %v8331_v28, %v8328_v44  ;;  %v6664_v26 = vunpack.i.h.bf16 %v7999_v36  ;;  %v6669_v37 = vunpack.i.h.bf16 %v8125_v42  ;;  %v6668_v61 = vunpack.i.l.bf16 %v8125_v42 }
 0x1ba   : > { %5783 = vmatmul.msk.bf16.gmra.mxu0 %vm1674_vm11, %v1639_v55  ;;  %v1549_v38 = vsel %vm1535_vm8, %v1516_v29, %v6659_v17  ;;  %v1493_v55 = vsel %vm1469_vm6, %v8289_v18, %v6469_v7  ;;  %v1464_v31 = vsel %vm1436_vm4, %v8208_v27, %v6399_v2  ;;  %v1463_v42 = vsel %vm1436_vm4, %v8211_v47, %v6398_v16 }
 0x1bb   : > { %v6747_v0 = vpop.permute.xlu1 %6746  ;;  %v1525_v45 = vsel %vm1502_vm7, %v1492_v56, %v6548_v6  ;;  %v1526_v50 = vsel %vm1502_vm7, %v1493_v55, %v6549_v53  ;;  %v6769_v18 = vunpack.i.h.bf16 %v6767_v14  ;;  %v6768_v7 = vunpack.i.l.bf16 %v6767_v14  ;;  %v10640_v6 = vld [vmem:[#allocation68_spill] sm:$0xff] }
 0x1bc   : > { %v6742_v32 = vpop.permute.xlu0 %6741  ;;  %v6749_v20 = vunpack.i.h.bf16 %v6747_v0  ;;  %v6748_v36 = vunpack.i.l.bf16 %v6747_v0  ;;  %v1581_v52 = vsel %vm1568_vm9, %v1548_v63, %v6663_v58  ;;  %v1582_v10 = vsel %vm1568_vm9, %v1549_v38, %v6664_v26  ;;  %v10642_v55 = vld [vmem:[#allocation64_spill] sm:$0xff] }
 0x1bd   : > { %v6744_v8 = vunpack.i.h.bf16 %v6742_v32  ;;  %v6743_v33 = vunpack.i.l.bf16 %v6742_v32  ;;  %v1614_v27 = vsel %vm1601_vm10, %v1581_v52, %v6668_v61  ;;  %v1615_v35 = vsel %vm1601_vm10, %v1582_v10, %v6669_v37 }
 0x1be   : > { %v6479_v2 = vunpack.i.h.bf16 %v7806_v19  ;;  %v6478_v47 = vunpack.i.l.bf16 %v7806_v19  ;;  %v1558_v16 = vsel %vm1535_vm8, %v1525_v45, %v6748_v36  ;;  %v1559_v12 = vsel %vm1535_vm8, %v1526_v50, %v6749_v20 }
 0x1bf   : > { %v1626_v57 = vsel %vm1601_vm10, %v1593_v23, %v6743_v33  ;;  %v1627_v5 = vsel %vm1601_vm10, %v1594_v22, %v6744_v8  ;;  %v6559_v54 = vunpack.i.h.bf16 %v10638_v24  ;;  %v6558_v30 = vunpack.i.l.bf16 %v10638_v24 }
 0x1c0   : > { %v1646_v40 = vpack.c.bf16 %v1627_v5, %v1626_v57  ;;  %v6449_v32 = vunpack.i.h.bf16 %v10639_v59  ;;  %v1640_v11 = vpack.c.bf16 %v1615_v35, %v1614_v27  ;;  %v6448_v0 = vunpack.i.l.bf16 %v10639_v59  ;;  %v10644_v27 = vld [vmem:[#allocation20_spill] sm:$0xff]  ;;  %v10648_v59 = vld [vmem:[#allocation74_spill] sm:$0xff] }
 0x1c1   : > { %v6754_v8 = vunpack.i.h.bf16 %v8336_v49  ;;  %v6753_v33 = vunpack.i.l.bf16 %v8336_v49  ;;  %v1496_v43 = vsel %vm1469_vm6, %v1463_v42, %v6478_v47  ;;  %v1497_v23 = vsel %vm1469_vm6, %v1464_v31, %v6479_v2  ;;  %v10641_v49 = vld [vmem:[#allocation24_spill] sm:$0xff]  ;;  %v6841_v47 = vld [vmem:[%s6931_s29 + $0x170] sm:$0xff] }
 0x1c2   : > { %5790 = vmatmul.msk.bf16.vlgmr.msra.gmra.mxu3 %vm1674_vm11, %v1646_v40  ;;  %v6529_v57 = vunpack.i.h.bf16 %v10640_v6  ;;  %v6528_v5 = vunpack.i.l.bf16 %v10640_v6  ;;  %v1529_v29 = vsel %vm1502_vm7, %v1496_v43, %v6558_v30  ;;  %v1530_v26 = vsel %vm1502_vm7, %v1497_v23, %v6559_v54  ;;  %v6782_v6 = vpop.permute.xlu2 %6781 }
 0x1c3   : > { %v6762_v39 = vpop.permute.xlu1 %6761  ;;  %v6674_v58 = vunpack.i.h.bf16 %v10641_v49  ;;  %v6673_v40 = vunpack.i.l.bf16 %v10641_v49  ;;  %v1562_v38 = vsel %vm1535_vm8, %v1529_v29, %v6753_v33  ;;  %v1563_v37 = vsel %vm1535_vm8, %v1530_v26, %v6754_v8  ;;  %v10650_v33 = vld [vmem:[#allocation73_spill] sm:$0xff]  ;;  %v10651_v29 = vld [vmem:[#allocation52_spill] sm:$0xff] }
 0x1c4   : > { %v6757_v48 = vpop.permute.xlu0 %6756  ;;  %v6764_v22 = vunpack.i.h.bf16 %v6762_v39  ;;  %v6763_v53 = vunpack.i.l.bf16 %v6762_v39  ;;  %v6872_v56 = vmov 0   ;;  %v6403_v20 = vunpack.i.l.bf16 %v10642_v55  ;;  %v10647_v39 = vld [vmem:[#allocation65_spill] sm:$0xff] }
 0x1c5   : > { %v6759_v15 = vunpack.i.h.bf16 %v6757_v48  ;;  %v6758_v9 = vunpack.i.l.bf16 %v6757_v48  ;;  %1885 = vst.msk [vmem:[#allocation2 + $0xc] sm:$0xf] %vm1880_vm12, %v6872_v56  ;;  %v1484_v36 = vsel %vm1469_vm6, %v8275_v4, %v6448_v0  ;;  %v1485_v45 = vsel %vm1469_vm6, %v8270_v3, %v6449_v32 }
 0x1c6   : > { %v1595_v31 = vsel %vm1568_vm9, %v1562_v38, %v6763_v53  ;;  %v1596_v42 = vsel %vm1568_vm9, %v1563_v37, %v6764_v22  ;;  %1881 = vst.msk [vmem:[#allocation2] sm:$0xf] %vm1880_vm12, %v6872_v56  ;;  %v1517_v50 = vsel %vm1502_vm7, %v1484_v36, %v6528_v5  ;;  %v1518_v4 = vsel %vm1502_vm7, %v1485_v45, %v6529_v57  ;;  %v6842_v38 = vld [vmem:[%s6931_s29 + $0x168] sm:$0xff] }
 0x1c7   : > { %v1591_v21 = vsel %vm1568_vm9, %v1558_v16, %v6758_v9  ;;  %v1592_v17 = vsel %vm1568_vm9, %v1559_v12, %v6759_v15  ;;  %1882 = vst.msk [vmem:[#allocation2 + $0x4] sm:$0xf] %vm1880_vm12, %v6872_v56  ;;  %v1550_v3 = vsel %vm1535_vm8, %v1517_v50, %v6673_v40  ;;  %v1551_v9 = vsel %vm1535_vm8, %v1518_v4, %v6674_v58  ;;  %v10645_v16 = vld [vmem:[#allocation32_spill] sm:$0xff] }
 0x1c8   : > { %v8403_v13 = vsel %vm1601_vm10, %v1591_v21, %v6768_v7  ;;  %v8406_v19 = vsel %vm1601_vm10, %v1592_v17, %v6769_v18  ;;  %v10643_v7 = vld [vmem:[#allocation44_spill] sm:$0xff]  ;;  %1886 = vst.msk [vmem:[#allocation2 + $0x10] sm:$0xf] %vm1880_vm12, %v6872_v56  ;;  %v6684_v35 = vunpack.i.h.bf16 %v10644_v27  ;;  %v6683_v2 = vunpack.i.l.bf16 %v10644_v27 }
 0x1c9   : > { %v1645_v41 = vpack.c.bf16 %v8406_v19, %v8403_v13  ;;  %v6679_v52 = vunpack.i.h.bf16 %v10643_v7  ;;  %v6678_v10 = vunpack.i.l.bf16 %v10643_v7  ;;  %1888 = vst.msk [vmem:[#allocation2 + $0x18] sm:$0xf] %vm1880_vm12, %v6872_v56  ;;  %v10646_v12 = vunpack.i.h.bf16 %v10645_v16  ;;  %v10653_v7 = vld [vmem:[#allocation45_spill] sm:$0xff] }
 0x1ca   : > { %5784 = vmatmul.msk.bf16.gmra.mxu0 %vm1674_vm11, %v1640_v11  ;;  %v6248_v54 = vunpack.i.l.bf16 %v10645_v16  ;;  %v6404_v30 = vunpack.i.h.bf16 %v10642_v55  ;;  %v6483_v21 = vunpack.i.l.bf16 %v10647_v39  ;;  %1889 = vst.msk [vmem:[#allocation2 + $0x1c] sm:$0xf] %vm1880_vm12, %v6872_v56  ;;  %v1433_v32 = vsel %vm1403_vm5, %v10648_v59, %v6324_v34  ;;  %v10649_v11 = vld [vmem:[#allocation15_spill] sm:$0xff] }
 0x1cb   : > { %v8455_v24 = vsel %vm1370_vm3, %v6841_v47, %v10646_v12  ;;  %v6777_v17 = vpop.permute.xlu1 %6776  ;;  %v1432_v0 = vsel %vm1403_vm5, %v10649_v11, %v6323_v62  ;;  %v6484_v8 = vunpack.i.h.bf16 %v10647_v39  ;;  %v6563_v43 = vunpack.i.l.bf16 %v10650_v33  ;;  %1891 = vst.msk [vmem:[#allocation2 + $0x24] sm:$0xf] %vm1880_vm12, %v6872_v56  ;;  %v10657_v12 = vld [vmem:[#allocation72_spill] sm:$0xff] }
 0x1cc   : > { %v6772_v63 = vpop.permute.xlu0 %6771  ;;  %v1465_v23 = vsel %vm1436_vm4, %v1432_v0, %v6403_v20  ;;  %v6564_v22 = vunpack.i.h.bf16 %v10650_v33  ;;  %v1583_v53 = vsel %vm1568_vm9, %v1550_v3, %v6678_v10  ;;  %v1584_v34 = vsel %vm1568_vm9, %v1551_v9, %v6679_v52  ;;  %1892 = vst.msk [vmem:[#allocation2 + $0x28] sm:$0xf] %vm1880_vm12, %v6872_v56  ;;  %v10654_v10 = vld [vmem:[#allocation46_spill] sm:$0xff]  ;;  %v10655_v9 = vld [vmem:[#allocation63_spill] sm:$0xff] }
 0x1cd   : > { %v6774_v61 = vunpack.i.h.bf16 %v6772_v63  ;;  %v6773_v14 = vunpack.i.l.bf16 %v6772_v63  ;;  %v6779_v60 = vunpack.i.h.bf16 %v6777_v17  ;;  %v6778_v62 = vunpack.i.l.bf16 %v6777_v17  ;;  %1894 = vst.msk [vmem:[#allocation2 + $0x30] sm:$0xf] %vm1880_vm12, %v6872_v56 }
 0x1ce   : > { %v1616_v57 = vsel %vm1601_vm10, %v1583_v53, %v6683_v2  ;;  %v1617_v5 = vsel %vm1601_vm10, %v1584_v34, %v6684_v35  ;;  %v6294_v26 = vunpack.i.h.bf16 %v10651_v29  ;;  %v6293_v49 = vunpack.i.l.bf16 %v10651_v29  ;;  %1895 = vst.msk [vmem:[#allocation2 + $0x34] sm:$0xf] %vm1880_vm12, %v6872_v56  ;;  %v10656_v35 = vld [vmem:[#allocation57_spill] sm:$0xff] }
 0x1cf   : > { %v1628_v48 = vsel %vm1601_vm10, %v1595_v31, %v6773_v14  ;;  %v1629_v18 = vsel %vm1601_vm10, %v1596_v42, %v6774_v61  ;;  %v1466_v58 = vsel %vm1436_vm4, %v1433_v32, %v6404_v30  ;;  %v1498_v40 = vsel %vm1469_vm6, %v1465_v23, %v6483_v21  ;;  %v10652_v61 = vld [vmem:[#allocation62_spill] sm:$0xff]  ;;  %1897 = vst.msk [vmem:[#allocation2 + $0x3c] sm:$0xf] %vm1880_vm12, %v6872_v56  ;;  %v10658_v32 = vld [vmem:[#allocation33_spill] sm:$0xff] }
 0x1d0   : > { %v1647_v15 = vpack.c.bf16 %v1629_v18, %v1628_v48  ;;  %v1401_v37 = vsel %vm1370_vm3, %v6842_v38, %v6248_v54  ;;  %v6373_v14 = vunpack.i.l.bf16 %v10652_v61  ;;  %v1499_v55 = vsel %vm1469_vm6, %v1466_v58, %v6484_v8  ;;  %1898 = vst.msk [vmem:[#allocation2 + $0x40] sm:$0xf] %vm1880_vm12, %v6872_v56 }
 0x1d1   : > { %v1531_v20 = vsel %vm1502_vm7, %v1498_v40, %v6563_v43  ;;  %v1532_v36 = vsel %vm1502_vm7, %v1499_v55, %v6564_v22  ;;  %v6784_v31 = vunpack.i.h.bf16 %v6782_v6  ;;  %v6783_v42 = vunpack.i.l.bf16 %v6782_v6  ;;  %1900 = vst.msk [vmem:[#allocation2 + $0x48] sm:$0xf] %vm1880_vm12, %v6872_v56  ;;  %v10659_v43 = vld [vmem:[#allocation60_spill] sm:$0xff] }
 0x1d2   : > { %5791 = vmatmul.msk.bf16.gmra.mxu3 %vm1674_vm11, %v1647_v15  ;;  %v1641_v45 = vpack.c.bf16 %v1617_v5, %v1616_v57  ;;  %v1564_v50 = vsel %vm1535_vm8, %v1531_v20, %v6778_v62  ;;  %v1565_v48 = vsel %vm1535_vm8, %v1532_v36, %v6779_v60  ;;  %v1421_v52 = vsel %vm1403_vm5, %v10653_v7, %v6294_v26  ;;  %v10660_v62 = vld [vmem:[#allocation69_spill] sm:$0xff]  ;;  %v10661_v26 = vld [vmem:[#allocation47_spill] sm:$0xff] }
 0x1d3   : > { %v1420_v15 = vsel %vm1403_vm5, %v10654_v10, %v6293_v49  ;;  %v6374_v3 = vunpack.i.h.bf16 %v10652_v61  ;;  %v6453_v27 = vunpack.i.l.bf16 %v10655_v9  ;;  %1901 = vst.msk [vmem:[#allocation2 + $0x4c] sm:$0xf] %vm1880_vm12, %v6872_v56  ;;  %v6329_v2 = vunpack.i.h.bf16 %v10656_v35  ;;  %v6792_v59 = vpop.permute.xlu1 %6791  ;;  %v8575_v10 = vld [vmem:[%s10409_s2] ss:$0 sm:$0xff] }
 0x1d4   : > { %v6787_v63 = vpop.permute.xlu0 %6786  ;;  %v6328_v47 = vunpack.i.l.bf16 %v10656_v35  ;;  %v6454_v16 = vunpack.i.h.bf16 %v10655_v9  ;;  %v6533_v54 = vunpack.i.l.bf16 %v10657_v12  ;;  %1903 = vst.msk [vmem:[#allocation2 + $0x54] sm:$0xf] %vm1880_vm12, %v6872_v56  ;;  %v1453_v30 = vsel %vm1436_vm4, %v1420_v15, %v6373_v14 }
 0x1d5   : > { %v6789_v18 = vunpack.i.h.bf16 %v6787_v63  ;;  %v6788_v4 = vunpack.i.l.bf16 %v6787_v63  ;;  %v6534_v39 = vunpack.i.h.bf16 %v10657_v12  ;;  %v1597_v21 = vsel %vm1568_vm9, %v1564_v50, %v6783_v42  ;;  %1904 = vst.msk [vmem:[#allocation2 + $0x58] sm:$0xf] %vm1880_vm12, %v6872_v56  ;;  %v6797_v42 = vpop.permute.xlu2 %6796  ;;  %v10662_v50 = vld [vmem:[#allocation5_spill] sm:$0xff] }
 0x1d6   : > { %v1598_v17 = vsel %vm1568_vm9, %v1565_v48, %v6784_v31  ;;  %v6689_v11 = vunpack.i.h.bf16 %v10658_v32  ;;  %v6688_v0 = vunpack.i.l.bf16 %v10658_v32  ;;  %1906 = vst.msk [vmem:[#allocation2 + $0x60] sm:$0xf] %vm1880_vm12, %v6872_v56  ;;  %v6409_v23 = vunpack.i.h.bf16 %v10659_v43 }
 0x1d7   : > { %v1630_v8 = vsel %vm1601_vm10, %v1597_v21, %v6788_v4  ;;  %v1631_v33 = vsel %vm1601_vm10, %v1598_v17, %v6789_v18  ;;  %v6408_v22 = vunpack.i.l.bf16 %v10659_v43  ;;  %v1454_v53 = vsel %vm1436_vm4, %v1421_v52, %v6374_v3  ;;  %1907 = vst.msk [vmem:[#allocation2 + $0x64] sm:$0xf] %vm1880_vm12, %v6872_v56  ;;  %v10664_v17 = vld [vmem:[#allocation51_spill] sm:$0xff] }
 0x1d8   : > { %v1486_v34 = vsel %vm1469_vm6, %v1453_v30, %v6453_v27  ;;  %v1487_v60 = vsel %vm1469_vm6, %v1454_v53, %v6454_v16  ;;  %v6489_v6 = vunpack.i.h.bf16 %v10660_v62  ;;  %v6488_v57 = vunpack.i.l.bf16 %v10660_v62  ;;  %1909 = vst.msk [vmem:[#allocation2 + $0x6c] sm:$0xf] %vm1880_vm12, %v6872_v56  ;;  %v10666_v43 = vld [vmem:[#allocation67_spill] sm:$0xff] }
 0x1d9   : > { %v1519_v5 = vsel %vm1502_vm7, %v1486_v34, %v6533_v54  ;;  %v1520_v29 = vsel %vm1502_vm7, %v1487_v60, %v6534_v39  ;;  %v6694_v49 = vunpack.i.h.bf16 %v10661_v26  ;;  %v6693_v58 = vunpack.i.l.bf16 %v10661_v26  ;;  %1910 = vst.msk [vmem:[#allocation2 + $0x70] sm:$0xf] %vm1880_vm12, %v6872_v56  ;;  %v6844_v39 = vld [vmem:[%s6931_s29 + $0xd8] sm:$0xff] }
 0x1da   : > { %5785 = vmatmul.msk.bf16.gmra.mxu0 %vm1674_vm11, %v1641_v45  ;;  %v1648_v40 = vpack.c.bf16 %v1631_v33, %v1630_v8  ;;  %v1552_v63 = vsel %vm1535_vm8, %v1519_v5, %v6688_v0  ;;  %v1553_v38 = vsel %vm1535_vm8, %v1520_v29, %v6689_v11  ;;  %v6699_v61 = vunpack.i.h.bf16 %v8226_v25  ;;  %1912 = vst.msk [vmem:[#allocation2 + $0x78] sm:$0xf] %vm1880_vm12, %v6872_v56  ;;  %v6843_v45 = vld [vmem:[%s6931_s29 + $0xe0] sm:$0xff]  ;;  %s6875_s29 = smov 40  }
 0x1db   : > { %v6698_v14 = vunpack.i.l.bf16 %v8226_v25  ;;  %v1434_v55 = vsel %vm1403_vm5, %v1401_v37, %v6328_v47  ;;  %v1435_v20 = vsel %vm1403_vm5, %v8455_v24, %v6329_v2  ;;  %v6794_v36 = vunpack.i.h.bf16 %v6792_v59  ;;  %1913 = vst.msk [vmem:[#allocation2 + $0x7c] sm:$0xf] %vm1880_vm12, %v6872_v56  ;;  %v6807_v30 = vpop.permute.xlu1 %6806  ;;  %v10665_v11 = vld [vmem:[#allocation56_spill] sm:$0xff] }
 0x1dc   : > { %v6793_v31 = vunpack.i.l.bf16 %v6792_v59  ;;  %v10663_v48 = vunpack.i.h.bf16 %v10662_v50  ;;  %v6218_v18 = vunpack.i.l.bf16 %v10662_v50  ;;  %v1467_v37 = vsel %vm1436_vm4, %v1434_v55, %v6408_v22  ;;  %v6802_v24 = vpop.permute.xlu0 %6801  ;;  %1915 = vst.msk [vmem:[#allocation2 + $0x84] sm:$0xf] %vm1880_vm12, %v6872_v56 }
 0x1dd   : > { %v1468_v4 = vsel %vm1436_vm4, %v1435_v20, %v6409_v23  ;;  %v1500_v7 = vsel %vm1469_vm6, %v1467_v37, %v6488_v57  ;;  %1916 = vst.msk [vmem:[#allocation2 + $0x88] sm:$0xf] %vm1880_vm12, %v6872_v56  ;;  %v1585_v15 = vsel %vm1568_vm9, %v1552_v63, %v6693_v58  ;;  %v1586_v3 = vsel %vm1568_vm9, %v1553_v38, %v6694_v49 }
 0x1de   : > { %v1390_v25 = vsel %vm1370_vm3, %v6843_v45, %v10663_v48  ;;  %v1501_v52 = vsel %vm1469_vm6, %v1468_v4, %v6489_v6  ;;  %v6799_v9 = vunpack.i.h.bf16 %v6797_v42  ;;  %v6798_v27 = vunpack.i.l.bf16 %v6797_v42  ;;  %1918 = vst.msk [vmem:[#allocation2 + $0x90] sm:$0xf] %vm1880_vm12, %v6872_v56 }
 0x1df   : > { %v1618_v35 = vsel %vm1601_vm10, %v1585_v15, %v6698_v14  ;;  %v1619_v2 = vsel %vm1601_vm10, %v1586_v3, %v6699_v61  ;;  %v1533_v47 = vsel %vm1502_vm7, %v1500_v7, %v6793_v31  ;;  %v1534_v16 = vsel %vm1502_vm7, %v1501_v52, %v6794_v36  ;;  %1919 = vst.msk [vmem:[#allocation2 + $0x94] sm:$0xf] %vm1880_vm12, %v6872_v56 }
 0x1e0   : > { %v6804_v12 = vunpack.i.h.bf16 %v6802_v24  ;;  %v6803_v54 = vunpack.i.l.bf16 %v6802_v24  ;;  %v1389_v21 = vsel %vm1370_vm3, %v6844_v39, %v6218_v18  ;;  %v6299_v59 = vunpack.i.h.bf16 %v10664_v17  ;;  %1921 = vst.msk [vmem:[#allocation2 + $0x9c] sm:$0xf] %vm1880_vm12, %v6872_v56  ;;  %v10668_v18 = vld [vmem:[#allocation12_spill] sm:$0xff] }
 0x1e1   : > { %v6298_v32 = vunpack.i.l.bf16 %v10664_v17  ;;  %v6379_v0 = vunpack.i.h.bf16 %v10665_v11  ;;  %v6378_v33 = vunpack.i.l.bf16 %v10665_v11  ;;  %v6459_v23 = vunpack.i.h.bf16 %v10666_v43  ;;  %1922 = vst.msk [vmem:[#allocation2 + $0xa0] sm:$0xf] %vm1880_vm12, %v6872_v56 }
 0x1e2   : > { %5792 = vmatmul.msk.bf16.gmra.mxu3 %vm1674_vm11, %v1648_v40  ;;  %v1642_v53 = vpack.c.bf16 %v1619_v2, %v1618_v35  ;;  %v1566_v34 = vsel %vm1535_vm8, %v1533_v47, %v6798_v27  ;;  %v1567_v60 = vsel %vm1535_vm8, %v1534_v16, %v6799_v9  ;;  %v6809_v62 = vunpack.i.h.bf16 %v6807_v30  ;;  %1924 = vst.msk [vmem:[#allocation2 + $0xa8] sm:$0xf] %vm1880_vm12, %v6872_v56  ;;  %v10667_v40 = vld [vmem:[#allocation71_spill] sm:$0xff] }
 0x1e3   : > { %v6808_v6 = vunpack.i.l.bf16 %v6807_v30  ;;  %v6458_v57 = vunpack.i.l.bf16 %v10666_v43  ;;  %v1599_v5 = vsel %vm1568_vm9, %v1566_v34, %v6803_v54  ;;  %v1600_v29 = vsel %vm1568_vm9, %v1567_v60, %v6804_v12  ;;  %1925 = vst.msk [vmem:[#allocation2 + $0xac] sm:$0xf] %vm1880_vm12, %v6872_v56  ;;  %v2295_v54 = vld [vmem:[#allocation2 + $0xc] sm:$0xf] }
 0x1e4   : > { %v1422_v49 = vsel %vm1403_vm5, %v1389_v21, %v6298_v32  ;;  %v1423_v58 = vsel %vm1403_vm5, %v1390_v25, %v6299_v59  ;;  %v6539_v63 = vunpack.i.h.bf16 %v10667_v40  ;;  %v6538_v38 = vunpack.i.l.bf16 %v10667_v40  ;;  %1927 = vst.msk [vmem:[#allocation2 + $0xb4] sm:$0xf] %vm1880_vm12, %v6872_v56 }
 0x1e5   : > { %v1455_v61 = vsel %vm1436_vm4, %v1422_v49, %v6378_v33  ;;  %v1456_v14 = vsel %vm1436_vm4, %v1423_v58, %v6379_v0  ;;  %1928 = vst.msk [vmem:[#allocation2 + $0xb8] sm:$0xf] %vm1880_vm12, %v6872_v56  ;;  %v6704_v20 = vunpack.i.h.bf16 %v8221_v1  ;;  %v6703_v36 = vunpack.i.l.bf16 %v8221_v1  ;;  %vm8673_vm4 = vmor %vm1968_vm0, %vm1969_vm1 }
 0x1e6   : > { %1930 = vst.msk [vmem:[#allocation2 + $0xc0] sm:$0xf] %vm1880_vm12, %v6872_v56  ;;  %v1632_v31 = vsel %vm1601_vm10, %v1599_v5, %v6808_v6  ;;  %v1633_v42 = vsel %vm1601_vm10, %v1600_v29, %v6809_v62  ;;  %v1488_v45 = vsel %vm1469_vm6, %v1455_v61, %v6458_v57  ;;  %v1489_v50 = vsel %vm1469_vm6, %v1456_v14, %v6459_v23 }
 0x1e7   : > { %v1736_v8 = vpop.f32.mrf.mxu0  ;;  %1931 = vst.msk [vmem:[#allocation2 + $0xc4] sm:$0xf] %vm1880_vm12, %v6872_v56  ;;  %v1521_v25 = vsel %vm1502_vm7, %v1488_v45, %v6538_v38  ;;  %v1522_v1 = vsel %vm1502_vm7, %v1489_v50, %v6539_v63  ;;  %v6709_v37 = vunpack.i.h.bf16 %v10668_v18  ;;  %v6708_v4 = vunpack.i.l.bf16 %v10668_v18  ;;  %vm8681_vm7 = vmand %vm1883_vm13, %vm1968_vm0  ;;  %v8701_v50 = vld [vmem:[#allocation2 + $0x4] sm:$0xf] }
 0x1e8   : > { %v1737_v22 = vadd.f32 %v8575_v10, %v1736_v8  ;;  %1933 = vst.msk [vmem:[#allocation2 + $0xcc] sm:$0xf] %vm1880_vm12, %v6872_v56  ;;  %v1649_v15 = vpack.c.bf16 %v1633_v42, %v1632_v31  ;;  %v1554_v3 = vsel %vm1535_vm8, %v1521_v25, %v6703_v36  ;;  %v1555_v9 = vsel %vm1535_vm8, %v1522_v1, %v6704_v20  ;;  %v2409_v36 = vld [vmem:[#allocation2] sm:$0xf]  ;;  %v2304_v31 = vld [vmem:[#allocation2 + $0x18] sm:$0xf] }
 0x1e9   : > { %1934 = vst.msk [vmem:[#allocation2 + $0xd0] sm:$0xf] %vm1880_vm12, %v6872_v56  ;;  %v6714_v27 = vunpack.i.h.bf16 %v8280_v46  ;;  %v6713_v35 = vunpack.i.l.bf16 %v8280_v46  ;;  %v1587_v39 = vsel %vm1568_vm9, %v1554_v3, %v6708_v4  ;;  %v1588_v21 = vsel %vm1568_vm9, %v1555_v9, %v6709_v37 }
 0x1ea   : > { %v1816_v26 = vmul.f32 0.01, %v1737_v22  ;;  %5786 = vmatmul.msk.bf16.gmra.mxu0 %vm1674_vm11, %v1642_v53  ;;  %1887 = vst.msk [vmem:[#allocation2 + $0x14] sm:$0x1] %vm1883_vm13, %v6872_v56  ;;  %vm2457_vm9 = vsmask.f32 3328 }
 0x1eb   : > { %1884 = vst.msk [vmem:[#allocation2 + $0x8] sm:$0x1] %vm1883_vm13, %v6872_v56  ;;  %v1620_v17 = vsel %vm1601_vm10, %v1587_v39, %v6713_v35  ;;  %v1621_v59 = vsel %vm1601_vm10, %v1588_v21, %v6714_v27  ;;  %v2461_v1 = vshrl.u32 %v2409_v36, 16  ;;  %v2464_v37 = vshll.u32 %v2409_v36, 16 }
 0x1ec   : > { %v1848_v55 = vmax.f32 %v1737_v22, %v1816_v26  ;;  %1890 = vst.msk [vmem:[#allocation2 + $0x20] sm:$0x1] %vm1883_vm13, %v6872_v56  ;;  %v1643_v43 = vpack.c.bf16 %v1621_v59, %v1620_v17  ;;  %v2470_v4 = vshll.u32 %v8701_v50, 16  ;;  %vm2909_vm0 = vcmask 1046532  }
 0x1ed   : > { %1893 = vst.msk [vmem:[#allocation2 + $0x2c] sm:$0x1] %vm1883_vm13, %v6872_v56  ;;  %v2466_v27 = vrot.slane %v2464_v37, 5 }
 0x1ee   : > { %v1936_v48 = vpack.c.bf16 %v1848_v55, %v1848_v55  ;;  %1896 = vst.msk [vmem:[#allocation2 + $0x38] sm:$0x1] %vm1883_vm13, %v6872_v56 }
 0x1ef   : > { %v1738_v24 = vpop.f32.mrf.mxu0  ;;  %1899 = vst.msk [vmem:[#allocation2 + $0x44] sm:$0x1] %vm1883_vm13, %v6872_v56 }
 0x1f0   : > { %v1972_v7 = vshrl.u32 %v1936_v48, 16  ;;  %v1739_v52 = vadd.f32 %v8575_v10, %v1738_v24  ;;  %v1975_v47 = vshll.u32 %v1936_v48, 16  ;;  %1902 = vst.msk [vmem:[#allocation2 + $0x50] sm:$0x1] %vm1883_vm13, %v6872_v56  ;;  %v2474_v24 = vshrl.u32 %v8701_v50, 16 }
 0x1f1   : > { %1905 = vst.msk [vmem:[#allocation2 + $0x5c] sm:$0x1] %vm1883_vm13, %v6872_v56  ;;  %v2301_v62 = vld [vmem:[#allocation2 + $0x14] sm:$0x1] }
 0x1f2   : > { %v1974_v2 = vrot.slane %v1972_v7, 7  ;;  %v1817_v16 = vmul.f32 0.01, %v1739_v52  ;;  %5793 = vmatmul.msk.bf16.gmra.mxu3 %vm1674_vm11, %v1649_v15  ;;  %1908 = vst.msk [vmem:[#allocation2 + $0x68] sm:$0x1] %vm1883_vm13, %v6872_v56  ;;  %v2463_v15 = vrot.slane %v2461_v1, 4 }
 0x1f3   : > { %1911 = vst.msk [vmem:[#allocation2 + $0x74] sm:$0x1] %vm1883_vm13, %v6872_v56 }
 0x1f4   : > { %v1977_v46 = vor.u32 %v1975_v47, %v1974_v2  ;;  %v1849_v30 = vmax.f32 %v1739_v52, %v1817_v16  ;;  %v1978_v6 = vrot.slane %v1974_v2, 4  ;;  %1914 = vst.msk [vmem:[#allocation2 + $0x80] sm:$0x1] %vm1883_vm13, %v6872_v56  ;;  %v8717_v16 = vld [vmem:[#allocation2 + $0x8] sm:$0x1]  ;;  %v2467_v17 = vor.u32 %v2466_v27, %v2463_v15 }
 0x1f5   : > { %1917 = vst.msk [vmem:[#allocation2 + $0x8c] sm:$0x1] %vm1883_vm13, %v6872_v56 }
 0x1f6   : > { %v2296_v32 = vsel %vm8650_vm15, %v1977_v46, %v2295_v54  ;;  %v1937_v11 = vpack.c.bf16 %v1849_v30, %v1849_v30  ;;  %1920 = vst.msk [vmem:[#allocation2 + $0x98] sm:$0x1] %vm1883_vm13, %v6872_v56  ;;  %v2472_v54 = vrot.slane %v2470_v4, 5  ;;  %v2476_v46 = vrot.slane %v2474_v24, 4 }
 0x1f7   : > { %2297 = vst [vmem:[#allocation2 + $0xc] sm:$0xf] %v2296_v32  ;;  %v1741_v0 = vpop.f32.mrf.mxu0 }
 0x1f8   : > { %v1980_v8 = vshrl.u32 %v1937_v11, 16  ;;  %v1742_v33 = vadd.f32 %v8575_v10, %v1741_v0  ;;  %v1983_v53 = vshll.u32 %v1937_v11, 16  ;;  %1923 = vst.msk [vmem:[#allocation2 + $0xa4] sm:$0x1] %vm1883_vm13, %v6872_v56 }
 0x1f9   : > { %1926 = vst.msk [vmem:[#allocation2 + $0xb0] sm:$0x1] %vm1883_vm13, %v6872_v56 }
 0x1fa   : > { %v1982_v22 = vrot.slane %v1980_v8, 7  ;;  %v1818_v34 = vmul.f32 0.01, %v1742_v33  ;;  %5787 = vmatmul.msk.bf16.gmra.mxu0 %vm1674_vm11, %v1643_v43  ;;  %1929 = vst.msk [vmem:[#allocation2 + $0xbc] sm:$0x1] %vm1883_vm13, %v6872_v56 }
 0x1fb   : > { %1932 = vst.msk [vmem:[#allocation2 + $0xc8] sm:$0x1] %vm1883_vm13, %v6872_v56 }
 0x1fc   : > { %v1985_v57 = vor.u32 %v1983_v53, %v1982_v22  ;;  %v1987_v5 = vrot.slane %v1982_v22, 4  ;;  %v1850_v29 = vmax.f32 %v1742_v33, %v1818_v34  ;;  %1935 = vst.msk [vmem:[#allocation2 + $0xd4] sm:$0x1] %vm1883_vm13, %v6872_v56  ;;  %vm8726_vm13 = vmor %vm2457_vm9, %vm2458_vm14  ;;  %v2468_v22 = vrot.slane %v2467_v17, 4 }
 0x1fd   : > { %v2477_v53 = vor.u32 %v2476_v46, %v2472_v54  ;;  %vm5292_vm9 = vcmask 588800  }
 0x1fe   : > { %v1986_v26 = vsel %vm8673_vm4, %v1978_v6, %v1985_v57  ;;  %v2302_v49 = vsel %vm8681_vm7, %v1987_v5, %v2301_v62  ;;  %v1938_v58 = vpack.c.bf16 %v1850_v29, %v1850_v29  ;;  %v2411_v40 = vld [vmem:[#allocation2 + $0xc] sm:$0xf]  ;;  %v2480_v5 = vshll.u32 %v8717_v16, 16  ;;  %v2308_v29 = vld [vmem:[#allocation2 + $0x20] sm:$0x1] }
 0x1ff   : > { %2298 = vst.msk [vmem:[#allocation2 + $0x10] sm:$0xf] %vm1880_vm12, %v1986_v26  ;;  %v1743_v63 = vpop.f32.mrf.mxu0  ;;  %v2485_v38 = vshrl.u32 %v2411_v40, 16  ;;  %v2488_v61 = vshll.u32 %v2411_v40, 16  ;;  %v3023_v34 = vld [vmem:[#allocation2 + $0xc] sm:$0xf] }
 0x200   : > { %2303 = vst [vmem:[#allocation2 + $0x14] sm:$0x1] %v2302_v49  ;;  %v1989_v14 = vshrl.u32 %v1938_v58, 16  ;;  %v1992_v55 = vshll.u32 %v1938_v58, 16  ;;  %v1744_v20 = vadd.f32 %v8575_v10, %v1743_v63  ;;  %v2473_v58 = vsel %vm8726_vm13, %v2468_v22, %v2472_v54 }
 0x201   : > { %v2487_v42 = vrot.slane %v2485_v38, 4  ;;  %v2490_v45 = vrot.slane %v2488_v61, 5  ;;  %v2478_v40 = vrot.slane %v2477_v53, 4  ;;  %v2482_v44 = vrot.slane %v2480_v5, 5 }
 0x202   : > { %v1991_v48 = vrot.slane %v1989_v14, 7  ;;  %v1819_v25 = vmul.f32 0.01, %v1744_v20  ;;  %v4304_v28 = vunpack.c.l.b16 %v2473_v58 }
 0x203   : > { %v2491_v18 = vor.u32 %v2490_v45, %v2487_v42  ;;  %v3075_v45 = vshll.u32 %v3023_v34, 16  ;;  %v2483_v37 = vsel %vm8726_vm13, %v2478_v40, %v2482_v44 }
 0x204   : > { %v1994_v7 = vor.u32 %v1992_v55, %v1991_v48  ;;  %v1851_v52 = vmax.f32 %v1744_v20, %v1819_v25  ;;  %v1995_v3 = vrot.slane %v1991_v48, 4  ;;  %v4305_v27 = vunpack.c.l.b16 %v2483_v37 }
 0x205   : > { %v2492_v9 = vrot.slane %v2491_v18, 4 }
 0x206   : > { %v2305_v35 = vsel %vm8650_vm15, %v1994_v7, %v2304_v31  ;;  %v1939_v2 = vpack.c.bf16 %v1851_v52, %v1851_v52  ;;  %v8715_v47 = vld [vmem:[#allocation2 + $0x10] sm:$0xf] }
 0x207   : > { %2306 = vst [vmem:[#allocation2 + $0x18] sm:$0xf] %v2305_v35  ;;  %v1746_v30 = vpop.f32.mrf.mxu0  ;;  %v8719_v39 = vld [vmem:[#allocation2 + $0x14] sm:$0x1]  ;;  %v2494_v21 = vshll.u32 %v8715_v47, 16  ;;  %v2498_v56 = vshrl.u32 %v8715_v47, 16 }
 0x208   : > { %v1997_v59 = vshrl.u32 %v1939_v2, 16  ;;  %v2000_v32 = vshll.u32 %v1939_v2, 16  ;;  %v1747_v11 = vadd.f32 %v8575_v10, %v1746_v30  ;;  %v2504_v8 = vshll.u32 %v8719_v39, 16  ;;  %v8750_v15 = vld [vmem:[#allocation2 + $0x10] sm:$0xf] }
 0x209   : > { %v2496_v33 = vrot.slane %v2494_v21, 5  ;;  %v2500_v43 = vrot.slane %v2498_v56, 4  ;;  %v3077_v30 = vrot.slane %v3075_v45, 5  ;;  %v2311_v21 = vld [vmem:[#allocation2 + $0x24] sm:$0xf]  ;;  %v4336_v56 = vpack.c.b16 %v4305_v27, %v4304_v28 }
 0x20a   : > { %v1999_v62 = vrot.slane %v1997_v59, 7  ;;  %v1820_v6 = vmul.f32 0.01, %v1747_v11  ;;  %5788 = vmatmul.msk.bf16.gmra.mxu0 %vm1674_vm11, %v1644_v51  ;;  %v2506_v57 = vrot.slane %v2504_v8, 5  ;;  %v3072_v51 = vshrl.u32 %v3023_v34, 16 }
 0x20b   : > { %v2497_v26 = vsel %vm8726_vm13, %v2492_v9, %v2496_v33  ;;  %v2501_v49 = vor.u32 %v2500_v43, %v2496_v33  ;;  %v3081_v17 = vshll.u32 %v8750_v15, 16  ;;  %v3085_v59 = vshrl.u32 %v8750_v15, 16  ;;  %4352 = vrot.lane.b32.xlu2 %v4336_v56, %s6865_s8  ;;  %v8756_v8 = vld [vmem:[#allocation2 + $0x14] sm:$0x1] }
 0x20c   : > { %v2002_v63 = vor.u32 %v2000_v32, %v1999_v62  ;;  %v2004_v38 = vrot.slane %v1999_v62, 4  ;;  %v1852_v61 = vmax.f32 %v1747_v11, %v1820_v6  ;;  %v4306_v14 = vunpack.c.l.b16 %v2497_v26 }
 0x20d   : > { %v2502_v55 = vrot.slane %v2501_v49, 4  ;;  %v3074_v35 = vrot.slane %v3072_v51, 4  ;;  %v8758_v43 = vrot.slane %v3081_v17, 5  ;;  %v3087_v22 = vrot.slane %v3085_v59, 4 }
 0x20e   : > { %v2003_v20 = vsel %vm8673_vm4, %v1995_v3, %v2002_v63  ;;  %v2309_v36 = vsel %vm8681_vm7, %v2004_v38, %v2308_v29  ;;  %v1940_v31 = vpack.c.bf16 %v1852_v61, %v1852_v61  ;;  %v2413_v42 = vld [vmem:[#allocation2 + $0x18] sm:$0xf]  ;;  %v3091_v63 = vshll.u32 %v8756_v8, 16 }
 0x20f   : > { %2307 = vst.msk [vmem:[#allocation2 + $0x1c] sm:$0xf] %vm1880_vm12, %v2003_v20  ;;  %v1748_v48 = vpop.f32.mrf.mxu0  ;;  %v2507_v25 = vsel %vm8726_vm13, %v2502_v55, %v2506_v57  ;;  %v2509_v1 = vshrl.u32 %v2413_v42, 16  ;;  %v2512_v18 = vshll.u32 %v2413_v42, 16  ;;  %v3078_v33 = vor.u32 %v3077_v30, %v3074_v35  ;;  %v3632_v44 = vld [vmem:[#allocation2 + $0x18] sm:$0xf] }
 0x210   : > { %2310 = vst [vmem:[#allocation2 + $0x20] sm:$0x1] %v2309_v36  ;;  %v2006_v4 = vshrl.u32 %v1940_v31, 16  ;;  %v2009_v24 = vshll.u32 %v1940_v31, 16  ;;  %v1749_v7 = vadd.f32 %v8575_v10, %v1748_v48  ;;  %v4307_v52 = vunpack.c.l.b16 %v2507_v25  ;;  %v2315_v42 = vld [vmem:[#allocation2 + $0x2c] sm:$0x1] }
 0x211   : > { %v2511_v3 = vrot.slane %v2509_v1, 4  ;;  %v2514_v9 = vrot.slane %v2512_v18, 5  ;;  %v3088_v49 = vor.u32 %v3087_v22, %v8758_v43  ;;  %v3079_v55 = vrot.slane %v3078_v33, 4 }
 0x212   : > { %v2008_v2 = vrot.slane %v2006_v4, 7  ;;  %v1821_v54 = vmul.f32 0.01, %v1749_v7  ;;  %v4337_v46 = vpack.c.b16 %v4307_v52, %v4306_v14  ;;  %v3093_v13 = vrot.slane %v3091_v63, 5 }
 0x213   : > { %v2515_v6 = vor.u32 %v2514_v9, %v2511_v3  ;;  %v3084_v48 = vsel %vm8726_vm13, %v3079_v55, %v8758_v43  ;;  %v3089_v25 = vrot.slane %v3088_v49, 4  ;;  %v3681_v19 = vshrl.u32 %v3632_v44, 16 }
 0x214   : > { %v2011_v32 = vor.u32 %v2009_v24, %v2008_v2  ;;  %v1853_v11 = vmax.f32 %v1749_v7, %v1821_v54  ;;  %4354 = vrot.lane.b32.xlu0 %v4337_v46, %s6865_s8  ;;  %v2012_v31 = vrot.slane %v2008_v2, 4  ;;  %v3684_v27 = vshll.u32 %v3632_v44, 16 }
 0x215   : > { %v2516_v36 = vrot.slane %v2515_v6, 4  ;;  %v3094_v59 = vsel %vm8726_vm13, %v3089_v25, %v3093_v13  ;;  %v3683_v22 = vrot.slane %v3681_v19, 4  ;;  %v8801_v44 = vunpack.c.l.b16 %v3084_v48  ;;  %v6103_v19 = vld [vmem:[#allocation2 + $0xc] sm:$0xff] }
 0x216   : > { %v2312_v53 = vsel %vm8650_vm15, %v2011_v32, %v2311_v21  ;;  %v1941_v34 = vpack.c.bf16 %v1853_v11, %v1853_v11  ;;  %v8762_v62 = vld [vmem:[#allocation2 + $0x1c] sm:$0xf] }
 0x217   : > { %2313 = vst [vmem:[#allocation2 + $0x24] sm:$0xf] %v2312_v53  ;;  %v1751_v57 = vpop.f32.mrf.mxu0  ;;  %v8764_v5 = vld [vmem:[#allocation2 + $0x20] sm:$0x1]  ;;  %v2518_v29 = vshll.u32 %v8762_v62, 16  ;;  %v2522_v26 = vshrl.u32 %v8762_v62, 16 }
 0x218   : > { %v2014_v58 = vshrl.u32 %v1941_v34, 16  ;;  %v1752_v40 = vadd.f32 %v8575_v10, %v1751_v57  ;;  %v2528_v14 = vshll.u32 %v8764_v5, 16  ;;  %v2017_v51 = vshll.u32 %v1941_v34, 16  ;;  %v8791_v32 = vld [vmem:[#allocation2 + $0x1c] sm:$0xf] }
 0x219   : > { %v2520_v38 = vrot.slane %v2518_v29, 5  ;;  %v2524_v61 = vrot.slane %v2522_v26, 4  ;;  %v3686_v57 = vrot.slane %v3684_v27, 5  ;;  %v2318_v29 = vld [vmem:[#allocation2 + $0x30] sm:$0xf]  ;;  %v8793_v26 = vunpack.c.l.b16 %v3094_v59 }
 0x21a   : > { %v2016_v28 = vrot.slane %v2014_v58, 7  ;;  %v1822_v20 = vmul.f32 0.01, %v1752_v40  ;;  %5789 = vmatmul.msk.bf16.gmra.mxu0 %vm1674_vm11, %v1645_v41  ;;  %v2530_v7 = vrot.slane %v2528_v14, 5  ;;  %v8795_v49 = vld [vmem:[#allocation2 + $0x20] sm:$0x1] }
 0x21b   : > { %v2525_v45 = vor.u32 %v2524_v61, %v2520_v38  ;;  %v2521_v4 = vsel %vm8726_vm13, %v2516_v36, %v2520_v38  ;;  %v3690_v58 = vshll.u32 %v8791_v32, 16  ;;  %vm2908_vm11 = vcmask 1042432  }
 0x21c   : > { %v2019_v1 = vor.u32 %v2017_v51, %v2016_v28  ;;  %v2021_v18 = vrot.slane %v2016_v28, 4  ;;  %v1854_v37 = vmax.f32 %v1752_v40, %v1822_v20  ;;  %v4308_v54 = vunpack.c.l.b16 %v2521_v4  ;;  %vm8823_vm1 = vmor %vm2908_vm11, %vm2909_vm0 }
 0x21d   : > { %v2526_v24 = vrot.slane %v2525_v45, 4  ;;  %v3694_v40 = vshrl.u32 %v8791_v32, 16  ;;  %v2930_v61 = vrot.slane %v8764_v5, 5  ;;  %v3687_v14 = vor.u32 %v3686_v57, %v3683_v22 }
 0x21e   : > { %v2020_v41 = vsel %vm8673_vm4, %v2012_v31, %v2019_v1  ;;  %v2316_v52 = vsel %vm8681_vm7, %v2021_v18, %v2315_v42  ;;  %v1942_v3 = vpack.c.bf16 %v1854_v37, %v1854_v37  ;;  %v2415_v9 = vld [vmem:[#allocation2 + $0x24] sm:$0xf]  ;;  %v3692_v28 = vrot.slane %v3690_v58, 5 }
 0x21f   : > { %2314 = vst.msk [vmem:[#allocation2 + $0x28] sm:$0xf] %vm1880_vm12, %v2020_v41  ;;  %v1753_v35 = vpop.f32.mrf.mxu0  ;;  %v2531_v2 = vsel %vm8726_vm13, %v2526_v24, %v2530_v7  ;;  %v2533_v46 = vshrl.u32 %v2415_v9, 16  ;;  %v2536_v30 = vshll.u32 %v2415_v9, 16  ;;  %v3696_v51 = vrot.slane %v3694_v40, 4 }
 0x220   : > { %2317 = vst [vmem:[#allocation2 + $0x2c] sm:$0x1] %v2316_v52  ;;  %v2023_v21 = vshrl.u32 %v1942_v3, 16  ;;  %v1754_v56 = vadd.f32 %v8575_v10, %v1753_v35  ;;  %v4309_v17 = vunpack.c.l.b16 %v2531_v2  ;;  %v2026_v11 = vshll.u32 %v1942_v3, 16 }
 0x221   : > { %v2535_v33 = vrot.slane %v2533_v46, 4  ;;  %v2538_v43 = vrot.slane %v2536_v30, 5  ;;  %v3700_v45 = vshll.u32 %v8795_v49, 16  ;;  %v4592_v4 = vpack.c.b16 %v8793_v26, %v8801_v44  ;;  %v3455_v46 = vld [vmem:[#allocation2 + $0xc] sm:$0xe] }
 0x222   : > { %v2025_v53 = vrot.slane %v2023_v21, 7  ;;  %v1823_v34 = vmul.f32 0.01, %v1754_v56  ;;  %v4338_v6 = vpack.c.b16 %v4309_v17, %v4308_v54  ;;  %v3688_v7 = vrot.slane %v3687_v14, 4  ;;  %v2322_v30 = vld [vmem:[#allocation2 + $0x38] sm:$0x1] }
 0x223   : > { %v2539_v55 = vor.u32 %v2538_v43, %v2535_v33  ;;  %v3697_v13 = vor.u32 %v3696_v51, %v3692_v28  ;;  %v3702_v17 = vrot.slane %v3700_v45, 5  ;;  %v3521_v59 = vrot.slane %v8750_v15, 5  ;;  %v4064_v26 = vld [vmem:[#allocation2 + $0x18] sm:$0xe] }
 0x224   : > { %v2028_v63 = vor.u32 %v2026_v11, %v2025_v53  ;;  %v1855_v38 = vmax.f32 %v1754_v56, %v1823_v34  ;;  %4356 = vrot.lane.b32.xlu1 %v4338_v6, %s6865_s8  ;;  %v2029_v20 = vrot.slane %v2025_v53, 4  ;;  %v3693_v54 = vsel %vm8726_vm13, %v3688_v7, %v3692_v28 }
 0x225   : > { %v2540_v41 = vrot.slane %v2539_v55, 4  ;;  %v3698_v22 = vrot.slane %v3697_v13, 4  ;;  %v8815_v6 = vunpack.c.l.b16 %v3693_v54  ;;  %v5810_v57 = vrot.slane %v3455_v46, 9 }
 0x226   : > { %v2319_v36 = vsel %vm8650_vm15, %v2028_v63, %v2318_v29  ;;  %v1943_v31 = vpack.c.bf16 %v1855_v38, %v1855_v38  ;;  %v2416_v42 = vld [vmem:[#allocation2 + $0x28] sm:$0xf] }
 0x227   : > { %2320 = vst [vmem:[#allocation2 + $0x30] sm:$0xf] %v2319_v36  ;;  %v1756_v25 = vpop.f32.mrf.mxu0  ;;  %v2444_v1 = vld [vmem:[#allocation2 + $0x2c] sm:$0x1]  ;;  %v2542_v18 = vshll.u32 %v2416_v42, 16  ;;  %v2546_v37 = vshrl.u32 %v2416_v42, 16  ;;  %v3703_v45 = vsel %vm8726_vm13, %v3698_v22, %v3702_v17 }
 0x228   : > { %v2031_v48 = vshrl.u32 %v1943_v31, 16  ;;  %v1757_v24 = vadd.f32 %v8575_v10, %v1756_v25  ;;  %v2552_v9 = vshll.u32 %v2444_v1, 16  ;;  %v2034_v35 = vshll.u32 %v1943_v31, 16 }
 0x229   : > { %v2544_v52 = vrot.slane %v2542_v18, 5  ;;  %v2548_v3 = vrot.slane %v2546_v37, 4  ;;  %v3522_v18 = vsel %vm8823_vm1, %v5810_v57, %v3521_v59  ;;  %v3524_v37 = vrot.slane %v8756_v8, 5 }
 0x22a   : > { %v2033_v27 = vrot.slane %v2031_v48, 7  ;;  %v1824_v2 = vmul.f32 0.01, %v1757_v24  ;;  %v2554_v34 = vrot.slane %v2552_v9, 5  ;;  %v2845_v48 = vld [vmem:[#allocation2 + $0xc] sm:$0xe]  ;;  %v4640_v8 = vunpack.c.l.b16 %v3522_v18 }
 0x22b   : > { %v2545_v21 = vsel %vm8726_vm13, %v2540_v41, %v2544_v52  ;;  %v2549_v56 = vor.u32 %v2548_v3, %v2544_v52  ;;  %v6119_v41 = vld [vmem:[#allocation2 + $0x18] sm:$0xff]  ;;  %v8836_v3 = vunpack.c.l.b16 %v3703_v45  ;;  %v5795_v46 = vrot.slane %v2845_v48, 9  ;;  %v2329_v45 = vld [vmem:[#allocation2 + $0x44] sm:$0x1] }
 0x22c   : > { %v2036_v11 = vor.u32 %v2034_v35, %v2033_v27  ;;  %v2038_v33 = vrot.slane %v2033_v27, 4  ;;  %v1856_v43 = vmax.f32 %v1757_v24, %v1824_v2  ;;  %4528 = vrot.lane.b32.xlu1 %v6103_v19, %s6870_s13  ;;  %v4310_v63 = vunpack.c.l.b16 %v2545_v21  ;;  %v2325_v52 = vld [vmem:[#allocation2 + $0x3c] sm:$0xf] }
 0x22d   : > { %v2550_v53 = vrot.slane %v2549_v56, 4  ;;  %v2920_v35 = vrot.slane %v8715_v47, 5  ;;  %v2923_v17 = vrot.slane %v8719_v39, 5  ;;  %v2913_v22 = vrot.slane %v8701_v50, 5 }
 0x22e   : > { %v2037_v29 = vsel %vm8673_vm4, %v2029_v20, %v2036_v11  ;;  %v2323_v58 = vsel %vm8681_vm7, %v2038_v33, %v2322_v30  ;;  %v1944_v40 = vpack.c.bf16 %v1856_v43, %v1856_v43  ;;  %v2417_v15 = vld [vmem:[#allocation2 + $0x30] sm:$0xf]  ;;  %v3523_v20 = vrot.slane %v3521_v59, 4  ;;  %v2844_v43 = vld [vmem:[#allocation2] sm:$0xe] }
 0x22f   : > { %2321 = vst.msk [vmem:[#allocation2 + $0x34] sm:$0xf] %vm1880_vm12, %v2037_v29  ;;  %v1758_v14 = vpop.f32.mrf.mxu0  ;;  %v2555_v55 = vsel %vm8726_vm13, %v2550_v53, %v2554_v34  ;;  %v2557_v28 = vshrl.u32 %v2417_v15, 16  ;;  %v2560_v51 = vshll.u32 %v2417_v15, 16  ;;  %v2922_v56 = vrot.slane %v2920_v35, 4 }
 0x230   : > { %2324 = vst [vmem:[#allocation2 + $0x38] sm:$0x1] %v2323_v58  ;;  %v2040_v36 = vshrl.u32 %v1944_v40, 16  ;;  %v1759_v31 = vadd.f32 %v8575_v10, %v1758_v14  ;;  %v4311_v42 = vunpack.c.l.b16 %v2555_v55  ;;  %v2043_v7 = vshll.u32 %v1944_v40, 16 }
 0x231   : > { %v2559_v25 = vrot.slane %v2557_v28, 4  ;;  %v2562_v1 = vrot.slane %v2560_v51, 5  ;;  %v3525_v27 = vsel %vm8823_vm1, %v3523_v20, %v3524_v37  ;;  %v4848_v34 = vpack.c.b16 %v8836_v3, %v8815_v6 }
 0x232   : > { %v2042_v24 = vrot.slane %v2040_v36, 7  ;;  %v1825_v13 = vmul.f32 0.01, %v1759_v31  ;;  %v4339_v19 = vpack.c.b16 %v4311_v42, %v4310_v63  ;;  %v4641_v21 = vunpack.c.l.b16 %v3525_v27 }
 0x233   : > { %v2563_v9 = vor.u32 %v2562_v1, %v2559_v25  ;;  %v2924_v39 = vsel %vm8823_vm1, %v2922_v56, %v2923_v17  ;;  %v2921_v14 = vsel %vm8823_vm1, %v5795_v46, %v2920_v35  ;;  %v5794_v28 = vrot.slane %v2844_v43, 9 }
 0x234   : > { %v2045_v2 = vor.u32 %v2043_v7, %v2042_v24  ;;  %v1857_v54 = vmax.f32 %v1759_v31, %v1825_v13  ;;  %4358 = vrot.lane.b32.xlu2 %v4339_v19, %s6865_s8  ;;  %4784 = vrot.lane.b32.xlu1 %v6119_v41, %s6873_s23  ;;  %v2046_v30 = vrot.slane %v2042_v24, 4  ;;  %v8854_v51 = vpack.c.b16 %v4641_v21, %v4640_v8 }
 0x235   : > { %v2564_v47 = vrot.slane %v2563_v9, 4  ;;  %v2915_v42 = vrot.slane %v2913_v22, 4  ;;  %v2916_v18 = vrot.slane %v8717_v16, 5  ;;  %v4386_v37 = vunpack.c.l.b16 %v2921_v14 }
 0x236   : > { %v2326_v59 = vsel %vm8650_vm15, %v2045_v2, %v2325_v52  ;;  %v1945_v11 = vpack.c.bf16 %v1857_v54, %v1857_v54  ;;  %v2418_v33 = vld [vmem:[#allocation2 + $0x34] sm:$0xf]  ;;  %v2914_v52 = vsel %vm8823_vm1, %v5794_v28, %v2913_v22  ;;  %v4387_v9 = vunpack.c.l.b16 %v2924_v39 }
 0x237   : > { %2327 = vst [vmem:[#allocation2 + $0x3c] sm:$0xf] %v2326_v59  ;;  %v1761_v53 = vpop.f32.mrf.mxu0  ;;  %v2445_v57 = vld [vmem:[#allocation2 + $0x38] sm:$0x1]  ;;  %v2566_v29 = vshll.u32 %v2418_v33, 16  ;;  %v2570_v58 = vshrl.u32 %v2418_v33, 16  ;;  %v2917_v2 = vsel %vm8823_vm1, %v2915_v42, %v2916_v18 }
 0x238   : > { %v2048_v40 = vshrl.u32 %v1945_v11, 16  ;;  %v1762_v63 = vadd.f32 %v8575_v10, %v1761_v53  ;;  %v2576_v15 = vshll.u32 %v2445_v57, 16  ;;  %v2051_v36 = vshll.u32 %v1945_v11, 16  ;;  %v8877_v33 = vld [vmem:[#allocation2 + $0x1c] sm:$0xf] }
 0x239   : > { %v2568_v55 = vrot.slane %v2566_v29, 5  ;;  %v2572_v50 = vrot.slane %v2570_v58, 4  ;;  %v8874_v21 = vpack.c.b16 %v4387_v9, %v4386_v37  ;;  %v4384_v11 = vunpack.c.l.b16 %v2914_v52 }
 0x23a   : > { %v2050_v20 = vrot.slane %v2048_v40, 7  ;;  %v1826_v31 = vmul.f32 0.01, %v1762_v63  ;;  %v2578_v13 = vrot.slane %v2576_v15, 5  ;;  %v5826_v53 = vrot.slane %v4064_v26, 9 }
 0x23b   : > { %v2569_v25 = vsel %vm8726_vm13, %v2564_v47, %v2568_v55  ;;  %v2573_v1 = vor.u32 %v2572_v50, %v2568_v55  ;;  %v4130_v39 = vrot.slane %v8791_v32, 5  ;;  %v2332_v40 = vld [vmem:[#allocation2 + $0x48] sm:$0xf]  ;;  %v3528_v55 = vrot.slane %v8877_v33, 5 }
 0x23c   : > { %v2053_v48 = vor.u32 %v2051_v36, %v2050_v20  ;;  %v2055_v24 = vrot.slane %v2050_v20, 4  ;;  %v1858_v7 = vmax.f32 %v1762_v63, %v1826_v31  ;;  %4608 = vrot.lane.b32.xlu2 %v4592_v4, %s6871_s14  ;;  %v4312_v41 = vunpack.c.l.b16 %v2569_v25 }
 0x23d   : > { %v2574_v19 = vrot.slane %v2573_v1, 4  ;;  %v4385_v63 = vunpack.c.l.b16 %v2917_v2  ;;  %v8891_v32 = vsel %vm8823_vm1, %v5826_v53, %v4130_v39  ;;  %v4133_v20 = vrot.slane %v8795_v49, 5 }
 0x23e   : > { %v2054_v27 = vsel %vm8673_vm4, %v2046_v30, %v2053_v48  ;;  %v2330_v16 = vsel %vm8681_vm7, %v2055_v24, %v2329_v45  ;;  %v1946_v35 = vpack.c.bf16 %v1858_v7, %v1858_v7  ;;  %v2419_v54 = vld [vmem:[#allocation2 + $0x3c] sm:$0xf]  ;;  %v3456_v30 = vld [vmem:[#allocation2 + $0x18] sm:$0xe]  ;;  %v4132_v45 = vrot.slane %v4130_v39, 4 }
 0x23f   : > { %2328 = vst.msk [vmem:[#allocation2 + $0x40] sm:$0xf] %vm1880_vm12, %v2054_v27  ;;  %v1763_v44 = vpop.f32.mrf.mxu0  ;;  %v2579_v4 = vsel %vm8726_vm13, %v2574_v19, %v2578_v13  ;;  %v2581_v8 = vshrl.u32 %v2419_v54, 16  ;;  %v2584_v46 = vshll.u32 %v2419_v54, 16  ;;  %v5811_v14 = vrot.slane %v3456_v30, 9 }
 0x240   : > { %2331 = vst [vmem:[#allocation2 + $0x44] sm:$0x1] %v2330_v16  ;;  %v2057_v56 = vshrl.u32 %v1946_v35, 16  ;;  %v1764_v17 = vadd.f32 %v8575_v10, %v1763_v44  ;;  %v4313_v59 = vunpack.c.l.b16 %v2579_v4  ;;  %v2060_v47 = vshll.u32 %v1946_v35, 16  ;;  %v8908_v27 = vld [vmem:[#allocation2 + $0x20] sm:$0x1] }
 0x241   : > { %v2583_v43 = vrot.slane %v2581_v8, 4  ;;  %v2586_v22 = vrot.slane %v2584_v46, 5  ;;  %v8897_v25 = vsel %vm8823_vm1, %v5811_v14, %v3528_v55  ;;  %v3530_v18 = vrot.slane %v3528_v55, 4  ;;  %v6104_v46 = vld [vmem:[#allocation2 + $0x18] sm:$0xff]  ;;  %v2336_v30 = vld [vmem:[#allocation2 + $0x50] sm:$0x1] }
 0x242   : > { %v8879_v57 = vrot.slane %v2057_v56, 7  ;;  %v1827_v29 = vmul.f32 0.01, %v1764_v17  ;;  %v4340_v58 = vpack.c.b16 %v4313_v59, %v4312_v41  ;;  %v4416_v49 = vpack.c.b16 %v4385_v63, %v4384_v11 }
 0x243   : > { %v2587_v15 = vor.u32 %v2586_v22, %v2583_v43  ;;  %v4896_v13 = vunpack.c.l.b16 %v8891_v32  ;;  %v4134_v9 = vsel %vm8823_vm1, %v4132_v45, %v4133_v20  ;;  %v4642_v54 = vunpack.c.l.b16 %v8897_v25  ;;  %v2381_v45 = vld [vmem:[#allocation2 + $0x9c] sm:$0xf] }
 0x244   : > { %v2062_v50 = vor.u32 %v2060_v47, %v8879_v57  ;;  %v1859_v28 = vmax.f32 %v1764_v17, %v1827_v29  ;;  %4864 = vrot.lane.b32.xlu2 %v4848_v34, %s6874_s26  ;;  %4360 = vrot.lane.b32.xlu0 %v4340_v58, %s6865_s8  ;;  %v2063_v36 = vrot.slane %v8879_v57, 4  ;;  %v4897_v17 = vunpack.c.l.b16 %v4134_v9 }
 0x245   : > { %v1796_v31 = vpop.f32.mrf.mxu3  ;;  %v2588_v42 = vrot.slane %v2587_v15, 4  ;;  %v3531_v59 = vrot.slane %v8908_v27, 5 }
 0x246   : > { %v2333_v6 = vsel %vm8650_vm15, %v2062_v50, %v2332_v40  ;;  %v1947_v3 = vpack.c.bf16 %v1859_v28, %v1859_v28  ;;  %v1797_v34 = vadd.f32 %v8575_v10, %v1796_v31  ;;  %v2420_v1 = vld [vmem:[#allocation2 + $0x40] sm:$0xf]  ;;  %v8919_v40 = vld [vmem:[#allocation2 + $0x18] sm:$0xf] }
 0x247   : > { %2334 = vst [vmem:[#allocation2 + $0x48] sm:$0xf] %v2333_v6  ;;  %v1766_v37 = vpop.f32.mrf.mxu0  ;;  %v8902_v48 = vld [vmem:[#allocation2 + $0x44] sm:$0x1]  ;;  %v2590_v24 = vshll.u32 %v2420_v1, 16  ;;  %v2594_v7 = vshrl.u32 %v2420_v1, 16  ;;  %v3532_v39 = vsel %vm8823_vm1, %v3530_v18, %v3531_v59 }
 0x248   : > { %v2065_v19 = vshrl.u32 %v1947_v3, 16  ;;  %v1840_v41 = vmul.f32 0.01, %v1797_v34  ;;  %v1767_v52 = vadd.f32 %v8575_v10, %v1766_v37  ;;  %v2600_v2 = vshll.u32 %v8902_v48, 16  ;;  %v8929_v28 = vld [vmem:[%s10409_s2] ss:$0 sm:$0xff] }
 0x249   : > { %v2592_v16 = vrot.slane %v2590_v24, 5  ;;  %v2596_v35 = vrot.slane %v2594_v7, 4  ;;  %v2068_v44 = vshll.u32 %v1947_v3, 16  ;;  %v3096_v3 = vshrl.u32 %v8919_v40, 16 }
 0x24a   : > { %v2067_v26 = vrot.slane %v2065_v19, 7  ;;  %v1872_v4 = vmax.f32 %v1797_v34, %v1840_v41  ;;  %v1828_v8 = vmul.f32 0.01, %v1767_v52  ;;  %v2602_v29 = vrot.slane %v2600_v2, 5  ;;  %v6120_v41 = vld [vmem:[#allocation2 + $0x24] sm:$0xff] }
 0x24b   : > { %v2593_v10 = vsel %vm8726_vm13, %v2588_v42, %v2592_v16  ;;  %v2597_v56 = vor.u32 %v2596_v35, %v2592_v16  ;;  %v8938_v37 = vpack.c.b16 %v4897_v17, %v4896_v13  ;;  %v2339_v13 = vld [vmem:[#allocation2 + $0x54] sm:$0xf] }
 0x24c   : > { %v2070_v11 = vor.u32 %v2068_v44, %v2067_v26  ;;  %v2072_v47 = vrot.slane %v2067_v26, 4  ;;  %v1960_v43 = vpack.c.bf16 %v1872_v4, %v1872_v4  ;;  %v1860_v22 = vmax.f32 %v1767_v52, %v1828_v8  ;;  %4530 = vrot.lane.b32.xlu2 %v6104_v46, %s6870_s13  ;;  %4432 = vrot.lane.b32.xlu0 %v4416_v49, %s6867_s10 }
 0x24d   : > { %v1798_v53 = vpop.f32.mrf.mxu3  ;;  %v2598_v57 = vrot.slane %v2597_v56, 4  ;;  %v4314_v58 = vunpack.c.l.b16 %v2593_v10  ;;  %v8950_v8 = vrot.slane %v3096_v3, 4  ;;  %v3099_v56 = vshll.u32 %v8919_v40, 16  ;;  %v2343_v3 = vld [vmem:[#allocation2 + $0x5c] sm:$0x1] }
 0x24e   : > { %v2071_v63 = vsel %vm8673_vm4, %v2063_v36, %v2070_v11  ;;  %v2337_v15 = vsel %vm8681_vm7, %v2072_v47, %v2336_v30  ;;  %v2176_v14 = vshrl.u32 %v1960_v43, 16  ;;  %v2179_v55 = vshll.u32 %v1960_v43, 16  ;;  %v2421_v49 = vld [vmem:[#allocation2 + $0x48] sm:$0xf] }
 0x24f   : > { %2335 = vst.msk [vmem:[#allocation2 + $0x4c] sm:$0xf] %vm1880_vm12, %v2071_v63  ;;  %v1948_v50 = vpack.c.bf16 %v1860_v22, %v1860_v22  ;;  %v1799_v32 = vadd.f32 %v8929_v28, %v1798_v53  ;;  %v1768_v20 = vpop.f32.mrf.mxu0  ;;  %v2603_v31 = vsel %vm8726_vm13, %v2598_v57, %v2602_v29  ;;  %v4643_v36 = vunpack.c.l.b16 %v3532_v39 }
 0x250   : > { %2338 = vst [vmem:[#allocation2 + $0x50] sm:$0x1] %v2337_v15  ;;  %v8934_v42 = vrot.slane %v2176_v14, 7  ;;  %v1769_v25 = vadd.f32 %v8929_v28, %v1768_v20  ;;  %v4315_v6 = vunpack.c.l.b16 %v2603_v31  ;;  %v2605_v35 = vshrl.u32 %v2421_v49, 16  ;;  %v2385_v20 = vld [vmem:[#allocation2 + $0xa4] sm:$0x1] }
 0x251   : > { %v2074_v34 = vshrl.u32 %v1948_v50, 16  ;;  %v2077_v1 = vshll.u32 %v1948_v50, 16  ;;  %v1841_v18 = vmul.f32 0.01, %v1799_v32  ;;  %v8941_v52 = vpack.c.b16 %v4643_v36, %v4642_v54 }
 0x252   : > { %v2181_v24 = vor.u32 %v2179_v55, %v8934_v42  ;;  %v1829_v7 = vmul.f32 0.01, %v1769_v25  ;;  %v4341_v19 = vpack.c.b16 %v4315_v6, %v4314_v58  ;;  %v2608_v2 = vshll.u32 %v2421_v49, 16 }
 0x253   : > { %v8943_v9 = vrot.slane %v2074_v34, 7  ;;  %v1873_v16 = vmax.f32 %v1799_v32, %v1841_v18  ;;  %v2182_v26 = vrot.slane %v8934_v42, 4  ;;  %v2607_v10 = vrot.slane %v2605_v35, 4 }
 0x254   : > { %v2382_v44 = vsel %vm8650_vm15, %v2181_v24, %v2381_v45  ;;  %v1861_v4 = vmax.f32 %v1769_v25, %v1829_v7  ;;  %4362 = vrot.lane.b32.xlu1 %v4341_v19, %s6865_s8  ;;  %4786 = vrot.lane.b32.xlu2 %v6120_v41, %s6873_s23  ;;  %v2610_v43 = vrot.slane %v2608_v2, 5 }
 0x255   : > { %2383 = vst [vmem:[#allocation2 + $0x9c] sm:$0xf] %v2382_v44  ;;  %v2079_v54 = vor.u32 %v2077_v1, %v8943_v9  ;;  %v1961_v46 = vpack.c.bf16 %v1873_v16, %v1873_v16  ;;  %4688 = vrot.lane.b32.xlu0 %v8854_v51, %s6875_s29  ;;  %v1801_v30 = vpop.f32.mrf.mxu3  ;;  %v2080_v17 = vrot.slane %v8943_v9, 4  ;;  %v3101_v44 = vrot.slane %v3099_v56, 5 }
 0x256   : > { %v1949_v59 = vpack.c.bf16 %v1861_v4, %v1861_v4  ;;  %v1802_v11 = vadd.f32 %v8929_v28, %v1801_v30  ;;  %v2422_v47 = vld [vmem:[#allocation2 + $0x4c] sm:$0xf]  ;;  %v2611_v55 = vor.u32 %v2610_v43, %v2607_v10 }
 0x257   : > { %v2340_v22 = vsel %vm8650_vm15, %v2079_v54, %v2339_v13  ;;  %v2184_v53 = vshrl.u32 %v1961_v46, 16  ;;  %v2187_v57 = vshll.u32 %v1961_v46, 16  ;;  %v1771_v29 = vpop.f32.mrf.mxu0  ;;  %v2447_v58 = vld [vmem:[#allocation2 + $0x50] sm:$0x1]  ;;  %v2614_v39 = vshll.u32 %v2422_v47, 16  ;;  %v6123_v12 = vld [vmem:[#allocation2 + $0x48] sm:$0xff] }
 0x258   : > { %2341 = vst [vmem:[#allocation2 + $0x54] sm:$0xf] %v2340_v22  ;;  %v2082_v51 = vshrl.u32 %v1949_v59, 16  ;;  %v2085_v63 = vshll.u32 %v1949_v59, 16  ;;  %v1842_v15 = vmul.f32 0.01, %v1802_v11  ;;  %v1772_v40 = vadd.f32 %v8929_v28, %v1771_v29 }
 0x259   : > { %v2186_v14 = vrot.slane %v2184_v53, 7  ;;  %v2616_v50 = vrot.slane %v2614_v39, 5  ;;  %v2618_v32 = vshrl.u32 %v2422_v47, 16  ;;  %v2624_v45 = vshll.u32 %v2447_v58, 16  ;;  %v2388_v59 = vld [vmem:[#allocation2 + $0xa8] sm:$0xf] }
 0x25a   : > { %v2084_v31 = vrot.slane %v2082_v51, 7  ;;  %v1874_v36 = vmax.f32 %v1802_v11, %v1842_v15  ;;  %v1830_v42 = vmul.f32 0.01, %v1772_v40  ;;  %v2612_v34 = vrot.slane %v2611_v55, 4 }
 0x25b   : > { %v2189_v25 = vor.u32 %v2187_v57, %v2186_v14  ;;  %v2191_v6 = vrot.slane %v2186_v14, 4  ;;  %v2620_v1 = vrot.slane %v2618_v32, 4  ;;  %v2626_v46 = vrot.slane %v2624_v45, 5  ;;  %v2346_v14 = vld [vmem:[#allocation2 + $0x60] sm:$0xf] }
 0x25c   : > { %v2087_v18 = vor.u32 %v2085_v63, %v2084_v31  ;;  %v2089_v49 = vrot.slane %v2084_v31, 4  ;;  %v1962_v24 = vpack.c.bf16 %v1874_v36, %v1874_v36  ;;  %v1862_v7 = vmax.f32 %v1772_v40, %v1830_v42  ;;  %4434 = vrot.lane.b32.xlu1 %v8874_v21, %s6867_s10 }
 0x25d   : > { %v2190_v19 = vsel %vm8673_vm4, %v2182_v26, %v2189_v25  ;;  %v2386_v41 = vsel %vm8681_vm7, %v2191_v6, %v2385_v20  ;;  %4944 = vrot.lane.b32.xlu0 %v8938_v37, %s6876_s30  ;;  %v1803_v9 = vpop.f32.mrf.mxu3  ;;  %v2617_v16 = vsel %vm8726_vm13, %v2612_v34, %v2616_v50  ;;  %v2621_v35 = vor.u32 %v2620_v1, %v2616_v50 }
 0x25e   : > { %2384 = vst.msk [vmem:[#allocation2 + $0xa0] sm:$0xf] %vm1880_vm12, %v2190_v19  ;;  %v2088_v21 = vsel %vm8673_vm4, %v2080_v17, %v2087_v18  ;;  %v2344_v2 = vsel %vm8681_vm7, %v2089_v49, %v2343_v3  ;;  %v2193_v26 = vshrl.u32 %v1962_v24, 16  ;;  %v1950_v13 = vpack.c.bf16 %v1862_v7, %v1862_v7  ;;  %v2846_v49 = vld [vmem:[#allocation2 + $0x18] sm:$0xe] }
 0x25f   : > { %2387 = vst [vmem:[#allocation2 + $0xa4] sm:$0x1] %v2386_v41  ;;  %v1804_v4 = vadd.f32 %v8929_v28, %v1803_v9  ;;  %v1773_v37 = vpop.f32.mrf.mxu0  ;;  %v2622_v54 = vrot.slane %v2621_v35, 4  ;;  %v2196_v10 = vshll.u32 %v1962_v24, 16  ;;  %v4316_v11 = vunpack.c.l.b16 %v2617_v16 }
 0x260   : > { %2342 = vst.msk [vmem:[#allocation2 + $0x58] sm:$0xf] %vm1880_vm12, %v2088_v21  ;;  %v8978_v30 = vrot.slane %v2193_v26, 7  ;;  %v1774_v17 = vadd.f32 %v8929_v28, %v1773_v37  ;;  %v2091_v47 = vshrl.u32 %v1950_v13, 16  ;;  %v2094_v43 = vshll.u32 %v1950_v13, 16 }
 0x261   : > { %2345 = vst [vmem:[#allocation2 + $0x5c] sm:$0x1] %v2344_v2  ;;  %v1843_v56 = vmul.f32 0.01, %v1804_v4  ;;  %v2627_v22 = vsel %vm8726_vm13, %v2622_v54, %v2626_v46  ;;  %v3102_v63 = vor.u32 %v3101_v44, %v8950_v8  ;;  %v3105_v15 = vshll.u32 %v8877_v33, 16 }
 0x262   : > { %v2198_v53 = vor.u32 %v2196_v10, %v8978_v30  ;;  %v2199_v57 = vrot.slane %v8978_v30, 4  ;;  %v1831_v29 = vmul.f32 0.01, %v1774_v17  ;;  %v4317_v58 = vunpack.c.l.b16 %v2627_v22  ;;  %v2392_v21 = vld [vmem:[#allocation2 + $0xb0] sm:$0x1] }
 0x263   : > { %v2093_v39 = vrot.slane %v2091_v47, 7  ;;  %v1875_v51 = vmax.f32 %v1804_v4, %v1843_v56  ;;  %v3109_v32 = vshrl.u32 %v8877_v33, 16  ;;  %v3103_v42 = vrot.slane %v3102_v63, 4  ;;  %v2350_v54 = vld [vmem:[#allocation2 + $0x68] sm:$0x1] }
 0x264   : > { %v2389_v40 = vsel %vm8650_vm15, %v2198_v53, %v2388_v59  ;;  %v1863_v55 = vmax.f32 %v1774_v17, %v1831_v29  ;;  %v4342_v50 = vpack.c.b16 %v4317_v58, %v4316_v11  ;;  %4690 = vrot.lane.b32.xlu1 %v8941_v52, %s6875_s29  ;;  %v3107_v25 = vrot.slane %v3105_v15, 5  ;;  %v3635_v53 = vld [vmem:[#allocation2 + $0x28] sm:$0xf] }
 0x265   : > { %2390 = vst [vmem:[#allocation2 + $0xa8] sm:$0xf] %v2389_v40  ;;  %v2096_v20 = vor.u32 %v2094_v43, %v2093_v39  ;;  %v2097_v31 = vrot.slane %v2093_v39, 4  ;;  %v1963_v36 = vpack.c.bf16 %v1875_v51, %v1875_v51  ;;  %v1806_v45 = vpop.f32.mrf.mxu3  ;;  %v3111_v6 = vrot.slane %v3109_v32, 4  ;;  %v4065_v51 = vld [vmem:[#allocation2 + $0x24] sm:$0xe] }
 0x266   : > { %v1951_v8 = vpack.c.bf16 %v1863_v55, %v1863_v55  ;;  %4364 = vrot.lane.b32.xlu2 %v4342_v50, %s6865_s8  ;;  %v3115_v3 = vshll.u32 %v8908_v27, 16  ;;  %v1807_v33 = vadd.f32 %v8929_v28, %v1806_v45  ;;  %v3108_v19 = vsel %vm8726_vm13, %v3103_v42, %v3107_v25 }
 0x267   : > { %v2347_v34 = vsel %vm8650_vm15, %v2096_v20, %v2346_v14  ;;  %v2201_v1 = vshrl.u32 %v1963_v36, 16  ;;  %v2204_v52 = vshll.u32 %v1963_v36, 16  ;;  %v1776_v18 = vpop.f32.mrf.mxu0  ;;  %v3112_v41 = vor.u32 %v3111_v6, %v3107_v25  ;;  %v3665_v14 = vld [vmem:[#allocation2 + $0x2c] sm:$0x1] }
 0x268   : > { %2348 = vst [vmem:[#allocation2 + $0x60] sm:$0xf] %v2347_v34  ;;  %v2099_v24 = vshrl.u32 %v1951_v8, 16  ;;  %v2102_v7 = vshll.u32 %v1951_v8, 16  ;;  %v3117_v16 = vrot.slane %v3115_v3, 5  ;;  %v4562_v35 = vunpack.c.l.b16 %v3108_v19 }
 0x269   : > { %v2203_v9 = vrot.slane %v2201_v1, 7  ;;  %v1844_v27 = vmul.f32 0.01, %v1807_v33  ;;  %v3113_v26 = vrot.slane %v3112_v41, 4  ;;  %v1777_v44 = vadd.f32 %v8929_v28, %v1776_v18  ;;  %v2395_v8 = vld [vmem:[#allocation2 + $0xb4] sm:$0xf] }
 0x26a   : > { %v2101_v2 = vrot.slane %v2099_v24, 7  ;;  %v5796_v13 = vrot.slane %v2846_v49, 9  ;;  %v2927_v30 = vrot.slane %v8762_v62, 5  ;;  %v4137_v20 = vrot.slane %v3635_v53, 5  ;;  %v2353_v41 = vld [vmem:[#allocation2 + $0x6c] sm:$0xf] }
 0x26b   : > { %v2206_v4 = vor.u32 %v2204_v52, %v2203_v9  ;;  %v2208_v37 = vrot.slane %v2203_v9, 4  ;;  %v1876_v46 = vmax.f32 %v1807_v33, %v1844_v27  ;;  %v3118_v17 = vsel %vm8726_vm13, %v3113_v26, %v3117_v16 }
 0x26c   : > { %v2104_v10 = vor.u32 %v2102_v7, %v2101_v2  ;;  %v2106_v59 = vrot.slane %v2101_v2, 4  ;;  %v1832_v11 = vmul.f32 0.01, %v1777_v44  ;;  %v4563_v56 = vunpack.c.l.b16 %v3118_v17 }
 0x26d   : > { %v2207_v47 = vsel %vm8673_vm4, %v2199_v57, %v2206_v4  ;;  %v2393_v43 = vsel %vm8681_vm7, %v2208_v37, %v2392_v21  ;;  %v1964_v22 = vpack.c.bf16 %v1876_v46, %v1876_v46  ;;  %v2928_v39 = vsel %vm8823_vm1, %v5796_v13, %v2927_v30  ;;  %v3634_v57 = vld [vmem:[#allocation2 + $0x24] sm:$0xf]  ;;  %v1808_v7 = vpop.f32.mrf.mxu3  ;;  %v3028_v4 = vld [vmem:[#allocation2 + $0x28] sm:$0xf] }
 0x26e   : > { %2391 = vst.msk [vmem:[#allocation2 + $0xac] sm:$0xf] %vm1880_vm12, %v2207_v47  ;;  %v2105_v62 = vsel %vm8673_vm4, %v2097_v31, %v2104_v10  ;;  %v2351_v29 = vsel %vm8681_vm7, %v2106_v59, %v2350_v54  ;;  %v1864_v58 = vmax.f32 %v1777_v44, %v1832_v11  ;;  %v4593_v63 = vpack.c.b16 %v4563_v56, %v4562_v35  ;;  %v3457_v21 = vld [vmem:[#allocation2 + $0x24] sm:$0xe]  ;;  %v9035_v10 = vld [vmem:[#allocation2 + $0x2c] sm:$0x1] }
 0x26f   : > { %2394 = vst [vmem:[#allocation2 + $0xb0] sm:$0x1] %v2393_v43  ;;  %v2210_v15 = vshrl.u32 %v1964_v22, 16  ;;  %v2929_v40 = vrot.slane %v2927_v30, 4  ;;  %v2213_v55 = vshll.u32 %v1964_v22, 16  ;;  %v4388_v32 = vunpack.c.l.b16 %v2928_v39  ;;  %v1778_v27 = vpop.f32.mrf.mxu0 }
 0x270   : > { %2349 = vst.msk [vmem:[#allocation2 + $0x64] sm:$0xf] %vm1880_vm12, %v2105_v62  ;;  %v1952_v50 = vpack.c.bf16 %v1864_v58, %v1864_v58  ;;  %4610 = vrot.lane.b32.xlu0 %v4593_v63, %s6871_s14  ;;  %v5827_v42 = vrot.slane %v4065_v51, 9  ;;  %v3705_v45 = vshrl.u32 %v3634_v57, 16  ;;  %v4140_v34 = vrot.slane %v3665_v14, 5 }
 0x271   : > { %2352 = vst [vmem:[#allocation2 + $0x68] sm:$0x1] %v2351_v29  ;;  %v9016_v31 = vrot.slane %v2210_v15, 7  ;;  %v2931_v36 = vsel %vm8823_vm1, %v2929_v40, %v2930_v61  ;;  %v4139_v18 = vrot.slane %v4137_v20, 4  ;;  %v3708_v61 = vshll.u32 %v3634_v57, 16 }
 0x272   : > { %v2108_v25 = vshrl.u32 %v1952_v50, 16  ;;  %v2111_v6 = vshll.u32 %v1952_v50, 16  ;;  %v4389_v3 = vunpack.c.l.b16 %v2931_v36  ;;  %v4138_v33 = vsel %vm8823_vm1, %v5827_v42, %v4137_v20  ;;  %v3027_v43 = vld [vmem:[#allocation2 + $0x24] sm:$0xf] }
 0x273   : > { %v2215_v1 = vor.u32 %v2213_v55, %v9016_v31  ;;  %v2216_v52 = vrot.slane %v9016_v31, 4  ;;  %v3707_v24 = vrot.slane %v3705_v45, 4  ;;  %v4141_v9 = vsel %vm8823_vm1, %v4139_v18, %v4140_v34 }
 0x274   : > { %v9026_v49 = vrot.slane %v2108_v25, 7  ;;  %v4418_v5 = vpack.c.b16 %v4389_v3, %v4388_v32  ;;  %v3714_v16 = vshll.u32 %v3635_v53, 16  ;;  %v3718_v35 = vshrl.u32 %v3635_v53, 16 }
 0x275   : > { %v2396_v19 = vsel %vm8650_vm15, %v2215_v1, %v2395_v8  ;;  %v4898_v26 = vunpack.c.l.b16 %v4138_v33  ;;  %v4899_v44 = vunpack.c.l.b16 %v4141_v9  ;;  %v3710_v13 = vrot.slane %v3708_v61, 5 }
 0x276   : > { %2397 = vst [vmem:[#allocation2 + $0xb4] sm:$0xf] %v2396_v19  ;;  %v2113_v2 = vor.u32 %v2111_v6, %v9026_v49  ;;  %4436 = vrot.lane.b32.xlu2 %v4418_v5, %s6867_s10  ;;  %v3716_v37 = vrot.slane %v3714_v16, 5  ;;  %v3720_v54 = vrot.slane %v3718_v35, 4  ;;  %v3724_v46 = vshll.u32 %v3665_v14, 16  ;;  %v1811_v5 = vpop.f32.mrf.mxu3 }
 0x277   : > { %v1809_v30 = vadd.f32 %v8929_v28, %v1808_v7  ;;  %v4929_v17 = vpack.c.b16 %v4899_v44, %v4898_v26  ;;  %v3711_v11 = vor.u32 %v3710_v13, %v3707_v24  ;;  %v1779_v47 = vadd.f32 %v8929_v28, %v1778_v27  ;;  %v2399_v27 = vld [vmem:[#allocation2 + $0xbc] sm:$0x1]  ;;  %v1781_v13 = vpop.f32.mrf.mxu0 }
 0x278   : > { %v2354_v59 = vsel %vm8650_vm15, %v2113_v2, %v2353_v41  ;;  %v3721_v56 = vor.u32 %v3720_v54, %v3716_v37  ;;  %v3726_v22 = vrot.slane %v3724_v46, 5  ;;  %v5812_v62 = vrot.slane %v3457_v21, 9  ;;  %v2357_v46 = vld [vmem:[#allocation2 + $0x74] sm:$0x1] }
 0x279   : > { %2355 = vst [vmem:[#allocation2 + $0x6c] sm:$0xf] %v2354_v59  ;;  %v1845_v53 = vmul.f32 0.01, %v1809_v30  ;;  %4946 = vrot.lane.b32.xlu1 %v4929_v17, %s6876_s30  ;;  %v3712_v29 = vrot.slane %v3711_v11, 4  ;;  %v3535_v39 = vrot.slane %v3028_v4, 5  ;;  %v1812_v44 = vadd.f32 %v8929_v28, %v1811_v5 }
 0x27a   : > { %v1833_v58 = vmul.f32 0.01, %v1779_v47  ;;  %v3538_v51 = vrot.slane %v9035_v10, 5  ;;  %v3722_v57 = vrot.slane %v3721_v56, 4  ;;  %v3120_v15 = vshrl.u32 %v3027_v43, 16 }
 0x27b   : > { %v1877_v63 = vmax.f32 %v1809_v30, %v1845_v53  ;;  %v3123_v40 = vshll.u32 %v3027_v43, 16  ;;  %v3717_v14 = vsel %vm8726_vm13, %v3712_v29, %v3716_v37  ;;  %v3536_v50 = vsel %vm8823_vm1, %v5812_v62, %v3535_v39  ;;  %v5434_v43 = vld [vmem:[%s10412_s5] sm:$0x3]  ;;  %v4066_v62 = vld [vmem:[#allocation2 + $0x30] sm:$0xe] }
 0x27c   : > { %v1865_v55 = vmax.f32 %v1779_v47, %v1833_v58  ;;  %v3537_v32 = vrot.slane %v3535_v39, 4  ;;  %v3727_v20 = vsel %vm8726_vm13, %v3722_v57, %v3726_v22  ;;  %v4818_v36 = vunpack.c.l.b16 %v3717_v14 }
 0x27d   : > { %v1965_v42 = vpack.c.bf16 %v1877_v63, %v1877_v63  ;;  %v4644_v45 = vunpack.c.l.b16 %v3536_v50  ;;  %v4819_v8 = vunpack.c.l.b16 %v3727_v20  ;;  %v3122_v3 = vrot.slane %v3120_v15, 4  ;;  %v10679_v15 = vld [vmem:[#allocation13_spill] sm:$0xff] }
 0x27e   : > { %v1953_v25 = vpack.c.bf16 %v1865_v55, %v1865_v55  ;;  %v3539_v6 = vsel %vm8823_vm1, %v3537_v32, %v3538_v51  ;;  %v3125_v18 = vrot.slane %v3123_v40, 5  ;;  %v3129_v19 = vshll.u32 %v3028_v4, 16  ;;  %v10680_v40 = vld [vmem:[#allocation14_spill] sm:$0xff]  ;;  %v9077_v55 = vld [vmem:[#allocation2 + $0x38] sm:$0x1]  ;;  %v6105_v32 = vld [vmem:[#allocation2 + $0x24] sm:$0xff] }
 0x27f   : > { %v2218_v34 = vshrl.u32 %v1965_v42, 16  ;;  %v2221_v1 = vshll.u32 %v1965_v42, 16  ;;  %v4645_v33 = vunpack.c.l.b16 %v3539_v6  ;;  %v4849_v24 = vpack.c.b16 %v4819_v8, %v4818_v36 }
 0x280   : > { %v2116_v61 = vshrl.u32 %v1953_v25, 16  ;;  %v2119_v7 = vshll.u32 %v1953_v25, 16  ;;  %v3126_v16 = vor.u32 %v3125_v18, %v3122_v3  ;;  %v3133_v35 = vshrl.u32 %v3028_v4, 16 }
 0x281   : > { %v2220_v41 = vrot.slane %v2218_v34, 7  ;;  %v4674_v9 = vpack.c.b16 %v4645_v33, %v4644_v45  ;;  %4866 = vrot.lane.b32.xlu0 %v4849_v24, %s6874_s26  ;;  %v3131_v2 = vrot.slane %v3129_v19, 5  ;;  %v3139_v26 = vshll.u32 %v9035_v10, 16 }
 0x282   : > { %v2118_v21 = vrot.slane %v2116_v61, 7  ;;  %v3127_v30 = vrot.slane %v3126_v16, 4  ;;  %v3135_v59 = vrot.slane %v3133_v35, 4  ;;  %v2114_v17 = vrot.slane %v9026_v49, 4  ;;  %v3637_v49 = vld [vmem:[#allocation2 + $0x34] sm:$0xf]  ;;  %v1783_v16 = vpop.f32.mrf.mxu0 }
 0x283   : > { %v2223_v37 = vor.u32 %v2221_v1, %v2220_v41  ;;  %v2225_v54 = vrot.slane %v2220_v41, 4  ;;  %4692 = vrot.lane.b32.xlu2 %v4674_v9, %s6875_s29  ;;  %v1846_v47 = vmul.f32 0.01, %v1812_v44  ;;  %v3141_v58 = vrot.slane %v3139_v26, 5  ;;  %v9090_v35 = vld [vmem:[#allocation2 + $0x2c] sm:$0x1] }
 0x284   : > { %v2121_v4 = vor.u32 %v2119_v7, %v2118_v21  ;;  %v2123_v11 = vrot.slane %v2118_v21, 4  ;;  %v3132_v22 = vsel %vm8726_vm13, %v3127_v30, %v3131_v2  ;;  %v3136_v53 = vor.u32 %v3135_v59, %v3131_v2  ;;  %v2402_v21 = vld [vmem:[#allocation2 + $0xc0] sm:$0xf]  ;;  %v1813_v30 = vpop.f32.mrf.mxu3  ;;  %v3029_v59 = vld [vmem:[#allocation2 + $0x30] sm:$0xf] }
 0x285   : > { %v2224_v10 = vsel %vm8673_vm4, %v2216_v52, %v2223_v37  ;;  %v2400_v56 = vsel %vm8681_vm7, %v2225_v54, %v2399_v27  ;;  %v1878_v39 = vmax.f32 %v1812_v44, %v1846_v47  ;;  %v3636_v52 = vld [vmem:[#allocation2 + $0x30] sm:$0xf]  ;;  %v1782_v57 = vadd.f32 %v8929_v28, %v1781_v13 }
 0x286   : > { %2398 = vst.msk [vmem:[#allocation2 + $0xb8] sm:$0xf] %vm1880_vm12, %v2224_v10  ;;  %v2122_v29 = vsel %vm8673_vm4, %v2114_v17, %v2121_v4  ;;  %v2358_v31 = vsel %vm8681_vm7, %v2123_v11, %v2357_v46  ;;  %v3137_v51 = vrot.slane %v3136_v53, 4  ;;  %v9073_v63 = vsel %vm1723_vm2, %v5434_v43, 0  ;;  %v9098_v43 = vld [vmem:[#allocation2 + $0x34] sm:$0xf] }
 0x287   : > { %2401 = vst [vmem:[#allocation2 + $0xbc] sm:$0x1] %v2400_v56  ;;  %v5418_v14 = vpack.c.bf16 %v10680_v40, %v10679_v15  ;;  %v4564_v50 = vunpack.c.l.b16 %v3132_v22  ;;  %v1966_v20 = vpack.c.bf16 %v1878_v39, %v1878_v39  ;;  %5497 = vmatpush.bf16.msra.mxu2 %v9073_v63  ;;  %v5828_v36 = vrot.slane %v4066_v62, 9  ;;  %v2360_v39 = vld [vmem:[#allocation2 + $0x78] sm:$0xf] }
 0x288   : > { %2356 = vst.msk [vmem:[#allocation2 + $0x70] sm:$0xf] %vm1880_vm12, %v2122_v29  ;;  %v4144_v42 = vrot.slane %v3637_v49, 5  ;;  %v3142_v45 = vsel %vm8726_vm13, %v3137_v51, %v3141_v58  ;;  %v1834_v8 = vmul.f32 0.01, %v1782_v57  ;;  %v3729_v25 = vshrl.u32 %v3636_v52, 16 }
 0x289   : > { %2359 = vst [vmem:[#allocation2 + $0x74] sm:$0x1] %v2358_v31  ;;  %v3732_v6 = vshll.u32 %v3636_v52, 16  ;;  %v4565_v3 = vunpack.c.l.b16 %v3142_v45  ;;  %4532 = vrot.lane.b32.xlu0 %v6105_v32, %s6870_s13  ;;  %v2227_v34 = vshrl.u32 %v1966_v20, 16  ;;  %v2230_v1 = vshll.u32 %v1966_v20, 16 }
 0x28a   : > { %v4147_v33 = vrot.slane %v9077_v55, 5  ;;  %v1866_v18 = vmax.f32 %v1782_v57, %v1834_v8  ;;  %6066 = vmatmul.msk.bf16.vlgmr.msra.gmra.mxu2 %vm1370_vm3, %v5418_v14  ;;  %v4145_v5 = vsel %vm8823_vm1, %v5828_v36, %v4144_v42  ;;  %v4146_v24 = vrot.slane %v4144_v42, 4  ;;  %v9112_v32 = vld [vmem:[#allocation2 + $0x38] sm:$0x1] }
 0x28b   : > { %v3731_v61 = vrot.slane %v3729_v25, 4  ;;  %v4594_v7 = vpack.c.b16 %v4565_v3, %v4564_v50  ;;  %v9088_v19 = vrot.slane %v2227_v34, 7  ;;  %v3734_v41 = vrot.slane %v3732_v6, 5  ;;  %v2847_v34 = vld [vmem:[#allocation2 + $0x24] sm:$0xe] }
 0x28c   : > { %v3738_v9 = vshll.u32 %v3637_v49, 16  ;;  %v2937_v27 = vrot.slane %v9090_v35, 5  ;;  %v1954_v2 = vpack.c.bf16 %v1866_v18, %v1866_v18  ;;  %v4148_v26 = vsel %vm8823_vm1, %v4146_v24, %v4147_v33  ;;  %v1786_v24 = vpop.f32.mrf.mxu0 }
 0x28d   : > { %v3742_v44 = vshrl.u32 %v3637_v49, 16  ;;  %4612 = vrot.lane.b32.xlu1 %v4594_v7, %s6871_s14  ;;  %v2232_v13 = vor.u32 %v2230_v1, %v9088_v19  ;;  %v4900_v37 = vunpack.c.l.b16 %v4145_v5  ;;  %v4901_v54 = vunpack.c.l.b16 %v4148_v26  ;;  %v6121_v49 = vld [vmem:[#allocation2 + $0x30] sm:$0xff] }
 0x28e   : > { %v3735_v46 = vor.u32 %v3734_v41, %v3731_v61  ;;  %v2125_v17 = vshrl.u32 %v1954_v2, 16  ;;  %v3740_v4 = vrot.slane %v3738_v9, 5  ;;  %v3748_v47 = vshll.u32 %v9077_v55, 16  ;;  %v6847_v9 = vld [vmem:[#allocation2 + $0x28] sm:$0xf]  ;;  %v6102_v38 = vld [vmem:[#allocation2 + $0xb4] sm:$0xff] }
 0x28f   : > { %v3744_v11 = vrot.slane %v3742_v44, 4  ;;  %v2403_v10 = vsel %vm8650_vm15, %v2232_v13, %v2402_v21  ;;  %v2128_v56 = vshll.u32 %v1954_v2, 16  ;;  %v4930_v22 = vpack.c.b16 %v4901_v54, %v4900_v37 }
 0x290   : > { %v3736_v53 = vrot.slane %v3735_v46, 4  ;;  %2404 = vst [vmem:[#allocation2 + $0xc0] sm:$0xf] %v2403_v10  ;;  %v9102_v62 = vrot.slane %v2125_v17, 7  ;;  %v1814_v31 = vadd.f32 %v8929_v28, %v1813_v30  ;;  %v1784_v58 = vadd.f32 %v8929_v28, %v1783_v16 }
 0x291   : > { %v3745_v29 = vor.u32 %v3744_v11, %v3740_v4  ;;  %4948 = vrot.lane.b32.xlu2 %v4930_v22, %s6876_s30  ;;  %4788 = vrot.lane.b32.xlu0 %v6121_v49, %s6873_s23  ;;  %v3144_v51 = vshrl.u32 %v3029_v59, 16  ;;  %v3147_v57 = vshll.u32 %v3029_v59, 16  ;;  %v3153_v15 = vshll.u32 %v9098_v43, 16 }
 0x292   : > { %v3741_v52 = vsel %vm8726_vm13, %v3736_v53, %v3740_v4  ;;  %v2130_v40 = vor.u32 %v2128_v56, %v9102_v62  ;;  %v3750_v55 = vrot.slane %v3748_v47, 5  ;;  %v1847_v20 = vmul.f32 0.01, %v1814_v31 }
 0x293   : > { %v3746_v14 = vrot.slane %v3745_v29, 4  ;;  %v4820_v50 = vunpack.c.l.b16 %v3741_v52  ;;  %v1835_v36 = vmul.f32 0.01, %v1784_v58  ;;  %v3146_v42 = vrot.slane %v3144_v51, 4  ;;  %v2364_v29 = vld [vmem:[#allocation2 + $0x80] sm:$0x1]  ;;  %v9133_v52 = vpop.permute.xlu2 %4352 }
 0x294   : > { %v3149_v45 = vrot.slane %v3147_v57, 5  ;;  %v2361_v8 = vsel %vm8650_vm15, %v2130_v40, %v2360_v39  ;;  %v3155_v6 = vrot.slane %v3153_v15, 5  ;;  %v3157_v3 = vshrl.u32 %v9098_v43, 16 }
 0x295   : > { %v3751_v25 = vsel %vm8726_vm13, %v3746_v14, %v3750_v55  ;;  %2362 = vst [vmem:[#allocation2 + $0x78] sm:$0xf] %v2361_v8  ;;  %v1879_v33 = vmax.f32 %v1814_v31, %v1847_v20  ;;  %v1867_v18 = vmax.f32 %v1784_v58, %v1835_v36  ;;  %v2233_v61 = vrot.slane %v9088_v19, 4  ;;  %v3458_v14 = vld [vmem:[#allocation2 + $0x30] sm:$0xe] }
 0x296   : > { %v4821_v1 = vunpack.c.l.b16 %v3751_v25  ;;  %v3150_v5 = vor.u32 %v3149_v45, %v3146_v42  ;;  %v3159_v7 = vrot.slane %v3157_v3, 4  ;;  %v3163_v41 = vshll.u32 %v9112_v32, 16  ;;  %v10681_v36 = vld [vmem:[#allocation6_spill] sm:$0xff]  ;;  %v10682_v42 = vld [vmem:[#allocation7_spill] sm:$0xff]  ;;  %v9138_v8 = vld [vmem:[#allocation2 + $0x40] sm:$0xf] }
 0x297   : > { %v2934_v16 = vrot.slane %v6847_v9, 5  ;;  %v1967_v2 = vpack.c.bf16 %v1879_v33, %v1879_v33  ;;  %v1955_v26 = vpack.c.bf16 %v1867_v18, %v1867_v18  ;;  %v5797_v44 = vrot.slane %v2847_v34, 9  ;;  %v9140_v25 = vld [vmem:[#allocation2 + $0x44] sm:$0x1]  ;;  %v6106_v33 = vld [vmem:[#allocation2 + $0x30] sm:$0xff]  ;;  %v1788_v18 = vpop.f32.mrf.mxu0 }
 0x298   : > { %v4850_v21 = vpack.c.b16 %v4821_v1, %v4820_v50  ;;  %v2131_v13 = vrot.slane %v9102_v62, 4  ;;  %v3151_v37 = vrot.slane %v3150_v5, 4  ;;  %v3160_v54 = vor.u32 %v3159_v7, %v3155_v6  ;;  %v2406_v62 = vld [vmem:[#allocation2 + $0xc8] sm:$0x1] }
 0x299   : > { %v2936_v46 = vrot.slane %v2934_v16, 4  ;;  %v2235_v30 = vshrl.u32 %v1967_v2, 16  ;;  %v2133_v59 = vshrl.u32 %v1955_v26, 16  ;;  %v3165_v17 = vrot.slane %v3163_v41, 5 }
 0x29a   : > { %4868 = vrot.lane.b32.xlu1 %v4850_v21, %s6874_s26  ;;  %v2935_v19 = vsel %vm8823_vm1, %v5797_v44, %v2934_v16  ;;  %v2238_v4 = vshll.u32 %v1967_v2, 16  ;;  %v3156_v11 = vsel %vm8726_vm13, %v3151_v37, %v3155_v6  ;;  %v3161_v47 = vrot.slane %v3160_v54, 4  ;;  %v6848_v37 = vld [vmem:[#allocation2 + $0x38] sm:$0x1] }
 0x29b   : > { %v2938_v10 = vsel %vm8823_vm1, %v2936_v46, %v2937_v27  ;;  %v2237_v56 = vrot.slane %v2235_v30, 7  ;;  %v2135_v22 = vrot.slane %v2133_v59, 7  ;;  %v2136_v53 = vshll.u32 %v1955_v26, 16  ;;  %v3638_v27 = vld [vmem:[#allocation2 + $0x3c] sm:$0xf] }
 0x29c   : > { %v4391_v49 = vunpack.c.l.b16 %v2938_v10  ;;  %v3166_v31 = vsel %vm8726_vm13, %v3161_v47, %v3165_v17  ;;  %v4566_v58 = vunpack.c.l.b16 %v3156_v11  ;;  %v4390_v39 = vunpack.c.l.b16 %v2935_v19  ;;  %v2848_v47 = vld [vmem:[#allocation2 + $0x30] sm:$0xe] }
 0x29d   : > { %v1787_v51 = vadd.f32 %v8929_v28, %v1786_v24  ;;  %v2240_v57 = vor.u32 %v2238_v4, %v2237_v56  ;;  %v2242_v35 = vrot.slane %v2237_v56, 4  ;;  %v2138_v15 = vor.u32 %v2136_v53, %v2135_v22 }
 0x29e   : > { %v2140_v40 = vrot.slane %v2135_v22, 4  ;;  %v4567_v55 = vunpack.c.l.b16 %v3166_v31  ;;  %v4419_v50 = vpack.c.b16 %v4391_v49, %v4390_v39  ;;  %v5419_v45 = vpack.c.bf16 %v10682_v42, %v10681_v36  ;;  %v9166_v31 = vpop.permute.xlu2 %4358  ;;  %v2367_v39 = vld [vmem:[#allocation2 + $0x84] sm:$0xf] }
 0x29f   : > { %v1836_v20 = vmul.f32 0.01, %v1787_v51  ;;  %v2241_v6 = vsel %vm8673_vm4, %v2233_v61, %v2240_v57  ;;  %v2407_v3 = vsel %vm8681_vm7, %v2242_v35, %v2406_v62  ;;  %v2139_v34 = vsel %vm8673_vm4, %v2131_v13, %v2138_v15  ;;  %v6122_v57 = vld [vmem:[#allocation2 + $0x3c] sm:$0xff] }
 0x2a0   : > { %v2365_v1 = vsel %vm8681_vm7, %v2140_v40, %v2364_v29  ;;  %2405 = vst.msk [vmem:[#allocation2 + $0xc4] sm:$0xf] %vm1880_vm12, %v2241_v6  ;;  %v4595_v5 = vpack.c.b16 %v4567_v55, %v4566_v58  ;;  %4438 = vrot.lane.b32.xlu0 %v4419_v50, %s6867_s10  ;;  %6067 = vmatmul.msk.bf16.gmra.mxu2 %vm1370_vm3, %v5419_v45  ;;  %v3753_v61 = vshrl.u32 %v3638_v27, 16  ;;  %v3756_v7 = vshll.u32 %v3638_v27, 16  ;;  %v6849_v40 = vld [vmem:[#allocation2 + $0x34] sm:$0xf]  ;;  %v1791_v6 = vpop.f32.mrf.mxu0 }
 0x2a1   : > { %v1868_v24 = vmax.f32 %v1787_v51, %v1836_v20  ;;  %2408 = vst [vmem:[#allocation2 + $0xc8] sm:$0x1] %v2407_v3  ;;  %v3762_v41 = vshll.u32 %v9138_v8, 16  ;;  %v3766_v9 = vshrl.u32 %v9138_v8, 16  ;;  %v3772_v16 = vshll.u32 %v9140_v25, 16 }
 0x2a2   : > { %4534 = vrot.lane.b32.xlu1 %v6106_v33, %s6870_s13  ;;  %v5813_v21 = vrot.slane %v3458_v14, 9  ;;  %2363 = vst.msk [vmem:[#allocation2 + $0x7c] sm:$0xf] %vm1880_vm12, %v2139_v34  ;;  %4614 = vrot.lane.b32.xlu2 %v4595_v5, %s6871_s14  ;;  %v3755_v26 = vrot.slane %v3753_v61, 4  ;;  %v3758_v44 = vrot.slane %v3756_v7, 5  ;;  %v3542_v13 = vrot.slane %v9098_v43, 5 }
 0x2a3   : > { %v1956_v2 = vpack.c.bf16 %v1868_v24, %v1868_v24  ;;  %v2944_v54 = vrot.slane %v6848_v37, 5  ;;  %v2951_v46 = vrot.slane %v8902_v48, 5  ;;  %2366 = vst [vmem:[#allocation2 + $0x80] sm:$0x1] %v2365_v1  ;;  %v3764_v30 = vrot.slane %v3762_v41, 5 }
 0x2a4   : > { %v3768_v59 = vrot.slane %v3766_v9, 4  ;;  %v3759_v19 = vor.u32 %v3758_v44, %v3755_v26  ;;  %v3774_v4 = vrot.slane %v3772_v16, 5  ;;  %v3543_v11 = vsel %vm8823_vm1, %v5813_v21, %v3542_v13  ;;  %v4067_v43 = vld [vmem:[#allocation2 + $0x3c] sm:$0xe]  ;;  %v3032_v37 = vld [vmem:[#allocation2 + $0x40] sm:$0xf] }
 0x2a5   : > { %v2142_v17 = vshrl.u32 %v1956_v2, 16  ;;  %v2145_v10 = vshll.u32 %v1956_v2, 16  ;;  %v3544_v22 = vrot.slane %v3542_v13, 4  ;;  %v3545_v53 = vrot.slane %v9112_v32, 5  ;;  %v3459_v7 = vld [vmem:[#allocation2 + $0x3c] sm:$0xe] }
 0x2a6   : > { %v3769_v56 = vor.u32 %v3768_v59, %v3764_v30  ;;  %v3760_v62 = vrot.slane %v3759_v19, 4  ;;  %v4646_v29 = vunpack.c.l.b16 %v3543_v11  ;;  %v1789_v58 = vadd.f32 %v8929_v28, %v1788_v18  ;;  %v10684_v19 = vld [vmem:[#allocation11_spill] sm:$0xff] }
 0x2a7   : > { %v9164_v49 = vrot.slane %v2142_v17, 7  ;;  %v3546_v35 = vsel %vm8823_vm1, %v3544_v22, %v3545_v53  ;;  %v5798_v15 = vrot.slane %v2848_v47, 9  ;;  %v2941_v27 = vrot.slane %v6849_v40, 5  ;;  %v10683_v17 = vld [vmem:[#allocation10_spill] sm:$0xff]  ;;  %v9197_v22 = vpop.permute.xlu2 %4608 }
 0x2a8   : > { %v3770_v51 = vrot.slane %v3769_v56, 4  ;;  %v3765_v14 = vsel %vm8726_vm13, %v3760_v62, %v3764_v30  ;;  %v4647_v55 = vunpack.c.l.b16 %v3546_v35  ;;  %v5829_v50 = vrot.slane %v4067_v43, 9  ;;  %v9190_v30 = vld [vmem:[#allocation2 + $0x44] sm:$0x1] }
 0x2a9   : > { %v2147_v32 = vor.u32 %v2145_v10, %v9164_v49  ;;  %v4822_v36 = vunpack.c.l.b16 %v3765_v14  ;;  %v1837_v42 = vmul.f32 0.01, %v1789_v58  ;;  %v2942_v45 = vsel %vm8823_vm1, %v5798_v15, %v2941_v27 }
 0x2aa   : > { %v3775_v20 = vsel %vm8726_vm13, %v3770_v51, %v3774_v4  ;;  %4790 = vrot.lane.b32.xlu1 %v6122_v57, %s6873_s23  ;;  %v4675_v1 = vpack.c.b16 %v4647_v55, %v4646_v29  ;;  %v2943_v33 = vrot.slane %v2941_v27, 4  ;;  %v2148_v18 = vrot.slane %v9164_v49, 4  ;;  %v2371_v51 = vld [vmem:[#allocation2 + $0x8c] sm:$0x1] }
 0x2ab   : > { %v2368_v3 = vsel %vm8650_vm15, %v2147_v32, %v2367_v39  ;;  %v4823_v34 = vunpack.c.l.b16 %v3775_v20  ;;  %v1869_v5 = vmax.f32 %v1789_v58, %v1837_v42  ;;  %v4392_v24 = vunpack.c.l.b16 %v2942_v45 }
 0x2ac   : > { %2369 = vst [vmem:[#allocation2 + $0x84] sm:$0xf] %v2368_v3  ;;  %v4151_v61 = vrot.slane %v9138_v8, 5  ;;  %4694 = vrot.lane.b32.xlu0 %v4675_v1, %s6875_s29  ;;  %v2945_v9 = vsel %vm8823_vm1, %v2943_v33, %v2944_v54  ;;  %v4154_v16 = vrot.slane %v9140_v25, 5  ;;  %v1792_v21 = vadd.f32 %v8929_v28, %v1791_v6  ;;  %v3031_v25 = vld [vmem:[#allocation2 + $0x3c] sm:$0xf]  ;;  %v1793_v6 = vpop.f32.mrf.mxu0 }
 0x2ad   : > { %v4851_v41 = vpack.c.b16 %v4823_v34, %v4822_v36  ;;  %v1957_v2 = vpack.c.bf16 %v1869_v5, %v1869_v5  ;;  %v4393_v26 = vunpack.c.l.b16 %v2945_v9  ;;  %v5420_v54 = vpack.c.bf16 %v10684_v19, %v10683_v17  ;;  %v3047_v3 = vld [vmem:[#allocation2 + $0x9c] sm:$0xf]  ;;  %v2374_v33 = vld [vmem:[#allocation2 + $0x90] sm:$0xf]  ;;  %v9223_v19 = vld [vmem:[#allocation2 + $0xa4] sm:$0x1] }
 0x2ae   : > { %v4152_v44 = vsel %vm8823_vm1, %v5829_v50, %v4151_v61  ;;  %v4153_v13 = vrot.slane %v4151_v61, 4  ;;  %v1838_v59 = vmul.f32 0.01, %v1792_v21  ;;  %v5814_v4 = vrot.slane %v3459_v7, 9  ;;  %v6107_v50 = vld [vmem:[#allocation2 + $0x3c] sm:$0xff] }
 0x2af   : > { %4870 = vrot.lane.b32.xlu2 %v4851_v41, %s6874_s26  ;;  %v4902_v8 = vunpack.c.l.b16 %v4152_v44  ;;  %v2150_v11 = vshrl.u32 %v1957_v2, 16  ;;  %v2153_v28 = vshll.u32 %v1957_v2, 16  ;;  %v4420_v47 = vpack.c.b16 %v4393_v26, %v4392_v24  ;;  %v9219_v2 = vld [vmem:[#allocation2 + $0xa0] sm:$0xf] }
 0x2b0   : > { %v4155_v10 = vsel %vm8823_vm1, %v4153_v13, %v4154_v16  ;;  %v1870_v53 = vmax.f32 %v1792_v21, %v1838_v59  ;;  %6068 = vmatmul.msk.bf16.gmra.mxu2 %vm1370_vm3, %v5420_v54  ;;  %v3549_v43 = vrot.slane %v3032_v37, 5  ;;  %v3552_v49 = vrot.slane %v9190_v30, 5  ;;  %v4068_v13 = vld [vmem:[#allocation2 + $0x48] sm:$0xe] }
 0x2b1   : > { %v4903_v56 = vunpack.c.l.b16 %v4155_v10  ;;  %v2152_v62 = vrot.slane %v2150_v11, 7  ;;  %v3168_v29 = vshrl.u32 %v3031_v25, 16  ;;  %v3171_v58 = vshll.u32 %v3031_v25, 16 }
 0x2b2   : > { %4440 = vrot.lane.b32.xlu1 %v4420_v47, %s6867_s10  ;;  %v3177_v39 = vshll.u32 %v3032_v37, 16  ;;  %v1958_v35 = vpack.c.bf16 %v1870_v53, %v1870_v53  ;;  %v3550_v15 = vsel %vm8823_vm1, %v5814_v4, %v3549_v43  ;;  %v3551_v40 = vrot.slane %v3549_v43, 4  ;;  %v3641_v43 = vld [vmem:[#allocation2 + $0x4c] sm:$0xf] }
 0x2b3   : > { %v4931_v57 = vpack.c.b16 %v4903_v56, %v4902_v8  ;;  %v2155_v27 = vor.u32 %v2153_v28, %v2152_v62  ;;  %v2157_v32 = vrot.slane %v2152_v62, 4  ;;  %v4648_v14 = vunpack.c.l.b16 %v3550_v15  ;;  %v9232_v56 = vpop.permute.xlu2 %4864 }
 0x2b4   : > { %v3170_v55 = vrot.slane %v3168_v29, 4  ;;  %v2159_v20 = vshrl.u32 %v1958_v35, 16  ;;  %v2162_v36 = vshll.u32 %v1958_v35, 16  ;;  %v3553_v42 = vsel %vm8823_vm1, %v3551_v40, %v3552_v49  ;;  %v3640_v49 = vld [vmem:[#allocation2 + $0x48] sm:$0xf] }
 0x2b5   : > { %4950 = vrot.lane.b32.xlu0 %v4931_v57, %s6876_s30  ;;  %v3173_v45 = vrot.slane %v3171_v58, 5  ;;  %v2156_v34 = vsel %vm8673_vm4, %v2148_v18, %v2155_v27  ;;  %v2372_v1 = vsel %vm8681_vm7, %v2157_v32, %v2371_v51  ;;  %v4649_v5 = vunpack.c.l.b16 %v3553_v42  ;;  %v6850_v18 = vld [vmem:[%s10409_s2] ss:$0 sm:$0xff]  ;;  %v9236_v51 = vld [vmem:[#allocation2 + $0x50] sm:$0x1]  ;;  %v9239_v27 = vpop.permute.xlu1 %4356 }
 0x2b6   : > { %v3179_v24 = vrot.slane %v3177_v39, 5  ;;  %2370 = vst.msk [vmem:[#allocation2 + $0x88] sm:$0xf] %vm1880_vm12, %v2156_v34  ;;  %v9213_v61 = vrot.slane %v2159_v20, 7  ;;  %v3181_v41 = vshrl.u32 %v3032_v37, 16  ;;  %v3187_v9 = vshll.u32 %v9190_v30, 16  ;;  %v9225_v30 = vpop.permute.xlu0 %4354 }
 0x2b7   : > { %4536 = vrot.lane.b32.xlu2 %v6107_v50, %s6870_s13  ;;  %v3174_v7 = vor.u32 %v3173_v45, %v3170_v55  ;;  %2373 = vst [vmem:[#allocation2 + $0x8c] sm:$0x1] %v2372_v1  ;;  %v4676_v16 = vpack.c.b16 %v4649_v5, %v4648_v14  ;;  %v1794_v21 = vadd.f32 %v6850_v18, %v1793_v6  ;;  %v3360_v26 = vshrl.u32 %v3047_v3, 16 }
 0x2b8   : > { %v3363_v44 = vshll.u32 %v3047_v3, 16  ;;  %v2164_v8 = vor.u32 %v2162_v36, %v9213_v61  ;;  %v2165_v59 = vrot.slane %v9213_v61, 4  ;;  %v3183_v37 = vrot.slane %v3181_v41, 4  ;;  %v9273_v61 = vld [vmem:[#allocation2 + $0xb0] sm:$0x1] }
 0x2b9   : > { %v3175_v17 = vrot.slane %v3174_v7, 4  ;;  %v3189_v54 = vrot.slane %v3187_v9, 5  ;;  %v1839_v4 = vmul.f32 0.01, %v1794_v21  ;;  %v3362_v25 = vrot.slane %v3360_v26, 4 }
 0x2ba   : > { %4696 = vrot.lane.b32.xlu1 %v4676_v16, %s6875_s29  ;;  %v3365_v11 = vrot.slane %v3363_v44, 5  ;;  %v2375_v28 = vsel %vm8650_vm15, %v2164_v8, %v2374_v33  ;;  %v3184_v10 = vor.u32 %v3183_v37, %v3179_v24  ;;  %v3369_v53 = vshll.u32 %v9219_v2, 16  ;;  %v2378_v26 = vld [vmem:[#allocation2 + $0x98] sm:$0x1] }
 0x2bb   : > { %v3180_v47 = vsel %vm8726_vm13, %v3175_v17, %v3179_v24  ;;  %2376 = vst [vmem:[#allocation2 + $0x90] sm:$0xf] %v2375_v28  ;;  %v1871_v29 = vmax.f32 %v1794_v21, %v1839_v4  ;;  %v3373_v39 = vshrl.u32 %v9219_v2, 16  ;;  %v3379_v15 = vshll.u32 %v9223_v19, 16  ;;  %v6087_v28 = vld [vmem:[#allocation2] sm:$0xff] }
 0x2bc   : > { %v4568_v62 = vunpack.c.l.b16 %v3180_v47  ;;  %v3366_v58 = vor.u32 %v3365_v11, %v3362_v25  ;;  %v3185_v57 = vrot.slane %v3184_v10, 4  ;;  %v3371_v35 = vrot.slane %v3369_v53, 5  ;;  %v3656_v11 = vld [vmem:[#allocation2 + $0xa8] sm:$0xf] }
 0x2bd   : > { %v5830_v40 = vrot.slane %v4068_v13, 9  ;;  %v1959_v32 = vpack.c.bf16 %v1871_v29, %v1871_v29  ;;  %v3375_v55 = vrot.slane %v3373_v39, 4  ;;  %v4158_v50 = vrot.slane %v3641_v43, 5  ;;  %v9257_v29 = vpop.permute.xlu2 %4530  ;;  %v9275_v23 = vpop.permute.xlu1 %4528 }
 0x2be   : > { %v3367_v14 = vrot.slane %v3366_v58, 4  ;;  %v3190_v20 = vsel %vm8726_vm13, %v3185_v57, %v3189_v54  ;;  %v3381_v36 = vrot.slane %v3379_v15, 5  ;;  %v4161_v42 = vrot.slane %v9236_v51, 5  ;;  %v9249_v21 = vpop.permute.xlu0 %4360  ;;  %v9259_v58 = vld [vmem:[#allocation2 + $0xac] sm:$0xf] }
 0x2bf   : > { %4792 = vrot.lane.b32.xlu2 %v6123_v12, %s6873_s23  ;;  %v3777_v45 = vshrl.u32 %v3640_v49, 16  ;;  %v4569_v6 = vunpack.c.l.b16 %v3190_v20  ;;  %v2167_v3 = vshrl.u32 %v1959_v32, 16  ;;  %v2170_v34 = vshll.u32 %v1959_v32, 16  ;;  %v9267_v57 = vld [vmem:[#allocation2 + $0x50] sm:$0x1]  ;;  %v10686_v32 = vld [vmem:[#allocation4_spill] sm:$0xff] }
 0x2c0   : > { %v3372_v1 = vsel %vm8726_vm13, %v3367_v14, %v3371_v35  ;;  %v3376_v33 = vor.u32 %v3375_v55, %v3371_v35  ;;  %v4159_v24 = vsel %vm8823_vm1, %v5830_v40, %v4158_v50  ;;  %v4160_v7 = vrot.slane %v4158_v50, 4  ;;  %v10685_v40 = vld [vmem:[#allocation3_spill] sm:$0xff] }
 0x2c1   : > { %v4584_v5 = vunpack.c.l.b16 %v3372_v1  ;;  %v4596_v41 = vpack.c.b16 %v4569_v6, %v4568_v62  ;;  %v2169_v9 = vrot.slane %v2167_v3, 7  ;;  %v4904_v16 = vunpack.c.l.b16 %v4159_v24  ;;  %v3467_v6 = vld [vmem:[#allocation2 + $0x9c] sm:$0xe] }
 0x2c2   : > { %v3779_v18 = vrot.slane %v3777_v45, 4  ;;  %v3377_v44 = vrot.slane %v3376_v33, 4  ;;  %v4162_v13 = vsel %vm8823_vm1, %v4160_v7, %v4161_v42  ;;  %v3780_v8 = vshll.u32 %v3640_v49, 16 }
 0x2c3   : > { %v3786_v17 = vshll.u32 %v3641_v43, 16  ;;  %4616 = vrot.lane.b32.xlu0 %v4596_v41, %s6871_s14  ;;  %v2172_v37 = vor.u32 %v2170_v34, %v2169_v9  ;;  %v2174_v54 = vrot.slane %v2169_v9, 4  ;;  %v4905_v4 = vunpack.c.l.b16 %v4162_v13  ;;  %v2849_v41 = vld [vmem:[#allocation2 + $0x3c] sm:$0xe] }
 0x2c4   : > { %v3790_v25 = vshrl.u32 %v3641_v43, 16  ;;  %v3382_v47 = vsel %vm8726_vm13, %v3377_v44, %v3381_v36  ;;  %v3782_v10 = vrot.slane %v3780_v8, 5  ;;  %v3796_v62 = vshll.u32 %v9236_v51, 16 }
 0x2c5   : > { %v3788_v53 = vrot.slane %v3786_v17, 5  ;;  %v2173_v49 = vsel %vm8673_vm4, %v2165_v59, %v2172_v37  ;;  %v2379_v43 = vsel %vm8681_vm7, %v2174_v54, %v2378_v26  ;;  %v4585_v39 = vunpack.c.l.b16 %v3382_v47  ;;  %v6852_v37 = vld [vmem:[#allocation2 + $0x40] sm:$0xf] }
 0x2c6   : > { %v4932_v12 = vpack.c.b16 %v4905_v4, %v4904_v16  ;;  %v2958_v35 = vrot.slane %v9267_v57, 5  ;;  %2377 = vst.msk [vmem:[#allocation2 + $0x94] sm:$0xf] %vm1880_vm12, %v2173_v49  ;;  %v3783_v51 = vor.u32 %v3782_v10, %v3779_v18  ;;  %v3792_v15 = vrot.slane %v3790_v25, 4  ;;  %v4433_v44 = vpop.permute.xlu0 %4432  ;;  %v6088_v10 = vld [vmem:[#allocation2 + $0xc] sm:$0xff]  ;;  %v9295_v49 = vpop.permute.xlu2 %4786 }
 0x2c7   : > { %v5421_v14 = vpack.c.bf16 %v10686_v32, %v10685_v40  ;;  %2380 = vst [vmem:[#allocation2 + $0x98] sm:$0x1] %v2379_v43  ;;  %v4604_v60 = vpack.c.b16 %v4585_v39, %v4584_v5  ;;  %v3969_v59 = vshrl.u32 %v3656_v11, 16  ;;  %v3972_v55 = vshll.u32 %v3656_v11, 16  ;;  %v6115_v11 = vld [vmem:[#allocation2 + $0x9c] sm:$0xff]  ;;  %v6090_v39 = vld [vmem:[#allocation2 + $0x24] sm:$0xff] }
 0x2c8   : > { %4952 = vrot.lane.b32.xlu1 %v4932_v12, %s6876_s30  ;;  %v3978_v50 = vshll.u32 %v9259_v58, 16  ;;  %v9281_v20 = vsel %vm1403_vm5, %v6087_v28, %v9133_v52  ;;  %v3784_v36 = vrot.slane %v3783_v51, 4  ;;  %v3793_v42 = vor.u32 %v3792_v15, %v3788_v53  ;;  %v6089_v32 = vld [vmem:[#allocation2 + $0x18] sm:$0xff] }
 0x2c9   : > { %6069 = vmatmul.msk.bf16.gmra.mxu2 %vm1370_vm3, %v5421_v14  ;;  %v3982_v45 = vshrl.u32 %v9259_v58, 16  ;;  %4632 = vrot.lane.b32.xlu2 %v4604_v60, %s6871_s14  ;;  %v3798_v3 = vrot.slane %v3796_v62, 5  ;;  %v3971_v34 = vrot.slane %v3969_v59, 4  ;;  %v3974_v1 = vrot.slane %v3972_v55, 5  ;;  %v4076_v55 = vld [vmem:[#allocation2 + $0xa8] sm:$0xe] }
 0x2ca   : > { %v3980_v33 = vrot.slane %v3978_v50, 5  ;;  %v3789_v5 = vsel %vm8726_vm13, %v3784_v36, %v3788_v53  ;;  %v3794_v24 = vrot.slane %v3793_v42, 4  ;;  %v3988_v52 = vshll.u32 %v9273_v61, 16  ;;  %v5260_v50 = vld [vmem:[%s10410_s3 + $0x20] sm:$0xf] }
 0x2cb   : > { %v3984_v7 = vrot.slane %v3982_v45, 4  ;;  %v4824_v9 = vunpack.c.l.b16 %v3789_v5  ;;  %v3975_v16 = vor.u32 %v3974_v1, %v3971_v34  ;;  %v5822_v18 = vrot.slane %v3467_v6, 9  ;;  %v2856_v1 = vld [vmem:[#allocation2 + $0x90] sm:$0xe]  ;;  %v10687_v5 = vld [vmem:[#allocation8_spill] sm:$0xff] }
 0x2cc   : > { %v3605_v26 = vrot.slane %v9219_v2, 5  ;;  %v3799_v13 = vsel %vm8726_vm13, %v3794_v24, %v3798_v3  ;;  %v3608_v17 = vrot.slane %v9223_v19, 5  ;;  %v2948_v54 = vrot.slane %v6852_v37, 5 }
 0x2cd   : > { %v3985_v8 = vor.u32 %v3984_v7, %v3980_v33  ;;  %v4825_v4 = vunpack.c.l.b16 %v3799_v13  ;;  %v3976_v25 = vrot.slane %v3975_v16, 4  ;;  %v5799_v47 = vrot.slane %v2849_v41, 9  ;;  %v2434_v41 = vld [vmem:[#allocation2 + $0x94] sm:$0xf]  ;;  %v6131_v13 = vld [vmem:[#allocation2 + $0xa8] sm:$0xff] }
 0x2ce   : > { %v3607_v28 = vrot.slane %v3605_v26, 4  ;;  %v3990_v62 = vrot.slane %v3988_v52, 5  ;;  %v3606_v2 = vsel %vm8823_vm1, %v5822_v18, %v3605_v26  ;;  %v2950_v43 = vrot.slane %v2948_v54, 4 }
 0x2cf   : > { %v3986_v53 = vrot.slane %v3985_v8, 4  ;;  %v4852_v12 = vpack.c.b16 %v4825_v4, %v4824_v9  ;;  %v3981_v19 = vsel %vm8726_vm13, %v3976_v25, %v3980_v33  ;;  %v2949_v15 = vsel %vm8823_vm1, %v5799_v47, %v2948_v54  ;;  %v2433_v9 = vld [vmem:[#allocation2 + $0x90] sm:$0xf]  ;;  %v4689_v54 = vpop.permute.xlu0 %4688  ;;  %v9341_v25 = vpop.permute.xlu2 %4364 }
 0x2d0   : > { %4552 = vrot.lane.b32.xlu1 %v6115_v11, %s6870_s13  ;;  %v3609_v51 = vsel %vm8823_vm1, %v3607_v28, %v3608_v17  ;;  %v9306_v40 = vsel %vm1403_vm5, %v6088_v10, %v9225_v30  ;;  %v2952_v59 = vsel %vm8823_vm1, %v2950_v43, %v2951_v46  ;;  %v9319_v36 = vsel %vm1403_vm5, %v6090_v39, %v9166_v31  ;;  %v9322_v30 = vpop.permute.xlu1 %4784  ;;  %v10688_v31 = vld [vmem:[#allocation9_spill] sm:$0xff] }
 0x2d1   : > { %v3991_v14 = vsel %vm8726_vm13, %v3986_v53, %v3990_v62  ;;  %v4665_v60 = vunpack.c.l.b16 %v3609_v51  ;;  %4872 = vrot.lane.b32.xlu0 %v4852_v12, %s6874_s26  ;;  %v4840_v42 = vunpack.c.l.b16 %v3981_v19  ;;  %v4395_v6 = vunpack.c.l.b16 %v2952_v59  ;;  %v9348_v19 = vld [vmem:[#allocation2 + $0x4c] sm:$0xf] }
 0x2d2   : > { %v4841_v45 = vunpack.c.l.b16 %v3991_v14  ;;  %v9326_v48 = vsel %vm1403_vm5, %v6089_v32, %v9239_v27  ;;  %v4664_v46 = vunpack.c.l.b16 %v3606_v2  ;;  %v4394_v3 = vunpack.c.l.b16 %v2949_v15  ;;  %v2453_v27 = vld [vmem:[#allocation2 + $0x98] sm:$0x1]  ;;  %v3460_v2 = vld [vmem:[#allocation2 + $0x48] sm:$0xe] }
 0x2d3   : > { %v4214_v34 = vrot.slane %v9259_v58, 5  ;;  %v5422_v24 = vpack.c.bf16 %v10688_v31, %v10687_v5  ;;  %v5838_v7 = vrot.slane %v4076_v55, 9  ;;  %v5282_v52 = vunpack.c.l.b16 %v5260_v50 }
 0x2d4   : > { %v4860_v33 = vpack.c.b16 %v4841_v45, %v4840_v42  ;;  %v4684_v16 = vpack.c.b16 %v4665_v60, %v4664_v46  ;;  %v4217_v26 = vrot.slane %v9273_v61, 5  ;;  %vm5325_vm2 = vcmask 1043456   ;;  %v9353_v60 = vld [vmem:[#allocation2 + $0x50] sm:$0x1] }
 0x2d5   : > { %v4216_v18 = vrot.slane %v4214_v34, 4  ;;  %v9333_v8 = vpack.c.b16 %v4395_v6, %v4394_v3  ;;  %v4215_v58 = vsel %vm8823_vm1, %v5838_v7, %v4214_v34  ;;  %v5287_v17 = vpack.c.b16 %v5282_v52, %v5282_v52  ;;  %v6108_v6 = vld [vmem:[#allocation2 + $0x48] sm:$0xff] }
 0x2d6   : > { %4888 = vrot.lane.b32.xlu2 %v4860_v33, %s6874_s26  ;;  %v5025_v37 = vsel %vm1469_vm6, %v9281_v20, %v4433_v44  ;;  %v5806_v61 = vrot.slane %v2856_v1, 9  ;;  %v2997_v11 = vrot.slane %v2434_v41, 5  ;;  %v2749_v28 = vshrl.u32 %v2433_v9, 16  ;;  %v6138_v44 = vld [vmem:[%s10410_s3 + $0x18] sm:$0xff] }
 0x2d7   : > { %v4218_v4 = vsel %vm8823_vm1, %v4216_v18, %v4217_v26  ;;  %v5327_v47 = vsel %vm5325_vm2, %v5287_v17, 0  ;;  %v3000_v10 = vrot.slane %v2453_v27, 5  ;;  %v2752_v53 = vshll.u32 %v2433_v9, 16 }
 0x2d8   : > { %4808 = vrot.lane.b32.xlu1 %v6131_v13, %s6873_s23  ;;  %v2758_v62 = vshll.u32 %v2434_v41, 16  ;;  %v4921_v43 = vunpack.c.l.b16 %v4218_v4  ;;  %5332 = vmatpush.bf16.msra.mxu1 %v5327_v47  ;;  %v2999_v20 = vrot.slane %v2997_v11, 4  ;;  %v2751_v39 = vrot.slane %v2749_v28, 4  ;;  %v9355_v59 = vpop.permute.xlu1 %4362  ;;  %v9385_v28 = vpop.permute.xlu2 %4436 }
 0x2d9   : > { %6070 = vmatmul.msk.bf16.gmra.mxu2 %vm1370_vm3, %v5422_v24  ;;  %v2762_v12 = vshrl.u32 %v2434_v41, 16  ;;  %4712 = vrot.lane.b32.xlu0 %v4684_v16, %s6875_s29  ;;  %v4920_v51 = vunpack.c.l.b16 %v4215_v58  ;;  %v2998_v15 = vsel %vm8823_vm1, %v5806_v61, %v2997_v11  ;;  %v2754_v32 = vrot.slane %v2752_v53, 5 }
 0x2da   : > { %v2760_v14 = vrot.slane %v2758_v62, 5  ;;  %6142 = vmatpush.bf16.msrb.mxu3 %v5327_v47  ;;  %v5057_v55 = vsel %vm1535_vm8, %v5025_v37, %v9275_v23  ;;  %v3001_v50 = vsel %vm8823_vm1, %v2999_v20, %v3000_v10  ;;  %v2768_v45 = vshll.u32 %v2453_v27, 16  ;;  %v6137_v23 = vld [vmem:[%s10410_s3 + $0x10] sm:$0xff]  ;;  %v3033_v27 = vld [vmem:[#allocation2 + $0x48] sm:$0xf]  ;;  %v9379_v37 = vpop.permute.xlu0 %4944 }
 0x2db   : > { %v2764_v42 = vrot.slane %v2762_v12, 4  ;;  %v4409_v46 = vunpack.c.l.b16 %v3001_v50  ;;  %v2755_v3 = vor.u32 %v2754_v32, %v2751_v39  ;;  %v5815_v34 = vrot.slane %v3460_v2, 9  ;;  %v6136_v47 = vld [vmem:[%s10410_s3 + $0x8] sm:$0xff]  ;;  %v2435_v2 = vld [vmem:[#allocation2 + $0x9c] sm:$0xf]  ;;  %v10690_v50 = vld [vmem:[#allocation22_spill] sm:$0xff] }
 0x2dc   : > { %v3556_v1 = vrot.slane %v9348_v19, 5  ;;  %v4940_v33 = vpack.c.b16 %v4921_v43, %v4920_v51  ;;  %v4408_v5 = vunpack.c.l.b16 %v2998_v15  ;;  %5333 = vmatpush.bf16.msra.mxu1 %v6138_v44  ;;  %v3559_v24 = vrot.slane %v9353_v60, 5  ;;  %v9401_v12 = vld [vmem:[#allocation2 + $0xa0] sm:$0xf]  ;;  %v6124_v51 = vld [vmem:[#allocation2 + $0x54] sm:$0xff] }
 0x2dd   : > { %v2765_v31 = vor.u32 %v2764_v42, %v2760_v14  ;;  %v2756_v7 = vrot.slane %v2755_v3, 4  ;;  %v2770_v52 = vrot.slane %v2768_v45, 5  ;;  %v5089_v26 = vsel %vm1601_vm10, %v5057_v55, %v9197_v22  ;;  %v10689_v55 = vld [vmem:[#allocation21_spill] sm:$0xff]  ;;  %v4069_v45 = vld [vmem:[#allocation2 + $0x54] sm:$0xe]  ;;  %v6135_v3 = vld [vmem:[%s10410_s3] sm:$0xff] }
 0x2de   : > { %4538 = vrot.lane.b32.xlu2 %v6108_v6, %s6870_s13  ;;  %v3557_v41 = vsel %vm8823_vm1, %v5815_v34, %v3556_v1  ;;  %v3558_v9 = vrot.slane %v3556_v1, 4  ;;  %6143 = vmatpush.bf16.msrb.mxu3 %v6138_v44  ;;  %v9369_v16 = vpack.c.b16 %v4409_v46, %v4408_v5  ;;  %vm5120_vm12 = vcmask 326656   ;;  %v3642_v34 = vld [vmem:[#allocation2 + $0x54] sm:$0xf] }
 0x2df   : > { %v2766_v18 = vrot.slane %v2765_v31, 4  ;;  %v2761_v13 = vsel %vm8726_vm13, %v2756_v7, %v2760_v14  ;;  %vm5153_vm15 = vcmask 392192   ;;  %v5122_v17 = vsel %vm5120_vm12, %v5089_v26, %v4689_v54 }
 0x2e0   : > { %4968 = vrot.lane.b32.xlu1 %v4940_v33, %s6876_s30  ;;  %v3560_v58 = vsel %vm8823_vm1, %v3558_v9, %v3559_v24  ;;  %v9383_v61 = vunpack.c.l.b16 %v2761_v13  ;;  %v4650_v22 = vunpack.c.l.b16 %v3557_v41  ;;  %5334 = vmatpush.bf16.msra.mxu1 %v6137_v23  ;;  %v3192_v10 = vshrl.u32 %v3033_v27, 16  ;;  %v9407_v6 = vpop.permute.xlu1 %4434  ;;  %v3643_v24 = vld [vmem:[#allocation2 + $0x58] sm:$0xf]  ;;  %v9418_v9 = vld [vmem:[#allocation2 + $0x5c] sm:$0x1] }
 0x2e1   : > { %v2771_v4 = vsel %vm8726_vm13, %v2766_v18, %v2770_v52  ;;  %v4651_v11 = vunpack.c.l.b16 %v3560_v58  ;;  %4442 = vrot.lane.b32.xlu0 %v9333_v8, %s6867_s10  ;;  %v3195_v53 = vshll.u32 %v3033_v27, 16  ;;  %v3201_v62 = vshll.u32 %v9348_v19, 16  ;;  %v9403_v8 = vld [vmem:[#allocation2 + $0xa4] sm:$0x1] }
 0x2e2   : > { %v9392_v54 = vunpack.c.l.b16 %v2771_v4  ;;  %6144 = vmatpush.bf16.msrb.mxu3 %v6137_v23  ;;  %v9397_v20 = vsel %vm5153_vm15, %v5122_v17, %v9322_v30  ;;  %v3205_v44 = vshrl.u32 %v9348_v19, 16  ;;  %v3211_v39 = vshll.u32 %v9353_v60, 16 }
 0x2e3   : > { %v4677_v43 = vpack.c.b16 %v4651_v11, %v4650_v22  ;;  %v3194_v15 = vrot.slane %v3192_v10, 4  ;;  %v3197_v32 = vrot.slane %v3195_v53, 5  ;;  %v3203_v14 = vrot.slane %v3201_v62, 5  ;;  %v9427_v10 = vpop.permute.xlu0 %4610 }
 0x2e4   : > { %v5423_v42 = vpack.c.bf16 %v10690_v50, %v10689_v55  ;;  %v4348_v30 = vpack.c.b16 %v9392_v54, %v9383_v61  ;;  %v3207_v19 = vrot.slane %v3205_v44, 4  ;;  %5335 = vmatpush.bf16.msra.mxu1 %v6136_v47  ;;  %v2773_v60 = vshrl.u32 %v2435_v2, 16  ;;  %v9433_v44 = vpop.permute.xlu2 %4692 }
 0x2e5   : > { %v2776_v46 = vshll.u32 %v2435_v2, 16  ;;  %v3198_v1 = vor.u32 %v3197_v32, %v3194_v15  ;;  %v2782_v33 = vshll.u32 %v9401_v12, 16  ;;  %v2786_v5 = vshrl.u32 %v9401_v12, 16 }
 0x2e6   : > { %4794 = vrot.lane.b32.xlu2 %v6124_v51, %s6873_s23  ;;  %v2792_v31 = vshll.u32 %v9403_v8, 16  ;;  %6145 = vmatpush.bf16.msrb.mxu3 %v6136_v47  ;;  %v3208_v23 = vor.u32 %v3207_v19, %v3203_v14  ;;  %v3213_v7 = vrot.slane %v3211_v39, 5  ;;  %v2775_v52 = vrot.slane %v2773_v60, 4 }
 0x2e7   : > { %v2778_v41 = vrot.slane %v2776_v46, 5  ;;  %v3199_v18 = vrot.slane %v3198_v1, 4  ;;  %v2784_v26 = vrot.slane %v2782_v33, 5  ;;  %v2788_v27 = vrot.slane %v2786_v5, 4  ;;  %v3049_v5 = vld [vmem:[#allocation2 + $0xa8] sm:$0xf] }
 0x2e8   : > { %4698 = vrot.lane.b32.xlu1 %v4677_v43, %s6875_s29  ;;  %v5831_v13 = vrot.slane %v4069_v45, 9  ;;  %v3209_v58 = vrot.slane %v3208_v23, 4  ;;  %v2794_v4 = vrot.slane %v2792_v31, 5  ;;  %v4165_v61 = vrot.slane %v3643_v24, 5  ;;  %5336 = vmatpush.bf16.msra.mxu1 %v6135_v3  ;;  %v4691_v60 = vpop.permute.xlu1 %4690 }
 0x2e9   : > { %6071 = vmatmul.msk.bf16.gmra.mxu2 %vm1370_vm3, %v5423_v42  ;;  %v2779_v17 = vor.u32 %v2778_v41, %v2775_v52  ;;  %4456 = vrot.lane.b32.xlu0 %v9369_v16, %s6867_s10  ;;  %v3204_v22 = vsel %vm8726_vm13, %v3199_v18, %v3203_v14  ;;  %v2789_v11 = vor.u32 %v2788_v27, %v2784_v26  ;;  %v4168_v47 = vrot.slane %v9418_v9, 5  ;;  %v9452_v18 = vld [vmem:[#allocation2 + $0xb0] sm:$0x1] }
 0x2ea   : > { %v3801_v54 = vshrl.u32 %v3642_v34, 16  ;;  %6146 = vmatpush.bf16.msrb.mxu3 %v6135_v3  ;;  %v3214_v53 = vsel %vm8726_vm13, %v3209_v58, %v3213_v7  ;;  %v4570_v62 = vunpack.c.l.b16 %v3204_v22  ;;  %v4166_v43 = vsel %vm8823_vm1, %v5831_v13, %v4165_v61 }
 0x2eb   : > { %v2780_v2 = vrot.slane %v2779_v17, 4  ;;  %v4571_v16 = vunpack.c.l.b16 %v3214_v53  ;;  %v2790_v39 = vrot.slane %v2789_v11, 4  ;;  %v4167_v51 = vrot.slane %v4165_v61, 4 }
 0x2ec   : > { %v4906_v15 = vunpack.c.l.b16 %v4166_v43  ;;  %v3803_v14 = vrot.slane %v3801_v54, 4  ;;  %v3804_v55 = vshll.u32 %v3642_v34, 16  ;;  %v3810_v50 = vshll.u32 %v3643_v24, 16  ;;  %v2857_v54 = vld [vmem:[#allocation2 + $0x9c] sm:$0xe] }
 0x2ed   : > { %v2785_v32 = vsel %vm8726_vm13, %v2780_v2, %v2784_v26  ;;  %v4597_v42 = vpack.c.b16 %v4571_v16, %v4570_v62  ;;  %v2795_v45 = vsel %vm8726_vm13, %v2790_v39, %v2794_v4  ;;  %v3814_v31 = vshrl.u32 %v3643_v24, 16 }
 0x2ee   : > { %6147 = vmatpush.bf16.msra.mxu3 %v9073_v63  ;;  %4376 = vrot.lane.b32.xlu2 %v4348_v30, %s6865_s8  ;;  %v4330_v19 = vunpack.c.l.b16 %v2785_v32  ;;  %v4169_v63 = vsel %vm8823_vm1, %v4167_v51, %v4168_v47  ;;  %v4331_v46 = vunpack.c.l.b16 %v2795_v45  ;;  %v3806_v1 = vrot.slane %v3804_v55, 5  ;;  %v9444_v30 = vld [vmem:[#allocation2 + $0xac] sm:$0xf]  ;;  %v9464_v47 = vpop.permute.xlu2 %4948  ;;  %v3658_v32 = vld [vmem:[#allocation2 + $0xb4] sm:$0xf] }
 0x2ef   : > { %v4907_v3 = vunpack.c.l.b16 %v4169_v63  ;;  %v3812_v33 = vrot.slane %v3810_v50, 5  ;;  %v3820_v34 = vshll.u32 %v9418_v9, 16  ;;  %vm5186_vm4 = vcmask 457728  }
 0x2f0   : > { %vm5219_vm7 = vcmask 523264   ;;  %v5027_v7 = vsel %vm1469_vm6, %v9306_v40, %v9407_v6  ;;  %v3807_v52 = vor.u32 %v3806_v1, %v3803_v14  ;;  %v5188_v41 = vsel %vm5186_vm4, %v9397_v20, %v9232_v56  ;;  %v4947_v45 = vpop.permute.xlu1 %4946 }
 0x2f1   : > { %v4933_v23 = vpack.c.b16 %v4907_v3, %v4906_v15  ;;  %4618 = vrot.lane.b32.xlu0 %v4597_v42, %s6871_s14  ;;  %v4349_v24 = vpack.c.b16 %v4331_v46, %v4330_v19  ;;  %v3816_v9 = vrot.slane %v3814_v31, 4  ;;  %v5221_v26 = vsel %vm5219_vm7, %v5188_v41, %v9379_v37  ;;  %v6116_v46 = vld [vmem:[#allocation2 + $0xa8] sm:$0xff]  ;;  %v3659_v31 = vld [vmem:[#allocation2 + $0xb8] sm:$0xf] }
 0x2f2   : > { %v3808_v27 = vrot.slane %v3807_v52, 4  ;;  %6050 = vmatmul.msk.bf16.vlgmr.msra.gmra.mxu1 %vm5292_vm9, %v5221_v26  ;;  %v3384_v40 = vshrl.u32 %v3049_v5, 16  ;;  %v3387_v6 = vshll.u32 %v3049_v5, 16  ;;  %v3393_v13 = vshll.u32 %v9444_v30, 16  ;;  %v3677_v52 = vld [vmem:[#allocation2 + $0xbc] sm:$0x1] }
 0x2f3   : > { %4954 = vrot.lane.b32.xlu1 %v4933_v23, %s6876_s30  ;;  %v3817_v56 = vor.u32 %v3816_v9, %v3812_v33  ;;  %v3822_v20 = vrot.slane %v3820_v34, 5  ;;  %v3397_v58 = vshrl.u32 %v9444_v30, 16  ;;  %v3403_v17 = vshll.u32 %v9452_v18, 16  ;;  %v4867_v4 = vpop.permute.xlu0 %4866 }
 0x2f4   : > { %v3813_v37 = vsel %vm8726_vm13, %v3808_v27, %v3812_v33  ;;  %v3386_v61 = vrot.slane %v3384_v40, 4  ;;  %v3389_v22 = vrot.slane %v3387_v6, 5  ;;  %v3395_v11 = vrot.slane %v3393_v13, 5  ;;  %v10692_v33 = vld [vmem:[#allocation19_spill] sm:$0xff] }
 0x2f5   : > { %v3818_v53 = vrot.slane %v3817_v56, 4  ;;  %v4826_v62 = vunpack.c.l.b16 %v3813_v37  ;;  %v3399_v2 = vrot.slane %v3397_v58, 4  ;;  %v5059_v43 = vsel %vm1535_vm8, %v5027_v7, %v9257_v29  ;;  %v3468_v56 = vld [vmem:[#allocation2 + $0xa8] sm:$0xe] }
 0x2f6   : > { %4378 = vrot.lane.b32.xlu2 %v4349_v24, %s6865_s8  ;;  %v3390_v16 = vor.u32 %v3389_v22, %v3386_v61  ;;  %v3405_v39 = vrot.slane %v3403_v17, 5  ;;  %v5091_v51 = vsel %vm1601_vm10, %v5059_v43, %v9427_v10  ;;  %v3004_v15 = vrot.slane %v9401_v12, 5  ;;  %v10691_v12 = vld [vmem:[#allocation18_spill] sm:$0xff] }
 0x2f7   : > { %v3823_v14 = vsel %vm8726_vm13, %v3818_v53, %v3822_v20  ;;  %v3400_v55 = vor.u32 %v3399_v2, %v3395_v11  ;;  %v5124_v50 = vsel %vm5120_vm12, %v5091_v51, %v4691_v60  ;;  %v5807_v42 = vrot.slane %v2857_v54, 9  ;;  %v4077_v2 = vld [vmem:[#allocation2 + $0xb4] sm:$0xe] }
 0x2f8   : > { %v4827_v19 = vunpack.c.l.b16 %v3823_v14  ;;  %v3391_v63 = vrot.slane %v3390_v16, 4  ;;  %v3006_v29 = vrot.slane %v3004_v15, 4  ;;  %v3007_v3 = vrot.slane %v9403_v8, 5 }
 0x2f9   : > { %v3401_v1 = vrot.slane %v3400_v55, 4  ;;  %v3005_v10 = vsel %vm8823_vm1, %v5807_v42, %v3004_v15  ;;  %v5424_v5 = vpack.c.bf16 %v10692_v33, %v10691_v12  ;;  %v3993_v34 = vshrl.u32 %v3658_v32, 16  ;;  %v6132_v15 = vld [vmem:[#allocation2 + $0xb4] sm:$0xff] }
 0x2fa   : > { %v4853_v23 = vpack.c.b16 %v4827_v19, %v4826_v62  ;;  %v3396_v60 = vsel %vm8726_vm13, %v3391_v63, %v3395_v11  ;;  %v3008_v7 = vsel %vm8823_vm1, %v3006_v29, %v3007_v3  ;;  %v3996_v8 = vshll.u32 %v3658_v32, 16 }
 0x2fb   : > { %4554 = vrot.lane.b32.xlu1 %v6116_v46, %s6870_s13  ;;  %v3406_v41 = vsel %vm8726_vm13, %v3401_v1, %v3405_v39  ;;  %v4586_v24 = vunpack.c.l.b16 %v3396_v60  ;;  %v4411_v9 = vunpack.c.l.b16 %v3008_v7  ;;  %6072 = vmatmul.msk.bf16.gmra.mxu2 %vm1370_vm3, %v5424_v5  ;;  %v3995_v26 = vrot.slane %v3993_v34, 4  ;;  %v4533_v61 = vpop.permute.xlu0 %4532  ;;  %v6853_v7 = vld [vmem:[#allocation2 + $0x4c] sm:$0xf] }
 0x2fc   : > { %4874 = vrot.lane.b32.xlu0 %v4853_v23, %s6874_s26  ;;  %v4587_v27 = vunpack.c.l.b16 %v3406_v41  ;;  %v3998_v40 = vrot.slane %v3996_v8, 5  ;;  %v4002_v6 = vshll.u32 %v3659_v31, 16  ;;  %v4006_v13 = vshrl.u32 %v3659_v31, 16  ;;  %v9494_v62 = vpop.permute.xlu2 %4614  ;;  %v3461_v8 = vld [vmem:[#allocation2 + $0x54] sm:$0xe] }
 0x2fd   : > { %v5029_v20 = vsel %vm1469_vm6, %v9326_v48, %v9385_v28  ;;  %v4410_v58 = vunpack.c.l.b16 %v3005_v10  ;;  %v4012_v17 = vshll.u32 %v3677_v52, 16  ;;  %v5157_v37 = vsel %vm5153_vm15, %v5124_v50, %v9295_v49 }
 0x2fe   : > { %v4605_v22 = vpack.c.b16 %v4587_v27, %v4586_v24  ;;  %v3999_v11 = vor.u32 %v3998_v40, %v3995_v26  ;;  %v4004_v54 = vrot.slane %v4002_v6, 5  ;;  %v4008_v53 = vrot.slane %v4006_v13, 4  ;;  %v10693_v26 = vld [vmem:[#allocation16_spill] sm:$0xff]  ;;  %v10694_v27 = vld [vmem:[#allocation17_spill] sm:$0xff]  ;;  %v3061_v6 = vld [vmem:[#allocation2 + $0x5c] sm:$0x1] }
 0x2ff   : > { %v4429_v43 = vpack.c.b16 %v4411_v9, %v4410_v58  ;;  %v5190_v16 = vsel %vm5186_vm4, %v5157_v37, %v4867_v4  ;;  %v5823_v39 = vrot.slane %v3468_v56, 9  ;;  %v3612_v51 = vrot.slane %v9444_v30, 5  ;;  %v4613_v19 = vpop.permute.xlu1 %4612  ;;  %v3035_v37 = vld [vmem:[#allocation2 + $0x54] sm:$0xf] }
 0x300   : > { %4634 = vrot.lane.b32.xlu2 %v4605_v22, %s6871_s14  ;;  %v4000_v48 = vrot.slane %v3999_v11, 4  ;;  %v4009_v28 = vor.u32 %v4008_v53, %v4004_v54  ;;  %v3615_v49 = vrot.slane %v9452_v18, 5  ;;  %v5223_v32 = vsel %vm5219_vm7, %v5190_v16, %v4947_v45  ;;  %v2850_v18 = vld [vmem:[#allocation2 + $0x48] sm:$0xe] }
 0x301   : > { %v3613_v14 = vsel %vm8823_vm1, %v5823_v39, %v3612_v51  ;;  %v3614_v55 = vrot.slane %v3612_v51, 4  ;;  %v5839_v50 = vrot.slane %v4077_v2, 9  ;;  %v4221_v42 = vrot.slane %v3659_v31, 5  ;;  %v3036_v31 = vld [vmem:[#allocation2 + $0x58] sm:$0xf] }
 0x302   : > { %v4005_v4 = vsel %vm8726_vm13, %v4000_v48, %v4004_v54  ;;  %v4010_v30 = vrot.slane %v4009_v28, 4  ;;  %v4014_v63 = vrot.slane %v4012_v17, 5  ;;  %6051 = vmatmul.msk.bf16.gmra.mxu1 %vm5292_vm9, %v5223_v32  ;;  %v4224_v46 = vrot.slane %v3677_v52, 5 }
 0x303   : > { %4810 = vrot.lane.b32.xlu1 %v6132_v15, %s6873_s23  ;;  %v3616_v45 = vsel %vm8823_vm1, %v3614_v55, %v3615_v49  ;;  %v4222_v29 = vsel %vm8823_vm1, %v5839_v50, %v4221_v42  ;;  %v4223_v3 = vrot.slane %v4221_v42, 4  ;;  %v5061_v1 = vsel %vm1535_vm8, %v5029_v20, %v4533_v61  ;;  %v4789_v17 = vpop.permute.xlu0 %4788  ;;  %v2437_v55 = vld [vmem:[#allocation2 + $0xa8] sm:$0xf] }
 0x304   : > { %4458 = vrot.lane.b32.xlu0 %v4429_v43, %s6867_s10  ;;  %v4015_v10 = vsel %vm8726_vm13, %v4010_v30, %v4014_v63  ;;  %v4842_v12 = vunpack.c.l.b16 %v4005_v4  ;;  %v4666_v33 = vunpack.c.l.b16 %v3613_v14  ;;  %v4667_v5 = vunpack.c.l.b16 %v3616_v45  ;;  %v9539_v4 = vld [vmem:[#allocation2 + $0xac] sm:$0xf]  ;;  %v9542_v45 = vld [vmem:[#allocation2 + $0xb0] sm:$0x1] }
 0x305   : > { %v4843_v34 = vunpack.c.l.b16 %v4015_v10  ;;  %v4225_v23 = vsel %vm8823_vm1, %v4223_v3, %v4224_v46  ;;  %v5800_v60 = vrot.slane %v2850_v18, 9  ;;  %v2955_v52 = vrot.slane %v6853_v7, 5 }
 0x306   : > { %v4922_v41 = vunpack.c.l.b16 %v4222_v29  ;;  %v4923_v24 = vunpack.c.l.b16 %v4225_v23  ;;  %v5093_v9 = vsel %vm1601_vm10, %v5061_v1, %v4613_v19  ;;  %v5425_v40 = vpack.c.bf16 %v10694_v27, %v10693_v26 }
 0x307   : > { %v4861_v13 = vpack.c.b16 %v4843_v34, %v4842_v12  ;;  %v2956_v56 = vsel %vm8823_vm1, %v5800_v60, %v2955_v52  ;;  %v2957_v20 = vrot.slane %v2955_v52, 4  ;;  %v3563_v58 = vrot.slane %v3036_v31, 5  ;;  %v9546_v12 = vld [vmem:[#allocation2 + $0x64] sm:$0xf]  ;;  %v4070_v60 = vld [vmem:[#allocation2 + $0x60] sm:$0xe] }
 0x308   : > { %v4685_v61 = vpack.c.b16 %v4667_v5, %v4666_v33  ;;  %v4941_v22 = vpack.c.b16 %v4923_v24, %v4922_v41  ;;  %v4396_v54 = vunpack.c.l.b16 %v2956_v56  ;;  %v5816_v53 = vrot.slane %v3461_v8, 9  ;;  %v6109_v33 = vld [vmem:[#allocation2 + $0x54] sm:$0xff]  ;;  %v9551_v24 = vld [vmem:[#allocation2 + $0x68] sm:$0x1] }
 0x309   : > { %v9522_v11 = vpop.permute.xlu2 %4870  ;;  %4890 = vrot.lane.b32.xlu2 %v4861_v13, %s6874_s26  ;;  %v2959_v2 = vsel %vm8823_vm1, %v2957_v20, %v2958_v35  ;;  %v3565_v43 = vrot.slane %v3563_v58, 4  ;;  %v3566_v16 = vrot.slane %v3061_v6, 5  ;;  %v5126_v39 = vsel %vm5120_vm12, %v5093_v9, %v9433_v44 }
 0x30a   : > { %v3564_v51 = vsel %vm8823_vm1, %v5816_v53, %v3563_v58  ;;  %v5159_v48 = vsel %vm5153_vm15, %v5126_v39, %v4789_v17  ;;  %v3216_v28 = vshrl.u32 %v3035_v37, 16  ;;  %v3219_v15 = vshll.u32 %v3035_v37, 16 }
 0x30b   : > { %4970 = vrot.lane.b32.xlu1 %v4941_v22, %s6876_s30  ;;  %6073 = vmatmul.msk.bf16.gmra.mxu2 %vm1370_vm3, %v5425_v40  ;;  %v3567_v57 = vsel %vm8823_vm1, %v3565_v43, %v3566_v16  ;;  %v3225_v49 = vshll.u32 %v3036_v31, 16  ;;  %v3229_v32 = vshrl.u32 %v3036_v31, 16  ;;  %v3235_v14 = vshll.u32 %v3061_v6, 16 }
 0x30c   : > { %v4869_v35 = vpop.permute.xlu1 %4868  ;;  %4714 = vrot.lane.b32.xlu0 %v4685_v61, %s6875_s29  ;;  %v4397_v44 = vunpack.c.l.b16 %v2959_v2  ;;  %v4653_v50 = vunpack.c.l.b16 %v3567_v57  ;;  %v3218_v42 = vrot.slane %v3216_v28, 4  ;;  %v3221_v19 = vrot.slane %v3219_v15, 5 }
 0x30d   : > { %v4652_v30 = vunpack.c.l.b16 %v3564_v51  ;;  %v3227_v63 = vrot.slane %v3225_v49, 5  ;;  %v3231_v46 = vrot.slane %v3229_v32, 4  ;;  %v5192_v18 = vsel %vm5186_vm4, %v5159_v48, %v4869_v35  ;;  %v9553_v9 = vpop.f32.mrf.mxu2 }
 0x30e   : > { %v3222_v29 = vor.u32 %v3221_v19, %v3218_v42  ;;  %v3237_v3 = vrot.slane %v3235_v14, 5  ;;  %v5225_v1 = vsel %vm5219_vm7, %v5192_v18, %v9464_v47  ;;  %v2797_v10 = vshrl.u32 %v2437_v55, 16 }
 0x30f   : > { %v3232_v5 = vor.u32 %v3231_v46, %v3227_v63  ;;  %v2800_v31 = vshll.u32 %v2437_v55, 16  ;;  %v2806_v34 = vshll.u32 %v9539_v4, 16  ;;  %v2810_v23 = vshrl.u32 %v9539_v4, 16  ;;  %v6125_v55 = vld [vmem:[#allocation2 + $0x60] sm:$0xff] }
 0x310   : > { %v4678_v7 = vpack.c.b16 %v4653_v50, %v4652_v30  ;;  %v3223_v52 = vrot.slane %v3222_v29, 4  ;;  %v2799_v8 = vrot.slane %v2797_v10, 4  ;;  %v2816_v41 = vshll.u32 %v9542_v45, 16  ;;  %v9579_v29 = vld [vmem:[#allocation2 + $0xb8] sm:$0xf] }
 0x311   : > { %4540 = vrot.lane.b32.xlu2 %v6109_v33, %s6870_s13  ;;  %v9556_v47 = vpop.permute.xlu2 %4536  ;;  %v3233_v26 = vrot.slane %v3232_v5, 4  ;;  %v2802_v27 = vrot.slane %v2800_v31, 5  ;;  %v2808_v40 = vrot.slane %v2806_v34, 5  ;;  %v2812_v6 = vrot.slane %v2810_v23, 4  ;;  %v9583_v5 = vld [vmem:[#allocation2 + $0xbc] sm:$0x1] }
 0x312   : > { %v4422_v13 = vpack.c.b16 %v4397_v44, %v4396_v54  ;;  %v3228_v56 = vsel %vm8726_vm13, %v3223_v52, %v3227_v63  ;;  %6052 = vmatmul.msk.bf16.gmra.mxu1 %vm5292_vm9, %v5225_v1  ;;  %v5832_v20 = vrot.slane %v4070_v60, 9  ;;  %v4172_v58 = vrot.slane %v9546_v12, 5  ;;  %v4439_v17 = vpop.permute.xlu0 %4438  ;;  %v3644_v54 = vld [vmem:[#allocation2 + $0x60] sm:$0xf]  ;;  %v10695_v23 = vld [vmem:[#allocation30_spill] sm:$0xff]  ;;  %v10696_v60 = vld [vmem:[#allocation31_spill] sm:$0xff] }
 0x313   : > { %4700 = vrot.lane.b32.xlu1 %v4678_v7, %s6875_s29  ;;  %v3238_v37 = vsel %vm8726_vm13, %v3233_v26, %v3237_v3  ;;  %v2803_v61 = vor.u32 %v2802_v27, %v2799_v8  ;;  %v2813_v22 = vor.u32 %v2812_v6, %v2808_v40  ;;  %v4175_v53 = vrot.slane %v9551_v24, 5 }
 0x314   : > { %v4535_v2 = vpop.permute.xlu1 %4534  ;;  %4444 = vrot.lane.b32.xlu0 %v4422_v13, %s6867_s10  ;;  %v4573_v43 = vunpack.c.l.b16 %v3238_v37  ;;  %v4173_v16 = vsel %vm8823_vm1, %v5832_v20, %v4172_v58  ;;  %v4174_v39 = vrot.slane %v4172_v58, 4  ;;  %v5031_v51 = vsel %vm1469_vm6, %v9319_v36, %v4439_v17  ;;  %v3051_v36 = vld [vmem:[#allocation2 + $0xb4] sm:$0xf] }
 0x315   : > { %v4572_v48 = vunpack.c.l.b16 %v3228_v56  ;;  %v2804_v28 = vrot.slane %v2803_v61, 4  ;;  %v2814_v15 = vrot.slane %v2813_v22, 4  ;;  %v2818_v57 = vrot.slane %v2816_v41, 5  ;;  %v9588_v8 = vpop.f32.mrf.mxu2 }
 0x316   : > { %v4176_v35 = vsel %vm8823_vm1, %v4174_v39, %v4175_v53  ;;  %v4908_v49 = vunpack.c.l.b16 %v4173_v16  ;;  %v3825_v32 = vshrl.u32 %v3644_v54, 16  ;;  %v3828_v14 = vshll.u32 %v3644_v54, 16  ;;  %v2423_v16 = vld [vmem:[#allocation2 + $0x54] sm:$0xf] }
 0x317   : > { %v2819_v44 = vsel %vm8726_vm13, %v2814_v15, %v2818_v57  ;;  %v4909_v50 = vunpack.c.l.b16 %v4176_v35  ;;  %v5063_v42 = vsel %vm1535_vm8, %v5031_v51, %v4535_v2  ;;  %v3834_v19 = vshll.u32 %v9546_v12, 16 }
 0x318   : > { %v4598_v30 = vpack.c.b16 %v4573_v43, %v4572_v48  ;;  %v2809_v63 = vsel %vm8726_vm13, %v2804_v28, %v2808_v40  ;;  %v3827_v46 = vrot.slane %v3825_v32, 4  ;;  %v3830_v18 = vrot.slane %v3828_v14, 5  ;;  %v2858_v43 = vld [vmem:[#allocation2 + $0xa8] sm:$0xe] }
 0x319   : > { %4796 = vrot.lane.b32.xlu2 %v6125_v55, %s6873_s23  ;;  %v4333_v3 = vunpack.c.l.b16 %v2819_v44  ;;  %v4934_v1 = vpack.c.b16 %v4909_v50, %v4908_v49  ;;  %v3836_v10 = vrot.slane %v3834_v19, 5  ;;  %v3838_v33 = vshrl.u32 %v9546_v12, 16  ;;  %v9591_v26 = vpop.permute.xlu2 %4792  ;;  %v6117_v55 = vld [vmem:[#allocation2 + $0xb4] sm:$0xff] }
 0x31a   : > { %v3831_v31 = vor.u32 %v3830_v18, %v3827_v46  ;;  %v3844_v34 = vshll.u32 %v9551_v24, 16  ;;  %v5426_v7 = vpack.c.bf16 %v10696_v60, %v10695_v23  ;;  %v3408_v52 = vshrl.u32 %v3051_v36, 16  ;;  %v9623_v60 = vld [vmem:[#allocation2 + $0x5c] sm:$0x1] }
 0x31b   : > { %v4332_v41 = vunpack.c.l.b16 %v2809_v63  ;;  %4956 = vrot.lane.b32.xlu1 %v4934_v1, %s6876_s30  ;;  %v3840_v27 = vrot.slane %v3838_v33, 4  ;;  %v3411_v40 = vshll.u32 %v3051_v36, 16  ;;  %v3417_v12 = vshll.u32 %v9579_v29, 16 }
 0x31c   : > { %v4791_v6 = vpop.permute.xlu1 %4790  ;;  %4620 = vrot.lane.b32.xlu0 %v4598_v30, %s6871_s14  ;;  %v3832_v13 = vrot.slane %v3831_v31, 4  ;;  %6074 = vmatmul.msk.bf16.gmra.mxu2 %vm1370_vm3, %v5426_v7  ;;  %v3410_v24 = vrot.slane %v3408_v52, 4  ;;  %v3421_v56 = vshrl.u32 %v9579_v29, 16  ;;  %v3427_v20 = vshll.u32 %v9583_v5, 16 }
 0x31d   : > { %v3841_v58 = vor.u32 %v3840_v27, %v3836_v10  ;;  %v3413_v17 = vrot.slane %v3411_v40, 5  ;;  %v3419_v37 = vrot.slane %v3417_v12, 5  ;;  %v4350_v61 = vpack.c.b16 %v4333_v3, %v4332_v41  ;;  %v6091_v3 = vld [vmem:[#allocation2 + $0x30] sm:$0xff] }
 0x31e   : > { %v3837_v22 = vsel %vm8726_vm13, %v3832_v13, %v3836_v10  ;;  %v3846_v53 = vrot.slane %v3844_v34, 5  ;;  %v3423_v2 = vrot.slane %v3421_v56, 4  ;;  %v4695_v54 = vpop.permute.xlu0 %4694  ;;  %v3429_v48 = vrot.slane %v3427_v20, 5 }
 0x31f   : > { %v3842_v39 = vrot.slane %v3841_v58, 4  ;;  %v3414_v51 = vor.u32 %v3413_v17, %v3410_v24  ;;  %v5095_v28 = vsel %vm1601_vm10, %v5063_v42, %v9494_v62  ;;  %v4828_v15 = vunpack.c.l.b16 %v3837_v22  ;;  %v9608_v42 = vld [vmem:[#allocation2 + $0x58] sm:$0xf]  ;;  %v3469_v24 = vld [vmem:[#allocation2 + $0xb4] sm:$0xe] }
 0x320   : > { %v3424_v57 = vor.u32 %v3423_v2, %v3419_v37  ;;  %v5128_v35 = vsel %vm5120_vm12, %v5095_v28, %v4695_v54  ;;  %v3011_v49 = vrot.slane %v9539_v4, 5  ;;  %v5808_v44 = vrot.slane %v2858_v43, 9  ;;  %v6133_v43 = vld [vmem:[#allocation2 + $0xc0] sm:$0xff] }
 0x321   : > { %4380 = vrot.lane.b32.xlu2 %v4350_v61, %s6865_s8  ;;  %v3847_v32 = vsel %vm8726_vm13, %v3842_v39, %v3846_v53  ;;  %v3415_v14 = vrot.slane %v3414_v51, 4  ;;  %v2629_v50 = vshrl.u32 %v2423_v16, 16  ;;  %v3014_v62 = vrot.slane %v9542_v45, 5  ;;  %v9631_v61 = vld [vmem:[#allocation2 + $0xc4] sm:$0xf]  ;;  %v10697_v51 = vld [vmem:[#allocation27_spill] sm:$0xff] }
 0x322   : > { %v4829_v19 = vunpack.c.l.b16 %v3847_v32  ;;  %v3425_v36 = vrot.slane %v3424_v57, 4  ;;  %v3013_v30 = vrot.slane %v3011_v49, 4  ;;  %v3012_v4 = vsel %vm8823_vm1, %v5808_v44, %v3011_v49  ;;  %v3678_v32 = vld [vmem:[#allocation2 + $0xc8] sm:$0x1]  ;;  %v2851_v44 = vld [vmem:[#allocation2 + $0x54] sm:$0xe] }
 0x323   : > { %v3420_v63 = vsel %vm8726_vm13, %v3415_v14, %v3419_v37  ;;  %4556 = vrot.lane.b32.xlu1 %v6117_v55, %s6870_s13  ;;  %v2631_v46 = vrot.slane %v2629_v50, 4  ;;  %v2632_v18 = vshll.u32 %v2423_v16, 16  ;;  %v9619_v33 = vpop.f32.mrf.mxu2  ;;  %v9621_v23 = vpop.permute.xlu2 %4632  ;;  %v2638_v52 = vshll.u32 %v9608_v42, 16 }
 0x324   : > { %v4854_v1 = vpack.c.b16 %v4829_v19, %v4828_v15  ;;  %v3430_v10 = vsel %vm8726_vm13, %v3425_v36, %v3429_v48  ;;  %v3015_v45 = vsel %vm8823_vm1, %v3013_v30, %v3014_v62  ;;  %v4588_v31 = vunpack.c.l.b16 %v3420_v63  ;;  %v4441_v41 = vpop.permute.xlu1 %4440  ;;  %v10698_v48 = vld [vmem:[#allocation28_spill] sm:$0xff] }
 0x325   : > { %v4589_v34 = vunpack.c.l.b16 %v3430_v10  ;;  %v2634_v7 = vrot.slane %v2632_v18, 5  ;;  %v4990_v27 = vsel %vm1403_vm5, %v6091_v3, %v9249_v21  ;;  %v5161_v40 = vsel %vm5153_vm15, %v5128_v35, %v4791_v6  ;;  %v4078_v6 = vld [vmem:[#allocation2 + $0xc0] sm:$0xe] }
 0x326   : > { %4876 = vrot.lane.b32.xlu0 %v4854_v1, %s6874_s26  ;;  %v4412_v12 = vunpack.c.l.b16 %v3012_v4  ;;  %v2642_v13 = vshrl.u32 %v9608_v42, 16  ;;  %v4413_v20 = vunpack.c.l.b16 %v3015_v45  ;;  %v2640_v17 = vrot.slane %v2638_v52, 5  ;;  %v3660_v45 = vld [vmem:[#allocation2 + $0xc0] sm:$0xf] }
 0x327   : > { %v4606_v56 = vpack.c.b16 %v4589_v34, %v4588_v31  ;;  %v2635_v58 = vor.u32 %v2634_v7, %v2631_v46  ;;  %v4951_v37 = vpop.permute.xlu0 %4950  ;;  %v2648_v53 = vshll.u32 %v9623_v60, 16  ;;  %v9635_v21 = vsel %vm1469_vm6, %v4990_v27, %v4441_v41 }
 0x328   : > { %v2644_v22 = vrot.slane %v2642_v13, 4  ;;  %v3619_v2 = vrot.slane %v9579_v29, 5  ;;  %v5824_v16 = vrot.slane %v3469_v24, 9  ;;  %v5194_v39 = vsel %vm5186_vm4, %v5161_v40, %v9522_v11 }
 0x329   : > { %4636 = vrot.lane.b32.xlu2 %v4606_v56, %s6871_s14  ;;  %v2636_v54 = vrot.slane %v2635_v58, 4  ;;  %v5427_v28 = vpack.c.bf16 %v10698_v48, %v10697_v51  ;;  %v3622_v35 = vrot.slane %v9583_v5, 5  ;;  %v5227_v49 = vsel %vm5219_vm7, %v5194_v39, %v4951_v37  ;;  %v3062_v39 = vld [vmem:[#allocation2 + $0x68] sm:$0x1] }
 0x32a   : > { %v2645_v15 = vor.u32 %v2644_v22, %v2640_v17  ;;  %v3621_v57 = vrot.slane %v3619_v2, 4  ;;  %v4430_v29 = vpack.c.b16 %v4413_v20, %v4412_v12  ;;  %v3620_v14 = vsel %vm8823_vm1, %v5824_v16, %v3619_v2  ;;  %6053 = vmatmul.msk.bf16.gmra.mxu1 %vm5292_vm9, %v5227_v49 }
 0x32b   : > { %4812 = vrot.lane.b32.xlu1 %v6133_v43, %s6873_s23  ;;  %v5840_v55 = vrot.slane %v4078_v6, 9  ;;  %v4228_v11 = vrot.slane %v9631_v61, 5  ;;  %v2641_v50 = vsel %vm8726_vm13, %v2636_v54, %v2640_v17  ;;  %v2650_v5 = vrot.slane %v2648_v53, 5  ;;  %v9657_v46 = vpop.f32.mrf.mxu2  ;;  %v3038_v17 = vld [vmem:[#allocation2 + $0x64] sm:$0xf] }
 0x32c   : > { %v2646_v19 = vrot.slane %v2645_v15, 4  ;;  %v3623_v36 = vsel %vm8823_vm1, %v3621_v57, %v3622_v35  ;;  %6075 = vmatmul.msk.bf16.gmra.mxu2 %vm1370_vm3, %v5427_v28  ;;  %v4231_v4 = vrot.slane %v3678_v32, 5  ;;  %v4668_v3 = vunpack.c.l.b16 %v3620_v14  ;;  %v9667_v27 = vpop.permute.xlu1 %4696  ;;  %v3462_v6 = vld [vmem:[#allocation2 + $0x60] sm:$0xe] }
 0x32d   : > { %v4669_v30 = vunpack.c.l.b16 %v3623_v36  ;;  %v4229_v62 = vsel %vm8823_vm1, %v5840_v55, %v4228_v11  ;;  %v4230_v63 = vrot.slane %v4228_v11, 4  ;;  %v5801_v1 = vrot.slane %v2851_v44, 9  ;;  %v3037_v57 = vld [vmem:[#allocation2 + $0x60] sm:$0xf] }
 0x32e   : > { %4460 = vrot.lane.b32.xlu0 %v4430_v29, %s6867_s10  ;;  %v2651_v18 = vsel %vm8726_vm13, %v2646_v19, %v2650_v5  ;;  %v2962_v10 = vrot.slane %v9608_v42, 5  ;;  %v4318_v31 = vunpack.c.l.b16 %v2641_v50  ;;  %v4924_v41 = vunpack.c.l.b16 %v4229_v62 }
 0x32f   : > { %v4319_v34 = vunpack.c.l.b16 %v2651_v18  ;;  %v4232_v52 = vsel %vm8823_vm1, %v4230_v63, %v4231_v4  ;;  %v4686_v40 = vpack.c.b16 %v4669_v30, %v4668_v3  ;;  %v2965_v24 = vrot.slane %v9623_v60, 5 }
 0x330   : > { %v9663_v7 = vpop.permute.xlu2 %4888  ;;  %v2963_v12 = vsel %vm8823_vm1, %v5801_v1, %v2962_v10  ;;  %v2964_v13 = vrot.slane %v2962_v10, 4  ;;  %v4925_v42 = vunpack.c.l.b16 %v4232_v52  ;;  %v4017_v20 = vshrl.u32 %v3660_v45, 16 }
 0x331   : > { %v4343_v56 = vpack.c.b16 %v4319_v34, %v4318_v31  ;;  %v4020_v58 = vshll.u32 %v3660_v45, 16  ;;  %v4398_v22 = vunpack.c.l.b16 %v2963_v12  ;;  %v4026_v53 = vshll.u32 %v9631_v61, 16 }
 0x332   : > { %v2966_v37 = vsel %vm8823_vm1, %v2964_v13, %v2965_v24  ;;  %v4030_v2 = vshrl.u32 %v9631_v61, 16  ;;  %v4019_v43 = vrot.slane %v4017_v20, 4  ;;  %v4036_v60 = vshll.u32 %v3678_v32, 16  ;;  %v3646_v20 = vld [vmem:[#allocation2 + $0x6c] sm:$0xf] }
 0x333   : > { %4366 = vrot.lane.b32.xlu2 %v4343_v56, %s6865_s8  ;;  %v4399_v54 = vunpack.c.l.b16 %v2966_v37  ;;  %v4022_v16 = vrot.slane %v4020_v58, 5  ;;  %v5065_v51 = vsel %vm1535_vm8, %v9635_v21, %v9556_v47  ;;  %v4028_v48 = vrot.slane %v4026_v53, 5  ;;  %v9687_v36 = vpop.f32.mrf.mxu2  ;;  %v10699_v37 = vld [vmem:[#allocation25_spill] sm:$0xff] }
 0x334   : > { %v4032_v28 = vrot.slane %v4030_v2, 4  ;;  %v3570_v15 = vrot.slane %v3038_v17, 5  ;;  %v4942_v35 = vpack.c.b16 %v4925_v42, %v4924_v41  ;;  %v5817_v14 = vrot.slane %v3462_v6, 9  ;;  %v4071_v42 = vld [vmem:[#allocation2 + $0x6c] sm:$0xe] }
 0x335   : > { %v4423_v49 = vpack.c.b16 %v4399_v54, %v4398_v22  ;;  %v4617_v29 = vpop.permute.xlu0 %4616  ;;  %v4023_v61 = vor.u32 %v4022_v16, %v4019_v43  ;;  %v4038_v11 = vrot.slane %v4036_v60, 5  ;;  %v3573_v32 = vrot.slane %v3062_v39, 5  ;;  %v10700_v22 = vld [vmem:[#allocation26_spill] sm:$0xff] }
 0x336   : > { %4716 = vrot.lane.b32.xlu0 %v4686_v40, %s6875_s29  ;;  %v4033_v55 = vor.u32 %v4032_v28, %v4028_v48  ;;  %v3572_v44 = vrot.slane %v3570_v15, 4  ;;  %v5097_v47 = vsel %vm1601_vm10, %v5065_v51, %v4617_v29  ;;  %v3571_v19 = vsel %vm8823_vm1, %v5817_v14, %v3570_v15  ;;  %v3647_v40 = vld [vmem:[#allocation2 + $0x70] sm:$0xf]  ;;  %v3671_v16 = vld [vmem:[#allocation2 + $0x74] sm:$0x1] }
 0x337   : > { %4446 = vrot.lane.b32.xlu1 %v4423_v49, %s6867_s10  ;;  %v4024_v21 = vrot.slane %v4023_v61, 4  ;;  %v3240_v5 = vshrl.u32 %v3037_v57, 16  ;;  %v3243_v63 = vshll.u32 %v3037_v57, 16  ;;  %v3249_v4 = vshll.u32 %v3038_v17, 16 }
 0x338   : > { %v9682_v50 = vpop.permute.xlu2 %4538  ;;  %v4034_v30 = vrot.slane %v4033_v55, 4  ;;  %v3574_v62 = vsel %vm8823_vm1, %v3572_v44, %v3573_v32  ;;  %v3253_v10 = vshrl.u32 %v3038_v17, 16  ;;  %v4654_v34 = vunpack.c.l.b16 %v3571_v19 }
 0x339   : > { %v4029_v18 = vsel %vm8726_vm13, %v4024_v21, %v4028_v48  ;;  %v4655_v3 = vunpack.c.l.b16 %v3574_v62  ;;  %v3242_v1 = vrot.slane %v3240_v5, 4  ;;  %v3245_v52 = vrot.slane %v3243_v63, 5 }
 0x33a   : > { %v4953_v45 = vpop.permute.xlu1 %4952  ;;  %v4039_v31 = vsel %vm8726_vm13, %v4034_v30, %v4038_v11  ;;  %v3251_v41 = vrot.slane %v3249_v4, 5  ;;  %v4844_v12 = vunpack.c.l.b16 %v4029_v18  ;;  %v3255_v24 = vrot.slane %v3253_v10, 4  ;;  %v2859_v10 = vld [vmem:[#allocation2 + $0xb4] sm:$0xe] }
 0x33b   : > { %4972 = vrot.lane.b32.xlu2 %v4942_v35, %s6876_s30  ;;  %v4845_v13 = vunpack.c.l.b16 %v4039_v31  ;;  %v3259_v56 = vshll.u32 %v3062_v39, 16  ;;  %v5130_v58 = vsel %vm5120_vm12, %v5097_v47, %v9667_v27  ;;  %v3246_v17 = vor.u32 %v3245_v52, %v3242_v1  ;;  %v9712_v21 = vpop.f32.mrf.mxu2  ;;  %v2440_v1 = vld [vmem:[#allocation2 + $0xb8] sm:$0xf] }
 0x33c   : > { %v5428_v53 = vpack.c.bf16 %v10700_v22, %v10699_v37  ;;  %v4679_v6 = vpack.c.b16 %v4655_v3, %v4654_v34  ;;  %v3256_v54 = vor.u32 %v3255_v24, %v3251_v41  ;;  %v5833_v51 = vrot.slane %v4071_v42, 9 }
 0x33d   : > { %v4862_v2 = vpack.c.b16 %v4845_v13, %v4844_v12  ;;  %v3261_v43 = vrot.slane %v3259_v56, 5  ;;  %v3247_v60 = vrot.slane %v3246_v17, 4  ;;  %v4179_v48 = vrot.slane %v3647_v40, 5  ;;  %v6110_v12 = vld [vmem:[#allocation2 + $0x60] sm:$0xff] }
 0x33e   : > { %6076 = vmatmul.msk.bf16.gmra.mxu2 %vm1370_vm3, %v5428_v53  ;;  %v3849_v39 = vshrl.u32 %v3646_v20, 16  ;;  %v3257_v28 = vrot.slane %v3256_v54, 4  ;;  %v3852_v15 = vshll.u32 %v3646_v20, 16  ;;  %v3858_v27 = vshll.u32 %v3647_v40, 16  ;;  %v2456_v20 = vld [vmem:[#allocation2 + $0xbc] sm:$0x1] }
 0x33f   : > { %4892 = vrot.lane.b32.xlu0 %v4862_v2, %s6874_s26  ;;  %v3862_v57 = vshrl.u32 %v3647_v40, 16  ;;  %v3252_v35 = vsel %vm8726_vm13, %v3247_v60, %v3251_v41  ;;  %v4181_v29 = vrot.slane %v4179_v48, 4  ;;  %v4182_v61 = vrot.slane %v3671_v16, 5  ;;  %v2439_v40 = vld [vmem:[#allocation2 + $0xb4] sm:$0xf] }
 0x340   : > { %v9704_v49 = vpop.permute.xlu2 %4794  ;;  %v3851_v14 = vrot.slane %v3849_v39, 4  ;;  %v3262_v55 = vsel %vm8726_vm13, %v3257_v28, %v3261_v43  ;;  %v4574_v11 = vunpack.c.l.b16 %v3252_v35  ;;  %v4180_v44 = vsel %vm8823_vm1, %v5833_v51, %v4179_v48  ;;  %v3470_v43 = vld [vmem:[#allocation2 + $0xc0] sm:$0xe] }
 0x341   : > { %v3854_v32 = vrot.slane %v3852_v15, 5  ;;  %v4575_v19 = vunpack.c.l.b16 %v3262_v55  ;;  %v4183_v5 = vsel %vm8823_vm1, %v4181_v29, %v4182_v61  ;;  %v3860_v30 = vrot.slane %v3858_v27, 5  ;;  %v3053_v15 = vld [vmem:[#allocation2 + $0xc0] sm:$0xf] }
 0x342   : > { %v9710_v47 = vpop.permute.xlu1 %4552  ;;  %v3864_v62 = vrot.slane %v3862_v57, 4  ;;  %v5163_v63 = vsel %vm5153_vm15, %v5130_v58, %v9591_v26  ;;  %v3868_v3 = vshll.u32 %v3671_v16, 16  ;;  %v4911_v52 = vunpack.c.l.b16 %v4183_v5  ;;  %v6092_v16 = vld [vmem:[#allocation2 + $0x3c] sm:$0xff] }
 0x343   : > { %4702 = vrot.lane.b32.xlu2 %v4679_v6, %s6875_s29  ;;  %v4873_v4 = vpop.permute.xlu0 %4872  ;;  %v3855_v18 = vor.u32 %v3854_v32, %v3851_v14  ;;  %v4599_v31 = vpack.c.b16 %v4575_v19, %v4574_v11  ;;  %v4910_v24 = vunpack.c.l.b16 %v4180_v44  ;;  %v5809_v58 = vrot.slane %v2859_v10, 9  ;;  %v3054_v14 = vld [vmem:[#allocation2 + $0xc4] sm:$0xf]  ;;  %v10701_v19 = vld [vmem:[#allocation39_spill] sm:$0xff] }
 0x344   : > { %v5196_v34 = vsel %vm5186_vm4, %v5163_v63, %v4873_v4  ;;  %v3865_v41 = vor.u32 %v3864_v62, %v3860_v30  ;;  %v3870_v42 = vrot.slane %v3868_v3, 5  ;;  %v3018_v17 = vrot.slane %v2440_v1, 5  ;;  %v10702_v5 = vld [vmem:[#allocation40_spill] sm:$0xff]  ;;  %v9741_v62 = vld [vmem:[#allocation2 + $0xc8] sm:$0x1] }
 0x345   : > { %v5229_v13 = vsel %vm5219_vm7, %v5196_v34, %v4953_v45  ;;  %v3856_v56 = vrot.slane %v3855_v18, 4  ;;  %4622 = vrot.lane.b32.xlu1 %v4599_v31, %s6871_s14  ;;  %v2821_v22 = vshrl.u32 %v2439_v40, 16  ;;  %v2824_v53 = vshll.u32 %v2439_v40, 16 }
 0x346   : > { %6054 = vmatmul.msk.bf16.gmra.mxu1 %vm5292_vm9, %v5229_v13  ;;  %v3866_v26 = vrot.slane %v3865_v41, 4  ;;  %v2830_v2 = vshll.u32 %v2440_v1, 16  ;;  %v4935_v45 = vpack.c.b16 %v4911_v52, %v4910_v24  ;;  %v3019_v54 = vsel %vm8823_vm1, %v5809_v58, %v3018_v17  ;;  %v6099_v41 = vld [vmem:[#allocation2 + $0x90] sm:$0xff] }
 0x347   : > { %4542 = vrot.lane.b32.xlu0 %v6110_v12, %s6870_s13  ;;  %v3861_v37 = vsel %vm8726_vm13, %v3856_v56, %v3860_v30  ;;  %v3020_v51 = vrot.slane %v3018_v17, 4  ;;  %v3021_v48 = vrot.slane %v2456_v20, 5  ;;  %v2823_v28 = vrot.slane %v2821_v22, 4 }
 0x348   : > { %v3871_v6 = vsel %vm8726_vm13, %v3866_v26, %v3870_v42  ;;  %v4830_v27 = vunpack.c.l.b16 %v3861_v37  ;;  %v4377_v57 = vpop.permute.xlu2 %4376  ;;  %v2826_v35 = vrot.slane %v2824_v53, 5  ;;  %v2832_v29 = vrot.slane %v2830_v2, 5  ;;  %v9756_v53 = vld [vmem:[#allocation2 + $0x64] sm:$0xf] }
 0x349   : > { %v4831_v60 = vunpack.c.l.b16 %v3871_v6  ;;  %v2834_v61 = vshrl.u32 %v2440_v1, 16  ;;  %v4993_v55 = vsel %vm1403_vm5, %v6092_v16, %v9355_v59  ;;  %v3022_v44 = vsel %vm8823_vm1, %v3020_v51, %v3021_v48  ;;  %v6126_v59 = vld [vmem:[#allocation2 + $0x6c] sm:$0xff]  ;;  %v6118_v2 = vld [vmem:[#allocation2 + $0xc0] sm:$0xff] }
 0x34a   : > { %v9730_v39 = vpop.permute.xlu1 %4808  ;;  %v4414_v32 = vunpack.c.l.b16 %v3019_v54  ;;  %v5429_v30 = vpack.c.bf16 %v10702_v5, %v10701_v19  ;;  %v2827_v18 = vor.u32 %v2826_v35, %v2823_v28  ;;  %v2840_v1 = vshll.u32 %v2456_v20, 16 }
 0x34b   : > { %4958 = vrot.lane.b32.xlu2 %v4935_v45, %s6876_s30  ;;  %v9735_v11 = vpop.permute.xlu0 %4712  ;;  %v4855_v4 = vpack.c.b16 %v4831_v60, %v4830_v27  ;;  %v2836_v3 = vrot.slane %v2834_v61, 4  ;;  %v4415_v10 = vunpack.c.l.b16 %v3022_v44  ;;  %v5825_v31 = vrot.slane %v3470_v43, 9  ;;  %v2852_v60 = vld [vmem:[#allocation2 + $0x60] sm:$0xe]  ;;  %v9765_v61 = vld [vmem:[#allocation2 + $0x68] sm:$0x1] }
 0x34c   : > { %v9743_v63 = vpop.f32.mrf.mxu2  ;;  %v3626_v34 = vrot.slane %v3054_v14, 5  ;;  %v3432_v52 = vshrl.u32 %v3053_v15, 16  ;;  %v2828_v40 = vrot.slane %v2827_v18, 4  ;;  %v3629_v13 = vrot.slane %v9741_v62, 5  ;;  %v9774_v18 = vld [vmem:[#allocation2 + $0xd0] sm:$0xf] }
 0x34d   : > { %4878 = vrot.lane.b32.xlu1 %v4855_v4, %s6874_s26  ;;  %v2837_v12 = vor.u32 %v2836_v3, %v2832_v29  ;;  %v3435_v24 = vshll.u32 %v3053_v15, 16  ;;  %v3441_v20 = vshll.u32 %v3054_v14, 16  ;;  %v9752_v58 = vsel %vm1403_vm5, %v6099_v41, %v4377_v57 }
 0x34e   : > { %6077 = vmatmul.msk.bf16.gmra.mxu2 %vm1370_vm3, %v5429_v30  ;;  %v3627_v56 = vsel %vm8823_vm1, %v5825_v31, %v3626_v34  ;;  %v3628_v26 = vrot.slane %v3626_v34, 4  ;;  %v3434_v42 = vrot.slane %v3432_v52, 4  ;;  %v2833_v17 = vsel %vm8726_vm13, %v2828_v40, %v2832_v29  ;;  %v2425_v40 = vld [vmem:[#allocation2 + $0x60] sm:$0xf] }
 0x34f   : > { %4798 = vrot.lane.b32.xlu0 %v6126_v59, %s6873_s23  ;;  %v2838_v37 = vrot.slane %v2837_v12, 4  ;;  %v2842_v22 = vrot.slane %v2840_v1, 5  ;;  %v4431_v45 = vpack.c.b16 %v4415_v10, %v4414_v32  ;;  %v4670_v54 = vunpack.c.l.b16 %v3627_v56  ;;  %v3662_v32 = vld [vmem:[#allocation2 + $0xcc] sm:$0xf] }
 0x350   : > { %v3630_v6 = vsel %vm8823_vm1, %v3628_v26, %v3629_v13  ;;  %v3437_v16 = vrot.slane %v3435_v24, 5  ;;  %v3443_v28 = vrot.slane %v3441_v20, 5  ;;  %v3445_v15 = vshrl.u32 %v3054_v14, 16  ;;  %v9776_v3 = vpop.permute.xlu2 %4378  ;;  %v9785_v13 = vld [vmem:[#allocation2 + $0xd4] sm:$0x1] }
 0x351   : > { %v2843_v51 = vsel %vm8726_vm13, %v2838_v37, %v2842_v22  ;;  %v4671_v48 = vunpack.c.l.b16 %v3630_v6  ;;  %v4334_v57 = vunpack.c.l.b16 %v2833_v17  ;;  %v2969_v44 = vrot.slane %v9756_v53, 5 }
 0x352   : > { %v9760_v43 = vpop.permute.xlu1 %4968  ;;  %v4335_v35 = vunpack.c.l.b16 %v2843_v51  ;;  %v3438_v29 = vor.u32 %v3437_v16, %v3434_v42  ;;  %v3447_v30 = vrot.slane %v3445_v15, 4  ;;  %v3451_v4 = vshll.u32 %v9741_v62, 16  ;;  %v6134_v62 = vld [vmem:[#allocation2 + $0xcc] sm:$0xff] }
 0x353   : > { %4558 = vrot.lane.b32.xlu2 %v6118_v2, %s6870_s13  ;;  %v4443_v27 = vpop.permute.xlu0 %4442  ;;  %v5802_v14 = vrot.slane %v2852_v60, 9  ;;  %v4687_v59 = vpack.c.b16 %v4671_v48, %v4670_v54  ;;  %v2971_v31 = vrot.slane %v2969_v44, 4  ;;  %v4041_v41 = vshrl.u32 %v3662_v32, 16 }
 0x354   : > { %v9768_v19 = vpop.f32.mrf.mxu2  ;;  %v9771_v5 = vsel %vm1469_vm6, %v4993_v55, %v4443_v27  ;;  %v4351_v1 = vpack.c.b16 %v4335_v35, %v4334_v57  ;;  %v3439_v10 = vrot.slane %v3438_v29, 4  ;;  %v3448_v34 = vor.u32 %v3447_v30, %v3443_v28 }
 0x355   : > { %4462 = vrot.lane.b32.xlu1 %v4431_v45, %s6867_s10  ;;  %v2970_v52 = vsel %vm8823_vm1, %v5802_v14, %v2969_v44  ;;  %v2972_v55 = vrot.slane %v9765_v61, 5  ;;  %v4044_v24 = vshll.u32 %v3662_v32, 16  ;;  %v4050_v56 = vshll.u32 %v9774_v18, 16 }
 0x356   : > { %v3444_v12 = vsel %vm8726_vm13, %v3439_v10, %v3443_v28  ;;  %v4054_v26 = vshrl.u32 %v9774_v18, 16  ;;  %v3449_v42 = vrot.slane %v3448_v34, 4  ;;  %v3453_v20 = vrot.slane %v3451_v4, 5 }
 0x357   : > { %4382 = vrot.lane.b32.xlu0 %v4351_v1, %s6865_s8  ;;  %v2973_v17 = vsel %vm8823_vm1, %v2971_v31, %v2972_v55  ;;  %v4043_v37 = vrot.slane %v4041_v41, 4  ;;  %v4400_v22 = vunpack.c.l.b16 %v2970_v52  ;;  %v4046_v2 = vrot.slane %v4044_v24, 5 }
 0x358   : > { %v4052_v45 = vrot.slane %v4050_v56, 5  ;;  %v4056_v6 = vrot.slane %v4054_v26, 4  ;;  %v3454_v54 = vsel %vm8726_vm13, %v3449_v42, %v3453_v20  ;;  %v4590_v16 = vunpack.c.l.b16 %v3444_v12 }
 0x359   : > { %v4060_v60 = vshll.u32 %v9785_v13, 16  ;;  %v2653_v48 = vshrl.u32 %v2425_v40, 16  ;;  %v4591_v28 = vunpack.c.l.b16 %v3454_v54  ;;  %v4401_v27 = vunpack.c.l.b16 %v2973_v17 }
 0x35a   : > { %v9794_v51 = vpop.permute.xlu1 %4698  ;;  %v4047_v57 = vor.u32 %v4046_v2, %v4043_v37  ;;  %v4057_v35 = vor.u32 %v4056_v6, %v4052_v45  ;;  %v2656_v4 = vshll.u32 %v2425_v40, 16  ;;  %v2662_v55 = vshll.u32 %v9756_v53, 16  ;;  %v10704_v37 = vld [vmem:[#allocation37_spill] sm:$0xff]  ;;  %v9822_v2 = vld [vmem:[#allocation2 + $0x70] sm:$0xf] }
 0x35b   : > { %4814 = vrot.lane.b32.xlu2 %v6134_v62, %s6873_s23  ;;  %v4457_v15 = vpop.permute.xlu0 %4456  ;;  %v4062_v32 = vrot.slane %v4060_v60, 5  ;;  %v2655_v30 = vrot.slane %v2653_v48, 4  ;;  %v4607_v14 = vpack.c.b16 %v4591_v28, %v4590_v16  ;;  %v2666_v41 = vshrl.u32 %v9756_v53, 16  ;;  %v3039_v53 = vld [vmem:[#allocation2 + $0x6c] sm:$0xf] }
 0x35c   : > { %v9797_v29 = vpop.f32.mrf.mxu2  ;;  %v5049_v44 = vsel %vm1469_vm6, %v9752_v58, %v4457_v15  ;;  %v4048_v10 = vrot.slane %v4047_v57, 4  ;;  %v4058_v31 = vrot.slane %v4057_v35, 4  ;;  %v2658_v52 = vrot.slane %v2656_v4, 5  ;;  %v9808_v58 = vpop.permute.xlu2 %4634  ;;  %v9834_v48 = vld [vmem:[#allocation2 + $0x74] sm:$0x1] }
 0x35d   : > { %v5081_v1 = vsel %vm1535_vm8, %v5049_v44, %v9710_v47  ;;  %4718 = vrot.lane.b32.xlu1 %v4687_v59, %s6875_s29  ;;  %v4424_v47 = vpack.c.b16 %v4401_v27, %v4400_v22  ;;  %v2664_v26 = vrot.slane %v2662_v55, 5  ;;  %v2668_v42 = vrot.slane %v2666_v41, 4  ;;  %v4079_v35 = vld [vmem:[#allocation2 + $0xcc] sm:$0xe] }
 0x35e   : > { %v5113_v34 = vsel %vm1601_vm10, %v5081_v1, %v9621_v23  ;;  %v4053_v62 = vsel %vm8726_vm13, %v4048_v10, %v4052_v45  ;;  %v4063_v59 = vsel %vm8726_vm13, %v4058_v31, %v4062_v32  ;;  %v6093_v23 = vld [vmem:[#allocation2 + $0x48] sm:$0xff]  ;;  %v2659_v56 = vor.u32 %v2658_v52, %v2655_v30 }
 0x35f   : > { %4638 = vrot.lane.b32.xlu0 %v4607_v14, %s6871_s14  ;;  %v5146_v40 = vsel %vm5120_vm12, %v5113_v34, %v9735_v11  ;;  %v4846_v12 = vunpack.c.l.b16 %v4053_v62  ;;  %v4847_v24 = vunpack.c.l.b16 %v4063_v59  ;;  %v2672_v20 = vshll.u32 %v9765_v61, 16  ;;  %v10703_v11 = vld [vmem:[#allocation36_spill] sm:$0xff]  ;;  %v3648_v59 = vld [vmem:[#allocation2 + $0x78] sm:$0xf] }
 0x360   : > { %v5179_v17 = vsel %vm5153_vm15, %v5146_v40, %v9730_v39  ;;  %v5430_v22 = vpack.c.bf16 %v10704_v37, %v10703_v11  ;;  %v9826_v45 = vsel %vm1403_vm5, %v6093_v23, %v9341_v25  ;;  %v2660_v54 = vrot.slane %v2659_v56, 4  ;;  %v9856_v23 = vld [vmem:[#allocation2 + $0x7c] sm:$0xf]  ;;  %v9870_v37 = vld [vmem:[#allocation2 + $0x80] sm:$0x1] }
 0x361   : > { %v4863_v6 = vpack.c.b16 %v4847_v24, %v4846_v12  ;;  %v5212_v16 = vsel %vm5186_vm4, %v5179_v17, %v9663_v7  ;;  %v2669_v61 = vor.u32 %v2668_v42, %v2664_v26  ;;  %v3264_v28 = vshrl.u32 %v3039_v53, 16 }
 0x362   : > { %v5245_v39 = vsel %vm5219_vm7, %v5212_v16, %v9760_v43  ;;  %6078 = vmatmul.msk.bf16.gmra.mxu2 %vm1370_vm3, %v5430_v22  ;;  %v3267_v15 = vshll.u32 %v3039_v53, 16  ;;  %v2665_v25 = vsel %vm8726_vm13, %v2660_v54, %v2664_v26  ;;  %v5067_v7 = vsel %vm1535_vm8, %v9771_v5, %v9682_v50 }
 0x363   : > { %4448 = vrot.lane.b32.xlu2 %v4424_v47, %s6867_s10  ;;  %v4619_v60 = vpop.permute.xlu0 %4618  ;;  %6062 = vmatmul.msk.bf16.vlgmr.msrb.gmra.mxu3 %vm5292_vm9, %v5245_v39  ;;  %v3273_v27 = vshll.u32 %v9822_v2, 16  ;;  %v3277_v43 = vshrl.u32 %v9822_v2, 16  ;;  %v2670_v32 = vrot.slane %v2669_v61, 4  ;;  %v2674_v30 = vrot.slane %v2672_v20, 5  ;;  %v6111_v61 = vld [vmem:[#allocation2 + $0x6c] sm:$0xff] }
 0x364   : > { %v9846_v44 = vpop.f32.mrf.mxu2  ;;  %v5099_v4 = vsel %vm1601_vm10, %v5067_v7, %v4619_v60  ;;  %v3266_v14 = vrot.slane %v3264_v28, 4  ;;  %v3269_v1 = vrot.slane %v3267_v15, 5  ;;  %v3283_v50 = vshll.u32 %v9834_v48, 16  ;;  %v9858_v12 = vpop.permute.xlu2 %4890 }
 0x365   : > { %v9844_v57 = vpop.permute.xlu1 %4954  ;;  %4894 = vrot.lane.b32.xlu1 %v4863_v6, %s6874_s26  ;;  %v3275_v10 = vrot.slane %v3273_v27, 5  ;;  %v3279_v31 = vrot.slane %v3277_v43, 4  ;;  %v2675_v5 = vsel %vm8726_vm13, %v2670_v32, %v2674_v30  ;;  %v4320_v34 = vunpack.c.l.b16 %v2665_v25 }
 0x366   : > { %v5841_v52 = vrot.slane %v4079_v35, 9  ;;  %v4235_v55 = vrot.slane %v9774_v18, 5  ;;  %v4321_v41 = vunpack.c.l.b16 %v2675_v5  ;;  %v5132_v40 = vsel %vm5120_vm12, %v5099_v4, %v9794_v51  ;;  %v9866_v18 = vld [vmem:[%s10413_s6] ss:$0 sm:$0xff] }
 0x367   : > { %v3270_v47 = vor.u32 %v3269_v1, %v3266_v14  ;;  %v3280_v62 = vor.u32 %v3279_v31, %v3275_v10  ;;  %v3285_v24 = vrot.slane %v3283_v50, 5  ;;  %v4238_v53 = vrot.slane %v9785_v13, 5  ;;  %v6100_v35 = vld [vmem:[#allocation2 + $0x9c] sm:$0xff] }
 0x368   : > { %v4236_v56 = vsel %vm8823_vm1, %v5841_v52, %v4235_v55  ;;  %v4237_v26 = vrot.slane %v4235_v55, 4  ;;  %v4344_v51 = vpack.c.b16 %v4321_v41, %v4320_v34  ;;  %v3873_v22 = vshrl.u32 %v3648_v59, 16  ;;  %v2428_v52 = vld [vmem:[#allocation2 + $0x70] sm:$0xf]  ;;  %v2427_v55 = vld [vmem:[#allocation2 + $0x6c] sm:$0xf] }
 0x369   : > { %v3271_v42 = vrot.slane %v3270_v47, 4  ;;  %v3281_v20 = vrot.slane %v3280_v62, 4  ;;  %v4926_v17 = vunpack.c.l.b16 %v4236_v56  ;;  %v3876_v6 = vshll.u32 %v3648_v59, 16  ;;  %v2853_v59 = vld [vmem:[#allocation2 + $0x6c] sm:$0xe] }
 0x36a   : > { %v4239_v11 = vsel %vm8823_vm1, %v4237_v26, %v4238_v53  ;;  %v3882_v54 = vshll.u32 %v9856_v23, 16  ;;  %4368 = vrot.lane.b32.xlu0 %v4344_v51, %s6865_s8  ;;  %v3886_v60 = vshrl.u32 %v9856_v23, 16  ;;  %v3875_v27 = vrot.slane %v3873_v22, 4  ;;  %v2450_v53 = vld [vmem:[#allocation2 + $0x74] sm:$0x1] }
 0x36b   : > { %v3276_v13 = vsel %vm8726_vm13, %v3271_v42, %v3275_v10  ;;  %v3286_v16 = vsel %vm8726_vm13, %v3281_v20, %v3285_v24  ;;  %v4927_v39 = vunpack.c.l.b16 %v4239_v11  ;;  %v3878_v43 = vrot.slane %v3876_v6, 5  ;;  %v3463_v10 = vld [vmem:[#allocation2 + $0x6c] sm:$0xe] }
 0x36c   : > { %v9881_v15 = vpop.f32.mrf.mxu2  ;;  %v4576_v25 = vunpack.c.l.b16 %v3276_v13  ;;  %v4577_v7 = vunpack.c.l.b16 %v3286_v16  ;;  %v5165_v32 = vsel %vm5153_vm15, %v5132_v40, %v9704_v49  ;;  %v3884_v4 = vrot.slane %v3882_v54, 5  ;;  %v6127_v13 = vld [vmem:[#allocation2 + $0x78] sm:$0xff] }
 0x36d   : > { %v9879_v28 = vpop.permute.xlu1 %4554  ;;  %4544 = vrot.lane.b32.xlu1 %v6111_v61, %s6870_s13  ;;  %v3888_v14 = vrot.slane %v3886_v60, 4  ;;  %v3892_v1 = vshll.u32 %v9870_v37, 16  ;;  %v9889_v31 = vadd.f32 %v9866_v18, %v9553_v9  ;;  %v3879_v34 = vor.u32 %v3878_v43, %v3875_v27  ;;  %v9920_v43 = vld [vmem:[%s10411_s4] ss:$0 sm:$0xff] }
 0x36e   : > { %v4875_v30 = vpop.permute.xlu0 %4874  ;;  %v4600_v50 = vpack.c.b16 %v4577_v7, %v4576_v25  ;;  %v5017_v49 = vsel %vm1403_vm5, %v6100_v35, %v9776_v3  ;;  %v4943_v40 = vpack.c.b16 %v4927_v39, %v4926_v17  ;;  %v5818_v56 = vrot.slane %v3463_v10, 9  ;;  %v9900_v17 = vpop.permute.xlu2 %4540 }
 0x36f   : > { %v5198_v5 = vsel %vm5186_vm4, %v5165_v32, %v4875_v30  ;;  %v5338_v41 = vpop.f32.mrf.mxu1  ;;  %v3889_v47 = vor.u32 %v3888_v14, %v3884_v4  ;;  %v3880_v9 = vrot.slane %v3879_v34, 4  ;;  %v3894_v24 = vrot.slane %v3892_v1, 5 }
 0x370   : > { %v5231_v62 = vsel %vm5219_vm7, %v5198_v5, %v9844_v57  ;;  %4624 = vrot.lane.b32.xlu2 %v4600_v50, %s6871_s14  ;;  %v3577_v26 = vrot.slane %v9822_v2, 5  ;;  %v3580_v42 = vrot.slane %v9834_v48, 5  ;;  %v2976_v3 = vrot.slane %v2428_v52, 5 }
 0x371   : > { %6055 = vmatmul.msk.bf16.gmra.mxu1 %vm5292_vm9, %v5231_v62  ;;  %v3890_v51 = vrot.slane %v3889_v47, 4  ;;  %v2677_v20 = vshrl.u32 %v2427_v55, 16  ;;  %v3885_v57 = vsel %vm8726_vm13, %v3880_v9, %v3884_v4  ;;  %v5803_v22 = vrot.slane %v2853_v59, 9  ;;  %v4072_v62 = vld [vmem:[#allocation2 + $0x78] sm:$0xe] }
 0x372   : > { %v3579_v11 = vrot.slane %v3577_v26, 4  ;;  %v2680_v6 = vshll.u32 %v2427_v55, 16  ;;  %4974 = vrot.lane.b32.xlu0 %v4943_v40, %s6876_s30  ;;  %v4832_v2 = vunpack.c.l.b16 %v3885_v57  ;;  %v3578_v48 = vsel %vm8823_vm1, %v5818_v56, %v3577_v26 }
 0x373   : > { %v3895_v54 = vsel %vm8726_vm13, %v3890_v51, %v3894_v24  ;;  %v2979_v16 = vrot.slane %v2450_v53, 5  ;;  %v2977_v7 = vsel %vm8823_vm1, %v5803_v22, %v2976_v3  ;;  %v2978_v27 = vrot.slane %v2976_v3, 4 }
 0x374   : > { %v9911_v39 = vpop.f32.mrf.mxu2  ;;  %v4833_v60 = vunpack.c.l.b16 %v3895_v54  ;;  %v3581_v25 = vsel %vm8823_vm1, %v3579_v11, %v3580_v42  ;;  %v2679_v30 = vrot.slane %v2677_v20, 4  ;;  %v2682_v4 = vrot.slane %v2680_v6, 5  ;;  %v3042_v11 = vld [vmem:[#allocation2 + $0x7c] sm:$0xf] }
 0x375   : > { %v9909_v61 = vpop.permute.xlu1 %4810  ;;  %4800 = vrot.lane.b32.xlu1 %v6127_v13, %s6873_s23  ;;  %v4657_v35 = vunpack.c.l.b16 %v3581_v25  ;;  %v2686_v14 = vshll.u32 %v2428_v52, 16  ;;  %v2980_v50 = vsel %vm8823_vm1, %v2978_v27, %v2979_v16  ;;  %v2690_v5 = vshrl.u32 %v2428_v52, 16  ;;  %v3064_v16 = vld [vmem:[#allocation2 + $0x80] sm:$0x1] }
 0x376   : > { %v4459_v32 = vpop.permute.xlu0 %4458  ;;  %v4856_v1 = vpack.c.b16 %v4833_v60, %v4832_v2  ;;  %v9928_v34 = vadd.f32 %v9866_v18, %v9588_v8  ;;  %v4656_v55 = vunpack.c.l.b16 %v3578_v48  ;;  %v4403_v40 = vunpack.c.l.b16 %v2980_v50  ;;  %v9943_v2 = vpop.permute.xlu2 %4796 }
 0x377   : > { %v5051_v10 = vsel %vm1469_vm6, %v5017_v49, %v4459_v32  ;;  %v2683_v47 = vor.u32 %v2682_v4, %v2679_v30  ;;  %v2688_v59 = vrot.slane %v2686_v14, 5  ;;  %v2692_v9 = vrot.slane %v2690_v5, 4  ;;  %v9932_v56 = vpop.f32.mrf.mxu1 }
 0x378   : > { %4880 = vrot.lane.b32.xlu2 %v4856_v1, %s6874_s26  ;;  %v2696_v24 = vshll.u32 %v2450_v53, 16  ;;  %v5339_v49 = vadd.f32 %v9920_v43, %v5338_v41  ;;  %v4680_v26 = vpack.c.b16 %v4657_v35, %v4656_v55  ;;  %v5083_v52 = vsel %vm1535_vm8, %v5051_v10, %v9879_v28  ;;  %v3464_v28 = vld [vmem:[#allocation2 + $0x78] sm:$0xe] }
 0x379   : > { %v4402_v8 = vunpack.c.l.b16 %v2977_v7  ;;  %v2684_v51 = vrot.slane %v2683_v47, 4  ;;  %v2693_v42 = vor.u32 %v2692_v9, %v2688_v59  ;;  %v5834_v20 = vrot.slane %v4072_v62, 9  ;;  %v3041_v35 = vld [vmem:[#allocation2 + $0x78] sm:$0xf] }
 0x37a   : > { %v5579_v3 = vadd.f32 %v9889_v31, %v5339_v49  ;;  %v4186_v57 = vrot.slane %v9856_v23, 5  ;;  %4704 = vrot.lane.b32.xlu0 %v4680_v26, %s6875_s29  ;;  %v2698_v22 = vrot.slane %v2696_v24, 5  ;;  %v4189_v6 = vrot.slane %v9870_v37, 5 }
 0x37b   : > { %v4425_v53 = vpack.c.b16 %v4403_v40, %v4402_v8  ;;  %v2689_v41 = vsel %vm8726_vm13, %v2684_v51, %v2688_v59  ;;  %v2694_v13 = vrot.slane %v2693_v42, 4  ;;  %v5115_v23 = vsel %vm1601_vm10, %v5083_v52, %v9808_v58 }
 0x37c   : > { %v5611_v48 = vmul.f32 0.01, %v5579_v3  ;;  %v4187_v31 = vsel %vm8823_vm1, %v5834_v20, %v4186_v57  ;;  %v4322_v60 = vunpack.c.l.b16 %v2689_v41  ;;  %v4188_v37 = vrot.slane %v4186_v57, 4 }
 0x37d   : > { %v4971_v54 = vpop.permute.xlu1 %4970  ;;  %v4912_v25 = vunpack.c.l.b16 %v4187_v31  ;;  %v3584_v27 = vrot.slane %v3042_v11, 5  ;;  %v2699_v30 = vsel %vm8726_vm13, %v2694_v13, %v2698_v22  ;;  %v5819_v14 = vrot.slane %v3464_v28, 9  ;;  %v4073_v28 = vld [vmem:[#allocation2 + $0x84] sm:$0xe] }
 0x37e   : > { %v4715_v7 = vpop.permute.xlu0 %4714  ;;  %v9954_v32 = vpop.f32.mrf.mxu2  ;;  %v5643_v4 = vmax.f32 %v5579_v3, %v5611_v48  ;;  %v4323_v1 = vunpack.c.l.b16 %v2699_v30  ;;  %v4190_v10 = vsel %vm8823_vm1, %v4188_v37, %v4189_v6  ;;  %v3587_v5 = vrot.slane %v3064_v16, 5  ;;  %v3650_v13 = vld [vmem:[#allocation2 + $0x84] sm:$0xf] }
 0x37f   : > { %v5148_v58 = vsel %vm5120_vm12, %v5115_v23, %v4715_v7  ;;  %v4913_v55 = vunpack.c.l.b16 %v4190_v10  ;;  %v3585_v40 = vsel %vm8823_vm1, %v5819_v14, %v3584_v27  ;;  %v3586_v47 = vrot.slane %v3584_v27, 4  ;;  %v5343_v51 = vpop.f32.mrf.mxu1 }
 0x380   : > { %v5181_v50 = vsel %vm5153_vm15, %v5148_v58, %v9909_v61  ;;  %4450 = vrot.lane.b32.xlu2 %v4425_v53, %s6867_s10  ;;  %5675 = vst.msk [vmem:[%s9952_s19] sm:$0xff] %vm1403_vm5, %v5643_v4  ;;  %v3288_v62 = vshrl.u32 %v3041_v35, 16  ;;  %v4345_v59 = vpack.c.b16 %v4323_v1, %v4322_v60  ;;  %v3291_v9 = vshll.u32 %v3041_v35, 16  ;;  %v3651_v53 = vld [vmem:[#allocation2 + $0x88] sm:$0xf]  ;;  %v9987_v35 = vpop.permute.xlu2 %4380 }
 0x381   : > { %v3297_v24 = vshll.u32 %v3042_v11, 16  ;;  %v3301_v49 = vshrl.u32 %v3042_v11, 16  ;;  %v4936_v26 = vpack.c.b16 %v4913_v55, %v4912_v25  ;;  %v3588_v52 = vsel %vm8823_vm1, %v3586_v47, %v3587_v5 }
 0x382   : > { %v3290_v61 = vrot.slane %v3288_v62, 4  ;;  %v3307_v8 = vshll.u32 %v3064_v16, 16  ;;  %4370 = vrot.lane.b32.xlu1 %v4345_v59, %s6865_s8  ;;  %v4659_v42 = vunpack.c.l.b16 %v3588_v52  ;;  %v3293_v3 = vrot.slane %v3291_v9, 5  ;;  %v6112_v59 = vld [vmem:[#allocation2 + $0x78] sm:$0xff] }
 0x383   : > { %v3299_v20 = vrot.slane %v3297_v24, 5  ;;  %v3303_v57 = vrot.slane %v3301_v49, 4  ;;  %v5505_v41 = vadd.f32 %v9866_v18, %v9619_v33  ;;  %4960 = vrot.lane.b32.xlu0 %v4936_v26, %s6876_s30  ;;  %v4658_v11 = vunpack.c.l.b16 %v3585_v40  ;;  %v3673_v33 = vld [vmem:[#allocation2 + $0x8c] sm:$0x1] }
 0x384   : > { %v5341_v22 = vadd.f32 %v9920_v43, %v9932_v56  ;;  %v5214_v6 = vsel %vm5186_vm4, %v5181_v50, %v9858_v12  ;;  %v3294_v31 = vor.u32 %v3293_v3, %v3290_v61  ;;  %v3309_v16 = vrot.slane %v3307_v8, 5 }
 0x385   : > { %v9978_v48 = vpop.permute.xlu1 %4700  ;;  %v3304_v23 = vor.u32 %v3303_v57, %v3299_v20  ;;  %v5247_v60 = vsel %vm5219_vm7, %v5214_v6, %v4971_v54  ;;  %v4681_v7 = vpack.c.b16 %v4659_v42, %v4658_v11  ;;  %v4193_v56 = vrot.slane %v3651_v53, 5 }
 0x386   : > { %v4445_v37 = vpop.permute.xlu0 %4444  ;;  %v9981_v25 = vpop.f32.mrf.mxu2  ;;  %v5580_v27 = vadd.f32 %v9928_v34, %v5341_v22  ;;  %6063 = vmatmul.msk.bf16.gmra.mxu3 %vm5292_vm9, %v5247_v60  ;;  %v3295_v30 = vrot.slane %v3294_v31, 4  ;;  %v5835_v58 = vrot.slane %v4073_v28, 9  ;;  %v3897_v14 = vshrl.u32 %v3650_v13, 16  ;;  %v2430_v28 = vld [vmem:[#allocation2 + $0x7c] sm:$0xf] }
 0x387   : > { %v5037_v12 = vsel %vm1469_vm6, %v9826_v45, %v4445_v37  ;;  %v3305_v4 = vrot.slane %v3304_v23, 4  ;;  %v4195_v1 = vrot.slane %v4193_v56, 4  ;;  %v4196_v10 = vrot.slane %v3673_v33, 5 }
 0x388   : > { %4706 = vrot.lane.b32.xlu2 %v4681_v7, %s6875_s29  ;;  %v5612_v54 = vmul.f32 0.01, %v5580_v27  ;;  %v3900_v50 = vshll.u32 %v3650_v13, 16  ;;  %v3300_v34 = vsel %vm8726_vm13, %v3295_v30, %v3299_v20  ;;  %v4194_v5 = vsel %vm8823_vm1, %v5835_v58, %v4193_v56  ;;  %v5345_v20 = vpop.f32.mrf.mxu1  ;;  %v2854_v13 = vld [vmem:[#allocation2 + $0x78] sm:$0xe] }
 0x389   : > { %v3310_v45 = vsel %vm8726_vm13, %v3305_v4, %v3309_v16  ;;  %v3899_v55 = vrot.slane %v3897_v14, 4  ;;  %v4578_v40 = vunpack.c.l.b16 %v3300_v34  ;;  %v4197_v9 = vsel %vm8823_vm1, %v4195_v1, %v4196_v10  ;;  %v2429_v14 = vld [vmem:[#allocation2 + $0x78] sm:$0xf]  ;;  %v6128_v34 = vld [vmem:[#allocation2 + $0x84] sm:$0xff] }
 0x38a   : > { %v4579_v47 = vunpack.c.l.b16 %v3310_v45  ;;  %v5644_v62 = vmax.f32 %v5580_v27, %v5612_v54  ;;  %v4915_v24 = vunpack.c.l.b16 %v4197_v9  ;;  %v3902_v49 = vrot.slane %v3900_v50, 5 }
 0x38b   : > { %v3906_v26 = vshll.u32 %v3651_v53, 16  ;;  %v3910_v52 = vshrl.u32 %v3651_v53, 16  ;;  %4546 = vrot.lane.b32.xlu0 %v6112_v59, %s6870_s13  ;;  %v4914_v8 = vunpack.c.l.b16 %v4194_v5  ;;  %v3916_v42 = vshll.u32 %v3673_v33, 16 }
 0x38c   : > { %v4601_v61 = vpack.c.b16 %v4579_v47, %v4578_v40  ;;  %5676 = vst.msk [vmem:[%s9952_s19 + $0x8] sm:$0xff] %vm1403_vm5, %v5644_v62  ;;  %v5344_v3 = vadd.f32 %v9920_v43, %v5343_v51  ;;  %v3903_v57 = vor.u32 %v3902_v49, %v3899_v55  ;;  %v5507_v53 = vadd.f32 %v9866_v18, %v9657_v46  ;;  %v2451_v51 = vld [vmem:[#allocation2 + $0x80] sm:$0x1] }
 0x38d   : > { %v3908_v11 = vrot.slane %v3906_v26, 5  ;;  %v3912_v22 = vrot.slane %v3910_v52, 4  ;;  %v4937_v23 = vpack.c.b16 %v4915_v24, %v4914_v8  ;;  %v5069_v60 = vsel %vm1535_vm8, %v5037_v12, %v9900_v17  ;;  %v4957_v56 = vpop.permute.xlu1 %4956 }
 0x38e   : > { %v4621_v6 = vpop.permute.xlu0 %4620  ;;  %v10002_v31 = vpop.f32.mrf.mxu2  ;;  %4626 = vrot.lane.b32.xlu1 %v4601_v61, %s6871_s14  ;;  %v5581_v16 = vadd.f32 %v5505_v41, %v5344_v3  ;;  %v3904_v37 = vrot.slane %v3903_v57, 4  ;;  %v3918_v7 = vrot.slane %v3916_v42, 5  ;;  %v5804_v4 = vrot.slane %v2854_v13, 9  ;;  %v6113_v3 = vld [vmem:[#allocation2 + $0x84] sm:$0xff] }
 0x38f   : > { %v3913_v33 = vor.u32 %v3912_v22, %v3908_v11  ;;  %v5101_v27 = vsel %vm1601_vm10, %v5069_v60, %v4621_v6  ;;  %v2983_v58 = vrot.slane %v2430_v28, 5  ;;  %v10013_v41 = vpop.permute.xlu2 %4636  ;;  %v2986_v54 = vrot.slane %v2451_v51, 5  ;;  %v10029_v22 = vld [vmem:[#allocation2 + $0x88] sm:$0xf] }
 0x390   : > { %4962 = vrot.lane.b32.xlu2 %v4937_v23, %s6876_s30  ;;  %v5613_v30 = vmul.f32 0.01, %v5581_v16  ;;  %v5134_v46 = vsel %vm5120_vm12, %v5101_v27, %v9978_v48  ;;  %v3909_v17 = vsel %vm8726_vm13, %v3904_v37, %v3908_v11  ;;  %v5346_v1 = vadd.f32 %v9920_v43, %v5345_v20  ;;  %v5348_v60 = vpop.f32.mrf.mxu1  ;;  %v3043_v37 = vld [vmem:[#allocation2 + $0x84] sm:$0xf]  ;;  %v10038_v27 = vld [vmem:[#allocation2 + $0x8c] sm:$0x1] }
 0x391   : > { %v3914_v12 = vrot.slane %v3913_v33, 4  ;;  %v4834_v10 = vunpack.c.l.b16 %v3909_v17  ;;  %v2984_v45 = vsel %vm8823_vm1, %v5804_v4, %v2983_v58  ;;  %v2985_v48 = vrot.slane %v2983_v58, 4 }
 0x392   : > { %v5645_v50 = vmax.f32 %v5581_v16, %v5613_v30  ;;  %v4404_v55 = vunpack.c.l.b16 %v2984_v45  ;;  %v5582_v40 = vadd.f32 %v5507_v53, %v5346_v1  ;;  %v2701_v47 = vshrl.u32 %v2429_v14, 16 }
 0x393   : > { %v3919_v5 = vsel %vm8726_vm13, %v3914_v12, %v3918_v7  ;;  %4802 = vrot.lane.b32.xlu0 %v6128_v34, %s6873_s23  ;;  %v2987_v59 = vsel %vm8823_vm1, %v2985_v48, %v2986_v54  ;;  %v2704_v9 = vshll.u32 %v2429_v14, 16  ;;  %v2710_v24 = vshll.u32 %v2430_v28, 16 }
 0x394   : > { %v4835_v62 = vunpack.c.l.b16 %v3919_v5  ;;  %5677 = vst.msk [vmem:[%s9952_s19 + $0x10] sm:$0xff] %vm1403_vm5, %v5645_v50  ;;  %v4405_v49 = vunpack.c.l.b16 %v2987_v59  ;;  %v5614_v26 = vmul.f32 0.01, %v5582_v40  ;;  %v2703_v52 = vrot.slane %v2701_v47, 4 }
 0x395   : > { %v2714_v61 = vshrl.u32 %v2430_v28, 16  ;;  %v2706_v20 = vrot.slane %v2704_v9, 5  ;;  %v2712_v57 = vrot.slane %v2710_v24, 5  ;;  %v2720_v11 = vshll.u32 %v2451_v51, 16  ;;  %v3465_v28 = vld [vmem:[#allocation2 + $0x84] sm:$0xe]  ;;  %v10044_v4 = vpop.permute.xlu1 %4556 }
 0x396   : > { %v10027_v8 = vpop.f32.mrf.mxu2  ;;  %v4857_v42 = vpack.c.b16 %v4835_v62, %v4834_v10  ;;  %v5510_v6 = vadd.f32 %v9866_v18, %v9687_v36  ;;  %v5646_v13 = vmax.f32 %v5582_v40, %v5614_v26  ;;  %v5167_v23 = vsel %vm5153_vm15, %v5134_v46, %v9943_v2  ;;  %v6129_v24 = vld [vmem:[#allocation2 + $0x90] sm:$0xff] }
 0x397   : > { %v2716_v53 = vrot.slane %v2714_v61, 4  ;;  %v4426_v51 = vpack.c.b16 %v4405_v49, %v4404_v55  ;;  %v2707_v33 = vor.u32 %v2706_v20, %v2703_v52  ;;  %v2722_v30 = vrot.slane %v2720_v11, 5  ;;  %v10048_v54 = vpop.permute.xlu2 %4366  ;;  %v2431_v55 = vld [vmem:[#allocation2 + $0x84] sm:$0xf] }
 0x398   : > { %v4877_v16 = vpop.permute.xlu0 %4876  ;;  %4882 = vrot.lane.b32.xlu1 %v4857_v42, %s6874_s26  ;;  %4548 = vrot.lane.b32.xlu2 %v6113_v3, %s6870_s13  ;;  %5678 = vst.msk [vmem:[%s9952_s19 + $0x18] sm:$0xff] %vm1403_vm5, %v5646_v13  ;;  %v3591_v2 = vrot.slane %v10029_v22, 5  ;;  %v5820_v14 = vrot.slane %v3465_v28, 9  ;;  %v5349_v17 = vadd.f32 %v9920_v43, %v5348_v60  ;;  %v3312_v12 = vshrl.u32 %v3043_v37, 16  ;;  %v6101_v42 = vld [vmem:[#allocation2 + $0xa8] sm:$0xff] }
 0x399   : > { %v5200_v7 = vsel %vm5186_vm4, %v5167_v23, %v4877_v16  ;;  %v2717_v36 = vor.u32 %v2716_v53, %v2712_v57  ;;  %v2708_v58 = vrot.slane %v2707_v33, 4  ;;  %v3594_v50 = vrot.slane %v10038_v27, 5  ;;  %v10068_v60 = vld [vmem:[#allocation2 + $0x8c] sm:$0x1] }
 0x39a   : > { %v5233_v46 = vsel %vm5219_vm7, %v5200_v7, %v4957_v56  ;;  %v3593_v10 = vrot.slane %v3591_v2, 4  ;;  %v3315_v34 = vshll.u32 %v3043_v37, 16  ;;  %v3592_v56 = vsel %vm8823_vm1, %v5820_v14, %v3591_v2  ;;  %v4074_v14 = vld [vmem:[#allocation2 + $0x90] sm:$0xe] }
 0x39b   : > { %6056 = vmatmul.msk.bf16.gmra.mxu1 %vm5292_vm9, %v5233_v46  ;;  %v2718_v1 = vrot.slane %v2717_v36, 4  ;;  %v2713_v45 = vsel %vm8726_vm13, %v2708_v58, %v2712_v57  ;;  %v5583_v48 = vadd.f32 %v5510_v6, %v5349_v17  ;;  %v3314_v5 = vrot.slane %v3312_v12, 4  ;;  %v10063_v6 = vld [vmem:[#allocation2 + $0x88] sm:$0xf]  ;;  %v5350_v12 = vpop.f32.mrf.mxu1 }
 0x39c   : > { %v4324_v47 = vunpack.c.l.b16 %v2713_v45  ;;  %v3595_v62 = vsel %vm8823_vm1, %v3593_v10, %v3594_v50  ;;  %v3317_v59 = vrot.slane %v3315_v34, 5  ;;  %v3321_v52 = vshll.u32 %v10029_v22, 16  ;;  %v10087_v45 = vld [vmem:[#allocation2 + $0x98] sm:$0x1] }
 0x39d   : > { %v2723_v40 = vsel %vm8726_vm13, %v2718_v1, %v2722_v30  ;;  %v4661_v49 = vunpack.c.l.b16 %v3595_v62  ;;  %v5615_v26 = vmul.f32 0.01, %v5583_v48  ;;  %v4660_v3 = vunpack.c.l.b16 %v3592_v56  ;;  %v10084_v17 = vpop.permute.xlu1 %4812 }
 0x39e   : > { %v4325_v9 = vunpack.c.l.b16 %v2723_v40  ;;  %v3318_v20 = vor.u32 %v3317_v59, %v3314_v5  ;;  %v3325_v57 = vshrl.u32 %v10029_v22, 16  ;;  %v2725_v13 = vshrl.u32 %v2431_v55, 16 }
 0x39f   : > { %v10060_v61 = vpop.f32.mrf.mxu2  ;;  %v5647_v23 = vmax.f32 %v5583_v48, %v5615_v26  ;;  %v3323_v16 = vrot.slane %v3321_v52, 5  ;;  %v3331_v28 = vshll.u32 %v10038_v27, 16  ;;  %v5512_v37 = vadd.f32 %v9866_v18, %v9712_v21  ;;  %v10078_v27 = vld [vmem:[#allocation2 + $0x94] sm:$0xf]  ;;  %v10089_v56 = vpop.permute.xlu2 %4972 }
 0x3a0   : > { %v4461_v11 = vpop.permute.xlu0 %4460  ;;  %4452 = vrot.lane.b32.xlu1 %v4426_v51, %s6867_s10  ;;  %v4346_v53 = vpack.c.b16 %v4325_v9, %v4324_v47  ;;  %4804 = vrot.lane.b32.xlu2 %v6129_v24, %s6873_s23  ;;  %v5020_v22 = vsel %vm1403_vm5, %v6101_v42, %v9987_v35  ;;  %v3319_v33 = vrot.slane %v3318_v20, 4  ;;  %v3327_v7 = vrot.slane %v3325_v57, 4  ;;  %v3652_v24 = vld [vmem:[#allocation2 + $0x90] sm:$0xf] }
 0x3a1   : > { %v4682_v51 = vpack.c.b16 %v4661_v49, %v4660_v3  ;;  %5679 = vst.msk [vmem:[%s9952_s19 + $0x20] sm:$0xff] %vm1403_vm5, %v5647_v23  ;;  %v2727_v36 = vrot.slane %v2725_v13, 4  ;;  %v2728_v30 = vshll.u32 %v2431_v55, 16  ;;  %v2734_v2 = vshll.u32 %v10063_v6, 16 }
 0x3a2   : > { %4372 = vrot.lane.b32.xlu0 %v4346_v53, %s6865_s8  ;;  %v3324_v46 = vsel %vm8726_vm13, %v3319_v33, %v3323_v16  ;;  %v3328_v21 = vor.u32 %v3327_v7, %v3323_v16  ;;  %v2738_v58 = vshrl.u32 %v10063_v6, 16  ;;  %v2744_v35 = vshll.u32 %v10068_v60, 16 }
 0x3a3   : > { %v3333_v1 = vrot.slane %v3331_v28, 5  ;;  %v5053_v10 = vsel %vm1469_vm6, %v5020_v22, %v4461_v11  ;;  %v2730_v50 = vrot.slane %v2728_v30, 5  ;;  %v2736_v34 = vrot.slane %v2734_v2, 5 }
 0x3a4   : > { %v3329_v48 = vrot.slane %v3328_v21, 4  ;;  %v4580_v5 = vunpack.c.l.b16 %v3324_v46  ;;  %v2740_v55 = vrot.slane %v2738_v58, 4  ;;  %v4200_v40 = vrot.slane %v10078_v27, 5  ;;  %v3045_v21 = vld [vmem:[#allocation2 + $0x90] sm:$0xf] }
 0x3a5   : > { %v2731_v47 = vor.u32 %v2730_v50, %v2727_v36  ;;  %v2746_v62 = vrot.slane %v2744_v35, 5  ;;  %v5836_v59 = vrot.slane %v4074_v14, 9  ;;  %v5351_v9 = vadd.f32 %v9920_v43, %v5350_v12 }
 0x3a6   : > { %v3334_v49 = vsel %vm8726_vm13, %v3329_v48, %v3333_v1  ;;  %v2741_v26 = vor.u32 %v2740_v55, %v2736_v34  ;;  %v4202_v52 = vrot.slane %v4200_v40, 4  ;;  %v4203_v42 = vrot.slane %v10087_v45, 5  ;;  %v10114_v55 = vld [vmem:[#allocation2 + $0x98] sm:$0x1] }
 0x3a7   : > { %v4581_v20 = vunpack.c.l.b16 %v3334_v49  ;;  %v2732_v57 = vrot.slane %v2731_v47, 4  ;;  %v4201_v11 = vsel %vm8823_vm1, %v5836_v59, %v4200_v40  ;;  %v5584_v13 = vadd.f32 %v5512_v37, %v5351_v9  ;;  %v10099_v53 = vpop.f32.mrf.mxu2  ;;  %v10118_v47 = vpop.f32.mrf.mxu1 }
 0x3a8   : > { %v4717_v3 = vpop.permute.xlu0 %4716  ;;  %4708 = vrot.lane.b32.xlu1 %v4682_v51, %s6875_s29  ;;  %v2742_v23 = vrot.slane %v2741_v26, 4  ;;  %v4204_v16 = vsel %vm8823_vm1, %v4202_v52, %v4203_v42  ;;  %v3921_v28 = vshrl.u32 %v3652_v24, 16  ;;  %v3924_v22 = vshll.u32 %v3652_v24, 16 }
 0x3a9   : > { %v4602_v33 = vpack.c.b16 %v4581_v20, %v4580_v5  ;;  %v2737_v7 = vsel %vm8726_vm13, %v2732_v57, %v2736_v34  ;;  %v4917_v36 = vunpack.c.l.b16 %v4204_v16  ;;  %v5616_v51 = vmul.f32 0.01, %v5584_v13  ;;  %v10112_v5 = vld [vmem:[#allocation2 + $0x94] sm:$0xf]  ;;  %v10116_v40 = vpop.permute.xlu1 %4446 }
 0x3aa   : > { %v2747_v30 = vsel %vm8726_vm13, %v2742_v23, %v2746_v62  ;;  %v4916_v2 = vunpack.c.l.b16 %v4201_v11  ;;  %v3923_v46 = vrot.slane %v3921_v28, 4  ;;  %v3926_v37 = vrot.slane %v3924_v22, 5  ;;  %v2855_v28 = vld [vmem:[#allocation2 + $0x84] sm:$0xe] }
 0x3ab   : > { %4628 = vrot.lane.b32.xlu0 %v4602_v33, %s6871_s14  ;;  %v4326_v58 = vunpack.c.l.b16 %v2737_v7  ;;  %v4327_v35 = vunpack.c.l.b16 %v2747_v30  ;;  %v5648_v14 = vmax.f32 %v5584_v13, %v5616_v51  ;;  %v3930_v12 = vshll.u32 %v10078_v27, 16  ;;  %v3654_v51 = vld [vmem:[#allocation2 + $0x9c] sm:$0xf] }
 0x3ac   : > { %v5085_v1 = vsel %vm1535_vm8, %v5053_v10, %v10044_v4  ;;  %v4938_v50 = vpack.c.b16 %v4917_v36, %v4916_v2  ;;  %v3927_v34 = vor.u32 %v3926_v37, %v3923_v46  ;;  %v3934_v48 = vshrl.u32 %v10078_v27, 16  ;;  %v10127_v27 = vpop.permute.xlu2 %4702 }
 0x3ad   : > { %v4347_v62 = vpack.c.b16 %v4327_v35, %v4326_v58  ;;  %5680 = vst.msk [vmem:[%s9952_s19 + $0x28] sm:$0xff] %vm1403_vm5, %v5648_v14  ;;  %v3932_v59 = vrot.slane %v3930_v12, 5  ;;  %v3940_v9 = vshll.u32 %v10087_v45, 16  ;;  %v3336_v24 = vshrl.u32 %v3045_v21, 16 }
 0x3ae   : > { %v10125_v4 = vadd.f32 %v9866_v18, %v9743_v63  ;;  %v3928_v10 = vrot.slane %v3927_v34, 4  ;;  %v3936_v49 = vrot.slane %v3934_v48, 4  ;;  %v3339_v26 = vshll.u32 %v3045_v21, 16  ;;  %v6114_v48 = vld [vmem:[#allocation2 + $0x90] sm:$0xff] }
 0x3af   : > { %4374 = vrot.lane.b32.xlu2 %v4347_v62, %s6865_s8  ;;  %v3338_v52 = vrot.slane %v3336_v24, 4  ;;  %v3345_v42 = vshll.u32 %v10112_v5, 16  ;;  %v3349_v20 = vshrl.u32 %v10112_v5, 16  ;;  %v3355_v45 = vshll.u32 %v10114_v55, 16  ;;  %v10134_v11 = vpop.f32.mrf.mxu2 }
 0x3b0   : > { %4964 = vrot.lane.b32.xlu1 %v4938_v50, %s6876_s30  ;;  %v3933_v63 = vsel %vm8726_vm13, %v3928_v10, %v3932_v59  ;;  %v3937_v13 = vor.u32 %v3936_v49, %v3932_v59  ;;  %v5117_v23 = vsel %vm1601_vm10, %v5085_v1, %v10013_v41  ;;  %v3341_v16 = vrot.slane %v3339_v26, 5  ;;  %v5355_v26 = vpop.f32.mrf.mxu1 }
 0x3b1   : > { %v4893_v57 = vpop.permute.xlu0 %4892  ;;  %v3942_v22 = vrot.slane %v3940_v9, 5  ;;  %v5150_v33 = vsel %vm5120_vm12, %v5117_v23, %v4717_v3  ;;  %v3347_v7 = vrot.slane %v3345_v42, 5  ;;  %v3351_v36 = vrot.slane %v3349_v20, 4  ;;  %v10148_v9 = vld [vmem:[#allocation2 + $0xa0] sm:$0xf] }
 0x3b2   : > { %v3938_v30 = vrot.slane %v3937_v13, 4  ;;  %v4836_v2 = vunpack.c.l.b16 %v3933_v63  ;;  %v3342_v46 = vor.u32 %v3341_v16, %v3338_v52  ;;  %v3357_v37 = vrot.slane %v3355_v45, 5  ;;  %v10159_v45 = vld [vmem:[#allocation2 + $0xa4] sm:$0x1] }
 0x3b3   : > { %v3352_v21 = vor.u32 %v3351_v36, %v3347_v7  ;;  %v5805_v58 = vrot.slane %v2855_v28, 9  ;;  %v2990_v35 = vrot.slane %v10063_v6, 5  ;;  %v2993_v14 = vrot.slane %v10068_v60, 5 }
 0x3b4   : > { %v3943_v41 = vsel %vm8726_vm13, %v3938_v30, %v3942_v22  ;;  %v3343_v12 = vrot.slane %v3342_v46, 4  ;;  %v5183_v3 = vsel %vm5153_vm15, %v5150_v33, %v10084_v17  ;;  %v3945_v1 = vshrl.u32 %v3654_v51, 16  ;;  %v6094_v22 = vld [vmem:[#allocation2 + $0x54] sm:$0xff]  ;;  %v10164_v33 = vpop.permute.xlu2 %4958 }
 0x3b5   : > { %v4837_v50 = vunpack.c.l.b16 %v3943_v41  ;;  %v3353_v34 = vrot.slane %v3352_v21, 4  ;;  %v2992_v62 = vrot.slane %v2990_v35, 4  ;;  %v5216_v59 = vsel %vm5186_vm4, %v5183_v3, %v4893_v57 }
 0x3b6   : > { %v3348_v6 = vsel %vm8726_vm13, %v3343_v12, %v3347_v7  ;;  %v2991_v60 = vsel %vm8823_vm1, %v5805_v58, %v2990_v35  ;;  %v3947_v24 = vrot.slane %v3945_v1, 4  ;;  %v3948_v10 = vshll.u32 %v3654_v51, 16 }
 0x3b7   : > { %v4623_v49 = vpop.permute.xlu1 %4622  ;;  %v4858_v17 = vpack.c.b16 %v4837_v50, %v4836_v2  ;;  %v3358_v52 = vsel %vm8726_vm13, %v3353_v34, %v3357_v37  ;;  %v4582_v42 = vunpack.c.l.b16 %v3348_v6  ;;  %v2994_v20 = vsel %vm8823_vm1, %v2992_v62, %v2993_v14  ;;  %v10161_v63 = vpop.f32.mrf.mxu2  ;;  %v6130_v34 = vld [vmem:[#allocation2 + $0x9c] sm:$0xff] }
 0x3b8   : > { %4550 = vrot.lane.b32.xlu1 %v6114_v48, %s6870_s13  ;;  %v4583_v13 = vunpack.c.l.b16 %v3358_v52  ;;  %v4407_v23 = vunpack.c.l.b16 %v2994_v20  ;;  %v3950_v16 = vrot.slane %v3948_v10, 5  ;;  %v3954_v28 = vshll.u32 %v10148_v9, 16 }
 0x3b9   : > { %v4543_v57 = vpop.permute.xlu0 %4542  ;;  %4884 = vrot.lane.b32.xlu0 %v4858_v17, %s6874_s26  ;;  %v4406_v7 = vunpack.c.l.b16 %v2991_v60  ;;  %v3958_v36 = vshrl.u32 %v10148_v9, 16  ;;  %v5354_v51 = vadd.f32 %v9920_v43, %v10118_v47  ;;  %v5249_v30 = vsel %vm5219_vm7, %v5216_v59, %v10089_v56  ;;  %v3466_v47 = vld [vmem:[#allocation2 + $0x90] sm:$0xe] }
 0x3ba   : > { %v4603_v2 = vpack.c.b16 %v4583_v13, %v4582_v42  ;;  %v3951_v46 = vor.u32 %v3950_v16, %v3947_v24  ;;  %v3956_v37 = vrot.slane %v3954_v28, 5  ;;  %v3964_v21 = vshll.u32 %v10159_v45, 16  ;;  %6064 = vmatmul.msk.bf16.gmra.mxu3 %vm5292_vm9, %v5249_v30 }
 0x3bb   : > { %v5517_v58 = vadd.f32 %v9866_v18, %v9768_v19  ;;  %v4999_v35 = vsel %vm1403_vm5, %v6094_v22, %v10048_v54  ;;  %v3960_v14 = vrot.slane %v3958_v36, 4  ;;  %v5585_v41 = vadd.f32 %v10125_v4, %v5354_v51 }
 0x3bc   : > { %4630 = vrot.lane.b32.xlu2 %v4603_v2, %s6871_s14  ;;  %v5039_v56 = vsel %vm1469_vm6, %v4999_v35, %v10116_v40  ;;  %v4427_v12 = vpack.c.b16 %v4407_v23, %v4406_v7  ;;  %v3952_v3 = vrot.slane %v3951_v46, 4  ;;  %v3598_v1 = vrot.slane %v10112_v5, 5  ;;  %v4075_v46 = vld [vmem:[#allocation2 + $0x9c] sm:$0xe] }
 0x3bd   : > { %v3961_v50 = vor.u32 %v3960_v14, %v3956_v37  ;;  %v5617_v48 = vmul.f32 0.01, %v5585_v41  ;;  %v5071_v19 = vsel %vm1535_vm8, %v5039_v56, %v4543_v57  ;;  %v5356_v54 = vadd.f32 %v9920_v43, %v5355_v26 }
 0x3be   : > { %v3966_v62 = vrot.slane %v3964_v21, 5  ;;  %v5821_v59 = vrot.slane %v3466_v47, 9  ;;  %v3600_v4 = vrot.slane %v3598_v1, 4  ;;  %v3601_v6 = vrot.slane %v10114_v55, 5 }
 0x3bf   : > { %v4879_v60 = vpop.permute.xlu1 %4878  ;;  %v3957_v40 = vsel %vm8726_vm13, %v3952_v3, %v3956_v37  ;;  %v3962_v24 = vrot.slane %v3961_v50, 4  ;;  %v5649_v5 = vmax.f32 %v5585_v41, %v5617_v48  ;;  %v5103_v10 = vsel %vm1601_vm10, %v5071_v19, %v4623_v49  ;;  %v10221_v41 = vld [vmem:[%s10413_s6] ss:$0 sm:$0xff] }
 0x3c0   : > { %4806 = vrot.lane.b32.xlu1 %v6130_v34, %s6873_s23  ;;  %v3602_v26 = vsel %vm8823_vm1, %v3600_v4, %v3601_v6  ;;  %v5586_v42 = vadd.f32 %v5517_v58, %v5356_v54  ;;  %v5520_v55 = vadd.f32 %v9866_v18, %v9797_v29  ;;  %v3599_v49 = vsel %vm8823_vm1, %v5821_v59, %v3598_v1  ;;  %v4559_v18 = vpop.permute.xlu2 %4558 }
 0x3c1   : > { %v4799_v17 = vpop.permute.xlu0 %4798  ;;  %v10190_v52 = vpop.f32.mrf.mxu2  ;;  %4454 = vrot.lane.b32.xlu0 %v4427_v12, %s6867_s10  ;;  %v3967_v20 = vsel %vm8726_vm13, %v3962_v24, %v3966_v62  ;;  %5681 = vst.msk [vmem:[%s9952_s19 + $0x30] sm:$0xff] %vm1403_vm5, %v5649_v5  ;;  %v4207_v57 = vrot.slane %v10148_v9, 5  ;;  %v4838_v23 = vunpack.c.l.b16 %v3957_v40  ;;  %v5136_v29 = vsel %vm5120_vm12, %v5103_v10, %v10127_v27 }
 0x3c2   : > { %v4839_v16 = vunpack.c.l.b16 %v3967_v20  ;;  %v5618_v28 = vmul.f32 0.01, %v5586_v42  ;;  %v4663_v22 = vunpack.c.l.b16 %v3602_v26  ;;  %v5169_v0 = vsel %vm5153_vm15, %v5136_v29, %v4799_v17 }
 0x3c3   : > { %v5358_v13 = vpop.f32.mrf.mxu1  ;;  %v4209_v51 = vrot.slane %v4207_v57, 4  ;;  %v4662_v2 = vunpack.c.l.b16 %v3599_v49  ;;  %v5202_v9 = vsel %vm5186_vm4, %v5169_v0, %v4879_v60  ;;  %v4210_v37 = vrot.slane %v10159_v45, 5 }
 0x3c4   : > { %v4859_v7 = vpack.c.b16 %v4839_v16, %v4838_v23  ;;  %v5650_v36 = vmax.f32 %v5586_v42, %v5618_v28  ;;  %v5359_v30 = vadd.f32 %v9920_v43, %v5358_v13  ;;  %v5235_v58 = vsel %vm5219_vm7, %v5202_v9, %v10164_v33 }
 0x3c5   : > { %v4683_v35 = vpack.c.b16 %v4663_v22, %v4662_v2  ;;  %6057 = vmatmul.msk.bf16.gmra.mxu1 %vm5292_vm9, %v5235_v58  ;;  %v5522_v47 = vadd.f32 %v10221_v41, %v9846_v44  ;;  %v5837_v45 = vrot.slane %v4075_v46, 9  ;;  %v4211_v56 = vsel %vm8823_vm1, %v4209_v51, %v4210_v37  ;;  %v6095_v22 = vld [vmem:[#allocation2 + $0x60] sm:$0xff] }
 0x3c6   : > { %4886 = vrot.lane.b32.xlu2 %v4859_v7, %s6874_s26  ;;  %5682 = vst.msk [vmem:[%s9952_s19 + $0x38] sm:$0xff] %vm1403_vm5, %v5650_v36  ;;  %v5587_v21 = vadd.f32 %v5520_v55, %v5359_v30  ;;  %v4919_v48 = vunpack.c.l.b16 %v4211_v56  ;;  %v5525_v9 = vadd.f32 %v10221_v41, %v9881_v15  ;;  %v10263_v15 = vld [vmem:[%s10411_s4] ss:$0 sm:$0xff] }
 0x3c7   : > { %v4463_v27 = vpop.permute.xlu1 %4462  ;;  %v4208_v1 = vsel %vm8823_vm1, %v5837_v45, %v4207_v57 }
 0x3c8   : > { %v5619_v12 = vmul.f32 0.01, %v5587_v21  ;;  %v4815_v19 = vpop.permute.xlu2 %4814  ;;  %v4918_v54 = vunpack.c.l.b16 %v4208_v1 }
 0x3c9   : > { %v10216_v14 = vpop.f32.mrf.mxu2  ;;  %v4383_v33 = vpop.permute.xlu0 %4382  ;;  %4710 = vrot.lane.b32.xlu0 %v4683_v35, %s6875_s29 }
 0x3ca   : > { %v5651_v50 = vmax.f32 %v5587_v21, %v5619_v12  ;;  %v4939_v4 = vpack.c.b16 %v4919_v48, %v4918_v54  ;;  %v5023_v24 = vsel %vm1403_vm5, %v6102_v38, %v4383_v33  ;;  %v10706_v54 = vld [vmem:[#allocation35_spill] sm:$0xff] }
 0x3cb   : > { %v5360_v3 = vpop.f32.mrf.mxu1  ;;  %v5055_v10 = vsel %vm1469_vm6, %v5023_v24, %v4463_v27 }
 0x3cc   : > { %v5361_v34 = vadd.f32 %v9920_v43, %v5360_v3  ;;  %5683 = vst.msk [vmem:[%s9952_s19 + $0x40] sm:$0xff] %vm1403_vm5, %v5651_v50  ;;  %v5087_v26 = vsel %vm1535_vm8, %v5055_v10, %v4559_v18 }
 0x3ce   : > { %v5588_v44 = vadd.f32 %v5522_v47, %v5361_v34 }
 0x3cf   : > { %v4719_v62 = vpop.permute.xlu1 %4718 }
 0x3d0   : > { %v5620_v59 = vmul.f32 0.01, %v5588_v44  ;;  %v4449_v5 = vpop.permute.xlu2 %4448 }
 0x3d1   : > { %v10233_v60 = vpop.f32.mrf.mxu2  ;;  %4966 = vrot.lane.b32.xlu0 %v4939_v4, %s6876_s30  ;;  %v4639_v40 = vpop.permute.xlu0 %4638  ;;  %v5527_v4 = vadd.f32 %v10221_v41, %v9911_v39 }
 0x3d2   : > { %v5652_v6 = vmax.f32 %v5588_v44, %v5620_v59  ;;  %v5119_v55 = vsel %vm1601_vm10, %v5087_v26, %v4639_v40 }
 0x3d3   : > { %v5152_v49 = vsel %vm5120_vm12, %v5119_v55, %v4719_v62 }
 0x3d4   : > { %5684 = vst.msk [vmem:[%s9952_s19 + $0x48] sm:$0xff] %vm1403_vm5, %v5652_v6  ;;  %v5185_v13 = vsel %vm5153_vm15, %v5152_v49, %v4815_v19  ;;  %v10705_v19 = vld [vmem:[#allocation34_spill] sm:$0xff] }
 0x3d5   : > { %v5431_v62 = vpack.c.bf16 %v10706_v54, %v10705_v19  ;;  %v6096_v49 = vld [vmem:[#allocation2 + $0x6c] sm:$0xff] }
 0x3d7   : > { %v4895_v17 = vpop.permute.xlu1 %4894 }
 0x3d8   : > { %v4625_v57 = vpop.permute.xlu2 %4624  ;;  %v5218_v16 = vsel %vm5186_vm4, %v5185_v13, %v4895_v17 }
 0x3d9   : > { %v10241_v42 = vpop.f32.mrf.mxu2 }
 0x3dc   : > { %v4369_v20 = vpop.permute.xlu0 %4368 }
 0x3dd   : > { %v5002_v51 = vsel %vm1403_vm5, %v6095_v22, %v4369_v20 }
 0x3de   : > { %v5041_v2 = vsel %vm1469_vm6, %v5002_v51, %v4449_v5 }
 0x3df   : > { %v4545_v23 = vpop.permute.xlu1 %4544 }
 0x3e0   : > { %v4881_v37 = vpop.permute.xlu2 %4880  ;;  %v5073_v27 = vsel %vm1535_vm8, %v5041_v2, %v4545_v23 }
 0x3e1   : > { %v5105_v33 = vsel %vm1601_vm10, %v5073_v27, %v4625_v57 }
 0x3e4   : > { %v4975_v28 = vpop.permute.xlu0 %4974 }
 0x3e5   : > { %v5559_v29 = vpop.f32.mrf.mxu2  ;;  %v5251_v0 = vsel %vm5219_vm7, %v5218_v16, %v4975_v28 }
 0x3e6   : > { %v5398_v7 = vpop.f32.mrf.mxu3  ;;  %v5560_v18 = vadd.f32 %v10221_v41, %v5559_v29  ;;  %6065 = vmatmul.msk.bf16.gmra.mxu3 %vm5292_vm9, %v5251_v0  ;;  %v10707_v0 = vld [vmem:[#allocation42_spill] sm:$0xff] }
 0x3e7   : > { %v5399_v36 = vadd.f32 %v9920_v43, %v5398_v7  ;;  %v4801_v21 = vpop.permute.xlu1 %4800  ;;  %v10708_v7 = vld [vmem:[#allocation43_spill] sm:$0xff] }
 0x3e8   : > { %v4451_v26 = vpop.permute.xlu2 %4450 }
 0x3e9   : > { %v5603_v30 = vadd.f32 %v5560_v18, %v5399_v36  ;;  %v5432_v18 = vpack.c.bf16 %v10708_v7, %v10707_v0 }
 0x3eb   : > { %v5635_v46 = vmul.f32 0.01, %v5603_v30 }
 0x3ec   : > { %v4705_v58 = vpop.permute.xlu0 %4704 }
 0x3ed   : > { %v5667_v35 = vmax.f32 %v5603_v30, %v5635_v46  ;;  %v5561_v12 = vpop.f32.mrf.mxu2  ;;  %v5138_v50 = vsel %vm5120_vm12, %v5105_v33, %v4705_v58  ;;  %v10710_v58 = vld [vmem:[#allocation48_spill] sm:$0xff] }
 0x3ee   : > { %v5363_v47 = vpop.f32.mrf.mxu1  ;;  %v5400_v56 = vpop.f32.mrf.mxu3  ;;  %v5562_v1 = vadd.f32 %v10221_v41, %v5561_v12  ;;  %v5171_v44 = vsel %vm5153_vm15, %v5138_v50, %v4801_v21  ;;  %v10709_v21 = vld [vmem:[#allocation41_spill] sm:$0xff] }
 0x3ef   : > { %v5364_v45 = vadd.f32 %v9920_v43, %v5363_v47  ;;  %5699 = vst.msk [vmem:[%s9952_s19 + $0xc0] sm:$0xff] %vm1403_vm5, %v5667_v35  ;;  %v5401_v3 = vadd.f32 %v10263_v15, %v5400_v56  ;;  %v5204_v10 = vsel %vm5186_vm4, %v5171_v44, %v4881_v37  ;;  %v5433_v35 = vpack.c.bf16 %v10710_v58, %v10709_v21 }
 0x3f0   : > { %v4707_v29 = vpop.permute.xlu2 %4706  ;;  %v5530_v47 = vadd.f32 %v10221_v41, %v9954_v32 }
 0x3f1   : > { %v5589_v34 = vadd.f32 %v5525_v9, %v5364_v45  ;;  %v5604_v43 = vadd.f32 %v5562_v1, %v5401_v3 }
 0x3f3   : > { %v5621_v48 = vmul.f32 0.01, %v5589_v34  ;;  %v5636_v59 = vmul.f32 0.01, %v5604_v43 }
 0x3f4   : > { %v4371_v24 = vpop.permute.xlu1 %4370 }
 0x3f5   : > { %v5653_v6 = vmax.f32 %v5589_v34, %v5621_v48  ;;  %v5668_v38 = vmax.f32 %v5604_v43, %v5636_v59  ;;  %v4961_v5 = vpop.permute.xlu0 %4960  ;;  %v5005_v13 = vsel %vm1403_vm5, %v6096_v49, %v4371_v24  ;;  %v6097_v34 = vld [vmem:[#allocation2 + $0x78] sm:$0xff]  ;;  %v5532_v43 = vadd.f32 %v10221_v41, %v9981_v25  ;;  %v6098_v49 = vld [vmem:[#allocation2 + $0x84] sm:$0xff] }
 0x3f6   : > { %v5365_v40 = vpop.f32.mrf.mxu1  ;;  %v5237_v55 = vsel %vm5219_vm7, %v5204_v10, %v4961_v5  ;;  %6079 = vmatmul.msk.bf16.vlgmr.msra.gmra.mxu3 %vm1370_vm3, %v5431_v62  ;;  %v5043_v28 = vsel %vm1469_vm6, %v5005_v13, %v4451_v26 }
 0x3f7   : > { %5685 = vst.msk [vmem:[%s9952_s19 + $0x50] sm:$0xff] %vm1403_vm5, %v5653_v6  ;;  %v5366_v17 = vadd.f32 %v10263_v15, %v5365_v40  ;;  %6058 = vmatmul.msk.bf16.gmra.mxu1 %vm5292_vm9, %v5237_v55 }
 0x3f8   : > { %5700 = vst.msk [vmem:[%s9952_s19 + $0xc8] sm:$0xff] %vm1403_vm5, %v5668_v38  ;;  %v4963_v9 = vpop.permute.xlu2 %4962 }
 0x3f9   : > { %v5590_v39 = vadd.f32 %v5527_v4, %v5366_v17 }
 0x3fb   : > { %v5622_v20 = vmul.f32 0.01, %v5590_v39 }
 0x3fd   : > { %v5654_v57 = vmax.f32 %v5590_v39, %v5622_v20  ;;  %v4547_v23 = vpop.permute.xlu0 %4546 }
 0x3fe   : > { %v5075_v22 = vsel %vm1535_vm8, %v5043_v28, %v4547_v23 }
 0x3ff   : > { %5686 = vst.msk [vmem:[%s9952_s19 + $0x58] sm:$0xff] %vm1403_vm5, %v5654_v57 }
 0x400   : > { %v4627_v16 = vpop.permute.xlu1 %4626  ;;  %v4549_v1 = vpop.permute.xlu2 %4548 }
 0x401   : > { %v5107_v36 = vsel %vm1601_vm10, %v5075_v22, %v4627_v16 }
 0x402   : > { %v5140_v30 = vsel %vm5120_vm12, %v5107_v36, %v4707_v29 }
 0x405   : > { %v4803_v51 = vpop.permute.xlu0 %4802 }
 0x406   : > { %6080 = vmatmul.msk.bf16.gmra.mxu3 %vm1370_vm3, %v5432_v18  ;;  %v5173_v2 = vsel %vm5153_vm15, %v5140_v30, %v4803_v51  ;;  %v5535_v30 = vadd.f32 %v10221_v41, %v10002_v31 }
 0x408   : > { %v4805_v38 = vpop.permute.xlu2 %4804 }
 0x40a   : > { %v4883_v46 = vpop.permute.xlu1 %4882 }
 0x40b   : > { %v5206_v37 = vsel %vm5186_vm4, %v5173_v2, %v4883_v46 }
 0x40c   : > { %v5239_v27 = vsel %vm5219_vm7, %v5206_v37, %v4963_v9 }
 0x40d   : > { %6059 = vmatmul.msk.bf16.gmra.mxu1 %vm5292_vm9, %v5239_v27  ;;  %v5403_v27 = vpop.f32.mrf.mxu3 }
 0x410   : > { %v4375_v20 = vpop.permute.xlu2 %4374 }
 0x411   : > { %v5011_v13 = vsel %vm1403_vm5, %v6098_v49, %v4375_v20 }
 0x412   : > { %v4453_v56 = vpop.permute.xlu1 %4452 }
 0x414   : > { %v4373_v12 = vpop.permute.xlu0 %4372 }
 0x415   : > { %v5008_v44 = vsel %vm1403_vm5, %v6097_v34, %v4373_v12  ;;  %v5405_v12 = vpop.f32.mrf.mxu3 }
 0x416   : > { %6081 = vmatmul.msk.bf16.gmra.mxu3 %vm1370_vm3, %v5433_v35  ;;  %v5045_v54 = vsel %vm1469_vm6, %v5008_v44, %v4453_v56 }
 0x417   : > { %v5077_v40 = vsel %vm1535_vm8, %v5045_v54, %v4549_v1 }
 0x418   : > { %v5368_v45 = vpop.f32.mrf.mxu1  ;;  %v4631_v28 = vpop.permute.xlu2 %4630 }
 0x419   : > { %v5369_v33 = vadd.f32 %v10263_v15, %v5368_v45 }
 0x41a   : > { %v4709_v62 = vpop.permute.xlu1 %4708 }
 0x41b   : > { %v5591_v3 = vadd.f32 %v5530_v47, %v5369_v33  ;;  %v5537_v47 = vadd.f32 %v10221_v41, %v10027_v8  ;;  %v5540_v8 = vadd.f32 %v10221_v41, %v10060_v61 }
 0x41d   : > { %v5623_v50 = vmul.f32 0.01, %v5591_v3  ;;  %v4629_v59 = vpop.permute.xlu0 %4628 }
 0x41e   : > { %v5109_v24 = vsel %vm1601_vm10, %v5077_v40, %v4629_v59  ;;  %v5404_v59 = vadd.f32 %v10263_v15, %v5403_v27 }
 0x41f   : > { %v5655_v48 = vmax.f32 %v5591_v3, %v5623_v50  ;;  %v5142_v5 = vsel %vm5120_vm12, %v5109_v24, %v4709_v62  ;;  %v5542_v24 = vadd.f32 %v10221_v41, %v10099_v53 }
 0x420   : > { %v5370_v19 = vpop.f32.mrf.mxu1  ;;  %v5175_v17 = vsel %vm5153_vm15, %v5142_v5, %v4805_v38  ;;  %v4887_v51 = vpop.permute.xlu2 %4886 }
 0x421   : > { %5687 = vst.msk [vmem:[%s9952_s19 + $0x60] sm:$0xff] %vm1403_vm5, %v5655_v48  ;;  %v5371_v32 = vadd.f32 %v10263_v15, %v5370_v19 }
 0x422   : > { %v4965_v10 = vpop.permute.xlu1 %4964 }
 0x423   : > { %v5592_v4 = vadd.f32 %v5532_v43, %v5371_v32 }
 0x425   : > { %v5624_v6 = vmul.f32 0.01, %v5592_v4 }
 0x427   : > { %v5656_v25 = vmax.f32 %v5592_v4, %v5624_v6 }
 0x429   : > { %5688 = vst.msk [vmem:[%s9952_s19 + $0x68] sm:$0xff] %vm1403_vm5, %v5656_v25 }
 0x42a   : > { %v4551_v23 = vpop.permute.xlu1 %4550 }
 0x42b   : > { %v4885_v26 = vpop.permute.xlu0 %4884 }
 0x42c   : > { %v5208_v55 = vsel %vm5186_vm4, %v5175_v17, %v4885_v26 }
 0x42d   : > { %v5241_v39 = vsel %vm5219_vm7, %v5208_v55, %v4965_v10  ;;  %v5406_v55 = vadd.f32 %v10263_v15, %v5405_v12 }
 0x42e   : > { %6060 = vmatmul.msk.bf16.gmra.mxu1 %vm5292_vm9, %v5241_v39 }
 0x432   : > { %v4807_v18 = vpop.permute.xlu1 %4806 }
 0x433   : > { %v4455_v57 = vpop.permute.xlu0 %4454 }
 0x434   : > { %v5047_v16 = vsel %vm1469_vm6, %v5011_v13, %v4455_v57 }
 0x435   : > { %v5079_v29 = vsel %vm1535_vm8, %v5047_v16, %v4551_v23  ;;  %v5545_v16 = vadd.f32 %v10221_v41, %v10134_v11  ;;  %v5547_v11 = vadd.f32 %v10221_v41, %v10161_v63 }
 0x436   : > { %v5111_v0 = vsel %vm1601_vm10, %v5079_v29, %v4631_v28 }
 0x43b   : > { %v4711_v22 = vpop.permute.xlu0 %4710 }
 0x43c   : > { %v5144_v7 = vsel %vm5120_vm12, %v5111_v0, %v4711_v22 }
 0x43d   : > { %v5177_v36 = vsel %vm5153_vm15, %v5144_v7, %v4807_v18  ;;  %v5408_v50 = vpop.f32.mrf.mxu3 }
 0x43e   : > { %v5210_v46 = vsel %vm5186_vm4, %v5177_v36, %v4887_v51  ;;  %v5409_v28 = vadd.f32 %v10263_v15, %v5408_v50 }
 0x442   : > { %v5373_v37 = vpop.f32.mrf.mxu1 }
 0x443   : > { %v4967_v2 = vpop.permute.xlu0 %4966  ;;  %v5374_v21 = vadd.f32 %v10263_v15, %v5373_v37 }
 0x444   : > { %v5243_v9 = vsel %vm5219_vm7, %v5210_v46, %v4967_v2 }
 0x445   : > { %6061 = vmatmul.msk.bf16.gmra.mxu1 %vm5292_vm9, %v5243_v9  ;;  %v5593_v58 = vadd.f32 %v5535_v30, %v5374_v21  ;;  %v5410_v34 = vpop.f32.mrf.mxu3 }
 0x446   : > { %v5411_v9 = vadd.f32 %v10263_v15, %v5410_v34 }
 0x447   : > { %v5625_v35 = vmul.f32 0.01, %v5593_v58 }
 0x449   : > { %v5657_v45 = vmax.f32 %v5593_v58, %v5625_v35 }
 0x44a   : > { %v5375_v56 = vpop.f32.mrf.mxu1 }
 0x44b   : > { %5689 = vst.msk [vmem:[%s9952_s19 + $0x70] sm:$0xff] %vm1403_vm5, %v5657_v45  ;;  %v5376_v31 = vadd.f32 %v10263_v15, %v5375_v56 }
 0x44d   : > { %v5594_v33 = vadd.f32 %v5537_v47, %v5376_v31 }
 0x44f   : > { %v5626_v3 = vmul.f32 0.01, %v5594_v33 }
 0x451   : > { %v5658_v1 = vmax.f32 %v5594_v33, %v5626_v3 }
 0x453   : > { %5690 = vst.msk [vmem:[%s9952_s19 + $0x78] sm:$0xff] %vm1403_vm5, %v5658_v1 }
 0x469   : > { %v5413_v43 = vpop.f32.mrf.mxu3 }
 0x46a   : > { %v5414_v31 = vadd.f32 %v10263_v15, %v5413_v43 }
 0x471   : > { %v10337_v48 = vpop.f32.mrf.mxu3 }
 0x472   : > { %v5416_v34 = vadd.f32 %v10263_v15, %v10337_v48 }
 0x474   : > { %v5378_v44 = vpop.f32.mrf.mxu1 }
 0x475   : > { %v5379_v19 = vadd.f32 %v10263_v15, %v5378_v44 }
 0x477   : > { %v5595_v32 = vadd.f32 %v5540_v8, %v5379_v19 }
 0x479   : > { %v5627_v54 = vmul.f32 0.01, %v5595_v32  ;;  %v5564_v62 = vpop.f32.mrf.mxu3 }
 0x47a   : > { %v5565_v4 = vadd.f32 %v10221_v41, %v5564_v62 }
 0x47b   : > { %v5659_v6 = vmax.f32 %v5595_v32, %v5627_v54  ;;  %v5550_v54 = vadd.f32 %v10221_v41, %v10190_v52 }
 0x47c   : > { %v5605_v38 = vadd.f32 %v5565_v4, %v5404_v59  ;;  %v5380_v40 = vpop.f32.mrf.mxu1 }
 0x47d   : > { %5691 = vst.msk [vmem:[%s9952_s19 + $0x80] sm:$0xff] %vm1403_vm5, %v5659_v6  ;;  %v5381_v61 = vadd.f32 %v10263_v15, %v5380_v40 }
 0x47e   : > { %v5637_v25 = vmul.f32 0.01, %v5605_v38 }
 0x47f   : > { %v5596_v5 = vadd.f32 %v5542_v24, %v5381_v61 }
 0x480   : > { %v5669_v10 = vmax.f32 %v5605_v38, %v5637_v25  ;;  %v5552_v38 = vadd.f32 %v10221_v41, %v10216_v14 }
 0x481   : > { %v5628_v17 = vmul.f32 0.01, %v5596_v5  ;;  %v5566_v26 = vpop.f32.mrf.mxu3 }
 0x482   : > { %5701 = vst.msk [vmem:[%s9952_s19 + $0xd0] sm:$0xff] %vm1403_vm5, %v5669_v10  ;;  %v5567_v39 = vadd.f32 %v10221_v41, %v5566_v26 }
 0x483   : > { %v5660_v20 = vmax.f32 %v5596_v5, %v5628_v17  ;;  %v5555_v5 = vadd.f32 %v10221_v41, %v10233_v60 }
 0x484   : > { %v5606_v49 = vadd.f32 %v5567_v39, %v5406_v55  ;;  %v5557_v39 = vadd.f32 %v10221_v41, %v10241_v42 }
 0x485   : > { %5692 = vst.msk [vmem:[%s9952_s19 + $0x88] sm:$0xff] %vm1403_vm5, %v5660_v20 }
 0x486   : > { %v5638_v53 = vmul.f32 0.01, %v5606_v49 }
 0x488   : > { %v5670_v57 = vmax.f32 %v5606_v49, %v5638_v53 }
 0x489   : > { %v5569_v23 = vpop.f32.mrf.mxu3 }
 0x48a   : > { %v5383_v13 = vpop.f32.mrf.mxu1  ;;  %5702 = vst.msk [vmem:[%s9952_s19 + $0xd8] sm:$0xff] %vm1403_vm5, %v5670_v57  ;;  %v5570_v22 = vadd.f32 %v10221_v41, %v5569_v23 }
 0x48b   : > { %v5384_v29 = vadd.f32 %v10263_v15, %v5383_v13 }
 0x48c   : > { %v5607_v7 = vadd.f32 %v5570_v22, %v5409_v28 }
 0x48d   : > { %v5597_v0 = vadd.f32 %v5545_v16, %v5384_v29 }
 0x48e   : > { %v5639_v36 = vmul.f32 0.01, %v5607_v7 }
 0x48f   : > { %v5629_v18 = vmul.f32 0.01, %v5597_v0 }
 0x490   : > { %v5671_v30 = vmax.f32 %v5607_v7, %v5639_v36 }
 0x491   : > { %v5661_v51 = vmax.f32 %v5597_v0, %v5629_v18  ;;  %v5571_v46 = vpop.f32.mrf.mxu3 }
 0x492   : > { %v5385_v2 = vpop.f32.mrf.mxu1  ;;  %v5572_v27 = vadd.f32 %v10221_v41, %v5571_v46  ;;  %5703 = vst.msk [vmem:[%s9952_s19 + $0xe0] sm:$0xff] %vm1403_vm5, %v5671_v30 }
 0x493   : > { %5693 = vst.msk [vmem:[%s9952_s19 + $0x90] sm:$0xff] %vm1403_vm5, %v5661_v51  ;;  %v5386_v37 = vadd.f32 %v10263_v15, %v5385_v2 }
 0x494   : > { %v5608_v58 = vadd.f32 %v5572_v27, %v5411_v9 }
 0x495   : > { %v5598_v21 = vadd.f32 %v5547_v11, %v5386_v37 }
 0x496   : > { %v5640_v47 = vmul.f32 0.01, %v5608_v58 }
 0x497   : > { %v5630_v35 = vmul.f32 0.01, %v5598_v21 }
 0x498   : > { %v5672_v56 = vmax.f32 %v5608_v58, %v5640_v47 }
 0x499   : > { %v5662_v45 = vmax.f32 %v5598_v21, %v5630_v35  ;;  %v5574_v63 = vpop.f32.mrf.mxu3 }
 0x49a   : > { %v5575_v12 = vadd.f32 %v10221_v41, %v5574_v63  ;;  %5704 = vst.msk [vmem:[%s9952_s19 + $0xe8] sm:$0xff] %vm1403_vm5, %v5672_v56 }
 0x49b   : > { %5694 = vst.msk [vmem:[%s9952_s19 + $0x98] sm:$0xff] %vm1403_vm5, %v5662_v45 }
 0x49c   : > { %v5609_v33 = vadd.f32 %v5575_v12, %v5414_v31 }
 0x49e   : > { %v5641_v3 = vmul.f32 0.01, %v5609_v33 }
 0x4a0   : > { %v5673_v1 = vmax.f32 %v5609_v33, %v5641_v3 }
 0x4a1   : > { %v5576_v50 = vpop.f32.mrf.mxu3 }
 0x4a2   : > { %5705 = vst.msk [vmem:[%s9952_s19 + $0xf0] sm:$0xff] %vm1403_vm5, %v5673_v1  ;;  %v5577_v8 = vadd.f32 %v10221_v41, %v5576_v50 }
 0x4a4   : > { %v5610_v44 = vadd.f32 %v5577_v8, %v5416_v34 }
 0x4a6   : > { %v5642_v43 = vmul.f32 0.01, %v5610_v44 }
 0x4a8   : > { %v5674_v19 = vmax.f32 %v5610_v44, %v5642_v43 }
 0x4aa   : > { %5706 = vst.msk [vmem:[%s9952_s19 + $0xf8] sm:$0xff] %vm1403_vm5, %v5674_v19 }
 0x4ab   : > { %v5388_v32 = vpop.f32.mrf.mxu1 }
 0x4ac   : > { %v5389_v62 = vadd.f32 %v10263_v15, %v5388_v32 }
 0x4ae   : > { %v5599_v59 = vadd.f32 %v5550_v54, %v5389_v62 }
 0x4b0   : > { %v5631_v4 = vmul.f32 0.01, %v5599_v59 }
 0x4b2   : > { %v5663_v6 = vmax.f32 %v5599_v59, %v5631_v4 }
 0x4b3   : > { %v5390_v48 = vpop.f32.mrf.mxu1 }
 0x4b4   : > { %5695 = vst.msk [vmem:[%s9952_s19 + $0xa0] sm:$0xff] %vm1403_vm5, %v5663_v6  ;;  %v5391_v40 = vadd.f32 %v10263_v15, %v5390_v48 }
 0x4b6   : > { %v5600_v24 = vadd.f32 %v5552_v38, %v5391_v40 }
 0x4b8   : > { %v5632_v61 = vmul.f32 0.01, %v5600_v24 }
 0x4ba   : > { %v5664_v25 = vmax.f32 %v5600_v24, %v5632_v61 }
 0x4bc   : > { %5696 = vst.msk [vmem:[%s9952_s19 + $0xa8] sm:$0xff] %vm1403_vm5, %v5664_v25 }
 0x4c2   : > { %v5393_v52 = vpop.f32.mrf.mxu1 }
 0x4c3   : > { %v5394_v10 = vadd.f32 %v10263_v15, %v5393_v52 }
 0x4c5   : > { %v5601_v17 = vadd.f32 %v5555_v5, %v5394_v10 }
 0x4c7   : > { %v5633_v26 = vmul.f32 0.01, %v5601_v17 }
 0x4c9   : > { %v5665_v55 = vmax.f32 %v5601_v17, %v5633_v26 }
 0x4ca   : > { %v5395_v14 = vpop.f32.mrf.mxu1 }
 0x4cb   : > { %5697 = vst.msk [vmem:[%s9952_s19 + $0xb0] sm:$0xff] %vm1403_vm5, %v5665_v55  ;;  %v5396_v20 = vadd.f32 %v10263_v15, %v5395_v14 }
 0x4cd   : > { %v5602_v49 = vadd.f32 %v5557_v39, %v5396_v20 }
 0x4cf   : > { %v5634_v53 = vmul.f32 0.01, %v5602_v49 }
 0x4d1   : > { %v5666_v57 = vmax.f32 %v5602_v49, %v5634_v53 }
 0x4d3   : > { %5698 = vst.msk [vmem:[%s9952_s19 + $0xb8] sm:$0xff] %vm1403_vm5, %v5666_v57 }
 0x4d4 PF: > { %s17_s24 = sadd.s32 1, %s6862_s24  }
 0x4d5   : > { %p14_p4 = scmp.ge.s32.totalorder %s17_s24, 4  }
 0x4d7   :  { %16 = sbr.rel (!%p14_p4) target bundleno = 1 (0x1), region = 80 }

</bundles_post_ra>
